<compile_context>
chip_gen: v7x
topology: tpu7x:2x2x1
jax: 0.10.0
libtpu: 0.0.40
codegen_flags: <defaults>
</compile_context>

<pallas_src>
import functools

import jax
import jax.numpy as jnp
from jax import lax
from jax.experimental import pallas as pl
from jax.experimental.pallas import tpu as pltpu

TB = 8          # batch tile (sublane multiple); grid is over batch blocks
CPAD = 128      # lane-dense padding for conv2/fc outputs


# ---------------------------------------------------------------------------
# Kernels
# ---------------------------------------------------------------------------
def _conv1_kernel(p_ref, w_ref, b_ref, o_ref):
    """p_ref: (4, TB*196, 32) bf16 pool-offset patch slabs; w_ref: (32, 8) bf16;
    b_ref: (1, 8) f32.  4 unrolled GEMMs + bias + ReLU, running max in registers,
    single (TB*196, 8) bf16 store (only the 6 real + 2 pad channels)."""
    w = w_ref[...]
    b = b_ref[...]
    acc = None
    for off in range(4):                       # static unroll over 2x2 pool offsets
        v = jnp.dot(p_ref[off], w, preferred_element_type=jnp.float32)
        v = jnp.maximum(v + b, 0.0)            # f32 VPU math (v5e-safe)
        acc = v if acc is None else jnp.maximum(acc, v)
    o_ref[...] = acc.astype(o_ref.dtype)


def _conv2_mlp_kernel(p_ref, c2w_ref, c2b_ref, f1w_ref, f1b_ref,
                      f2w_ref, f2b_ref, f3w_ref, f3b_ref, o_ref):
    """Fused conv2+ReLU+pool -> fc1+ReLU -> fc2+ReLU -> fc3.

    p_ref : (4, 25*TB, 200) bf16   rows ordered (spatial_pos, batch), lanes (kh,kw,ic8)
    c2w   : (200, 128) bf16        lanes = out-channels (16 real, zero-padded)
    f1w   : (25, 16, 128) bf16     per-spatial-position fc1 weight block
    f2w/f3w: (128, 128) bf16 ; biases (1,128) f32 ; o_ref: (TB, 128) f32.
    """
    tb = o_ref.shape[0]
    w2 = c2w_ref[...]
    b2 = c2b_ref[...]

    # conv2 + ReLU + maxpool: 4 GEMMs, running max in registers.
    y2 = None
    for off in range(4):
        v = jnp.dot(p_ref[off], w2, preferred_element_type=jnp.float32)
        v = jnp.maximum(v + b2, 0.0)
        y2 = v if y2 is None else jnp.maximum(y2, v)
    # y2: (25*tb, 128) f32; rows = (pos, batch); only lanes 0..15 are real channels.

    # fc1: the PyTorch .view(-1, 400) flatten is absorbed as a sum of 25
    # per-spatial-position (tb,16)@(16,128) dots (y2 stays in registers).
    h = jnp.zeros((tb, CPAD), jnp.float32)
    for p in range(25):
        blk = y2[p * tb:(p + 1) * tb, :16].astype(jnp.bfloat16)
        h = h + jnp.dot(blk, f1w_ref[p], preferred_element_type=jnp.float32)
    h = jnp.maximum(h + f1b_ref[...], 0.0)

    # fc2 + ReLU, fc3 (bf16 MXU path, f32 accumulation).
    h = jnp.dot(h.astype(jnp.bfloat16), f2w_ref[...],
                preferred_element_type=jnp.float32)
    h = jnp.maximum(h + f2b_ref[...], 0.0)
    o_ref[...] = jnp.dot(h.astype(jnp.bfloat16), f3w_ref[...],
                         preferred_element_type=jnp.float32) + f3b_ref[...]


# ---------------------------------------------------------------------------
# Host-side patch extraction (tiny: one fused strided-slice/stack per stage)
# ---------------------------------------------------------------------------
def _pool_patches(x, k):
    """x: (B, H, W, C) -> (4, B, Ho, Wo, k, k, C) patch tensors, one per 2x2
    pool offset, where Ho = (H-k+1)//2 (conv output H/W must be even)."""
    bsz, h, w, c = x.shape
    ho, wo = (h - k + 1) // 2, (w - k + 1) // 2
    rows = []
    for dh in range(k + 1):
        cols = []
        for dw in range(k + 1):
            sl = lax.slice(x, (0, dh, dw, 0),
                           (bsz, dh + 2 * ho - 1, dw + 2 * wo - 1, c),
                           (1, 2, 2, 1))                    # (B, Ho, Wo, C)
            cols.append(sl)
        rows.append(jnp.stack(cols, axis=3))                # (B, Ho, Wo, k+1, C)
    taps = jnp.stack(rows, axis=3)                          # (B, Ho, Wo, k+1, k+1, C)
    offs = []
    for ph in range(2):
        for pw in range(2):
            offs.append(taps[:, :, :, ph:ph + k, pw:pw + k, :])
    return jnp.stack(offs, axis=0)                          # (4, B, Ho, Wo, k, k, C)


# ---------------------------------------------------------------------------
# Parameters (PyTorch layout) and one-time kernel-layout preparation (eager)
# ---------------------------------------------------------------------------
def init_params(key, num_classes):
    def uniform(k, shape, fan_in):
        bound = 1.0 / (fan_in ** 0.5)
        return jax.random.uniform(k, shape, jnp.float32, -bound, bound)

    ks = jax.random.split(key, 10)
    return {
        "conv1_w": uniform(ks[0], (6, 1, 5, 5), 1 * 25),
        "conv1_b": uniform(ks[1], (6,), 1 * 25),
        "conv2_w": uniform(ks[2], (16, 6, 5, 5), 6 * 25),
        "conv2_b": uniform(ks[3], (16,), 6 * 25),
        "fc1_w": uniform(ks[4], (120, 16 * 5 * 5), 16 * 5 * 5),
        "fc1_b": uniform(ks[5], (120,), 16 * 5 * 5),
        "fc2_w": uniform(ks[6], (84, 120), 120),
        "fc2_b": uniform(ks[7], (84,), 120),
        "fc3_w": uniform(ks[8], (num_classes, 84), 84),
        "fc3_b": uniform(ks[9], (num_classes,), 84),
    }


def prepare_params(params):
    """One-time re-layout of PyTorch weights into lane-dense bf16 kernel layout."""
    bf = jnp.bfloat16

    # conv1: (6,1,5,5) -> (32, 8): rows = kh*5+kw (padded 25->32), lanes = oc (6->8).
    c1 = jnp.transpose(params["conv1_w"], (2, 3, 1, 0)).reshape(25, 6)
    c1w = jnp.pad(c1, ((0, 7), (0, 2))).astype(bf)
    c1b = jnp.zeros((1, 8), jnp.float32).at[0, :6].set(params["conv1_b"])
    # NOTE: zero weight cols + zero bias + ReLU => padded output channels are exactly 0.

    # conv2: (16,6,5,5) -> (200, 128): rows = (kh,kw,ic padded 6->8), lanes = oc (16->128).
    c2 = jnp.transpose(params["conv2_w"], (2, 3, 1, 0))           # (5,5,6,16)
    c2 = jnp.pad(c2, ((0, 0), (0, 0), (0, 2), (0, 0))).reshape(200, 16)
    c2w = jnp.pad(c2, ((0, 0), (0, CPAD - 16))).astype(bf)
    c2b = jnp.zeros((1, CPAD), jnp.float32).at[0, :16].set(params["conv2_b"])

    # fc1: torch columns ordered (c, h, w) -> per-position blocks (p=h*5+w, c, o).
    f1 = params["fc1_w"].reshape(120, 16, 5, 5).transpose(2, 3, 1, 0)  # (5,5,16,120)
    f1 = f1.reshape(25, 16, 120)
    f1w = jnp.pad(f1, ((0, 0), (0, 0), (0, CPAD - 120))).astype(bf)    # (25,16,128)
    f1b = jnp.zeros((1, CPAD), jnp.float32).at[0, :120].set(params["fc1_b"])

    f2w = jnp.pad(params["fc2_w"].T, ((0, CPAD - 120), (0, CPAD - 84))).astype(bf)
    f2b = jnp.zeros((1, CPAD), jnp.float32).at[0, :84].set(params["fc2_b"])

    nc = params["fc3_w"].shape[0]
    f3w = jnp.pad(params["fc3_w"].T, ((0, CPAD - 84), (0, CPAD - nc))).astype(bf)
    f3b = jnp.zeros((1, CPAD), jnp.float32).at[0, :nc].set(params["fc3_b"])

    return {"c1w": c1w, "c1b": c1b, "c2w": c2w, "c2b": c2b,
            "f1w": f1w, "f1b": f1b, "f2w": f2w, "f2b": f2b,
            "f3w": f3w, "f3b": f3b}


# ---------------------------------------------------------------------------
# Forward
# ---------------------------------------------------------------------------
@functools.partial(jax.jit, static_argnums=(2,))
def forward(prep, x, num_classes):
    bsz = x.shape[0]
    assert x.shape[1:] == (1, 32, 32), "LeNet geometry requires (B, 1, 32, 32)"
    bpad = ((bsz + TB - 1) // TB) * TB
    nb = bpad // TB

    # NCHW (C=1) -> NHWC, pad batch to a multiple of 8, cast to bf16.
    xh = x.reshape(bsz, 32, 32, 1)
    xh = jnp.pad(xh, ((0, bpad - bsz), (0, 0), (0, 0), (0, 0))).astype(jnp.bfloat16)

    # ---- stage 1: conv1 + ReLU + maxpool ---------------------------------
    pt1 = _pool_patches(xh, 5)                       # (4, Bp, 14, 14, 5, 5, 1)
    p1 = pt1.reshape(4, bpad * 196, 25)
    p1 = jnp.pad(p1, ((0, 0), (0, 0), (0, 7)))       # K 25 -> 32 lanes up front

    y1 = pl.pallas_call(
        _conv1_kernel,
        out_shape=jax.ShapeDtypeStruct((bpad * 196, 8), jnp.bfloat16),
        grid=(nb,),
        in_specs=[pl.BlockSpec((4, TB * 196, 32), lambda i: (0, i, 0)),
                  pl.BlockSpec((32, 8), lambda i: (0, 0)),
                  pl.BlockSpec((1, 8), lambda i: (0, 0))],
        out_specs=pl.BlockSpec((TB * 196, 8), lambda i: (i, 0)),
        compiler_params=pltpu.CompilerParams(dimension_semantics=("parallel",)),
    )(p1, prep["c1w"], prep["c1b"])
    y1 = y1.reshape(bpad, 14, 14, 8)                 # free (bitcast) reshape

    # ---- stage 2: conv2 + ReLU + maxpool + fc1/fc2/fc3 (fused) -----------
    pt2 = _pool_patches(y1, 5)                       # (4, Bp, 5, 5, 5, 5, 8)
    pt2 = pt2.reshape(4, nb, TB, 5, 5, 5, 5, 8).transpose(0, 1, 3, 4, 2, 5, 6, 7)
    p2 = pt2.reshape(4, nb * 25 * TB, 200)           # rows = (blk, s, t, b_in)

    logits = pl.pallas_call(
        _conv2_mlp_kernel,
        out_shape=jax.ShapeDtypeStruct((bpad, CPAD), jnp.float32),
        grid=(nb,),
        in_specs=[pl.BlockSpec((4, 25 * TB, 200), lambda i: (0, i, 0)),
                  pl.BlockSpec((200, CPAD), lambda i: (0, 0)),
                  pl.BlockSpec((1, CPAD), lambda i: (0, 0)),
                  pl.BlockSpec((25, 16, CPAD), lambda i: (0, 0, 0)),
                  pl.BlockSpec((1, CPAD), lambda i: (0, 0)),
                  pl.BlockSpec((CPAD, CPAD), lambda i: (0, 0)),
                  pl.BlockSpec((1, CPAD), lambda i: (0, 0)),
                  pl.BlockSpec((CPAD, CPAD), lambda i: (0, 0)),
                  pl.BlockSpec((1, CPAD), lambda i: (0, 0))],
        out_specs=pl.BlockSpec((TB, CPAD), lambda i: (i, 0)),
        compiler_params=pltpu.CompilerParams(dimension_semantics=("parallel",)),
    )(p2, prep["c2w"], prep["c2b"], prep["f1w"], prep["f1b"],
      prep["f2w"], prep["f2b"], prep["f3w"], prep["f3b"])

    return logits[:bsz, :num_classes]


# ---------------------------------------------------------------------------
# Pure-JAX reference of the PyTorch forward (correctness check only)
# ---------------------------------------------------------------------------
def reference_forward(params, x):
    def conv_block(y, w, b):
        y = lax.conv_general_dilated(
            y, w, window_strides=(1, 1), padding="VALID",
            dimension_numbers=("NCHW", "OIHW", "NCHW"),
            precision=lax.Precision.HIGHEST)
        y = jnp.maximum(y + b.reshape(1, -1, 1, 1), 0.0)
        return lax.reduce_window(y, -jnp.inf, lax.max,
                                 (1, 1, 2, 2), (1, 1, 2, 2), "VALID")

    hp = lax.Precision.HIGHEST
    x = conv_block(x, params["conv1_w"], params["conv1_b"])
    x = conv_block(x, params["conv2_w"], params["conv2_b"])
    x = x.reshape(-1, 16 * 5 * 5)
    x = jnp.maximum(jnp.dot(x, params["fc1_w"].T, precision=hp) + params["fc1_b"], 0.0)
    x = jnp.maximum(jnp.dot(x, params["fc2_w"].T, precision=hp) + params["fc2_b"], 0.0)
    return jnp.dot(x, params["fc3_w"].T, precision=hp) + params["fc3_b"]


if __name__ == "__main__":
    num_classes = 10
    key = jax.random.PRNGKey(0)
    k_param, k_x = jax.random.split(key)
    params = init_params(k_param, num_classes)
    prep = prepare_params(params)                    # one-time weight re-layout (eager)

    # LeNet geometry: (B=2, C=1, 32, 32)
    x = jax.random.normal(k_x, (2, 1, 32, 32), dtype=jnp.float32)

    out = jax.block_until_ready(forward(prep, x, num_classes))
    assert out.shape == (2, num_classes), out.shape

    ref = jax.block_until_ready(reference_forward(params, x))
    max_err = float(jnp.max(jnp.abs(out - ref)))
    assert jnp.allclose(out, ref, atol=5e-2, rtol=5e-2), max_err

    print("KERNEL_OK")
</pallas_src>

<mosaic_0001>
module attributes {stable_mosaic.version = 11 : i64} {
  func.func @_conv1_kernel(%arg0: i32, %arg1: memref<4x1568x32xbf16, #tpu.memory_space<vmem>>, %arg2: memref<32x8xbf16, #tpu.memory_space<vmem>>, %arg3: memref<1x8xf32, #tpu.memory_space<vmem>>, %arg4: memref<1568x8xbf16, #tpu.memory_space<vmem>>) attributes {dimension_semantics = [#tpu.dimension_semantics<parallel>], iteration_bounds = array<i64: 1>, scalar_prefetch = 0 : i64, scratch_operands = 0 : i64, tpu.core_type = #tpu.core_type<tc>, window_params = [{transform_indices = @transform_0, window_bounds = array<i64: 4, 1568, 32>}, {pipeline_mode = #tpu.pipeline_mode<synchronous>, transform_indices = @transform_1, window_bounds = array<i64: 32, 8>}, {pipeline_mode = #tpu.pipeline_mode<synchronous>, transform_indices = @transform_2, window_bounds = array<i64: 1, 8>}, {transform_indices = @transform_3, window_bounds = array<i64: 1568, 8>}]} {
    %c0 = arith.constant 0 : index
    %c0_0 = arith.constant 0 : index
    %0 = vector.load %arg2[%c0, %c0_0] : memref<32x8xbf16, #tpu.memory_space<vmem>>, vector<32x8xbf16>
    %c0_1 = arith.constant 0 : index
    %c0_2 = arith.constant 0 : index
    %1 = vector.load %arg3[%c0_1, %c0_2] : memref<1x8xf32, #tpu.memory_space<vmem>>, vector<1x8xf32>
    %c0_3 = arith.constant 0 : index
    %c0_4 = arith.constant 0 : index
    %c0_5 = arith.constant 0 : index
    %2 = vector.load %arg1[%c0_3, %c0_4, %c0_5] : memref<4x1568x32xbf16, #tpu.memory_space<vmem>>, vector<1x1568x32xbf16>
    %3 = vector.shape_cast %2 : vector<1x1568x32xbf16> to vector<1568x32xbf16>
    %cst = arith.constant dense<0.000000e+00> : vector<1568x8xf32>
    %4 = tpu.matmul %3, %0, %cst {dimension_numbers = #tpu.dot_dimension_numbers<[1], [0], [0], [1], [0, 0, 1, 1], [], []>} : vector<1568x32xbf16>, vector<32x8xbf16>, vector<1568x8xf32> -> vector<1568x8xf32>
    %5 = vector.broadcast %1 : vector<1x8xf32> to vector<1568x8xf32>
    %6 = arith.addf %4, %5 : vector<1568x8xf32>
    %cst_6 = arith.constant 0.000000e+00 : f32
    %7 = vector.broadcast %cst_6 : f32 to vector<1568x8xf32>
    %8 = arith.maximumf %6, %7 : vector<1568x8xf32>
    %c1 = arith.constant 1 : index
    %c0_7 = arith.constant 0 : index
    %c0_8 = arith.constant 0 : index
    %9 = vector.load %arg1[%c1, %c0_7, %c0_8] : memref<4x1568x32xbf16, #tpu.memory_space<vmem>>, vector<1x1568x32xbf16>
    %10 = vector.shape_cast %9 : vector<1x1568x32xbf16> to vector<1568x32xbf16>
    %cst_9 = arith.constant dense<0.000000e+00> : vector<1568x8xf32>
    %11 = tpu.matmul %10, %0, %cst_9 {dimension_numbers = #tpu.dot_dimension_numbers<[1], [0], [0], [1], [0, 0, 1, 1], [], []>} : vector<1568x32xbf16>, vector<32x8xbf16>, vector<1568x8xf32> -> vector<1568x8xf32>
    %12 = vector.broadcast %1 : vector<1x8xf32> to vector<1568x8xf32>
    %13 = arith.addf %11, %12 : vector<1568x8xf32>
    %cst_10 = arith.constant 0.000000e+00 : f32
    %14 = vector.broadcast %cst_10 : f32 to vector<1568x8xf32>
    %15 = arith.maximumf %13, %14 : vector<1568x8xf32>
    %16 = arith.maximumf %8, %15 : vector<1568x8xf32>
    %c2 = arith.constant 2 : index
    %c0_11 = arith.constant 0 : index
    %c0_12 = arith.constant 0 : index
    %17 = vector.load %arg1[%c2, %c0_11, %c0_12] : memref<4x1568x32xbf16, #tpu.memory_space<vmem>>, vector<1x1568x32xbf16>
    %18 = vector.shape_cast %17 : vector<1x1568x32xbf16> to vector<1568x32xbf16>
    %cst_13 = arith.constant dense<0.000000e+00> : vector<1568x8xf32>
    %19 = tpu.matmul %18, %0, %cst_13 {dimension_numbers = #tpu.dot_dimension_numbers<[1], [0], [0], [1], [0, 0, 1, 1], [], []>} : vector<1568x32xbf16>, vector<32x8xbf16>, vector<1568x8xf32> -> vector<1568x8xf32>
    %20 = vector.broadcast %1 : vector<1x8xf32> to vector<1568x8xf32>
    %21 = arith.addf %19, %20 : vector<1568x8xf32>
    %cst_14 = arith.constant 0.000000e+00 : f32
    %22 = vector.broadcast %cst_14 : f32 to vector<1568x8xf32>
    %23 = arith.maximumf %21, %22 : vector<1568x8xf32>
    %24 = arith.maximumf %16, %23 : vector<1568x8xf32>
    %c3 = arith.constant 3 : index
    %c0_15 = arith.constant 0 : index
    %c0_16 = arith.constant 0 : index
    %25 = vector.load %arg1[%c3, %c0_15, %c0_16] : memref<4x1568x32xbf16, #tpu.memory_space<vmem>>, vector<1x1568x32xbf16>
    %26 = vector.shape_cast %25 : vector<1x1568x32xbf16> to vector<1568x32xbf16>
    %cst_17 = arith.constant dense<0.000000e+00> : vector<1568x8xf32>
    %27 = tpu.matmul %26, %0, %cst_17 {dimension_numbers = #tpu.dot_dimension_numbers<[1], [0], [0], [1], [0, 0, 1, 1], [], []>} : vector<1568x32xbf16>, vector<32x8xbf16>, vector<1568x8xf32> -> vector<1568x8xf32>
    %28 = vector.broadcast %1 : vector<1x8xf32> to vector<1568x8xf32>
    %29 = arith.addf %27, %28 : vector<1568x8xf32>
    %cst_18 = arith.constant 0.000000e+00 : f32
    %30 = vector.broadcast %cst_18 : f32 to vector<1568x8xf32>
    %31 = arith.maximumf %29, %30 : vector<1568x8xf32>
    %32 = arith.maximumf %24, %31 : vector<1568x8xf32>
    %33 = arith.truncf %32 : vector<1568x8xf32> to vector<1568x8xbf16>
    %c0_19 = arith.constant 0 : index
    %c0_20 = arith.constant 0 : index
    %34 = vector.load %arg4[%c0_19, %c0_20] : memref<1568x8xbf16, #tpu.memory_space<vmem>>, vector<1568x8xbf16>
    tpu.vector_store %arg4[%c0_19, %c0_20], %33 {strides = array<i32>} : memref<1568x8xbf16, #tpu.memory_space<vmem>>, vector<1568x8xbf16>,
    return
  }
  func.func @transform_0(%arg0: i32) -> (i32, i32, i32) {
    %c0_i32 = arith.constant 0 : i32
    %c0_i32_0 = arith.constant 0 : i32
    %c0_i32_1 = arith.constant 0 : i32
    return %c0_i32, %arg0, %c0_i32_0 : i32, i32, i32
  }
  func.func @transform_1(%arg0: i32) -> (i32, i32) {
    %c0_i32 = arith.constant 0 : i32
    %c0_i32_0 = arith.constant 0 : i32
    %c0_i32_1 = arith.constant 0 : i32
    return %c0_i32, %c0_i32_0 : i32, i32
  }
  func.func @transform_2(%arg0: i32) -> (i32, i32) {
    %c0_i32 = arith.constant 0 : i32
    %c0_i32_0 = arith.constant 0 : i32
    %c0_i32_1 = arith.constant 0 : i32
    return %c0_i32, %c0_i32_0 : i32, i32
  }
  func.func @transform_3(%arg0: i32) -> (i32, i32) {
    %c0_i32 = arith.constant 0 : i32
    %c0_i32_0 = arith.constant 0 : i32
    return %arg0, %c0_i32 : i32, i32
  }
}

module attributes {stable_mosaic.version = 11 : i64} {
  func.func @_conv2_mlp_kernel(%arg0: i32, %arg1: memref<4x200x200xbf16, #tpu.memory_space<vmem>>, %arg2: memref<200x128xbf16, #tpu.memory_space<vmem>>, %arg3: memref<1x128xf32, #tpu.memory_space<vmem>>, %arg4: memref<25x16x128xbf16, #tpu.memory_space<vmem>>, %arg5: memref<1x128xf32, #tpu.memory_space<vmem>>, %arg6: memref<128x128xbf16, #tpu.memory_space<vmem>>, %arg7: memref<1x128xf32, #tpu.memory_space<vmem>>, %arg8: memref<128x128xbf16, #tpu.memory_space<vmem>>, %arg9: memref<1x128xf32, #tpu.memory_space<vmem>>, %arg10: memref<8x128xf32, #tpu.memory_space<vmem>>) attributes {dimension_semantics = [#tpu.dimension_semantics<parallel>], iteration_bounds = array<i64: 1>, scalar_prefetch = 0 : i64, scratch_operands = 0 : i64, tpu.core_type = #tpu.core_type<tc>, window_params = [{transform_indices = @transform_0, window_bounds = array<i64: 4, 200, 200>}, {pipeline_mode = #tpu.pipeline_mode<synchronous>, transform_indices = @transform_1, window_bounds = array<i64: 200, 128>}, {pipeline_mode = #tpu.pipeline_mode<synchronous>, transform_indices = @transform_2, window_bounds = array<i64: 1, 128>}, {pipeline_mode = #tpu.pipeline_mode<synchronous>, transform_indices = @transform_3, window_bounds = array<i64: 25, 16, 128>}, {pipeline_mode = #tpu.pipeline_mode<synchronous>, transform_indices = @transform_4, window_bounds = array<i64: 1, 128>}, {pipeline_mode = #tpu.pipeline_mode<synchronous>, transform_indices = @transform_5, window_bounds = array<i64: 128, 128>}, {pipeline_mode = #tpu.pipeline_mode<synchronous>, transform_indices = @transform_6, window_bounds = array<i64: 1, 128>}, {pipeline_mode = #tpu.pipeline_mode<synchronous>, transform_indices = @transform_7, window_bounds = array<i64: 128, 128>}, {pipeline_mode = #tpu.pipeline_mode<synchronous>, transform_indices = @transform_8, window_bounds = array<i64: 1, 128>}, {transform_indices = @transform_9, window_bounds = array<i64: 8, 128>}]} {
    %c0 = arith.constant 0 : index
    %c0_0 = arith.constant 0 : index
    %0 = vector.load %arg2[%c0, %c0_0] : memref<200x128xbf16, #tpu.memory_space<vmem>>, vector<200x128xbf16>
    %c0_1 = arith.constant 0 : index
    %c0_2 = arith.constant 0 : index
    %1 = vector.load %arg3[%c0_1, %c0_2] : memref<1x128xf32, #tpu.memory_space<vmem>>, vector<1x128xf32>
    %c0_3 = arith.constant 0 : index
    %c0_4 = arith.constant 0 : index
    %c0_5 = arith.constant 0 : index
    %2 = vector.load %arg1[%c0_3, %c0_4, %c0_5] : memref<4x200x200xbf16, #tpu.memory_space<vmem>>, vector<1x200x200xbf16>
    %3 = vector.shape_cast %2 : vector<1x200x200xbf16> to vector<200x200xbf16>
    %cst = arith.constant dense<0.000000e+00> : vector<200x128xf32>
    %4 = tpu.matmul %3, %0, %cst {dimension_numbers = #tpu.dot_dimension_numbers<[1], [0], [0], [1], [0, 0, 1, 1], [], []>} : vector<200x200xbf16>, vector<200x128xbf16>, vector<200x128xf32> -> vector<200x128xf32>
    %5 = vector.broadcast %1 : vector<1x128xf32> to vector<200x128xf32>
    %6 = arith.addf %4, %5 : vector<200x128xf32>
    %cst_6 = arith.constant 0.000000e+00 : f32
    %7 = vector.broadcast %cst_6 : f32 to vector<200x128xf32>
    %8 = arith.maximumf %6, %7 : vector<200x128xf32>
    %c1 = arith.constant 1 : index
    %c0_7 = arith.constant 0 : index
    %c0_8 = arith.constant 0 : index
    %9 = vector.load %arg1[%c1, %c0_7, %c0_8] : memref<4x200x200xbf16, #tpu.memory_space<vmem>>, vector<1x200x200xbf16>
    %10 = vector.shape_cast %9 : vector<1x200x200xbf16> to vector<200x200xbf16>
    %cst_9 = arith.constant dense<0.000000e+00> : vector<200x128xf32>
    %11 = tpu.matmul %10, %0, %cst_9 {dimension_numbers = #tpu.dot_dimension_numbers<[1], [0], [0], [1], [0, 0, 1, 1], [], []>} : vector<200x200xbf16>, vector<200x128xbf16>, vector<200x128xf32> -> vector<200x128xf32>
    %12 = vector.broadcast %1 : vector<1x128xf32> to vector<200x128xf32>
    %13 = arith.addf %11, %12 : vector<200x128xf32>
    %cst_10 = arith.constant 0.000000e+00 : f32
    %14 = vector.broadcast %cst_10 : f32 to vector<200x128xf32>
    %15 = arith.maximumf %13, %14 : vector<200x128xf32>
    %16 = arith.maximumf %8, %15 : vector<200x128xf32>
    %c2 = arith.constant 2 : index
    %c0_11 = arith.constant 0 : index
    %c0_12 = arith.constant 0 : index
    %17 = vector.load %arg1[%c2, %c0_11, %c0_12] : memref<4x200x200xbf16, #tpu.memory_space<vmem>>, vector<1x200x200xbf16>
    %18 = vector.shape_cast %17 : vector<1x200x200xbf16> to vector<200x200xbf16>
    %cst_13 = arith.constant dense<0.000000e+00> : vector<200x128xf32>
    %19 = tpu.matmul %18, %0, %cst_13 {dimension_numbers = #tpu.dot_dimension_numbers<[1], [0], [0], [1], [0, 0, 1, 1], [], []>} : vector<200x200xbf16>, vector<200x128xbf16>, vector<200x128xf32> -> vector<200x128xf32>
    %20 = vector.broadcast %1 : vector<1x128xf32> to vector<200x128xf32>
    %21 = arith.addf %19, %20 : vector<200x128xf32>
    %cst_14 = arith.constant 0.000000e+00 : f32
    %22 = vector.broadcast %cst_14 : f32 to vector<200x128xf32>
    %23 = arith.maximumf %21, %22 : vector<200x128xf32>
    %24 = arith.maximumf %16, %23 : vector<200x128xf32>
    %c3 = arith.constant 3 : index
    %c0_15 = arith.constant 0 : index
    %c0_16 = arith.constant 0 : index
    %25 = vector.load %arg1[%c3, %c0_15, %c0_16] : memref<4x200x200xbf16, #tpu.memory_space<vmem>>, vector<1x200x200xbf16>
    %26 = vector.shape_cast %25 : vector<1x200x200xbf16> to vector<200x200xbf16>
    %cst_17 = arith.constant dense<0.000000e+00> : vector<200x128xf32>
    %27 = tpu.matmul %26, %0, %cst_17 {dimension_numbers = #tpu.dot_dimension_numbers<[1], [0], [0], [1], [0, 0, 1, 1], [], []>} : vector<200x200xbf16>, vector<200x128xbf16>, vector<200x128xf32> -> vector<200x128xf32>
    %28 = vector.broadcast %1 : vector<1x128xf32> to vector<200x128xf32>
    %29 = arith.addf %27, %28 : vector<200x128xf32>
    %cst_18 = arith.constant 0.000000e+00 : f32
    %30 = vector.broadcast %cst_18 : f32 to vector<200x128xf32>
    %31 = arith.maximumf %29, %30 : vector<200x128xf32>
    %32 = arith.maximumf %24, %31 : vector<200x128xf32>
    %cst_19 = arith.constant 0.000000e+00 : f32
    %33 = vector.broadcast %cst_19 : f32 to vector<8x128xf32>
    %34 = vector.extract_strided_slice %32 {offsets = [0, 0], sizes = [8, 16], strides = [1, 1]} : vector<200x128xf32> to vector<8x16xf32>
    %35 = arith.truncf %34 : vector<8x16xf32> to vector<8x16xbf16>
    %c0_20 = arith.constant 0 : index
    %c0_21 = arith.constant 0 : index
    %c0_22 = arith.constant 0 : index
    %36 = vector.load %arg4[%c0_20, %c0_21, %c0_22] : memref<25x16x128xbf16, #tpu.memory_space<vmem>>, vector<1x16x128xbf16>
    %37 = vector.shape_cast %36 : vector<1x16x128xbf16> to vector<16x128xbf16>
    %cst_23 = arith.constant dense<0.000000e+00> : vector<8x128xf32>
    %38 = tpu.matmul %35, %37, %cst_23 {dimension_numbers = #tpu.dot_dimension_numbers<[1], [0], [0], [1], [0, 0, 1, 1], [], []>} : vector<8x16xbf16>, vector<16x128xbf16>, vector<8x128xf32> -> vector<8x128xf32>
    %39 = arith.addf %33, %38 : vector<8x128xf32>
    %40 = vector.extract_strided_slice %32 {offsets = [8, 0], sizes = [8, 16], strides = [1, 1]} : vector<200x128xf32> to vector<8x16xf32>
    %41 = arith.truncf %40 : vector<8x16xf32> to vector<8x16xbf16>
    %c1_24 = arith.constant 1 : index
    %c0_25 = arith.constant 0 : index
    %c0_26 = arith.constant 0 : index
    %42 = vector.load %arg4[%c1_24, %c0_25, %c0_26] : memref<25x16x128xbf16, #tpu.memory_space<vmem>>, vector<1x16x128xbf16>
    %43 = vector.shape_cast %42 : vector<1x16x128xbf16> to vector<16x128xbf16>
    %cst_27 = arith.constant dense<0.000000e+00> : vector<8x128xf32>
    %44 = tpu.matmul %41, %43, %cst_27 {dimension_numbers = #tpu.dot_dimension_numbers<[1], [0], [0], [1], [0, 0, 1, 1], [], []>} : vector<8x16xbf16>, vector<16x128xbf16>, vector<8x128xf32> -> vector<8x128xf32>
    %45 = arith.addf %39, %44 : vector<8x128xf32>
    %46 = vector.extract_strided_slice %32 {offsets = [16, 0], sizes = [8, 16], strides = [1, 1]} : vector<200x128xf32> to vector<8x16xf32>
    %47 = arith.truncf %46 : vector<8x16xf32> to vector<8x16xbf16>
    %c2_28 = arith.constant 2 : index
    %c0_29 = arith.constant 0 : index
    %c0_30 = arith.constant 0 : index
    %48 = vector.load %arg4[%c2_28, %c0_29, %c0_30] : memref<25x16x128xbf16, #tpu.memory_space<vmem>>, vector<1x16x128xbf16>
    %49 = vector.shape_cast %48 : vector<1x16x128xbf16> to vector<16x128xbf16>
    %cst_31 = arith.constant dense<0.000000e+00> : vector<8x128xf32>
    %50 = tpu.matmul %47, %49, %cst_31 {dimension_numbers = #tpu.dot_dimension_numbers<[1], [0], [0], [1], [0, 0, 1, 1], [], []>} : vector<8x16xbf16>, vector<16x128xbf16>, vector<8x128xf32> -> vector<8x128xf32>
    %51 = arith.addf %45, %50 : vector<8x128xf32>
    %52 = vector.extract_strided_slice %32 {offsets = [24, 0], sizes = [8, 16], strides = [1, 1]} : vector<200x128xf32> to vector<8x16xf32>
    %53 = arith.truncf %52 : vector<8x16xf32> to vector<8x16xbf16>
    %c3_32 = arith.constant 3 : index
    %c0_33 = arith.constant 0 : index
    %c0_34 = arith.constant 0 : index
    %54 = vector.load %arg4[%c3_32, %c0_33, %c0_34] : memref<25x16x128xbf16, #tpu.memory_space<vmem>>, vector<1x16x128xbf16>
    %55 = vector.shape_cast %54 : vector<1x16x128xbf16> to vector<16x128xbf16>
    %cst_35 = arith.constant dense<0.000000e+00> : vector<8x128xf32>
    %56 = tpu.matmul %53, %55, %cst_35 {dimension_numbers = #tpu.dot_dimension_numbers<[1], [0], [0], [1], [0, 0, 1, 1], [], []>} : vector<8x16xbf16>, vector<16x128xbf16>, vector<8x128xf32> -> vector<8x128xf32>
    %57 = arith.addf %51, %56 : vector<8x128xf32>
    %58 = vector.extract_strided_slice %32 {offsets = [32, 0], sizes = [8, 16], strides = [1, 1]} : vector<200x128xf32> to vector<8x16xf32>
    %59 = arith.truncf %58 : vector<8x16xf32> to vector<8x16xbf16>
    %c4 = arith.constant 4 : index
    %c0_36 = arith.constant 0 : index
    %c0_37 = arith.constant 0 : index
    %60 = vector.load %arg4[%c4, %c0_36, %c0_37] : memref<25x16x128xbf16, #tpu.memory_space<vmem>>, vector<1x16x128xbf16>
    %61 = vector.shape_cast %60 : vector<1x16x128xbf16> to vector<16x128xbf16>
    %cst_38 = arith.constant dense<0.000000e+00> : vector<8x128xf32>
    %62 = tpu.matmul %59, %61, %cst_38 {dimension_numbers = #tpu.dot_dimension_numbers<[1], [0], [0], [1], [0, 0, 1, 1], [], []>} : vector<8x16xbf16>, vector<16x128xbf16>, vector<8x128xf32> -> vector<8x128xf32>
    %63 = arith.addf %57, %62 : vector<8x128xf32>
    %64 = vector.extract_strided_slice %32 {offsets = [40, 0], sizes = [8, 16], strides = [1, 1]} : vector<200x128xf32> to vector<8x16xf32>
    %65 = arith.truncf %64 : vector<8x16xf32> to vector<8x16xbf16>
    %c5 = arith.constant 5 : index
    %c0_39 = arith.constant 0 : index
    %c0_40 = arith.constant 0 : index
    %66 = vector.load %arg4[%c5, %c0_39, %c0_40] : memref<25x16x128xbf16, #tpu.memory_space<vmem>>, vector<1x16x128xbf16>
    %67 = vector.shape_cast %66 : vector<1x16x128xbf16> to vector<16x128xbf16>
    %cst_41 = arith.constant dense<0.000000e+00> : vector<8x128xf32>
    %68 = tpu.matmul %65, %67, %cst_41 {dimension_numbers = #tpu.dot_dimension_numbers<[1], [0], [0], [1], [0, 0, 1, 1], [], []>} : vector<8x16xbf16>, vector<16x128xbf16>, vector<8x128xf32> -> vector<8x128xf32>
    %69 = arith.addf %63, %68 : vector<8x128xf32>
    %70 = vector.extract_strided_slice %32 {offsets = [48, 0], sizes = [8, 16], strides = [1, 1]} : vector<200x128xf32> to vector<8x16xf32>
    %71 = arith.truncf %70 : vector<8x16xf32> to vector<8x16xbf16>
    %c6 = arith.constant 6 : index
    %c0_42 = arith.constant 0 : index
    %c0_43 = arith.constant 0 : index
    %72 = vector.load %arg4[%c6, %c0_42, %c0_43] : memref<25x16x128xbf16, #tpu.memory_space<vmem>>, vector<1x16x128xbf16>
    %73 = vector.shape_cast %72 : vector<1x16x128xbf16> to vector<16x128xbf16>
    %cst_44 = arith.constant dense<0.000000e+00> : vector<8x128xf32>
    %74 = tpu.matmul %71, %73, %cst_44 {dimension_numbers = #tpu.dot_dimension_numbers<[1], [0], [0], [1], [0, 0, 1, 1], [], []>} : vector<8x16xbf16>, vector<16x128xbf16>, vector<8x128xf32> -> vector<8x128xf32>
    %75 = arith.addf %69, %74 : vector<8x128xf32>
    %76 = vector.extract_strided_slice %32 {offsets = [56, 0], sizes = [8, 16], strides = [1, 1]} : vector<200x128xf32> to vector<8x16xf32>
    %77 = arith.truncf %76 : vector<8x16xf32> to vector<8x16xbf16>
    %c7 = arith.constant 7 : index
    %c0_45 = arith.constant 0 : index
    %c0_46 = arith.constant 0 : index
    %78 = vector.load %arg4[%c7, %c0_45, %c0_46] : memref<25x16x128xbf16, #tpu.memory_space<vmem>>, vector<1x16x128xbf16>
    %79 = vector.shape_cast %78 : vector<1x16x128xbf16> to vector<16x128xbf16>
    %cst_47 = arith.constant dense<0.000000e+00> : vector<8x128xf32>
    %80 = tpu.matmul %77, %79, %cst_47 {dimension_numbers = #tpu.dot_dimension_numbers<[1], [0], [0], [1], [0, 0, 1, 1], [], []>} : vector<8x16xbf16>, vector<16x128xbf16>, vector<8x128xf32> -> vector<8x128xf32>
    %81 = arith.addf %75, %80 : vector<8x128xf32>
    %82 = vector.extract_strided_slice %32 {offsets = [64, 0], sizes = [8, 16], strides = [1, 1]} : vector<200x128xf32> to vector<8x16xf32>
    %83 = arith.truncf %82 : vector<8x16xf32> to vector<8x16xbf16>
    %c8 = arith.constant 8 : index
    %c0_48 = arith.constant 0 : index
    %c0_49 = arith.constant 0 : index
    %84 = vector.load %arg4[%c8, %c0_48, %c0_49] : memref<25x16x128xbf16, #tpu.memory_space<vmem>>, vector<1x16x128xbf16>
    %85 = vector.shape_cast %84 : vector<1x16x128xbf16> to vector<16x128xbf16>
    %cst_50 = arith.constant dense<0.000000e+00> : vector<8x128xf32>
    %86 = tpu.matmul %83, %85, %cst_50 {dimension_numbers = #tpu.dot_dimension_numbers<[1], [0], [0], [1], [0, 0, 1, 1], [], []>} : vector<8x16xbf16>, vector<16x128xbf16>, vector<8x128xf32> -> vector<8x128xf32>
    %87 = arith.addf %81, %86 : vector<8x128xf32>
    %88 = vector.extract_strided_slice %32 {offsets = [72, 0], sizes = [8, 16], strides = [1, 1]} : vector<200x128xf32> to vector<8x16xf32>
    %89 = arith.truncf %88 : vector<8x16xf32> to vector<8x16xbf16>
    %c9 = arith.constant 9 : index
    %c0_51 = arith.constant 0 : index
    %c0_52 = arith.constant 0 : index
    %90 = vector.load %arg4[%c9, %c0_51, %c0_52] : memref<25x16x128xbf16, #tpu.memory_space<vmem>>, vector<1x16x128xbf16>
    %91 = vector.shape_cast %90 : vector<1x16x128xbf16> to vector<16x128xbf16>
    %cst_53 = arith.constant dense<0.000000e+00> : vector<8x128xf32>
    %92 = tpu.matmul %89, %91, %cst_53 {dimension_numbers = #tpu.dot_dimension_numbers<[1], [0], [0], [1], [0, 0, 1, 1], [], []>} : vector<8x16xbf16>, vector<16x128xbf16>, vector<8x128xf32> -> vector<8x128xf32>
    %93 = arith.addf %87, %92 : vector<8x128xf32>
    %94 = vector.extract_strided_slice %32 {offsets = [80, 0], sizes = [8, 16], strides = [1, 1]} : vector<200x128xf32> to vector<8x16xf32>
    %95 = arith.truncf %94 : vector<8x16xf32> to vector<8x16xbf16>
    %c10 = arith.constant 10 : index
    %c0_54 = arith.constant 0 : index
    %c0_55 = arith.constant 0 : index
    %96 = vector.load %arg4[%c10, %c0_54, %c0_55] : memref<25x16x128xbf16, #tpu.memory_space<vmem>>, vector<1x16x128xbf16>
    %97 = vector.shape_cast %96 : vector<1x16x128xbf16> to vector<16x128xbf16>
    %cst_56 = arith.constant dense<0.000000e+00> : vector<8x128xf32>
    %98 = tpu.matmul %95, %97, %cst_56 {dimension_numbers = #tpu.dot_dimension_numbers<[1], [0], [0], [1], [0, 0, 1, 1], [], []>} : vector<8x16xbf16>, vector<16x128xbf16>, vector<8x128xf32> -> vector<8x128xf32>
    %99 = arith.addf %93, %98 : vector<8x128xf32>
    %100 = vector.extract_strided_slice %32 {offsets = [88, 0], sizes = [8, 16], strides = [1, 1]} : vector<200x128xf32> to vector<8x16xf32>
    %101 = arith.truncf %100 : vector<8x16xf32> to vector<8x16xbf16>
    %c11 = arith.constant 11 : index
    %c0_57 = arith.constant 0 : index
    %c0_58 = arith.constant 0 : index
    %102 = vector.load %arg4[%c11, %c0_57, %c0_58] : memref<25x16x128xbf16, #tpu.memory_space<vmem>>, vector<1x16x128xbf16>
    %103 = vector.shape_cast %102 : vector<1x16x128xbf16> to vector<16x128xbf16>
    %cst_59 = arith.constant dense<0.000000e+00> : vector<8x128xf32>
    %104 = tpu.matmul %101, %103, %cst_59 {dimension_numbers = #tpu.dot_dimension_numbers<[1], [0], [0], [1], [0, 0, 1, 1], [], []>} : vector<8x16xbf16>, vector<16x128xbf16>, vector<8x128xf32> -> vector<8x128xf32>
    %105 = arith.addf %99, %104 : vector<8x128xf32>
    %106 = vector.extract_strided_slice %32 {offsets = [96, 0], sizes = [8, 16], strides = [1, 1]} : vector<200x128xf32> to vector<8x16xf32>
    %107 = arith.truncf %106 : vector<8x16xf32> to vector<8x16xbf16>
    %c12 = arith.constant 12 : index
    %c0_60 = arith.constant 0 : index
    %c0_61 = arith.constant 0 : index
    %108 = vector.load %arg4[%c12, %c0_60, %c0_61] : memref<25x16x128xbf16, #tpu.memory_space<vmem>>, vector<1x16x128xbf16>
    %109 = vector.shape_cast %108 : vector<1x16x128xbf16> to vector<16x128xbf16>
    %cst_62 = arith.constant dense<0.000000e+00> : vector<8x128xf32>
    %110 = tpu.matmul %107, %109, %cst_62 {dimension_numbers = #tpu.dot_dimension_numbers<[1], [0], [0], [1], [0, 0, 1, 1], [], []>} : vector<8x16xbf16>, vector<16x128xbf16>, vector<8x128xf32> -> vector<8x128xf32>
    %111 = arith.addf %105, %110 : vector<8x128xf32>
    %112 = vector.extract_strided_slice %32 {offsets = [104, 0], sizes = [8, 16], strides = [1, 1]} : vector<200x128xf32> to vector<8x16xf32>
    %113 = arith.truncf %112 : vector<8x16xf32> to vector<8x16xbf16>
    %c13 = arith.constant 13 : index
    %c0_63 = arith.constant 0 : index
    %c0_64 = arith.constant 0 : index
    %114 = vector.load %arg4[%c13, %c0_63, %c0_64] : memref<25x16x128xbf16, #tpu.memory_space<vmem>>, vector<1x16x128xbf16>
    %115 = vector.shape_cast %114 : vector<1x16x128xbf16> to vector<16x128xbf16>
    %cst_65 = arith.constant dense<0.000000e+00> : vector<8x128xf32>
    %116 = tpu.matmul %113, %115, %cst_65 {dimension_numbers = #tpu.dot_dimension_numbers<[1], [0], [0], [1], [0, 0, 1, 1], [], []>} : vector<8x16xbf16>, vector<16x128xbf16>, vector<8x128xf32> -> vector<8x128xf32>
    %117 = arith.addf %111, %116 : vector<8x128xf32>
    %118 = vector.extract_strided_slice %32 {offsets = [112, 0], sizes = [8, 16], strides = [1, 1]} : vector<200x128xf32> to vector<8x16xf32>
    %119 = arith.truncf %118 : vector<8x16xf32> to vector<8x16xbf16>
    %c14 = arith.constant 14 : index
    %c0_66 = arith.constant 0 : index
    %c0_67 = arith.constant 0 : index
    %120 = vector.load %arg4[%c14, %c0_66, %c0_67] : memref<25x16x128xbf16, #tpu.memory_space<vmem>>, vector<1x16x128xbf16>
    %121 = vector.shape_cast %120 : vector<1x16x128xbf16> to vector<16x128xbf16>
    %cst_68 = arith.constant dense<0.000000e+00> : vector<8x128xf32>
    %122 = tpu.matmul %119, %121, %cst_68 {dimension_numbers = #tpu.dot_dimension_numbers<[1], [0], [0], [1], [0, 0, 1, 1], [], []>} : vector<8x16xbf16>, vector<16x128xbf16>, vector<8x128xf32> -> vector<8x128xf32>
    %123 = arith.addf %117, %122 : vector<8x128xf32>
    %124 = vector.extract_strided_slice %32 {offsets = [120, 0], sizes = [8, 16], strides = [1, 1]} : vector<200x128xf32> to vector<8x16xf32>
    %125 = arith.truncf %124 : vector<8x16xf32> to vector<8x16xbf16>
    %c15 = arith.constant 15 : index
    %c0_69 = arith.constant 0 : index
    %c0_70 = arith.constant 0 : index
    %126 = vector.load %arg4[%c15, %c0_69, %c0_70] : memref<25x16x128xbf16, #tpu.memory_space<vmem>>, vector<1x16x128xbf16>
    %127 = vector.shape_cast %126 : vector<1x16x128xbf16> to vector<16x128xbf16>
    %cst_71 = arith.constant dense<0.000000e+00> : vector<8x128xf32>
    %128 = tpu.matmul %125, %127, %cst_71 {dimension_numbers = #tpu.dot_dimension_numbers<[1], [0], [0], [1], [0, 0, 1, 1], [], []>} : vector<8x16xbf16>, vector<16x128xbf16>, vector<8x128xf32> -> vector<8x128xf32>
    %129 = arith.addf %123, %128 : vector<8x128xf32>
    %130 = vector.extract_strided_slice %32 {offsets = [128, 0], sizes = [8, 16], strides = [1, 1]} : vector<200x128xf32> to vector<8x16xf32>
    %131 = arith.truncf %130 : vector<8x16xf32> to vector<8x16xbf16>
    %c16 = arith.constant 16 : index
    %c0_72 = arith.constant 0 : index
    %c0_73 = arith.constant 0 : index
    %132 = vector.load %arg4[%c16, %c0_72, %c0_73] : memref<25x16x128xbf16, #tpu.memory_space<vmem>>, vector<1x16x128xbf16>
    %133 = vector.shape_cast %132 : vector<1x16x128xbf16> to vector<16x128xbf16>
    %cst_74 = arith.constant dense<0.000000e+00> : vector<8x128xf32>
    %134 = tpu.matmul %131, %133, %cst_74 {dimension_numbers = #tpu.dot_dimension_numbers<[1], [0], [0], [1], [0, 0, 1, 1], [], []>} : vector<8x16xbf16>, vector<16x128xbf16>, vector<8x128xf32> -> vector<8x128xf32>
    %135 = arith.addf %129, %134 : vector<8x128xf32>
    %136 = vector.extract_strided_slice %32 {offsets = [136, 0], sizes = [8, 16], strides = [1, 1]} : vector<200x128xf32> to vector<8x16xf32>
    %137 = arith.truncf %136 : vector<8x16xf32> to vector<8x16xbf16>
    %c17 = arith.constant 17 : index
    %c0_75 = arith.constant 0 : index
    %c0_76 = arith.constant 0 : index
    %138 = vector.load %arg4[%c17, %c0_75, %c0_76] : memref<25x16x128xbf16, #tpu.memory_space<vmem>>, vector<1x16x128xbf16>
    %139 = vector.shape_cast %138 : vector<1x16x128xbf16> to vector<16x128xbf16>
    %cst_77 = arith.constant dense<0.000000e+00> : vector<8x128xf32>
    %140 = tpu.matmul %137, %139, %cst_77 {dimension_numbers = #tpu.dot_dimension_numbers<[1], [0], [0], [1], [0, 0, 1, 1], [], []>} : vector<8x16xbf16>, vector<16x128xbf16>, vector<8x128xf32> -> vector<8x128xf32>
    %141 = arith.addf %135, %140 : vector<8x128xf32>
    %142 = vector.extract_strided_slice %32 {offsets = [144, 0], sizes = [8, 16], strides = [1, 1]} : vector<200x128xf32> to vector<8x16xf32>
    %143 = arith.truncf %142 : vector<8x16xf32> to vector<8x16xbf16>
    %c18 = arith.constant 18 : index
    %c0_78 = arith.constant 0 : index
    %c0_79 = arith.constant 0 : index
    %144 = vector.load %arg4[%c18, %c0_78, %c0_79] : memref<25x16x128xbf16, #tpu.memory_space<vmem>>, vector<1x16x128xbf16>
    %145 = vector.shape_cast %144 : vector<1x16x128xbf16> to vector<16x128xbf16>
    %cst_80 = arith.constant dense<0.000000e+00> : vector<8x128xf32>
    %146 = tpu.matmul %143, %145, %cst_80 {dimension_numbers = #tpu.dot_dimension_numbers<[1], [0], [0], [1], [0, 0, 1, 1], [], []>} : vector<8x16xbf16>, vector<16x128xbf16>, vector<8x128xf32> -> vector<8x128xf32>
    %147 = arith.addf %141, %146 : vector<8x128xf32>
    %148 = vector.extract_strided_slice %32 {offsets = [152, 0], sizes = [8, 16], strides = [1, 1]} : vector<200x128xf32> to vector<8x16xf32>
    %149 = arith.truncf %148 : vector<8x16xf32> to vector<8x16xbf16>
    %c19 = arith.constant 19 : index
    %c0_81 = arith.constant 0 : index
    %c0_82 = arith.constant 0 : index
    %150 = vector.load %arg4[%c19, %c0_81, %c0_82] : memref<25x16x128xbf16, #tpu.memory_space<vmem>>, vector<1x16x128xbf16>
    %151 = vector.shape_cast %150 : vector<1x16x128xbf16> to vector<16x128xbf16>
    %cst_83 = arith.constant dense<0.000000e+00> : vector<8x128xf32>
    %152 = tpu.matmul %149, %151, %cst_83 {dimension_numbers = #tpu.dot_dimension_numbers<[1], [0], [0], [1], [0, 0, 1, 1], [], []>} : vector<8x16xbf16>, vector<16x128xbf16>, vector<8x128xf32> -> vector<8x128xf32>
    %153 = arith.addf %147, %152 : vector<8x128xf32>
    %154 = vector.extract_strided_slice %32 {offsets = [160, 0], sizes = [8, 16], strides = [1, 1]} : vector<200x128xf32> to vector<8x16xf32>
    %155 = arith.truncf %154 : vector<8x16xf32> to vector<8x16xbf16>
    %c20 = arith.constant 20 : index
    %c0_84 = arith.constant 0 : index
    %c0_85 = arith.constant 0 : index
    %156 = vector.load %arg4[%c20, %c0_84, %c0_85] : memref<25x16x128xbf16, #tpu.memory_space<vmem>>, vector<1x16x128xbf16>
    %157 = vector.shape_cast %156 : vector<1x16x128xbf16> to vector<16x128xbf16>
    %cst_86 = arith.constant dense<0.000000e+00> : vector<8x128xf32>
    %158 = tpu.matmul %155, %157, %cst_86 {dimension_numbers = #tpu.dot_dimension_numbers<[1], [0], [0], [1], [0, 0, 1, 1], [], []>} : vector<8x16xbf16>, vector<16x128xbf16>, vector<8x128xf32> -> vector<8x128xf32>
    %159 = arith.addf %153, %158 : vector<8x128xf32>
    %160 = vector.extract_strided_slice %32 {offsets = [168, 0], sizes = [8, 16], strides = [1, 1]} : vector<200x128xf32> to vector<8x16xf32>
    %161 = arith.truncf %160 : vector<8x16xf32> to vector<8x16xbf16>
    %c21 = arith.constant 21 : index
    %c0_87 = arith.constant 0 : index
    %c0_88 = arith.constant 0 : index
    %162 = vector.load %arg4[%c21, %c0_87, %c0_88] : memref<25x16x128xbf16, #tpu.memory_space<vmem>>, vector<1x16x128xbf16>
    %163 = vector.shape_cast %162 : vector<1x16x128xbf16> to vector<16x128xbf16>
    %cst_89 = arith.constant dense<0.000000e+00> : vector<8x128xf32>
    %164 = tpu.matmul %161, %163, %cst_89 {dimension_numbers = #tpu.dot_dimension_numbers<[1], [0], [0], [1], [0, 0, 1, 1], [], []>} : vector<8x16xbf16>, vector<16x128xbf16>, vector<8x128xf32> -> vector<8x128xf32>
    %165 = arith.addf %159, %164 : vector<8x128xf32>
    %166 = vector.extract_strided_slice %32 {offsets = [176, 0], sizes = [8, 16], strides = [1, 1]} : vector<200x128xf32> to vector<8x16xf32>
    %167 = arith.truncf %166 : vector<8x16xf32> to vector<8x16xbf16>
    %c22 = arith.constant 22 : index
    %c0_90 = arith.constant 0 : index
    %c0_91 = arith.constant 0 : index
    %168 = vector.load %arg4[%c22, %c0_90, %c0_91] : memref<25x16x128xbf16, #tpu.memory_space<vmem>>, vector<1x16x128xbf16>
    %169 = vector.shape_cast %168 : vector<1x16x128xbf16> to vector<16x128xbf16>
    %cst_92 = arith.constant dense<0.000000e+00> : vector<8x128xf32>
    %170 = tpu.matmul %167, %169, %cst_92 {dimension_numbers = #tpu.dot_dimension_numbers<[1], [0], [0], [1], [0, 0, 1, 1], [], []>} : vector<8x16xbf16>, vector<16x128xbf16>, vector<8x128xf32> -> vector<8x128xf32>
    %171 = arith.addf %165, %170 : vector<8x128xf32>
    %172 = vector.extract_strided_slice %32 {offsets = [184, 0], sizes = [8, 16], strides = [1, 1]} : vector<200x128xf32> to vector<8x16xf32>
    %173 = arith.truncf %172 : vector<8x16xf32> to vector<8x16xbf16>
    %c23 = arith.constant 23 : index
    %c0_93 = arith.constant 0 : index
    %c0_94 = arith.constant 0 : index
    %174 = vector.load %arg4[%c23, %c0_93, %c0_94] : memref<25x16x128xbf16, #tpu.memory_space<vmem>>, vector<1x16x128xbf16>
    %175 = vector.shape_cast %174 : vector<1x16x128xbf16> to vector<16x128xbf16>
    %cst_95 = arith.constant dense<0.000000e+00> : vector<8x128xf32>
    %176 = tpu.matmul %173, %175, %cst_95 {dimension_numbers = #tpu.dot_dimension_numbers<[1], [0], [0], [1], [0, 0, 1, 1], [], []>} : vector<8x16xbf16>, vector<16x128xbf16>, vector<8x128xf32> -> vector<8x128xf32>
    %177 = arith.addf %171, %176 : vector<8x128xf32>
    %178 = vector.extract_strided_slice %32 {offsets = [192, 0], sizes = [8, 16], strides = [1, 1]} : vector<200x128xf32> to vector<8x16xf32>
    %179 = arith.truncf %178 : vector<8x16xf32> to vector<8x16xbf16>
    %c24 = arith.constant 24 : index
    %c0_96 = arith.constant 0 : index
    %c0_97 = arith.constant 0 : index
    %180 = vector.load %arg4[%c24, %c0_96, %c0_97] : memref<25x16x128xbf16, #tpu.memory_space<vmem>>, vector<1x16x128xbf16>
    %181 = vector.shape_cast %180 : vector<1x16x128xbf16> to vector<16x128xbf16>
    %cst_98 = arith.constant dense<0.000000e+00> : vector<8x128xf32>
    %182 = tpu.matmul %179, %181, %cst_98 {dimension_numbers = #tpu.dot_dimension_numbers<[1], [0], [0], [1], [0, 0, 1, 1], [], []>} : vector<8x16xbf16>, vector<16x128xbf16>, vector<8x128xf32> -> vector<8x128xf32>
    %183 = arith.addf %177, %182 : vector<8x128xf32>
    %c0_99 = arith.constant 0 : index
    %c0_100 = arith.constant 0 : index
    %184 = vector.load %arg5[%c0_99, %c0_100] : memref<1x128xf32, #tpu.memory_space<vmem>>, vector<1x128xf32>
    %185 = vector.broadcast %184 : vector<1x128xf32> to vector<8x128xf32>
    %186 = arith.addf %183, %185 : vector<8x128xf32>
    %cst_101 = arith.constant 0.000000e+00 : f32
    %187 = vector.broadcast %cst_101 : f32 to vector<8x128xf32>
    %188 = arith.maximumf %186, %187 : vector<8x128xf32>
    %189 = arith.truncf %188 : vector<8x128xf32> to vector<8x128xbf16>
    %c0_102 = arith.constant 0 : index
    %c0_103 = arith.constant 0 : index
    %190 = vector.load %arg6[%c0_102, %c0_103] : memref<128x128xbf16, #tpu.memory_space<vmem>>, vector<128x128xbf16>
    %cst_104 = arith.constant dense<0.000000e+00> : vector<8x128xf32>
    %191 = tpu.matmul %189, %190, %cst_104 {dimension_numbers = #tpu.dot_dimension_numbers<[1], [0], [0], [1], [0, 0, 1, 1], [], []>} : vector<8x128xbf16>, vector<128x128xbf16>, vector<8x128xf32> -> vector<8x128xf32>
    %c0_105 = arith.constant 0 : index
    %c0_106 = arith.constant 0 : index
    %192 = vector.load %arg7[%c0_105, %c0_106] : memref<1x128xf32, #tpu.memory_space<vmem>>, vector<1x128xf32>
    %193 = vector.broadcast %192 : vector<1x128xf32> to vector<8x128xf32>
    %194 = arith.addf %191, %193 : vector<8x128xf32>
    %cst_107 = arith.constant 0.000000e+00 : f32
    %195 = vector.broadcast %cst_107 : f32 to vector<8x128xf32>
    %196 = arith.maximumf %194, %195 : vector<8x128xf32>
    %197 = arith.truncf %196 : vector<8x128xf32> to vector<8x128xbf16>
    %c0_108 = arith.constant 0 : index
    %c0_109 = arith.constant 0 : index
    %198 = vector.load %arg8[%c0_108, %c0_109] : memref<128x128xbf16, #tpu.memory_space<vmem>>, vector<128x128xbf16>
    %cst_110 = arith.constant dense<0.000000e+00> : vector<8x128xf32>
    %199 = tpu.matmul %197, %198, %cst_110 {dimension_numbers = #tpu.dot_dimension_numbers<[1], [0], [0], [1], [0, 0, 1, 1], [], []>} : vector<8x128xbf16>, vector<128x128xbf16>, vector<8x128xf32> -> vector<8x128xf32>
    %c0_111 = arith.constant 0 : index
    %c0_112 = arith.constant 0 : index
    %200 = vector.load %arg9[%c0_111, %c0_112] : memref<1x128xf32, #tpu.memory_space<vmem>>, vector<1x128xf32>
    %201 = vector.broadcast %200 : vector<1x128xf32> to vector<8x128xf32>
    %202 = arith.addf %199, %201 : vector<8x128xf32>
    %c0_113 = arith.constant 0 : index
    %c0_114 = arith.constant 0 : index
    %203 = vector.load %arg10[%c0_113, %c0_114] : memref<8x128xf32, #tpu.memory_space<vmem>>, vector<8x128xf32>
    tpu.vector_store %arg10[%c0_113, %c0_114], %202 {strides = array<i32>} : memref<8x128xf32, #tpu.memory_space<vmem>>, vector<8x128xf32>,
    return
  }
  func.func @transform_0(%arg0: i32) -> (i32, i32, i32) {
    %c0_i32 = arith.constant 0 : i32
    %c0_i32_0 = arith.constant 0 : i32
    %c0_i32_1 = arith.constant 0 : i32
    return %c0_i32, %arg0, %c0_i32_0 : i32, i32, i32
  }
  func.func @transform_1(%arg0: i32) -> (i32, i32) {
    %c0_i32 = arith.constant 0 : i32
    %c0_i32_0 = arith.constant 0 : i32
    %c0_i32_1 = arith.constant 0 : i32
    return %c0_i32, %c0_i32_0 : i32, i32
  }
  func.func @transform_2(%arg0: i32) -> (i32, i32) {
    %c0_i32 = arith.constant 0 : i32
    %c0_i32_0 = arith.constant 0 : i32
    %c0_i32_1 = arith.constant 0 : i32
    return %c0_i32, %c0_i32_0 : i32, i32
  }
  func.func @transform_3(%arg0: i32) -> (i32, i32, i32) {
    %c0_i32 = arith.constant 0 : i32
    %c0_i32_0 = arith.constant 0 : i32
    %c0_i32_1 = arith.constant 0 : i32
    %c0_i32_2 = arith.constant 0 : i32
    return %c0_i32, %c0_i32_0, %c0_i32_1 : i32, i32, i32
  }
  func.func @transform_4(%arg0: i32) -> (i32, i32) {
    %c0_i32 = arith.constant 0 : i32
    %c0_i32_0 = arith.constant 0 : i32
    %c0_i32_1 = arith.constant 0 : i32
    return %c0_i32, %c0_i32_0 : i32, i32
  }
  func.func @transform_5(%arg0: i32) -> (i32, i32) {
    %c0_i32 = arith.constant 0 : i32
    %c0_i32_0 = arith.constant 0 : i32
    %c0_i32_1 = arith.constant 0 : i32
    return %c0_i32, %c0_i32_0 : i32, i32
  }
  func.func @transform_6(%arg0: i32) -> (i32, i32) {
    %c0_i32 = arith.constant 0 : i32
    %c0_i32_0 = arith.constant 0 : i32
    %c0_i32_1 = arith.constant 0 : i32
    return %c0_i32, %c0_i32_0 : i32, i32
  }
  func.func @transform_7(%arg0: i32) -> (i32, i32) {
    %c0_i32 = arith.constant 0 : i32
    %c0_i32_0 = arith.constant 0 : i32
    %c0_i32_1 = arith.constant 0 : i32
    return %c0_i32, %c0_i32_0 : i32, i32
  }
  func.func @transform_8(%arg0: i32) -> (i32, i32) {
    %c0_i32 = arith.constant 0 : i32
    %c0_i32_0 = arith.constant 0 : i32
    %c0_i32_1 = arith.constant 0 : i32
    return %c0_i32, %c0_i32_0 : i32, i32
  }
  func.func @transform_9(%arg0: i32) -> (i32, i32) {
    %c0_i32 = arith.constant 0 : i32
    %c0_i32_0 = arith.constant 0 : i32
    return %arg0, %c0_i32 : i32, i32
  }
}

</mosaic_0001>

<bundles_post_ra>
// kernel: forward.2
= control target key start
LH: loop header
LB: loop body
LE: loop exit
PB: predicated region body
PF: predicated region fallthrough
CT: control target
= control target key end

     0   :  { %vm724_vm0 = vcmask 261120   ;;  %vm9386_vm1 = vcmask 60416   ;;  %s16751_s1 = inlined_call_operand.vmem [shape: bf16[32,8], index: 1, kind: input, shape index: {}]   ;;  %s16752_s0 = inlined_call_operand.vmem [shape: bf16[4,1568,32], index: 0, kind: input, shape index: {}]   ;;  %s16753_s2 = inlined_call_operand.vmem [shape: f32[1,8], index: 2, kind: input, shape index: {}]   ;;  %s16754_s3 = inlined_call_operand.vmem [shape: bf16[1568,8], index: 3, kind: output, shape index: {}]  }
   0x1   :  { %v12554_v0 = vld [vmem:[%s16751_s1] sm:$0xff]   ;;  %v12555_v1 = vld [vmem:[%s16751_s1 + $0x8] sm:$0xff]   ;;  %v12557_v3 = vld [vmem:[%s16752_s0 + $0x310] sm:$0xff]  }
   0x2   :  { %11754 = vmatprep.subr.bf16.mxu0 %v12554_v0  ;;  %11954 = vmatprep.subr.bf16.mxu1 %v12554_v0  ;;  %v12556_v2 = vld [vmem:[%s16752_s0] sm:$0xff]   ;;  %v12558_v4 = vld [vmem:[%s16752_s0 + $0x8] sm:$0xff]   ;;  %v12559_v5 = vld [vmem:[%s16752_s0 + $0x318] sm:$0xff]  }
   0x3   :  { %11755 = vmatpush3.bf16.msra.mxu0 %v12554_v0  ;;  %11955 = vmatpush3.bf16.msra.mxu1 %v12554_v0  ;;  %v12560_v6 = vld [vmem:[%s16752_s0 + $0x10] sm:$0xff]   ;;  %v12561_v7 = vld [vmem:[%s16752_s0 + $0x320] sm:$0xff]   ;;  %v12562_v8 = vld [vmem:[%s16752_s0 + $0x18] sm:$0xff]  }
   0x4   :  { %11756 = vmatprep.subr.bf16.mxu0 %v12555_v1  ;;  %11956 = vmatprep.subr.bf16.mxu1 %v12555_v1  ;;  %v12563_v9 = vld [vmem:[%s16752_s0 + $0x328] sm:$0xff]   ;;  %v12564_v10 = vld [vmem:[%s16752_s0 + $0x20] sm:$0xff]   ;;  %v12565_v11 = vld [vmem:[%s16752_s0 + $0x330] sm:$0xff]  }
   0x5   :  { %11758 = vmatprep.mubr.msk.bf16.mxu0 %vm724_vm0, %v12556_v2  ;;  %11958 = vmatprep.mubr.msk.bf16.mxu1 %vm724_vm0, %v12557_v3  ;;  %v12566_v12 = vld [vmem:[%s16752_s0 + $0x28] sm:$0xff]   ;;  %v12567_v13 = vld [vmem:[%s16752_s0 + $0x338] sm:$0xff]   ;;  %v12568_v14 = vld [vmem:[%s16752_s0 + $0x30] sm:$0xff]  }
   0x6   :  { %v12569_v15 = vld [vmem:[%s16752_s0 + $0x340] sm:$0xff]   ;;  %v12570_v16 = vld [vmem:[%s16752_s0 + $0x38] sm:$0xff]   ;;  %v12571_v17 = vld [vmem:[%s16752_s0 + $0x348] sm:$0xff]  }
   0x7   :  { %11757 = vmatpush3.bf16.msra.mxu0 %v12555_v1  ;;  %11957 = vmatpush3.bf16.msra.mxu1 %v12555_v1  ;;  %v12572_v18 = vld [vmem:[%s16752_s0 + $0x40] sm:$0xff]   ;;  %v12573_v19 = vld [vmem:[%s16752_s0 + $0x350] sm:$0xff]   ;;  %v12574_v20 = vld [vmem:[%s16752_s0 + $0x48] sm:$0xff]  }
   0x8   :  { %12154 = vmatprep.subr.bf16.mxu0 %v12554_v0  ;;  %12354 = vmatprep.subr.bf16.mxu1 %v12554_v0  ;;  %v12575_v21 = vld [vmem:[%s16752_s0 + $0x358] sm:$0xff]   ;;  %v12576_v22 = vld [vmem:[%s16752_s0 + $0x50] sm:$0xff]   ;;  %v12577_v23 = vld [vmem:[%s16752_s0 + $0x360] sm:$0xff]  }
   0x9   :  { %v12578_v24 = vld [vmem:[%s16752_s0 + $0x58] sm:$0xff]   ;;  %v12579_v25 = vld [vmem:[%s16752_s0 + $0x368] sm:$0xff]   ;;  %v12580_v26 = vld [vmem:[%s16752_s0 + $0x60] sm:$0xff]  }
   0xa   :  { %11759 = vmatmul.mubr.msk.bf16.vlgmr.msra.gmra.mrb[0].mxu0 %vm724_vm0, %v12558_v4  ;;  %11959 = vmatmul.mubr.msk.bf16.vlgmr.msra.gmra.mrb[0].mxu1 %vm724_vm0, %v12559_v5  ;;  %v12581_v27 = vld [vmem:[%s16752_s0 + $0x370] sm:$0xff]   ;;  %v12582_v28 = vld [vmem:[%s16752_s0 + $0x68] sm:$0xff]   ;;  %v12583_v29 = vld [vmem:[%s16752_s0 + $0x378] sm:$0xff]  }
   0xb   :  { %12155 = vmatpush3.bf16.msra.mxu0 %v12554_v0  ;;  %12355 = vmatpush3.bf16.msra.mxu1 %v12554_v0  ;;  %v12584_v30 = vld [vmem:[%s16752_s0 + $0x70] sm:$0xff]   ;;  %v12585_v31 = vld [vmem:[%s16752_s0 + $0x380] sm:$0xff]   ;;  %v12586_v32 = vld [vmem:[%s16752_s0 + $0x78] sm:$0xff]  }
   0xc   :  { %11762 = vmatprep.mubr.msk.bf16.mxu0 %vm724_vm0, %v12560_v6  ;;  %11962 = vmatprep.mubr.msk.bf16.mxu1 %vm724_vm0, %v12561_v7  ;;  %v12587_v33 = vld [vmem:[%s16752_s0 + $0x388] sm:$0xff]   ;;  %v12588_v34 = vld [vmem:[%s16752_s0 + $0x80] sm:$0xff]   ;;  %v12589_v35 = vld [vmem:[%s16752_s0 + $0x390] sm:$0xff]  }
   0xd   :  { %12156 = vmatprep.subr.bf16.mxu0 %v12555_v1  ;;  %12356 = vmatprep.subr.bf16.mxu1 %v12555_v1  ;;  %v12590_v36 = vld [vmem:[%s16752_s0 + $0x88] sm:$0xff]   ;;  %v12591_v37 = vld [vmem:[%s16752_s0 + $0x398] sm:$0xff]   ;;  %v12592_v38 = vld [vmem:[%s16752_s0 + $0x90] sm:$0xff]  }
   0xe   :  { %v12593_v39 = vld [vmem:[%s16752_s0 + $0x3a0] sm:$0xff]   ;;  %v12594_v40 = vld [vmem:[%s16752_s0 + $0x98] sm:$0xff]   ;;  %v12595_v41 = vld [vmem:[%s16752_s0 + $0x3a8] sm:$0xff]  }
   0xf   :  { %12157 = vmatpush3.bf16.msra.mxu0 %v12555_v1  ;;  %12357 = vmatpush3.bf16.msra.mxu1 %v12555_v1  ;;  %v12596_v42 = vld [vmem:[%s16752_s0 + $0xa0] sm:$0xff]   ;;  %v12597_v43 = vld [vmem:[%s16752_s0 + $0x3b0] sm:$0xff]   ;;  %v12598_v44 = vld [vmem:[%s16752_s0 + $0xa8] sm:$0xff]  }
  0x10   :  { %v12599_v45 = vld [vmem:[%s16752_s0 + $0x3b8] sm:$0xff]   ;;  %v12600_v46 = vld [vmem:[%s16752_s0 + $0xb0] sm:$0xff]   ;;  %v12601_v47 = vld [vmem:[%s16752_s0 + $0x3c0] sm:$0xff]  }
  0x11   :  { %v12602_v48 = vld [vmem:[%s16752_s0 + $0xb8] sm:$0xff]   ;;  %v12603_v49 = vld [vmem:[%s16752_s0 + $0x3c8] sm:$0xff]   ;;  %v12604_v50 = vld [vmem:[%s16752_s0 + $0xc0] sm:$0xff]  }
  0x12   :  { %11763 = vmatmul.mubr.msk.bf16.gmra.mrb[4].mxu0 %vm724_vm0, %v12562_v8  ;;  %11963 = vmatmul.mubr.msk.bf16.gmra.mrb[4].mxu1 %vm724_vm0, %v12563_v9  ;;  %v12605_v51 = vld [vmem:[%s16752_s0 + $0x3d0] sm:$0xff]   ;;  %v12606_v52 = vld [vmem:[%s16752_s0 + $0xc8] sm:$0xff]   ;;  %v12607_v53 = vld [vmem:[%s16752_s0 + $0x3d8] sm:$0xff]  }
  0x13   :  { %11766 = vmatprep.mubr.msk.bf16.mxu0 %vm724_vm0, %v12564_v10  ;;  %11966 = vmatprep.mubr.msk.bf16.mxu1 %vm724_vm0, %v12565_v11  ;;  %v12608_v54 = vld [vmem:[%s16752_s0 + $0xd0] sm:$0xff]   ;;  %v12609_v55 = vld [vmem:[%s16752_s0 + $0x3e0] sm:$0xff]   ;;  %v12610_v56 = vld [vmem:[%s16752_s0 + $0xd8] sm:$0xff]  }
  0x14   :  { %v12611_v57 = vld [vmem:[%s16752_s0 + $0x3e8] sm:$0xff]   ;;  %v12612_v58 = vld [vmem:[%s16752_s0 + $0xe0] sm:$0xff]   ;;  %v12613_v59 = vld [vmem:[%s16752_s0 + $0x3f0] sm:$0xff]  }
  0x15   :  { %v12614_v60 = vld [vmem:[%s16752_s0 + $0xe8] sm:$0xff]   ;;  %v12615_v61 = vld [vmem:[%s16752_s0 + $0x3f8] sm:$0xff]   ;;  %v12616_v62 = vld [vmem:[%s16752_s0 + $0xf0] sm:$0xff]  }
  0x16   :  { %v12617_v63 = vld [vmem:[%s16752_s0 + $0x400] sm:$0xff]   ;;  %v12618_v0 = vld [vmem:[%s16752_s0 + $0xf8] sm:$0xff]   ;;  %v12619_v1 = vld [vmem:[%s16752_s0 + $0x408] sm:$0xff]  }
  0x17   :  { %v12620_v2 = vld [vmem:[%s16752_s0 + $0x100] sm:$0xff]   ;;  %v12621_v3 = vld [vmem:[%s16752_s0 + $0x410] sm:$0xff]   ;;  %v12622_v4 = vld [vmem:[%s16752_s0 + $0x108] sm:$0xff]  }
  0x18   :  { %v12623_v5 = vld [vmem:[%s16752_s0 + $0x418] sm:$0xff]   ;;  %v12624_v6 = vld [vmem:[%s16752_s0 + $0x110] sm:$0xff]   ;;  %v12625_v7 = vld [vmem:[%s16752_s0 + $0x420] sm:$0xff]  }
  0x19   :  { %v12626_v8 = vld [vmem:[%s16752_s0 + $0x118] sm:$0xff]   ;;  %v12627_v9 = vld [vmem:[%s16752_s0 + $0x428] sm:$0xff]   ;;  %v12628_v10 = vld [vmem:[%s16752_s0 + $0x120] sm:$0xff]  }
  0x1a   :  { %11767 = vmatmul.mubr.msk.bf16.gmra.mrb[8].mxu0 %vm724_vm0, %v12566_v12  ;;  %11967 = vmatmul.mubr.msk.bf16.gmra.mrb[8].mxu1 %vm724_vm0, %v12567_v13  ;;  %v12629_v11 = vld [vmem:[%s16752_s0 + $0x430] sm:$0xff]   ;;  %v12630_v12 = vld [vmem:[%s16752_s0 + $0x128] sm:$0xff]   ;;  %v12631_v13 = vld [vmem:[%s16752_s0 + $0x438] sm:$0xff]  }
  0x1b   :  { %11770 = vmatprep.mubr.msk.bf16.mxu0 %vm724_vm0, %v12568_v14  ;;  %11970 = vmatprep.mubr.msk.bf16.mxu1 %vm724_vm0, %v12569_v15  ;;  %v12632_v14 = vld [vmem:[%s16752_s0 + $0x130] sm:$0xff]   ;;  %v12633_v15 = vld [vmem:[%s16752_s0 + $0x440] sm:$0xff]  }
  0x22   :  { %11771 = vmatmul.mubr.msk.bf16.gmra.mrb[12].mxu0 %vm724_vm0, %v12570_v16  ;;  %11971 = vmatmul.mubr.msk.bf16.gmra.mrb[12].mxu1 %vm724_vm0, %v12571_v17  ;;  %v12634_v16 = vld [vmem:[%s16752_s0 + $0x138] sm:$0xff]   ;;  %v12635_v17 = vld [vmem:[%s16752_s0 + $0x448] sm:$0xff]  }
  0x23   :  { %11774 = vmatprep.mubr.msk.bf16.mxu0 %vm724_vm0, %v12572_v18  ;;  %11974 = vmatprep.mubr.msk.bf16.mxu1 %vm724_vm0, %v12573_v19  ;;  %v12636_v18 = vld [vmem:[%s16752_s0 + $0x140] sm:$0xff]   ;;  %v12637_v19 = vld [vmem:[%s16752_s0 + $0x450] sm:$0xff]  }
  0x2a   :  { %11775 = vmatmul.mubr.msk.bf16.gmra.mrb[16].mxu0 %vm724_vm0, %v12574_v20  ;;  %11975 = vmatmul.mubr.msk.bf16.gmra.mrb[16].mxu1 %vm724_vm0, %v12575_v21  ;;  %v12638_v20 = vld [vmem:[%s16752_s0 + $0x148] sm:$0xff]   ;;  %v12639_v21 = vld [vmem:[%s16752_s0 + $0x458] sm:$0xff]  }
  0x2b   :  { %11778 = vmatprep.mubr.msk.bf16.mxu0 %vm724_vm0, %v12576_v22  ;;  %11978 = vmatprep.mubr.msk.bf16.mxu1 %vm724_vm0, %v12577_v23  ;;  %v12640_v22 = vld [vmem:[%s16752_s0 + $0x150] sm:$0xff]   ;;  %v12641_v23 = vld [vmem:[%s16752_s0 + $0x460] sm:$0xff]  }
  0x32   :  { %11779 = vmatmul.mubr.msk.bf16.gmra.mrb[20].mxu0 %vm724_vm0, %v12578_v24  ;;  %11979 = vmatmul.mubr.msk.bf16.gmra.mrb[20].mxu1 %vm724_vm0, %v12579_v25  ;;  %v12642_v24 = vld [vmem:[%s16752_s0 + $0x158] sm:$0xff]   ;;  %v12643_v25 = vld [vmem:[%s16752_s0 + $0x468] sm:$0xff]  }
  0x33   :  { %11782 = vmatprep.mubr.msk.bf16.mxu0 %vm724_vm0, %v12580_v26  ;;  %11982 = vmatprep.mubr.msk.bf16.mxu1 %vm724_vm0, %v12581_v27  ;;  %v12644_v26 = vld [vmem:[%s16752_s0 + $0x160] sm:$0xff]   ;;  %v12645_v27 = vld [vmem:[%s16752_s0 + $0x470] sm:$0xff]  }
  0x3a   :  { %11783 = vmatmul.mubr.msk.bf16.gmra.mrb[24].mxu0 %vm724_vm0, %v12582_v28  ;;  %11983 = vmatmul.mubr.msk.bf16.gmra.mrb[24].mxu1 %vm724_vm0, %v12583_v29  ;;  %v12646_v28 = vld [vmem:[%s16752_s0 + $0x168] sm:$0xff]   ;;  %v12647_v29 = vld [vmem:[%s16752_s0 + $0x478] sm:$0xff]  }
  0x3b   :  { %11786 = vmatprep.mubr.msk.bf16.mxu0 %vm724_vm0, %v12584_v30  ;;  %11986 = vmatprep.mubr.msk.bf16.mxu1 %vm724_vm0, %v12585_v31  ;;  %v12648_v30 = vld [vmem:[%s16752_s0 + $0x170] sm:$0xff]   ;;  %v12649_v31 = vld [vmem:[%s16752_s0 + $0x480] sm:$0xff]  }
  0x42   :  { %11787 = vmatmul.mubr.msk.bf16.gmra.mrb[28].mxu0 %vm724_vm0, %v12586_v32  ;;  %11987 = vmatmul.mubr.msk.bf16.gmra.mrb[28].mxu1 %vm724_vm0, %v12587_v33  ;;  %v12650_v32 = vld [vmem:[%s16752_s0 + $0x178] sm:$0xff]   ;;  %v12651_v33 = vld [vmem:[%s16752_s0 + $0x488] sm:$0xff]  }
  0x43   :  { %11790 = vmatprep.mubr.msk.bf16.mxu0 %vm724_vm0, %v12588_v34  ;;  %11990 = vmatprep.mubr.msk.bf16.mxu1 %vm724_vm0, %v12589_v35  ;;  %v12652_v34 = vld [vmem:[%s16752_s0 + $0x180] sm:$0xff]   ;;  %v12653_v35 = vld [vmem:[%s16752_s0 + $0x490] sm:$0xff]  }
  0x4a   :  { %11791 = vmatmul.mubr.msk.bf16.gmra.mrb[32].mxu0 %vm724_vm0, %v12590_v36  ;;  %11991 = vmatmul.mubr.msk.bf16.gmra.mrb[32].mxu1 %vm724_vm0, %v12591_v37  ;;  %v12654_v36 = vld [vmem:[%s16752_s0 + $0x188] sm:$0xff]   ;;  %v12655_v37 = vld [vmem:[%s16752_s0 + $0x498] sm:$0xff]  }
  0x4b   :  { %11794 = vmatprep.mubr.msk.bf16.mxu0 %vm724_vm0, %v12592_v38  ;;  %11994 = vmatprep.mubr.msk.bf16.mxu1 %vm724_vm0, %v12593_v39  ;;  %v12656_v38 = vld [vmem:[%s16752_s0 + $0x190] sm:$0xff]   ;;  %v12657_v39 = vld [vmem:[%s16752_s0 + $0x4a0] sm:$0xff]  }
  0x52   :  { %11795 = vmatmul.mubr.msk.bf16.gmra.mrb[36].mxu0 %vm724_vm0, %v12594_v40  ;;  %11995 = vmatmul.mubr.msk.bf16.gmra.mrb[36].mxu1 %vm724_vm0, %v12595_v41  ;;  %v12658_v40 = vld [vmem:[%s16752_s0 + $0x198] sm:$0xff]   ;;  %v12659_v41 = vld [vmem:[%s16752_s0 + $0x4a8] sm:$0xff]  }
  0x53   :  { %11798 = vmatprep.mubr.msk.bf16.mxu0 %vm724_vm0, %v12596_v42  ;;  %11998 = vmatprep.mubr.msk.bf16.mxu1 %vm724_vm0, %v12597_v43  ;;  %v12660_v42 = vld [vmem:[%s16752_s0 + $0x1a0] sm:$0xff]   ;;  %v12661_v43 = vld [vmem:[%s16752_s0 + $0x4b0] sm:$0xff]  }
  0x5a   :  { %11799 = vmatmul.mubr.msk.bf16.gmra.mrb[40].mxu0 %vm724_vm0, %v12598_v44  ;;  %11999 = vmatmul.mubr.msk.bf16.gmra.mrb[40].mxu1 %vm724_vm0, %v12599_v45  ;;  %v12662_v44 = vld [vmem:[%s16752_s0 + $0x1a8] sm:$0xff]   ;;  %v12663_v45 = vld [vmem:[%s16752_s0 + $0x4b8] sm:$0xff]  }
  0x5b   :  { %11802 = vmatprep.mubr.msk.bf16.mxu0 %vm724_vm0, %v12600_v46  ;;  %12002 = vmatprep.mubr.msk.bf16.mxu1 %vm724_vm0, %v12601_v47  ;;  %v12664_v46 = vld [vmem:[%s16752_s0 + $0x1b0] sm:$0xff]   ;;  %v12665_v47 = vld [vmem:[%s16752_s0 + $0x4c0] sm:$0xff]  }
  0x62   :  { %11803 = vmatmul.mubr.msk.bf16.gmra.mrb[44].mxu0 %vm724_vm0, %v12602_v48  ;;  %12003 = vmatmul.mubr.msk.bf16.gmra.mrb[44].mxu1 %vm724_vm0, %v12603_v49  ;;  %v13421_v48 = vld [vmem:[%s16753_s2] ss:$0 sm:$0xff]  ;;  %v12666_v49 = vld [vmem:[%s16752_s0 + $0x1b8] sm:$0xff]  }
  0x63   :  { %11806 = vmatprep.mubr.msk.bf16.mxu0 %vm724_vm0, %v12604_v50  ;;  %12006 = vmatprep.mubr.msk.bf16.mxu1 %vm724_vm0, %v12605_v51  ;;  %v12667_v50 = vld [vmem:[%s16752_s0 + $0x4c8] sm:$0xff]  }
  0x6a   :  { %11807 = vmatmul.mubr.msk.bf16.gmra.mrb[48].mxu0 %vm724_vm0, %v12606_v52  ;;  %12007 = vmatmul.mubr.msk.bf16.gmra.mrb[48].mxu1 %vm724_vm0, %v12607_v53 }
  0x6b   :  { %11810 = vmatprep.mubr.msk.bf16.mxu0 %vm724_vm0, %v12608_v54  ;;  %12010 = vmatprep.mubr.msk.bf16.mxu1 %vm724_vm0, %v12609_v55 }
  0x72   :  { %11811 = vmatmul.mubr.msk.bf16.gmra.mrb[52].mxu0 %vm724_vm0, %v12610_v56  ;;  %12011 = vmatmul.mubr.msk.bf16.gmra.mrb[52].mxu1 %vm724_vm0, %v12611_v57 }
  0x73   :  { %11814 = vmatprep.mubr.msk.bf16.mxu0 %vm724_vm0, %v12612_v58  ;;  %12014 = vmatprep.mubr.msk.bf16.mxu1 %vm724_vm0, %v12613_v59 }
  0x7a   :  { %11815 = vmatmul.mubr.msk.bf16.gmra.mrb[56].mxu0 %vm724_vm0, %v12614_v60  ;;  %12015 = vmatmul.mubr.msk.bf16.gmra.mrb[56].mxu1 %vm724_vm0, %v12615_v61  ;;  %v12668_v61 = vld [vmem:[%s16752_s0 + $0x1c0] sm:$0xff]  }
  0x7b   :  { %11818 = vmatprep.mubr.msk.bf16.mxu0 %vm724_vm0, %v12616_v62  ;;  %12018 = vmatprep.mubr.msk.bf16.mxu1 %vm724_vm0, %v12617_v63  ;;  %v12669_v62 = vld [vmem:[%s16752_s0 + $0x4d0] sm:$0xff]  }
  0x82   :  { %11819 = vmatmul.mubr.msk.bf16.gmra.mrb[60].mxu0 %vm724_vm0, %v12618_v0  ;;  %12019 = vmatmul.mubr.msk.bf16.gmra.mrb[60].mxu1 %vm724_vm0, %v12619_v1 }
  0x83   :  { %11822 = vmatprep.mubr.msk.bf16.mxu0 %vm724_vm0, %v12620_v2  ;;  %12022 = vmatprep.mubr.msk.bf16.mxu1 %vm724_vm0, %v12621_v3 }
  0x8a   :  { %11823 = vmatmul.mubr.msk.bf16.gmra.mrb[64].mxu0 %vm724_vm0, %v12622_v4  ;;  %12023 = vmatmul.mubr.msk.bf16.gmra.mrb[64].mxu1 %vm724_vm0, %v12623_v5 }
  0x8b   :  { %11826 = vmatprep.mubr.msk.bf16.mxu0 %vm724_vm0, %v12624_v6  ;;  %12026 = vmatprep.mubr.msk.bf16.mxu1 %vm724_vm0, %v12625_v7 }
  0x92   :  { %11827 = vmatmul.mubr.msk.bf16.gmra.mrb[68].mxu0 %vm724_vm0, %v12626_v8  ;;  %12027 = vmatmul.mubr.msk.bf16.gmra.mrb[68].mxu1 %vm724_vm0, %v12627_v9 }
  0x93   :  { %11830 = vmatprep.mubr.msk.bf16.mxu0 %vm724_vm0, %v12628_v10  ;;  %12030 = vmatprep.mubr.msk.bf16.mxu1 %vm724_vm0, %v12629_v11 }
  0x9a   :  { %11831 = vmatmul.mubr.msk.bf16.gmra.mrb[72].mxu0 %vm724_vm0, %v12630_v12  ;;  %12031 = vmatmul.mubr.msk.bf16.gmra.mrb[72].mxu1 %vm724_vm0, %v12631_v13 }
  0x9b   :  { %11834 = vmatprep.mubr.msk.bf16.mxu0 %vm724_vm0, %v12632_v14  ;;  %12034 = vmatprep.mubr.msk.bf16.mxu1 %vm724_vm0, %v12633_v15  ;;  %v12670_v15 = vld [vmem:[%s16752_s0 + $0x1c8] sm:$0xff]  }
  0xa2   :  { %11835 = vmatmul.mubr.msk.bf16.gmra.mrb[76].mxu0 %vm724_vm0, %v12634_v16  ;;  %12035 = vmatmul.mubr.msk.bf16.gmra.mrb[76].mxu1 %vm724_vm0, %v12635_v17  ;;  %v12671_v16 = vld [vmem:[%s16752_s0 + $0x4d8] sm:$0xff]  }
  0xa3   :  { %11838 = vmatprep.mubr.msk.bf16.mxu0 %vm724_vm0, %v12636_v18  ;;  %12038 = vmatprep.mubr.msk.bf16.mxu1 %vm724_vm0, %v12637_v19 }
  0xaa   :  { %11839 = vmatmul.mubr.msk.bf16.gmra.mrb[80].mxu0 %vm724_vm0, %v12638_v20  ;;  %12039 = vmatmul.mubr.msk.bf16.gmra.mrb[80].mxu1 %vm724_vm0, %v12639_v21 }
  0xab   :  { %11842 = vmatprep.mubr.msk.bf16.mxu0 %vm724_vm0, %v12640_v22  ;;  %12042 = vmatprep.mubr.msk.bf16.mxu1 %vm724_vm0, %v12641_v23 }
  0xb2   :  { %11843 = vmatmul.mubr.msk.bf16.gmra.mrb[84].mxu0 %vm724_vm0, %v12642_v24  ;;  %12043 = vmatmul.mubr.msk.bf16.gmra.mrb[84].mxu1 %vm724_vm0, %v12643_v25 }
  0xb3   :  { %11846 = vmatprep.mubr.msk.bf16.mxu0 %vm724_vm0, %v12644_v26  ;;  %12046 = vmatprep.mubr.msk.bf16.mxu1 %vm724_vm0, %v12645_v27 }
  0xba   :  { %11847 = vmatmul.mubr.msk.bf16.gmra.mrb[88].mxu0 %vm724_vm0, %v12646_v28  ;;  %12047 = vmatmul.mubr.msk.bf16.gmra.mrb[88].mxu1 %vm724_vm0, %v12647_v29  ;;  %v12672_v29 = vld [vmem:[%s16752_s0 + $0x1d0] sm:$0xff]  }
  0xbb   :  { %11850 = vmatprep.mubr.msk.bf16.mxu0 %vm724_vm0, %v12648_v30  ;;  %12050 = vmatprep.mubr.msk.bf16.mxu1 %vm724_vm0, %v12649_v31  ;;  %v12673_v30 = vld [vmem:[%s16752_s0 + $0x4e0] sm:$0xff]  }
  0xc2   :  { %11851 = vmatmul.mubr.msk.bf16.gmra.mrb[92].mxu0 %vm724_vm0, %v12650_v32  ;;  %12051 = vmatmul.mubr.msk.bf16.gmra.mrb[92].mxu1 %vm724_vm0, %v12651_v33 }
  0xc3   :  { %11854 = vmatprep.mubr.msk.bf16.mxu0 %vm724_vm0, %v12652_v34  ;;  %12054 = vmatprep.mubr.msk.bf16.mxu1 %vm724_vm0, %v12653_v35 }
  0xca   :  { %11855 = vmatmul.mubr.msk.bf16.gmra.mrb[96].mxu0 %vm724_vm0, %v12654_v36  ;;  %12055 = vmatmul.mubr.msk.bf16.gmra.mrb[96].mxu1 %vm724_vm0, %v12655_v37 }
  0xcb   :  { %11858 = vmatprep.mubr.msk.bf16.mxu0 %vm724_vm0, %v12656_v38  ;;  %12058 = vmatprep.mubr.msk.bf16.mxu1 %vm724_vm0, %v12657_v39 }
  0xd2   :  { %11859 = vmatmul.mubr.msk.bf16.gmra.mrb[100].mxu0 %vm724_vm0, %v12658_v40  ;;  %12059 = vmatmul.mubr.msk.bf16.gmra.mrb[100].mxu1 %vm724_vm0, %v12659_v41 }
  0xd3   :  { %11862 = vmatprep.mubr.msk.bf16.mxu0 %vm724_vm0, %v12660_v42  ;;  %12062 = vmatprep.mubr.msk.bf16.mxu1 %vm724_vm0, %v12661_v43 }
  0xda   :  { %11863 = vmatmul.mubr.msk.bf16.gmra.mrb[104].mxu0 %vm724_vm0, %v12662_v44  ;;  %12063 = vmatmul.mubr.msk.bf16.gmra.mrb[104].mxu1 %vm724_vm0, %v12663_v45 }
  0xdb   :  { %11866 = vmatprep.mubr.msk.bf16.mxu0 %vm724_vm0, %v12664_v46  ;;  %12066 = vmatprep.mubr.msk.bf16.mxu1 %vm724_vm0, %v12665_v47  ;;  %v12674_v47 = vld [vmem:[%s16752_s0 + $0x1d8] sm:$0xff]  }
  0xdd   :  { %v11760_v51 = vpop.f32.mrb[0].mxu0  ;;  %v11960_v52 = vpop.f32.mrb[0].mxu1 }
  0xde   :  { %v1062_v53 = vadd.f32 %v11760_v51, %v13421_v48  ;;  %v3056_v54 = vadd.f32 %v11960_v52, %v13421_v48  ;;  %v1053_v55 = vpop.f32.mrb[1].mxu0  ;;  %v3047_v56 = vpop.f32.mrb[1].mxu1 }
  0xdf   :  { %v1054_v57 = vadd.f32 %v13421_v48, %v1053_v55  ;;  %v3048_v58 = vadd.f32 %v13421_v48, %v3047_v56  ;;  %v11761_v59 = vpop.f32.mrb[2].mxu0  ;;  %v11961_v60 = vpop.f32.mrb[2].mxu1 }
  0xe0   :  { %v1838_v63 = vmax.f32 %v1062_v53, 0.0  ;;  %v3832_v0 = vmax.f32 %v3056_v54, 0.0  ;;  %v1065_v1 = vadd.f32 %v11761_v59, %v13421_v48  ;;  %v3059_v2 = vadd.f32 %v11961_v60, %v13421_v48  ;;  %v1056_v3 = vpop.f32.mrb[3].mxu0  ;;  %v3050_v4 = vpop.f32.mrb[3].mxu1 }
  0xe1   :  { %v1836_v5 = vmax.f32 %v1054_v57, 0.0  ;;  %v3830_v6 = vmax.f32 %v3048_v58, 0.0  ;;  %v1057_v7 = vadd.f32 %v13421_v48, %v1056_v3  ;;  %v3051_v8 = vadd.f32 %v13421_v48, %v3050_v4 }
  0xe2   :  { %v1839_v9 = vmax.f32 %v1065_v1, 0.0  ;;  %v3833_v10 = vmax.f32 %v3059_v2, 0.0  ;;  %11867 = vmatmul.mubr.msk.bf16.gmra.mrb[108].mxu0 %vm724_vm0, %v12666_v49  ;;  %12067 = vmatmul.mubr.msk.bf16.gmra.mrb[108].mxu1 %vm724_vm0, %v12667_v50  ;;  %v13449_v11 = vmax.f32 %v1838_v63, %v3832_v0  ;;  %v12675_v49 = vld [vmem:[%s16752_s0 + $0x4e8] sm:$0xff]   ;;  %v12677_v63 = vld [vmem:[%s16752_s0 + $0x4f0] sm:$0xff]  }
  0xe3   :  { %v1837_v12 = vmax.f32 %v1057_v7, 0.0  ;;  %v3831_v13 = vmax.f32 %v3051_v8, 0.0  ;;  %11870 = vmatprep.mubr.msk.bf16.mxu0 %vm724_vm0, %v12668_v61  ;;  %12070 = vmatprep.mubr.msk.bf16.mxu1 %vm724_vm0, %v12669_v62  ;;  %v13453_v14 = vmax.f32 %v1836_v5, %v3830_v6  ;;  %v12676_v62 = vld [vmem:[%s16752_s0 + $0x1e0] sm:$0xff]  }
  0xe4   :  { %v13461_v17 = vmax.f32 %v1839_v9, %v3833_v10 }
  0xe5   :  { %v11764_v18 = vpop.f32.mrb[4].mxu0  ;;  %v11964_v19 = vpop.f32.mrb[4].mxu1  ;;  %v13463_v20 = vmax.f32 %v1837_v12, %v3831_v13 }
  0xe6   :  { %v1078_v21 = vadd.f32 %v11764_v18, %v13421_v48  ;;  %v3072_v22 = vadd.f32 %v11964_v19, %v13421_v48  ;;  %v1069_v23 = vpop.f32.mrb[5].mxu0  ;;  %v3063_v24 = vpop.f32.mrb[5].mxu1  ;;  %v12678_v19 = vld [vmem:[%s16752_s0 + $0x1e8] sm:$0xff]  }
  0xe7   :  { %v1070_v25 = vadd.f32 %v13421_v48, %v1069_v23  ;;  %v3064_v26 = vadd.f32 %v13421_v48, %v3063_v24  ;;  %v11765_v27 = vpop.f32.mrb[6].mxu0  ;;  %v11965_v28 = vpop.f32.mrb[6].mxu1 }
  0xe8   :  { %v1842_v31 = vmax.f32 %v1078_v21, 0.0  ;;  %v3836_v32 = vmax.f32 %v3072_v22, 0.0  ;;  %v1081_v33 = vadd.f32 %v11765_v27, %v13421_v48  ;;  %v3075_v34 = vadd.f32 %v11965_v28, %v13421_v48  ;;  %v1072_v35 = vpop.f32.mrb[7].mxu0  ;;  %v3066_v36 = vpop.f32.mrb[7].mxu1  ;;  %v12679_v21 = vld [vmem:[%s16752_s0 + $0x4f8] sm:$0xff]  }
  0xe9   :  { %v1840_v37 = vmax.f32 %v1070_v25, 0.0  ;;  %v3834_v38 = vmax.f32 %v3064_v26, 0.0  ;;  %v1073_v39 = vadd.f32 %v13421_v48, %v1072_v35  ;;  %v3067_v40 = vadd.f32 %v13421_v48, %v3066_v36  ;;  %v12681_v35 = vld [vmem:[%s16752_s0 + $0x500] sm:$0xff]  }
  0xea   :  { %v1843_v41 = vmax.f32 %v1081_v33, 0.0  ;;  %v3837_v42 = vmax.f32 %v3075_v34, 0.0  ;;  %11871 = vmatmul.mubr.msk.bf16.gmra.mrb[112].mxu0 %vm724_vm0, %v12670_v15  ;;  %12071 = vmatmul.mubr.msk.bf16.gmra.mrb[112].mxu1 %vm724_vm0, %v12671_v16  ;;  %v13481_v43 = vmax.f32 %v1842_v31, %v3836_v32  ;;  %v12680_v34 = vld [vmem:[%s16752_s0 + $0x1f0] sm:$0xff]  }
  0xeb   :  { %v1841_v44 = vmax.f32 %v1073_v39, 0.0  ;;  %v3835_v45 = vmax.f32 %v3067_v40, 0.0  ;;  %11874 = vmatprep.mubr.msk.bf16.mxu0 %vm724_vm0, %v12672_v29  ;;  %12074 = vmatprep.mubr.msk.bf16.mxu1 %vm724_vm0, %v12673_v30  ;;  %v13485_v46 = vmax.f32 %v1840_v37, %v3834_v38 }
  0xec   :  { %v13493_v50 = vmax.f32 %v1843_v41, %v3837_v42 }
  0xed   :  { %v11768_v51 = vpop.f32.mrb[8].mxu0  ;;  %v11968_v52 = vpop.f32.mrb[8].mxu1  ;;  %v13495_v53 = vmax.f32 %v1841_v44, %v3835_v45 }
  0xee   :  { %v1094_v54 = vadd.f32 %v11768_v51, %v13421_v48  ;;  %v3088_v55 = vadd.f32 %v11968_v52, %v13421_v48  ;;  %v1085_v56 = vpop.f32.mrb[9].mxu0  ;;  %v3079_v57 = vpop.f32.mrb[9].mxu1 }
  0xef   :  { %v1086_v58 = vadd.f32 %v13421_v48, %v1085_v56  ;;  %v3080_v59 = vadd.f32 %v13421_v48, %v3079_v57  ;;  %v11769_v60 = vpop.f32.mrb[10].mxu0  ;;  %v11969_v61 = vpop.f32.mrb[10].mxu1  ;;  %v12682_v57 = vld [vmem:[%s16752_s0 + $0x1f8] sm:$0xff]  }
  0xf0   :  { %v1846_v0 = vmax.f32 %v1094_v54, 0.0  ;;  %v3840_v1 = vmax.f32 %v3088_v55, 0.0  ;;  %v1097_v2 = vadd.f32 %v11769_v60, %v13421_v48  ;;  %v3091_v3 = vadd.f32 %v11969_v61, %v13421_v48  ;;  %v1088_v4 = vpop.f32.mrb[11].mxu0  ;;  %v3082_v5 = vpop.f32.mrb[11].mxu1 }
  0xf1   :  { %v1844_v6 = vmax.f32 %v1086_v58, 0.0  ;;  %v3838_v7 = vmax.f32 %v3080_v59, 0.0  ;;  %v1089_v8 = vadd.f32 %v13421_v48, %v1088_v4  ;;  %v3083_v9 = vadd.f32 %v13421_v48, %v3082_v5  ;;  %v12683_v58 = vld [vmem:[%s16752_s0 + $0x508] sm:$0xff]  }
  0xf2   :  { %v1847_v10 = vmax.f32 %v1097_v2, 0.0  ;;  %v3841_v12 = vmax.f32 %v3091_v3, 0.0  ;;  %11875 = vmatmul.mubr.msk.bf16.gmra.mrb[116].mxu0 %vm724_vm0, %v12674_v47  ;;  %12075 = vmatmul.mubr.msk.bf16.gmra.mrb[116].mxu1 %vm724_vm0, %v12675_v49  ;;  %v13513_v13 = vmax.f32 %v1846_v0, %v3840_v1 }
  0xf3   :  { %v1845_v15 = vmax.f32 %v1089_v8, 0.0  ;;  %v3839_v16 = vmax.f32 %v3083_v9, 0.0  ;;  %11878 = vmatprep.mubr.msk.bf16.mxu0 %vm724_vm0, %v12676_v62  ;;  %12078 = vmatprep.mubr.msk.bf16.mxu1 %vm724_vm0, %v12677_v63  ;;  %v13517_v18 = vmax.f32 %v1844_v6, %v3838_v7  ;;  %v12684_v7 = vld [vmem:[%s16752_s0 + $0x200] sm:$0xff]   ;;  %v12685_v8 = vld [vmem:[%s16752_s0 + $0x510] sm:$0xff]  }
  0xf4   :  { %v13525_v22 = vmax.f32 %v1847_v10, %v3841_v12 }
  0xf5   :  { %v11772_v23 = vpop.f32.mrb[12].mxu0  ;;  %v11972_v24 = vpop.f32.mrb[12].mxu1  ;;  %v13527_v25 = vmax.f32 %v1845_v15, %v3839_v16 }
  0xf6   :  { %v1110_v26 = vadd.f32 %v11772_v23, %v13421_v48  ;;  %v3104_v27 = vadd.f32 %v11972_v24, %v13421_v48  ;;  %v1101_v28 = vpop.f32.mrb[13].mxu0  ;;  %v3095_v29 = vpop.f32.mrb[13].mxu1 }
  0xf7   :  { %v1102_v30 = vadd.f32 %v13421_v48, %v1101_v28  ;;  %v3096_v31 = vadd.f32 %v13421_v48, %v3095_v29  ;;  %v11773_v32 = vpop.f32.mrb[14].mxu0  ;;  %v11973_v33 = vpop.f32.mrb[14].mxu1 }
  0xf8   :  { %v1850_v36 = vmax.f32 %v1110_v26, 0.0  ;;  %v3844_v37 = vmax.f32 %v3104_v27, 0.0  ;;  %v1113_v38 = vadd.f32 %v11773_v32, %v13421_v48  ;;  %v3107_v39 = vadd.f32 %v11973_v33, %v13421_v48  ;;  %v1104_v40 = vpop.f32.mrb[15].mxu0  ;;  %v3098_v41 = vpop.f32.mrb[15].mxu1  ;;  %v12686_v33 = vld [vmem:[%s16752_s0 + $0x208] sm:$0xff]  }
  0xf9   :  { %v1848_v42 = vmax.f32 %v1102_v30, 0.0  ;;  %v3842_v44 = vmax.f32 %v3096_v31, 0.0  ;;  %v1105_v45 = vadd.f32 %v13421_v48, %v1104_v40  ;;  %v3099_v47 = vadd.f32 %v13421_v48, %v3098_v41 }
  0xfa   :  { %v1851_v49 = vmax.f32 %v1113_v38, 0.0  ;;  %v3845_v51 = vmax.f32 %v3107_v39, 0.0  ;;  %11879 = vmatmul.mubr.msk.bf16.gmra.mrb[120].mxu0 %vm724_vm0, %v12678_v19  ;;  %12079 = vmatmul.mubr.msk.bf16.gmra.mrb[120].mxu1 %vm724_vm0, %v12679_v21  ;;  %v13545_v52 = vmax.f32 %v1850_v36, %v3844_v37 }
  0xfb   :  { %v1849_v54 = vmax.f32 %v1105_v45, 0.0  ;;  %v3843_v55 = vmax.f32 %v3099_v47, 0.0  ;;  %11882 = vmatprep.mubr.msk.bf16.mxu0 %vm724_vm0, %v12680_v34  ;;  %12082 = vmatprep.mubr.msk.bf16.mxu1 %vm724_vm0, %v12681_v35  ;;  %v13549_v56 = vmax.f32 %v1848_v42, %v3842_v44  ;;  %v12687_v34 = vld [vmem:[%s16752_s0 + $0x518] sm:$0xff]  }
  0xfc   :  { %v13557_v59 = vmax.f32 %v1851_v49, %v3845_v51  ;;  %v12688_v51 = vld [vmem:[%s16752_s0 + $0x210] sm:$0xff]  }
  0xfd   :  { %v11776_v60 = vpop.f32.mrb[16].mxu0  ;;  %v11976_v61 = vpop.f32.mrb[16].mxu1  ;;  %v13559_v62 = vmax.f32 %v1849_v54, %v3843_v55  ;;  %v12689_v54 = vld [vmem:[%s16752_s0 + $0x520] sm:$0xff]  }
  0xfe   :  { %v1126_v63 = vadd.f32 %v11776_v60, %v13421_v48  ;;  %v3120_v0 = vadd.f32 %v11976_v61, %v13421_v48  ;;  %v1117_v1 = vpop.f32.mrb[17].mxu0  ;;  %v3111_v2 = vpop.f32.mrb[17].mxu1 }
  0xff   :  { %v1118_v3 = vadd.f32 %v13421_v48, %v1117_v1  ;;  %v3112_v4 = vadd.f32 %v13421_v48, %v3111_v2  ;;  %v11777_v5 = vpop.f32.mrb[18].mxu0  ;;  %v11977_v6 = vpop.f32.mrb[18].mxu1 }
 0x100   :  { %v1854_v9 = vmax.f32 %v1126_v63, 0.0  ;;  %v3848_v10 = vmax.f32 %v3120_v0, 0.0  ;;  %v1129_v12 = vadd.f32 %v11777_v5, %v13421_v48  ;;  %v3123_v15 = vadd.f32 %v11977_v6, %v13421_v48  ;;  %v1120_v16 = vpop.f32.mrb[19].mxu0  ;;  %v3114_v19 = vpop.f32.mrb[19].mxu1 }
 0x101   :  { %v1852_v21 = vmax.f32 %v1118_v3, 0.0  ;;  %v3846_v23 = vmax.f32 %v3112_v4, 0.0  ;;  %v1121_v24 = vadd.f32 %v13421_v48, %v1120_v16  ;;  %v3115_v26 = vadd.f32 %v13421_v48, %v3114_v19 }
 0x102   :  { %v1855_v27 = vmax.f32 %v1129_v12, 0.0  ;;  %v3849_v28 = vmax.f32 %v3123_v15, 0.0  ;;  %11883 = vmatmul.mubr.msk.bf16.gmra.mrb[124].mxu0 %vm724_vm0, %v12682_v57  ;;  %12083 = vmatmul.mubr.msk.bf16.gmra.mrb[124].mxu1 %vm724_vm0, %v12683_v58  ;;  %v13577_v29 = vmax.f32 %v1854_v9, %v3848_v10  ;;  %v12690_v10 = vld [vmem:[%s16752_s0 + $0x218] sm:$0xff]   ;;  %v12691_v12 = vld [vmem:[%s16752_s0 + $0x528] sm:$0xff]  }
 0x103   :  { %v1853_v30 = vmax.f32 %v1121_v24, 0.0  ;;  %v3847_v31 = vmax.f32 %v3115_v26, 0.0  ;;  %11886 = vmatprep.mubr.msk.bf16.mxu0 %vm724_vm0, %v12684_v7  ;;  %12086 = vmatprep.mubr.msk.bf16.mxu1 %vm724_vm0, %v12685_v8  ;;  %v13581_v32 = vmax.f32 %v1852_v21, %v3846_v23 }
 0x104   :  { %v13589_v35 = vmax.f32 %v1855_v27, %v3849_v28 }
 0x105   :  { %v11780_v36 = vpop.f32.mrb[20].mxu0  ;;  %v11980_v37 = vpop.f32.mrb[20].mxu1  ;;  %v13591_v38 = vmax.f32 %v1853_v30, %v3847_v31 }
 0x106   :  { %v1142_v39 = vadd.f32 %v11780_v36, %v13421_v48  ;;  %v3136_v40 = vadd.f32 %v11980_v37, %v13421_v48  ;;  %v1133_v41 = vpop.f32.mrb[21].mxu0  ;;  %v3127_v42 = vpop.f32.mrb[21].mxu1  ;;  %v12693_v36 = vld [vmem:[%s16752_s0 + $0x530] sm:$0xff]  }
 0x107   :  { %v1134_v44 = vadd.f32 %v13421_v48, %v1133_v41  ;;  %v3128_v45 = vadd.f32 %v13421_v48, %v3127_v42  ;;  %v11781_v47 = vpop.f32.mrb[22].mxu0  ;;  %v11981_v49 = vpop.f32.mrb[22].mxu1 }
 0x108   :  { %v1858_v55 = vmax.f32 %v1142_v39, 0.0  ;;  %v3852_v57 = vmax.f32 %v3136_v40, 0.0  ;;  %v1145_v58 = vadd.f32 %v11781_v47, %v13421_v48  ;;  %v3139_v60 = vadd.f32 %v11981_v49, %v13421_v48  ;;  %v1136_v61 = vpop.f32.mrb[23].mxu0  ;;  %v3130_v63 = vpop.f32.mrb[23].mxu1 }
 0x109   :  { %v1856_v0 = vmax.f32 %v1134_v44, 0.0  ;;  %v3850_v1 = vmax.f32 %v3128_v45, 0.0  ;;  %v1137_v2 = vadd.f32 %v13421_v48, %v1136_v61  ;;  %v3131_v3 = vadd.f32 %v13421_v48, %v3130_v63  ;;  %v12694_v63 = vld [vmem:[%s16752_s0 + $0x228] sm:$0xff]  }
 0x10a   :  { %v1859_v4 = vmax.f32 %v1145_v58, 0.0  ;;  %v3853_v5 = vmax.f32 %v3139_v60, 0.0  ;;  %11887 = vmatmul.mubr.msk.bf16.gmra.mrb[128].mxu0 %vm724_vm0, %v12686_v33  ;;  %12087 = vmatmul.mubr.msk.bf16.gmra.mrb[128].mxu1 %vm724_vm0, %v12687_v34  ;;  %v13609_v6 = vmax.f32 %v1858_v55, %v3852_v57  ;;  %v12692_v34 = vld [vmem:[%s16752_s0 + $0x220] sm:$0xff]  }
 0x10b   :  { %v1857_v7 = vmax.f32 %v1137_v2, 0.0  ;;  %v3851_v8 = vmax.f32 %v3131_v3, 0.0  ;;  %11890 = vmatprep.mubr.msk.bf16.mxu0 %vm724_vm0, %v12688_v51  ;;  %12090 = vmatprep.mubr.msk.bf16.mxu1 %vm724_vm0, %v12689_v54  ;;  %v13613_v9 = vmax.f32 %v1856_v0, %v3850_v1  ;;  %v12695_v0 = vld [vmem:[%s16752_s0 + $0x538] sm:$0xff]  }
 0x10c   :  { %v13621_v15 = vmax.f32 %v1859_v4, %v3853_v5 }
 0x10d   :  { %v11784_v16 = vpop.f32.mrb[24].mxu0  ;;  %v11984_v19 = vpop.f32.mrb[24].mxu1  ;;  %v13623_v21 = vmax.f32 %v1857_v7, %v3851_v8 }
 0x10e   :  { %v1158_v23 = vadd.f32 %v11784_v16, %v13421_v48  ;;  %v3152_v24 = vadd.f32 %v11984_v19, %v13421_v48  ;;  %v1149_v26 = vpop.f32.mrb[25].mxu0  ;;  %v3143_v27 = vpop.f32.mrb[25].mxu1 }
 0x10f   :  { %v1150_v28 = vadd.f32 %v13421_v48, %v1149_v26  ;;  %v3144_v30 = vadd.f32 %v13421_v48, %v3143_v27  ;;  %v11785_v31 = vpop.f32.mrb[26].mxu0  ;;  %v11985_v33 = vpop.f32.mrb[26].mxu1  ;;  %v12697_v26 = vld [vmem:[%s16752_s0 + $0x540] sm:$0xff]  }
 0x110   :  { %v1862_v37 = vmax.f32 %v1158_v23, 0.0  ;;  %v3856_v39 = vmax.f32 %v3152_v24, 0.0  ;;  %v1161_v40 = vadd.f32 %v11785_v31, %v13421_v48  ;;  %v3155_v41 = vadd.f32 %v11985_v33, %v13421_v48  ;;  %v1152_v42 = vpop.f32.mrb[27].mxu0  ;;  %v3146_v44 = vpop.f32.mrb[27].mxu1  ;;  %v12696_v24 = vld [vmem:[%s16752_s0 + $0x230] sm:$0xff]  }
 0x111   :  { %v1860_v45 = vmax.f32 %v1150_v28, 0.0  ;;  %v3854_v47 = vmax.f32 %v3144_v30, 0.0  ;;  %v1153_v49 = vadd.f32 %v13421_v48, %v1152_v42  ;;  %v3147_v51 = vadd.f32 %v13421_v48, %v3146_v44 }
 0x112   :  { %v1863_v54 = vmax.f32 %v1161_v40, 0.0  ;;  %v3857_v55 = vmax.f32 %v3155_v41, 0.0  ;;  %11891 = vmatmul.mubr.msk.bf16.gmra.mrb[132].mxu0 %vm724_vm0, %v12690_v10  ;;  %12091 = vmatmul.mubr.msk.bf16.gmra.mrb[132].mxu1 %vm724_vm0, %v12691_v12  ;;  %v13641_v57 = vmax.f32 %v1862_v37, %v3856_v39 }
 0x113   :  { %v1861_v58 = vmax.f32 %v1153_v49, 0.0  ;;  %v3855_v60 = vmax.f32 %v3147_v51, 0.0  ;;  %11894 = vmatprep.mubr.msk.bf16.mxu0 %vm724_vm0, %v12692_v34  ;;  %12094 = vmatprep.mubr.msk.bf16.mxu1 %vm724_vm0, %v12693_v36  ;;  %v13645_v61 = vmax.f32 %v1860_v45, %v3854_v47  ;;  %v12698_v51 = vld [vmem:[%s16752_s0 + $0x238] sm:$0xff]  }
 0x114   :  { %v13653_v1 = vmax.f32 %v1863_v54, %v3857_v55  ;;  %v12699_v54 = vld [vmem:[%s16752_s0 + $0x548] sm:$0xff]  }
 0x115   :  { %v11788_v2 = vpop.f32.mrb[28].mxu0  ;;  %v11988_v3 = vpop.f32.mrb[28].mxu1  ;;  %v13655_v4 = vmax.f32 %v1861_v58, %v3855_v60 }
 0x116   :  { %v1174_v5 = vadd.f32 %v11788_v2, %v13421_v48  ;;  %v3168_v7 = vadd.f32 %v11988_v3, %v13421_v48  ;;  %v1165_v8 = vpop.f32.mrb[29].mxu0  ;;  %v3159_v10 = vpop.f32.mrb[29].mxu1 }
 0x117   :  { %v1166_v12 = vadd.f32 %v13421_v48, %v1165_v8  ;;  %v3160_v16 = vadd.f32 %v13421_v48, %v3159_v10  ;;  %v11789_v19 = vpop.f32.mrb[30].mxu0  ;;  %v11989_v23 = vpop.f32.mrb[30].mxu1 }
 0x118   :  { %v1866_v27 = vmax.f32 %v1174_v5, 0.0  ;;  %v3860_v28 = vmax.f32 %v3168_v7, 0.0  ;;  %v1177_v30 = vadd.f32 %v11789_v19, %v13421_v48  ;;  %v3171_v31 = vadd.f32 %v11989_v23, %v13421_v48  ;;  %v1168_v33 = vpop.f32.mrb[31].mxu0  ;;  %v3162_v34 = vpop.f32.mrb[31].mxu1  ;;  %v12701_v19 = vld [vmem:[%s16752_s0 + $0x550] sm:$0xff]  }
 0x119   :  { %v1864_v36 = vmax.f32 %v1166_v12, 0.0  ;;  %v3858_v37 = vmax.f32 %v3160_v16, 0.0  ;;  %v1169_v39 = vadd.f32 %v13421_v48, %v1168_v33  ;;  %v3163_v40 = vadd.f32 %v13421_v48, %v3162_v34  ;;  %v12700_v16 = vld [vmem:[%s16752_s0 + $0x240] sm:$0xff]  }
 0x11a   :  { %v1867_v41 = vmax.f32 %v1177_v30, 0.0  ;;  %v3861_v42 = vmax.f32 %v3171_v31, 0.0  ;;  %11895 = vmatmul.mubr.msk.bf16.gmra.mrb[136].mxu0 %vm724_vm0, %v12694_v63  ;;  %12095 = vmatmul.mubr.msk.bf16.gmra.mrb[136].mxu1 %vm724_vm0, %v12695_v0  ;;  %v13673_v44 = vmax.f32 %v1866_v27, %v3860_v28 }
 0x11b   :  { %v1865_v45 = vmax.f32 %v1169_v39, 0.0  ;;  %v3859_v47 = vmax.f32 %v3163_v40, 0.0  ;;  %11898 = vmatprep.mubr.msk.bf16.mxu0 %vm724_vm0, %v12696_v24  ;;  %12098 = vmatprep.mubr.msk.bf16.mxu1 %vm724_vm0, %v12697_v26  ;;  %v13677_v49 = vmax.f32 %v1864_v36, %v3858_v37 }
 0x11c   :  { %v13685_v55 = vmax.f32 %v1867_v41, %v3861_v42 }
 0x11d   :  { %v11792_v58 = vpop.f32.mrb[32].mxu0  ;;  %v11992_v60 = vpop.f32.mrb[32].mxu1  ;;  %v13687_v63 = vmax.f32 %v1865_v45, %v3859_v47  ;;  %v12702_v47 = vld [vmem:[%s16752_s0 + $0x248] sm:$0xff]  }
 0x11e   :  { %v1190_v0 = vadd.f32 %v11792_v58, %v13421_v48  ;;  %v3184_v2 = vadd.f32 %v11992_v60, %v13421_v48  ;;  %v1181_v3 = vpop.f32.mrb[33].mxu0  ;;  %v3175_v5 = vpop.f32.mrb[33].mxu1 }
 0x11f   :  { %v1182_v7 = vadd.f32 %v13421_v48, %v1181_v3  ;;  %v3176_v8 = vadd.f32 %v13421_v48, %v3175_v5  ;;  %v11793_v10 = vpop.f32.mrb[34].mxu0  ;;  %v11993_v12 = vpop.f32.mrb[34].mxu1 }
 0x120   :  { %v1870_v23 = vmax.f32 %v1190_v0, 0.0  ;;  %v3864_v24 = vmax.f32 %v3184_v2, 0.0  ;;  %v1193_v26 = vadd.f32 %v11793_v10, %v13421_v48  ;;  %v3187_v27 = vadd.f32 %v11993_v12, %v13421_v48  ;;  %v1184_v28 = vpop.f32.mrb[35].mxu0  ;;  %v3178_v30 = vpop.f32.mrb[35].mxu1 }
 0x121   :  { %v1868_v31 = vmax.f32 %v1182_v7, 0.0  ;;  %v3862_v33 = vmax.f32 %v3176_v8, 0.0  ;;  %v1185_v34 = vadd.f32 %v13421_v48, %v1184_v28  ;;  %v3179_v36 = vadd.f32 %v13421_v48, %v3178_v30 }
 0x122   :  { %v1871_v37 = vmax.f32 %v1193_v26, 0.0  ;;  %v3865_v39 = vmax.f32 %v3187_v27, 0.0  ;;  %11899 = vmatmul.mubr.msk.bf16.gmra.mrb[140].mxu0 %vm724_vm0, %v12698_v51  ;;  %12099 = vmatmul.mubr.msk.bf16.gmra.mrb[140].mxu1 %vm724_vm0, %v12699_v54  ;;  %v13705_v40 = vmax.f32 %v1870_v23, %v3864_v24  ;;  %v12703_v51 = vld [vmem:[%s16752_s0 + $0x558] sm:$0xff]   ;;  %v12705_v23 = vld [vmem:[%s16752_s0 + $0x560] sm:$0xff]  }
 0x123   :  { %v1869_v41 = vmax.f32 %v1185_v34, 0.0  ;;  %v3863_v42 = vmax.f32 %v3179_v36, 0.0  ;;  %11902 = vmatprep.mubr.msk.bf16.mxu0 %vm724_vm0, %v12700_v16  ;;  %12102 = vmatprep.mubr.msk.bf16.mxu1 %vm724_vm0, %v12701_v19  ;;  %v13709_v45 = vmax.f32 %v1868_v31, %v3862_v33  ;;  %v12704_v19 = vld [vmem:[%s16752_s0 + $0x250] sm:$0xff]  }
 0x124   :  { %v13717_v58 = vmax.f32 %v1871_v37, %v3865_v39 }
 0x125   :  { %v11796_v54 = vpop.f32.mrb[36].mxu0  ;;  %v11996_v60 = vpop.f32.mrb[36].mxu1  ;;  %v13719_v0 = vmax.f32 %v1869_v41, %v3863_v42 }
 0x126   :  { %v1206_v2 = vadd.f32 %v11796_v54, %v13421_v48  ;;  %v3200_v3 = vadd.f32 %v11996_v60, %v13421_v48  ;;  %v1197_v5 = vpop.f32.mrb[37].mxu0  ;;  %v3191_v7 = vpop.f32.mrb[37].mxu1 }
 0x127   :  { %v1198_v8 = vadd.f32 %v13421_v48, %v1197_v5  ;;  %v3192_v10 = vadd.f32 %v13421_v48, %v3191_v7  ;;  %v11797_v12 = vpop.f32.mrb[38].mxu0  ;;  %v11997_v16 = vpop.f32.mrb[38].mxu1 }
 0x128   :  { %v1874_v24 = vmax.f32 %v1206_v2, 0.0  ;;  %v3868_v26 = vmax.f32 %v3200_v3, 0.0  ;;  %v1209_v27 = vadd.f32 %v11797_v12, %v13421_v48  ;;  %v3203_v28 = vadd.f32 %v11997_v16, %v13421_v48  ;;  %v1200_v30 = vpop.f32.mrb[39].mxu0  ;;  %v3194_v31 = vpop.f32.mrb[39].mxu1 }
 0x129   :  { %v1872_v33 = vmax.f32 %v1198_v8, 0.0  ;;  %v3866_v34 = vmax.f32 %v3192_v10, 0.0  ;;  %v1201_v36 = vadd.f32 %v13421_v48, %v1200_v30  ;;  %v3195_v37 = vadd.f32 %v13421_v48, %v3194_v31  ;;  %v12706_v48 = vld [vmem:[%s16752_s0 + $0x258] sm:$0xff]   ;;  %v13756_v8 = vld [vmem:[%s16753_s2] ss:$0 sm:$0xff]  ;;  %v12709_v30 = vld [vmem:[%s16752_s0 + $0x570] sm:$0xff]  }
 0x12a   :  { %v1875_v39 = vmax.f32 %v1209_v27, 0.0  ;;  %v3869_v41 = vmax.f32 %v3203_v28, 0.0  ;;  %11903 = vmatmul.mubr.msk.bf16.gmra.mrb[144].mxu0 %vm724_vm0, %v12702_v47  ;;  %12103 = vmatmul.mubr.msk.bf16.gmra.mrb[144].mxu1 %vm724_vm0, %v12703_v51  ;;  %v13737_v42 = vmax.f32 %v1874_v24, %v3868_v26  ;;  %v12707_v47 = vld [vmem:[%s16752_s0 + $0x568] sm:$0xff]   ;;  %v12708_v28 = vld [vmem:[%s16752_s0 + $0x260] sm:$0xff]  }
 0x12b   :  { %v1873_v54 = vmax.f32 %v1201_v36, 0.0  ;;  %v3867_v60 = vmax.f32 %v3195_v37, 0.0  ;;  %11906 = vmatprep.mubr.msk.bf16.mxu0 %vm724_vm0, %v12704_v19  ;;  %12106 = vmatprep.mubr.msk.bf16.mxu1 %vm724_vm0, %v12705_v23  ;;  %v13741_v2 = vmax.f32 %v1872_v33, %v3866_v34 }
 0x12c   :  { %v13749_v3 = vmax.f32 %v1875_v39, %v3869_v41 }
 0x12d   :  { %v11800_v51 = vpop.f32.mrb[40].mxu0  ;;  %v12000_v5 = vpop.f32.mrb[40].mxu1  ;;  %v13751_v7 = vmax.f32 %v1873_v54, %v3867_v60 }
 0x12e   :  { %v1222_v10 = vadd.f32 %v13756_v8, %v11800_v51  ;;  %v3216_v12 = vadd.f32 %v13756_v8, %v12000_v5  ;;  %v1213_v16 = vpop.f32.mrb[41].mxu0  ;;  %v3207_v19 = vpop.f32.mrb[41].mxu1 }
 0x12f   :  { %v1214_v23 = vadd.f32 %v13756_v8, %v1213_v16  ;;  %v3208_v24 = vadd.f32 %v13756_v8, %v3207_v19  ;;  %v11801_v26 = vpop.f32.mrb[42].mxu0  ;;  %v12001_v27 = vpop.f32.mrb[42].mxu1 }
 0x130   :  { %v1878_v31 = vmax.f32 %v1222_v10, 0.0  ;;  %v3872_v33 = vmax.f32 %v3216_v12, 0.0  ;;  %v1225_v34 = vadd.f32 %v13756_v8, %v11801_v26  ;;  %v3219_v36 = vadd.f32 %v13756_v8, %v12001_v27  ;;  %v1216_v37 = vpop.f32.mrb[43].mxu0  ;;  %v3210_v39 = vpop.f32.mrb[43].mxu1 }
 0x131   :  { %v1876_v41 = vmax.f32 %v1214_v23, 0.0  ;;  %v3870_v54 = vmax.f32 %v3208_v24, 0.0  ;;  %v1217_v60 = vadd.f32 %v13756_v8, %v1216_v37  ;;  %v3211_v51 = vadd.f32 %v13756_v8, %v3210_v39  ;;  %v12710_v24 = vld [vmem:[%s16752_s0 + $0x268] sm:$0xff]  }
 0x132   :  { %v1879_v5 = vmax.f32 %v1225_v34, 0.0  ;;  %v3873_v16 = vmax.f32 %v3219_v36, 0.0  ;;  %11907 = vmatmul.mubr.msk.bf16.gmra.mrb[148].mxu0 %vm724_vm0, %v12706_v48  ;;  %12107 = vmatmul.mubr.msk.bf16.gmra.mrb[148].mxu1 %vm724_vm0, %v12707_v47  ;;  %v13774_v10 = vmax.f32 %v1878_v31, %v3872_v33  ;;  %v12711_v48 = vld [vmem:[%s16752_s0 + $0x578] sm:$0xff]  }
 0x133   :  { %v1877_v12 = vmax.f32 %v1217_v60, 0.0  ;;  %v3871_v19 = vmax.f32 %v3211_v51, 0.0  ;;  %11910 = vmatprep.mubr.msk.bf16.mxu0 %vm724_vm0, %v12708_v28  ;;  %12110 = vmatprep.mubr.msk.bf16.mxu1 %vm724_vm0, %v12709_v30  ;;  %v13778_v23 = vmax.f32 %v1876_v41, %v3870_v54  ;;  %v12712_v54 = vld [vmem:[%s16752_s0 + $0x270] sm:$0xff]   ;;  %v12713_v60 = vld [vmem:[%s16752_s0 + $0x580] sm:$0xff]  }
 0x134   :  { %16755 = vst [vmem:[#allocation2_spill] sm:$0xff] %v13774_v10  ;;  %v13786_v26 = vmax.f32 %v1879_v5, %v3873_v16 }
 0x135   :  { %16756 = vst [vmem:[#allocation3_spill] sm:$0xff] %v13778_v23  ;;  %v11804_v47 = vpop.f32.mrb[44].mxu0  ;;  %v12004_v27 = vpop.f32.mrb[44].mxu1  ;;  %v13788_v31 = vmax.f32 %v1877_v12, %v3871_v19 }
 0x136   :  { %16757 = vst [vmem:[#allocation4_spill] sm:$0xff] %v13786_v26  ;;  %v1238_v28 = vadd.f32 %v13756_v8, %v11804_v47  ;;  %v3232_v30 = vadd.f32 %v13756_v8, %v12004_v27  ;;  %v1229_v33 = vpop.f32.mrb[45].mxu0  ;;  %v3223_v34 = vpop.f32.mrb[45].mxu1 }
 0x137   :  { %16758 = vst [vmem:[#allocation5_spill] sm:$0xff] %v13788_v31  ;;  %v1230_v36 = vadd.f32 %v13756_v8, %v1229_v33  ;;  %v3224_v37 = vadd.f32 %v13756_v8, %v3223_v34  ;;  %v11805_v39 = vpop.f32.mrb[46].mxu0  ;;  %v12005_v41 = vpop.f32.mrb[46].mxu1 }
 0x138   :  { %v1882_v51 = vmax.f32 %v1238_v28, 0.0  ;;  %v3876_v5 = vmax.f32 %v3232_v30, 0.0  ;;  %v1241_v16 = vadd.f32 %v13756_v8, %v11805_v39  ;;  %v3235_v12 = vadd.f32 %v13756_v8, %v12005_v41  ;;  %v1232_v19 = vpop.f32.mrb[47].mxu0  ;;  %v3226_v47 = vpop.f32.mrb[47].mxu1 }
 0x139   :  { %v1880_v27 = vmax.f32 %v1230_v36, 0.0  ;;  %v3874_v33 = vmax.f32 %v3224_v37, 0.0  ;;  %v1233_v34 = vadd.f32 %v13756_v8, %v1232_v19  ;;  %v3227_v31 = vadd.f32 %v13756_v8, %v3226_v47  ;;  %v12714_v37 = vld [vmem:[%s16752_s0 + $0x278] sm:$0xff]  }
 0x13a   :  { %v1883_v26 = vmax.f32 %v1241_v16, 0.0  ;;  %v3877_v23 = vmax.f32 %v3235_v12, 0.0  ;;  %11911 = vmatmul.mubr.msk.bf16.gmra.mrb[152].mxu0 %vm724_vm0, %v12710_v24  ;;  %12111 = vmatmul.mubr.msk.bf16.gmra.mrb[152].mxu1 %vm724_vm0, %v12711_v48  ;;  %v13806_v28 = vmax.f32 %v1882_v51, %v3876_v5  ;;  %v12715_v24 = vld [vmem:[%s16752_s0 + $0x588] sm:$0xff]  }
 0x13b   :  { %v1881_v30 = vmax.f32 %v1233_v34, 0.0  ;;  %v3875_v39 = vmax.f32 %v3227_v31, 0.0  ;;  %11914 = vmatprep.mubr.msk.bf16.mxu0 %vm724_vm0, %v12712_v54  ;;  %12114 = vmatprep.mubr.msk.bf16.mxu1 %vm724_vm0, %v12713_v60  ;;  %v13810_v36 = vmax.f32 %v1880_v27, %v3874_v33 }
 0x13c   :  { %16759 = vst [vmem:[#allocation6_spill] sm:$0xff] %v13806_v28  ;;  %v13818_v41 = vmax.f32 %v1883_v26, %v3877_v23  ;;  %v12716_v23 = vld [vmem:[%s16752_s0 + $0x280] sm:$0xff]   ;;  %v12717_v26 = vld [vmem:[%s16752_s0 + $0x590] sm:$0xff]  }
 0x13d   :  { %16760 = vst [vmem:[#allocation7_spill] sm:$0xff] %v13810_v36  ;;  %v11808_v48 = vpop.f32.mrb[48].mxu0  ;;  %v12008_v51 = vpop.f32.mrb[48].mxu1  ;;  %v13820_v5 = vmax.f32 %v1881_v30, %v3875_v39 }
 0x13e   :  { %16761 = vst [vmem:[#allocation8_spill] sm:$0xff] %v13818_v41  ;;  %v1254_v31 = vadd.f32 %v13756_v8, %v11808_v48  ;;  %v3248_v54 = vadd.f32 %v13756_v8, %v12008_v51  ;;  %v1245_v60 = vpop.f32.mrb[49].mxu0  ;;  %v3239_v16 = vpop.f32.mrb[49].mxu1 }
 0x13f   :  { %16762 = vst [vmem:[#allocation9_spill] sm:$0xff] %v13820_v5  ;;  %v1246_v12 = vadd.f32 %v13756_v8, %v1245_v60  ;;  %v3240_v19 = vadd.f32 %v13756_v8, %v3239_v16  ;;  %v11809_v47 = vpop.f32.mrb[50].mxu0  ;;  %v12009_v27 = vpop.f32.mrb[50].mxu1 }
 0x140   :  { %v1886_v33 = vmax.f32 %v1254_v31, 0.0  ;;  %v3880_v34 = vmax.f32 %v3248_v54, 0.0  ;;  %v1257_v30 = vadd.f32 %v13756_v8, %v11809_v47  ;;  %v3251_v39 = vadd.f32 %v13756_v8, %v12009_v27  ;;  %v1248_v48 = vpop.f32.mrb[51].mxu0  ;;  %v3242_v51 = vpop.f32.mrb[51].mxu1 }
 0x141   :  { %v1884_v60 = vmax.f32 %v1246_v12, 0.0  ;;  %v3878_v16 = vmax.f32 %v3240_v19, 0.0  ;;  %v1249_v5 = vadd.f32 %v13756_v8, %v1248_v48  ;;  %v3243_v41 = vadd.f32 %v13756_v8, %v3242_v51  ;;  %v12718_v19 = vld [vmem:[%s16752_s0 + $0x288] sm:$0xff]  }
 0x142   :  { %v1887_v36 = vmax.f32 %v1257_v30, 0.0  ;;  %v3881_v28 = vmax.f32 %v3251_v39, 0.0  ;;  %11915 = vmatmul.mubr.msk.bf16.gmra.mrb[156].mxu0 %vm724_vm0, %v12714_v37  ;;  %12115 = vmatmul.mubr.msk.bf16.gmra.mrb[156].mxu1 %vm724_vm0, %v12715_v24  ;;  %v13838_v31 = vmax.f32 %v1886_v33, %v3880_v34  ;;  %v12719_v37 = vld [vmem:[%s16752_s0 + $0x598] sm:$0xff]  }
 0x143   :  { %v1885_v54 = vmax.f32 %v1249_v5, 0.0  ;;  %v3879_v47 = vmax.f32 %v3243_v41, 0.0  ;;  %11918 = vmatprep.mubr.msk.bf16.mxu0 %vm724_vm0, %v12716_v23  ;;  %12118 = vmatprep.mubr.msk.bf16.mxu1 %vm724_vm0, %v12717_v26  ;;  %v13842_v12 = vmax.f32 %v1884_v60, %v3878_v16 }
 0x144   :  { %16763 = vst [vmem:[#allocation10_spill] sm:$0xff] %v13838_v31  ;;  %v13850_v27 = vmax.f32 %v1887_v36, %v3881_v28  ;;  %v12720_v28 = vld [vmem:[%s16752_s0 + $0x290] sm:$0xff]   ;;  %v12721_v36 = vld [vmem:[%s16752_s0 + $0x5a0] sm:$0xff]  }
 0x145   :  { %16764 = vst [vmem:[#allocation11_spill] sm:$0xff] %v13842_v12  ;;  %v11812_v24 = vpop.f32.mrb[52].mxu0  ;;  %v12012_v33 = vpop.f32.mrb[52].mxu1  ;;  %v13852_v5 = vmax.f32 %v1885_v54, %v3879_v47 }
 0x146   :  { %16765 = vst [vmem:[#allocation12_spill] sm:$0xff] %v13850_v27  ;;  %v1270_v41 = vadd.f32 %v13756_v8, %v11812_v24  ;;  %v3264_v23 = vadd.f32 %v13756_v8, %v12012_v33  ;;  %v1261_v26 = vpop.f32.mrb[53].mxu0  ;;  %v3255_v34 = vpop.f32.mrb[53].mxu1 }
 0x147   :  { %16766 = vst [vmem:[#allocation13_spill] sm:$0xff] %v13852_v5  ;;  %v1262_v30 = vadd.f32 %v13756_v8, %v1261_v26  ;;  %v3256_v39 = vadd.f32 %v13756_v8, %v3255_v34  ;;  %v11813_v48 = vpop.f32.mrb[54].mxu0  ;;  %v12013_v51 = vpop.f32.mrb[54].mxu1 }
 0x148   :  { %v1890_v60 = vmax.f32 %v1270_v41, 0.0  ;;  %v3884_v16 = vmax.f32 %v3264_v23, 0.0  ;;  %v1273_v54 = vadd.f32 %v13756_v8, %v11813_v48  ;;  %v3267_v47 = vadd.f32 %v13756_v8, %v12013_v51  ;;  %v1264_v24 = vpop.f32.mrb[55].mxu0  ;;  %v3258_v33 = vpop.f32.mrb[55].mxu1 }
 0x149   :  { %v1888_v26 = vmax.f32 %v1262_v30, 0.0  ;;  %v3882_v34 = vmax.f32 %v3256_v39, 0.0  ;;  %v1265_v5 = vadd.f32 %v13756_v8, %v1264_v24  ;;  %v3259_v27 = vadd.f32 %v13756_v8, %v3258_v33  ;;  %v12722_v39 = vld [vmem:[%s16752_s0 + $0x298] sm:$0xff]  }
 0x14a   :  { %v1891_v12 = vmax.f32 %v1273_v54, 0.0  ;;  %v3885_v31 = vmax.f32 %v3267_v47, 0.0  ;;  %11919 = vmatmul.mubr.msk.bf16.gmra.mrb[160].mxu0 %vm724_vm0, %v12718_v19  ;;  %12119 = vmatmul.mubr.msk.bf16.gmra.mrb[160].mxu1 %vm724_vm0, %v12719_v37  ;;  %v13870_v41 = vmax.f32 %v1890_v60, %v3884_v16  ;;  %v12723_v19 = vld [vmem:[%s16752_s0 + $0x5a8] sm:$0xff]  }
 0x14b   :  { %v1889_v23 = vmax.f32 %v1265_v5, 0.0  ;;  %v3883_v48 = vmax.f32 %v3259_v27, 0.0  ;;  %11922 = vmatprep.mubr.msk.bf16.mxu0 %vm724_vm0, %v12720_v28  ;;  %12122 = vmatprep.mubr.msk.bf16.mxu1 %vm724_vm0, %v12721_v36  ;;  %v13874_v30 = vmax.f32 %v1888_v26, %v3882_v34 }
 0x14c   :  { %16767 = vst [vmem:[#allocation14_spill] sm:$0xff] %v13870_v41  ;;  %v13882_v51 = vmax.f32 %v1891_v12, %v3885_v31  ;;  %v12724_v31 = vld [vmem:[%s16752_s0 + $0x2a0] sm:$0xff]   ;;  %v12725_v12 = vld [vmem:[%s16752_s0 + $0x5b0] sm:$0xff]  }
 0x14d   :  { %16768 = vst [vmem:[#allocation15_spill] sm:$0xff] %v13874_v30  ;;  %v11816_v37 = vpop.f32.mrb[56].mxu0  ;;  %v12016_v60 = vpop.f32.mrb[56].mxu1  ;;  %v13884_v5 = vmax.f32 %v1889_v23, %v3883_v48 }
 0x14e   :  { %16769 = vst [vmem:[#allocation16_spill] sm:$0xff] %v13882_v51  ;;  %v1286_v27 = vadd.f32 %v13756_v8, %v11816_v37  ;;  %v3280_v28 = vadd.f32 %v13756_v8, %v12016_v60  ;;  %v1277_v36 = vpop.f32.mrb[57].mxu0  ;;  %v3271_v16 = vpop.f32.mrb[57].mxu1 }
 0x14f   :  { %16770 = vst [vmem:[#allocation17_spill] sm:$0xff] %v13884_v5  ;;  %v1278_v54 = vadd.f32 %v13756_v8, %v1277_v36  ;;  %v3272_v47 = vadd.f32 %v13756_v8, %v3271_v16  ;;  %v11817_v24 = vpop.f32.mrb[58].mxu0  ;;  %v12017_v33 = vpop.f32.mrb[58].mxu1 }
 0x150   :  { %v1894_v26 = vmax.f32 %v1286_v27, 0.0  ;;  %v3888_v34 = vmax.f32 %v3280_v28, 0.0  ;;  %v1289_v23 = vadd.f32 %v13756_v8, %v11817_v24  ;;  %v3283_v48 = vadd.f32 %v13756_v8, %v12017_v33  ;;  %v1280_v37 = vpop.f32.mrb[59].mxu0  ;;  %v3274_v60 = vpop.f32.mrb[59].mxu1 }
 0x151   :  { %v1892_v36 = vmax.f32 %v1278_v54, 0.0  ;;  %v3886_v16 = vmax.f32 %v3272_v47, 0.0  ;;  %v1281_v5 = vadd.f32 %v13756_v8, %v1280_v37  ;;  %v3275_v51 = vadd.f32 %v13756_v8, %v3274_v60  ;;  %v12726_v47 = vld [vmem:[%s16752_s0 + $0x2a8] sm:$0xff]  }
 0x152   :  { %v1895_v30 = vmax.f32 %v1289_v23, 0.0  ;;  %v3889_v41 = vmax.f32 %v3283_v48, 0.0  ;;  %11923 = vmatmul.mubr.msk.bf16.gmra.mrb[164].mxu0 %vm724_vm0, %v12722_v39  ;;  %12123 = vmatmul.mubr.msk.bf16.gmra.mrb[164].mxu1 %vm724_vm0, %v12723_v19  ;;  %v13902_v27 = vmax.f32 %v1894_v26, %v3888_v34  ;;  %v12727_v39 = vld [vmem:[%s16752_s0 + $0x5b8] sm:$0xff]  }
 0x153   :  { %v1893_v28 = vmax.f32 %v1281_v5, 0.0  ;;  %v3887_v24 = vmax.f32 %v3275_v51, 0.0  ;;  %11926 = vmatprep.mubr.msk.bf16.mxu0 %vm724_vm0, %v12724_v31  ;;  %12126 = vmatprep.mubr.msk.bf16.mxu1 %vm724_vm0, %v12725_v12  ;;  %v13906_v54 = vmax.f32 %v1892_v36, %v3886_v16 }
 0x154   :  { %16771 = vst [vmem:[#allocation18_spill] sm:$0xff] %v13902_v27  ;;  %v13914_v33 = vmax.f32 %v1895_v30, %v3889_v41  ;;  %v12728_v41 = vld [vmem:[%s16752_s0 + $0x2b0] sm:$0xff]   ;;  %v12729_v30 = vld [vmem:[%s16752_s0 + $0x5c0] sm:$0xff]  }
 0x155   :  { %16772 = vst [vmem:[#allocation19_spill] sm:$0xff] %v13906_v54  ;;  %v11820_v19 = vpop.f32.mrb[60].mxu0  ;;  %v12020_v26 = vpop.f32.mrb[60].mxu1  ;;  %v13916_v5 = vmax.f32 %v1893_v28, %v3887_v24 }
 0x156   :  { %16773 = vst [vmem:[#allocation20_spill] sm:$0xff] %v13914_v33  ;;  %v1302_v51 = vadd.f32 %v13756_v8, %v11820_v19  ;;  %v3296_v31 = vadd.f32 %v13756_v8, %v12020_v26  ;;  %v1293_v12 = vpop.f32.mrb[61].mxu0  ;;  %v3287_v34 = vpop.f32.mrb[61].mxu1 }
 0x157   :  { %16774 = vst [vmem:[#allocation21_spill] sm:$0xff] %v13916_v5  ;;  %v1294_v23 = vadd.f32 %v13756_v8, %v1293_v12  ;;  %v3288_v48 = vadd.f32 %v13756_v8, %v3287_v34  ;;  %v11821_v37 = vpop.f32.mrb[62].mxu0  ;;  %v12021_v60 = vpop.f32.mrb[62].mxu1 }
 0x158   :  { %v1898_v36 = vmax.f32 %v1302_v51, 0.0  ;;  %v3892_v16 = vmax.f32 %v3296_v31, 0.0  ;;  %v1305_v28 = vadd.f32 %v13756_v8, %v11821_v37  ;;  %v3299_v24 = vadd.f32 %v13756_v8, %v12021_v60  ;;  %v1296_v19 = vpop.f32.mrb[63].mxu0  ;;  %v3290_v26 = vpop.f32.mrb[63].mxu1 }
 0x159   :  { %v1896_v12 = vmax.f32 %v1294_v23, 0.0  ;;  %v3890_v34 = vmax.f32 %v3288_v48, 0.0  ;;  %v1297_v5 = vadd.f32 %v13756_v8, %v1296_v19  ;;  %v3291_v33 = vadd.f32 %v13756_v8, %v3290_v26  ;;  %v12730_v48 = vld [vmem:[%s16752_s0 + $0x2b8] sm:$0xff]  }
 0x15a   :  { %v1899_v54 = vmax.f32 %v1305_v28, 0.0  ;;  %v3893_v27 = vmax.f32 %v3299_v24, 0.0  ;;  %11927 = vmatmul.mubr.msk.bf16.gmra.mrb[168].mxu0 %vm724_vm0, %v12726_v47  ;;  %12127 = vmatmul.mubr.msk.bf16.gmra.mrb[168].mxu1 %vm724_vm0, %v12727_v39  ;;  %v13934_v51 = vmax.f32 %v1898_v36, %v3892_v16  ;;  %v12731_v47 = vld [vmem:[%s16752_s0 + $0x5c8] sm:$0xff]  }
 0x15b   :  { %v1897_v31 = vmax.f32 %v1297_v5, 0.0  ;;  %v3891_v37 = vmax.f32 %v3291_v33, 0.0  ;;  %11930 = vmatprep.mubr.msk.bf16.mxu0 %vm724_vm0, %v12728_v41  ;;  %12130 = vmatprep.mubr.msk.bf16.mxu1 %vm724_vm0, %v12729_v30  ;;  %v13938_v23 = vmax.f32 %v1896_v12, %v3890_v34 }
 0x15c   :  { %16775 = vst [vmem:[#allocation22_spill] sm:$0xff] %v13934_v51  ;;  %v13946_v60 = vmax.f32 %v1899_v54, %v3893_v27  ;;  %v12732_v27 = vld [vmem:[%s16752_s0 + $0x2c0] sm:$0xff]   ;;  %v12733_v54 = vld [vmem:[%s16752_s0 + $0x5d0] sm:$0xff]  }
 0x15d   :  { %16776 = vst [vmem:[#allocation23_spill] sm:$0xff] %v13938_v23  ;;  %v11824_v39 = vpop.f32.mrb[64].mxu0  ;;  %v12024_v36 = vpop.f32.mrb[64].mxu1  ;;  %v13948_v5 = vmax.f32 %v1897_v31, %v3891_v37 }
 0x15e   :  { %16777 = vst [vmem:[#allocation24_spill] sm:$0xff] %v13946_v60  ;;  %v1318_v33 = vadd.f32 %v13756_v8, %v11824_v39  ;;  %v3312_v41 = vadd.f32 %v13756_v8, %v12024_v36  ;;  %v1309_v30 = vpop.f32.mrb[65].mxu0  ;;  %v3303_v16 = vpop.f32.mrb[65].mxu1 }
 0x15f   :  { %16778 = vst [vmem:[#allocation25_spill] sm:$0xff] %v13948_v5  ;;  %v1310_v28 = vadd.f32 %v13756_v8, %v1309_v30  ;;  %v3304_v24 = vadd.f32 %v13756_v8, %v3303_v16  ;;  %v11825_v19 = vpop.f32.mrb[66].mxu0  ;;  %v12025_v26 = vpop.f32.mrb[66].mxu1 }
 0x160   :  { %v1902_v12 = vmax.f32 %v1318_v33, 0.0  ;;  %v3896_v34 = vmax.f32 %v3312_v41, 0.0  ;;  %v1321_v31 = vadd.f32 %v13756_v8, %v11825_v19  ;;  %v3315_v37 = vadd.f32 %v13756_v8, %v12025_v26  ;;  %v1312_v39 = vpop.f32.mrb[67].mxu0  ;;  %v3306_v36 = vpop.f32.mrb[67].mxu1 }
 0x161   :  { %v1900_v30 = vmax.f32 %v1310_v28, 0.0  ;;  %v3894_v16 = vmax.f32 %v3304_v24, 0.0  ;;  %v1313_v5 = vadd.f32 %v13756_v8, %v1312_v39  ;;  %v3307_v60 = vadd.f32 %v13756_v8, %v3306_v36  ;;  %v12734_v24 = vld [vmem:[%s16752_s0 + $0x2c8] sm:$0xff]  }
 0x162   :  { %v1903_v23 = vmax.f32 %v1321_v31, 0.0  ;;  %v3897_v51 = vmax.f32 %v3315_v37, 0.0  ;;  %11931 = vmatmul.mubr.msk.bf16.gmra.mrb[172].mxu0 %vm724_vm0, %v12730_v48  ;;  %12131 = vmatmul.mubr.msk.bf16.gmra.mrb[172].mxu1 %vm724_vm0, %v12731_v47  ;;  %v13966_v33 = vmax.f32 %v1902_v12, %v3896_v34  ;;  %v12735_v48 = vld [vmem:[%s16752_s0 + $0x5d8] sm:$0xff]  }
 0x163   :  { %v1901_v41 = vmax.f32 %v1313_v5, 0.0  ;;  %v3895_v19 = vmax.f32 %v3307_v60, 0.0  ;;  %11934 = vmatprep.mubr.msk.bf16.mxu0 %vm724_vm0, %v12732_v27  ;;  %12134 = vmatprep.mubr.msk.bf16.mxu1 %vm724_vm0, %v12733_v54  ;;  %v13970_v28 = vmax.f32 %v1900_v30, %v3894_v16 }
 0x164   :  { %16779 = vst [vmem:[#allocation26_spill] sm:$0xff] %v13966_v33  ;;  %v13978_v26 = vmax.f32 %v1903_v23, %v3897_v51  ;;  %v12736_v51 = vld [vmem:[%s16752_s0 + $0x2d0] sm:$0xff]   ;;  %v12737_v23 = vld [vmem:[%s16752_s0 + $0x5e0] sm:$0xff]  }
 0x165   :  { %16780 = vst [vmem:[#allocation27_spill] sm:$0xff] %v13970_v28  ;;  %v11828_v47 = vpop.f32.mrb[68].mxu0  ;;  %v12028_v12 = vpop.f32.mrb[68].mxu1  ;;  %v13980_v5 = vmax.f32 %v1901_v41, %v3895_v19 }
 0x166   :  { %16781 = vst [vmem:[#allocation28_spill] sm:$0xff] %v13978_v26  ;;  %v1334_v60 = vadd.f32 %v13756_v8, %v11828_v47  ;;  %v3328_v27 = vadd.f32 %v13756_v8, %v12028_v12  ;;  %v1325_v54 = vpop.f32.mrb[69].mxu0  ;;  %v3319_v34 = vpop.f32.mrb[69].mxu1 }
 0x167   :  { %16782 = vst [vmem:[#allocation29_spill] sm:$0xff] %v13980_v5  ;;  %v1326_v31 = vadd.f32 %v13756_v8, %v1325_v54  ;;  %v3320_v37 = vadd.f32 %v13756_v8, %v3319_v34  ;;  %v11829_v39 = vpop.f32.mrb[70].mxu0  ;;  %v12029_v36 = vpop.f32.mrb[70].mxu1 }
 0x168   :  { %v1906_v30 = vmax.f32 %v1334_v60, 0.0  ;;  %v3900_v16 = vmax.f32 %v3328_v27, 0.0  ;;  %v1337_v41 = vadd.f32 %v13756_v8, %v11829_v39  ;;  %v3331_v19 = vadd.f32 %v13756_v8, %v12029_v36  ;;  %v1328_v47 = vpop.f32.mrb[71].mxu0  ;;  %v3322_v12 = vpop.f32.mrb[71].mxu1 }
 0x169   :  { %v1904_v54 = vmax.f32 %v1326_v31, 0.0  ;;  %v3898_v34 = vmax.f32 %v3320_v37, 0.0  ;;  %v1329_v5 = vadd.f32 %v13756_v8, %v1328_v47  ;;  %v3323_v26 = vadd.f32 %v13756_v8, %v3322_v12  ;;  %v12738_v37 = vld [vmem:[%s16752_s0 + $0x2d8] sm:$0xff]  }
 0x16a   :  { %v1907_v28 = vmax.f32 %v1337_v41, 0.0  ;;  %v3901_v33 = vmax.f32 %v3331_v19, 0.0  ;;  %11935 = vmatmul.mubr.msk.bf16.gmra.mrb[176].mxu0 %vm724_vm0, %v12734_v24  ;;  %12135 = vmatmul.mubr.msk.bf16.gmra.mrb[176].mxu1 %vm724_vm0, %v12735_v48  ;;  %v13998_v60 = vmax.f32 %v1906_v30, %v3900_v16  ;;  %v12739_v24 = vld [vmem:[%s16752_s0 + $0x5e8] sm:$0xff]  }
 0x16b   :  { %v1905_v27 = vmax.f32 %v1329_v5, 0.0  ;;  %v3899_v39 = vmax.f32 %v3323_v26, 0.0  ;;  %11938 = vmatprep.mubr.msk.bf16.mxu0 %vm724_vm0, %v12736_v51  ;;  %12138 = vmatprep.mubr.msk.bf16.mxu1 %vm724_vm0, %v12737_v23  ;;  %v14002_v31 = vmax.f32 %v1904_v54, %v3898_v34 }
 0x16c   :  { %16783 = vst [vmem:[#allocation30_spill] sm:$0xff] %v13998_v60  ;;  %v14010_v36 = vmax.f32 %v1907_v28, %v3901_v33  ;;  %v12740_v33 = vld [vmem:[%s16752_s0 + $0x2e0] sm:$0xff]   ;;  %v12741_v28 = vld [vmem:[%s16752_s0 + $0x5f0] sm:$0xff]  }
 0x16d   :  { %16784 = vst [vmem:[#allocation31_spill] sm:$0xff] %v14002_v31  ;;  %v11832_v48 = vpop.f32.mrb[72].mxu0  ;;  %v12032_v30 = vpop.f32.mrb[72].mxu1  ;;  %v14012_v5 = vmax.f32 %v1905_v27, %v3899_v39 }
 0x16e   :  { %16785 = vst [vmem:[#allocation32_spill] sm:$0xff] %v14010_v36  ;;  %v1350_v26 = vadd.f32 %v13756_v8, %v11832_v48  ;;  %v3344_v51 = vadd.f32 %v13756_v8, %v12032_v30  ;;  %v1341_v23 = vpop.f32.mrb[73].mxu0  ;;  %v3335_v16 = vpop.f32.mrb[73].mxu1 }
 0x16f   :  { %16786 = vst [vmem:[#allocation33_spill] sm:$0xff] %v14012_v5  ;;  %v1342_v41 = vadd.f32 %v13756_v8, %v1341_v23  ;;  %v3336_v19 = vadd.f32 %v13756_v8, %v3335_v16  ;;  %v11833_v47 = vpop.f32.mrb[74].mxu0  ;;  %v12033_v12 = vpop.f32.mrb[74].mxu1 }
 0x170   :  { %v1910_v54 = vmax.f32 %v1350_v26, 0.0  ;;  %v3904_v34 = vmax.f32 %v3344_v51, 0.0  ;;  %v1353_v27 = vadd.f32 %v13756_v8, %v11833_v47  ;;  %v3347_v39 = vadd.f32 %v13756_v8, %v12033_v12  ;;  %v1344_v48 = vpop.f32.mrb[75].mxu0  ;;  %v3338_v30 = vpop.f32.mrb[75].mxu1 }
 0x171   :  { %v1908_v23 = vmax.f32 %v1342_v41, 0.0  ;;  %v3902_v16 = vmax.f32 %v3336_v19, 0.0  ;;  %v1345_v5 = vadd.f32 %v13756_v8, %v1344_v48  ;;  %v3339_v36 = vadd.f32 %v13756_v8, %v3338_v30  ;;  %v12742_v19 = vld [vmem:[%s16752_s0 + $0x2e8] sm:$0xff]  }
 0x172   :  { %v1911_v31 = vmax.f32 %v1353_v27, 0.0  ;;  %v3905_v60 = vmax.f32 %v3347_v39, 0.0  ;;  %11939 = vmatmul.mubr.msk.bf16.gmra.mrb[180].mxu0 %vm724_vm0, %v12738_v37  ;;  %12139 = vmatmul.mubr.msk.bf16.gmra.mrb[180].mxu1 %vm724_vm0, %v12739_v24  ;;  %v14030_v26 = vmax.f32 %v1910_v54, %v3904_v34  ;;  %v12743_v37 = vld [vmem:[%s16752_s0 + $0x5f8] sm:$0xff]  }
 0x173   :  { %v1909_v51 = vmax.f32 %v1345_v5, 0.0  ;;  %v3903_v47 = vmax.f32 %v3339_v36, 0.0  ;;  %11942 = vmatprep.mubr.msk.bf16.mxu0 %vm724_vm0, %v12740_v33  ;;  %12142 = vmatprep.mubr.msk.bf16.mxu1 %vm724_vm0, %v12741_v28  ;;  %v14034_v41 = vmax.f32 %v1908_v23, %v3902_v16 }
 0x174   :  { %16787 = vst [vmem:[#allocation34_spill] sm:$0xff] %v14030_v26  ;;  %v14042_v12 = vmax.f32 %v1911_v31, %v3905_v60  ;;  %v12744_v60 = vld [vmem:[%s16752_s0 + $0x2f0] sm:$0xff]   ;;  %v12745_v31 = vld [vmem:[%s16752_s0 + $0x600] sm:$0xff]  }
 0x175   :  { %16788 = vst [vmem:[#allocation35_spill] sm:$0xff] %v14034_v41  ;;  %v11836_v24 = vpop.f32.mrb[76].mxu0  ;;  %v12036_v54 = vpop.f32.mrb[76].mxu1  ;;  %v14044_v5 = vmax.f32 %v1909_v51, %v3903_v47 }
 0x176   :  { %16789 = vst [vmem:[#allocation36_spill] sm:$0xff] %v14042_v12  ;;  %v1366_v36 = vadd.f32 %v13756_v8, %v11836_v24  ;;  %v3360_v33 = vadd.f32 %v13756_v8, %v12036_v54  ;;  %v1357_v28 = vpop.f32.mrb[77].mxu0  ;;  %v3351_v34 = vpop.f32.mrb[77].mxu1 }
 0x177   :  { %16790 = vst [vmem:[#allocation37_spill] sm:$0xff] %v14044_v5  ;;  %v1358_v27 = vadd.f32 %v13756_v8, %v1357_v28  ;;  %v3352_v39 = vadd.f32 %v13756_v8, %v3351_v34  ;;  %v11837_v48 = vpop.f32.mrb[78].mxu0  ;;  %v12037_v30 = vpop.f32.mrb[78].mxu1 }
 0x178   :  { %v1914_v23 = vmax.f32 %v1366_v36, 0.0  ;;  %v3908_v16 = vmax.f32 %v3360_v33, 0.0  ;;  %v1369_v51 = vadd.f32 %v13756_v8, %v11837_v48  ;;  %v3363_v47 = vadd.f32 %v13756_v8, %v12037_v30  ;;  %v1360_v24 = vpop.f32.mrb[79].mxu0  ;;  %v3354_v54 = vpop.f32.mrb[79].mxu1 }
 0x179   :  { %v1912_v28 = vmax.f32 %v1358_v27, 0.0  ;;  %v3906_v34 = vmax.f32 %v3352_v39, 0.0  ;;  %v1361_v5 = vadd.f32 %v13756_v8, %v1360_v24  ;;  %v3355_v12 = vadd.f32 %v13756_v8, %v3354_v54  ;;  %v12746_v39 = vld [vmem:[%s16752_s0 + $0x2f8] sm:$0xff]  }
 0x17a   :  { %v1915_v41 = vmax.f32 %v1369_v51, 0.0  ;;  %v3909_v26 = vmax.f32 %v3363_v47, 0.0  ;;  %11943 = vmatmul.mubr.msk.bf16.gmra.mrb[184].mxu0 %vm724_vm0, %v12742_v19  ;;  %12143 = vmatmul.mubr.msk.bf16.gmra.mrb[184].mxu1 %vm724_vm0, %v12743_v37  ;;  %v14062_v36 = vmax.f32 %v1914_v23, %v3908_v16  ;;  %v12747_v19 = vld [vmem:[%s16752_s0 + $0x608] sm:$0xff]  }
 0x17b   :  { %v1913_v33 = vmax.f32 %v1361_v5, 0.0  ;;  %v3907_v48 = vmax.f32 %v3355_v12, 0.0  ;;  %11946 = vmatprep.mubr.msk.bf16.mxu0 %vm724_vm0, %v12744_v60  ;;  %12146 = vmatprep.mubr.msk.bf16.mxu1 %vm724_vm0, %v12745_v31  ;;  %v14066_v27 = vmax.f32 %v1912_v28, %v3906_v34 }
 0x17c   :  { %16791 = vst [vmem:[#allocation38_spill] sm:$0xff] %v14062_v36  ;;  %v14074_v30 = vmax.f32 %v1915_v41, %v3909_v26  ;;  %v12748_v26 = vld [vmem:[%s16752_s0 + $0x300] sm:$0xff]   ;;  %v12749_v41 = vld [vmem:[%s16752_s0 + $0x610] sm:$0xff]  }
 0x17d   :  { %16792 = vst [vmem:[#allocation39_spill] sm:$0xff] %v14066_v27  ;;  %v11840_v37 = vpop.f32.mrb[80].mxu0  ;;  %v12040_v23 = vpop.f32.mrb[80].mxu1  ;;  %v14076_v5 = vmax.f32 %v1913_v33, %v3907_v48  ;;  %v14091_v33 = vld [vmem:[%s16753_s2] ss:$0 sm:$0xff] }
 0x17e   :  { %16793 = vst [vmem:[#allocation40_spill] sm:$0xff] %v14074_v30  ;;  %v1382_v12 = vadd.f32 %v13756_v8, %v11840_v37  ;;  %v3376_v60 = vadd.f32 %v13756_v8, %v12040_v23  ;;  %v1373_v31 = vpop.f32.mrb[81].mxu0  ;;  %v3367_v16 = vpop.f32.mrb[81].mxu1 }
 0x17f   :  { %16794 = vst [vmem:[#allocation41_spill] sm:$0xff] %v14076_v5  ;;  %v1374_v51 = vadd.f32 %v13756_v8, %v1373_v31  ;;  %v3368_v47 = vadd.f32 %v13756_v8, %v3367_v16  ;;  %v11841_v24 = vpop.f32.mrb[82].mxu0  ;;  %v12041_v54 = vpop.f32.mrb[82].mxu1 }
 0x180   :  { %v1918_v28 = vmax.f32 %v1382_v12, 0.0  ;;  %v3912_v34 = vmax.f32 %v3376_v60, 0.0  ;;  %v1385_v48 = vadd.f32 %v14091_v33, %v11841_v24  ;;  %v3379_v8 = vadd.f32 %v14091_v33, %v12041_v54  ;;  %v1376_v37 = vpop.f32.mrb[83].mxu0  ;;  %v3370_v23 = vpop.f32.mrb[83].mxu1 }
 0x181   :  { %v1916_v31 = vmax.f32 %v1374_v51, 0.0  ;;  %v3910_v16 = vmax.f32 %v3368_v47, 0.0  ;;  %v1377_v5 = vadd.f32 %v14091_v33, %v1376_v37  ;;  %v3371_v30 = vadd.f32 %v14091_v33, %v3370_v23  ;;  %v12750_v47 = vld [vmem:[%s16752_s0 + $0x308] sm:$0xff]  }
 0x182   :  { %v1919_v27 = vmax.f32 %v1385_v48, 0.0  ;;  %v3913_v12 = vmax.f32 %v3379_v8, 0.0  ;;  %11947 = vmatmul.mubr.msk.bf16.gmra.mrb[188].mxu0 %vm724_vm0, %v12746_v39  ;;  %12147 = vmatmul.mubr.msk.bf16.gmra.mrb[188].mxu1 %vm724_vm0, %v12747_v19  ;;  %v14099_v60 = vmax.f32 %v1918_v28, %v3912_v34  ;;  %v12751_v39 = vld [vmem:[%s16752_s0 + $0x618] sm:$0xff]  }
 0x183   :  { %v1917_v36 = vmax.f32 %v1377_v5, 0.0  ;;  %v3911_v24 = vmax.f32 %v3371_v30, 0.0  ;;  %11950 = vmatprep.mubr.msk.bf16.mxu0 %vm724_vm0, %v12748_v26  ;;  %12150 = vmatprep.mubr.msk.bf16.mxu1 %vm724_vm0, %v12749_v41  ;;  %v14103_v51 = vmax.f32 %v1916_v31, %v3910_v16 }
 0x184   :  { %16795 = vst [vmem:[#allocation42_spill] sm:$0xff] %v14099_v60  ;;  %v14111_v54 = vmax.f32 %v1919_v27, %v3913_v12  ;;  %v12752_v27 = vld [vmem:[%s16752_s0 + $0x620] sm:$0xff]  }
 0x185   :  { %16796 = vst [vmem:[#allocation43_spill] sm:$0xff] %v14103_v51  ;;  %v11844_v19 = vpop.f32.mrb[84].mxu0  ;;  %v12044_v28 = vpop.f32.mrb[84].mxu1  ;;  %v14113_v5 = vmax.f32 %v1917_v36, %v3911_v24  ;;  %v12753_v36 = vld [vmem:[%s16752_s0 + $0x930] sm:$0xff]  }
 0x186   :  { %16797 = vst [vmem:[#allocation44_spill] sm:$0xff] %v14111_v54  ;;  %v1398_v30 = vadd.f32 %v14091_v33, %v11844_v19  ;;  %v3392_v26 = vadd.f32 %v14091_v33, %v12044_v28  ;;  %v1389_v41 = vpop.f32.mrb[85].mxu0  ;;  %v3383_v34 = vpop.f32.mrb[85].mxu1 }
 0x187   :  { %16798 = vst [vmem:[#allocation45_spill] sm:$0xff] %v14113_v5  ;;  %v1390_v48 = vadd.f32 %v14091_v33, %v1389_v41  ;;  %v3384_v8 = vadd.f32 %v14091_v33, %v3383_v34  ;;  %v11845_v37 = vpop.f32.mrb[86].mxu0  ;;  %v12045_v23 = vpop.f32.mrb[86].mxu1 }
 0x188   :  { %v1922_v31 = vmax.f32 %v1398_v30, 0.0  ;;  %v3916_v16 = vmax.f32 %v3392_v26, 0.0  ;;  %v1401_v12 = vadd.f32 %v14091_v33, %v11845_v37  ;;  %v3395_v24 = vadd.f32 %v14091_v33, %v12045_v23  ;;  %v1392_v19 = vpop.f32.mrb[87].mxu0  ;;  %v3386_v28 = vpop.f32.mrb[87].mxu1 }
 0x189   :  { %v1920_v41 = vmax.f32 %v1390_v48, 0.0  ;;  %v3914_v34 = vmax.f32 %v3384_v8, 0.0  ;;  %v1393_v5 = vadd.f32 %v14091_v33, %v1392_v19  ;;  %v3387_v54 = vadd.f32 %v14091_v33, %v3386_v28  ;;  %v12757_v28 = vld [vmem:[%s16752_s0 + $0x940] sm:$0xff]  }
 0x18a   :  { %v1923_v51 = vmax.f32 %v1401_v12, 0.0  ;;  %v3917_v60 = vmax.f32 %v3395_v24, 0.0  ;;  %11951 = vmatmul.mubr.msk.bf16.gmra.mrb[192].mxu0 %vm724_vm0, %v12750_v47  ;;  %12151 = vmatmul.mubr.msk.bf16.gmra.mrb[192].mxu1 %vm724_vm0, %v12751_v39  ;;  %v14131_v30 = vmax.f32 %v1922_v31, %v3916_v16  ;;  %v12756_v24 = vld [vmem:[%s16752_s0 + $0x630] sm:$0xff]  }
 0x18b   :  { %v1921_v26 = vmax.f32 %v1393_v5, 0.0  ;;  %v3915_v37 = vmax.f32 %v3387_v54, 0.0  ;;  %12158 = vmatprep.mubr.msk.bf16.mxu0 %vm724_vm0, %v12752_v27  ;;  %12358 = vmatprep.mubr.msk.bf16.mxu1 %vm724_vm0, %v12753_v36  ;;  %v14135_v48 = vmax.f32 %v1920_v41, %v3914_v34  ;;  %v12754_v54 = vld [vmem:[%s16752_s0 + $0x628] sm:$0xff]   ;;  %v12755_v5 = vld [vmem:[%s16752_s0 + $0x938] sm:$0xff]  }
 0x18c   :  { %16799 = vst [vmem:[#allocation46_spill] sm:$0xff] %v14131_v30  ;;  %v14137_v8 = vmax.f32 %v1923_v51, %v3917_v60 }
 0x18d   :  { %16800 = vst [vmem:[#allocation47_spill] sm:$0xff] %v14135_v48  ;;  %v11848_v23 = vpop.f32.mrb[88].mxu0  ;;  %v12048_v19 = vpop.f32.mrb[88].mxu1  ;;  %v14139_v12 = vmax.f32 %v1921_v26, %v3915_v37 }
 0x18e   :  { %16801 = vst [vmem:[#allocation48_spill] sm:$0xff] %v14137_v8  ;;  %v1414_v47 = vadd.f32 %v14091_v33, %v11848_v23  ;;  %v3408_v39 = vadd.f32 %v14091_v33, %v12048_v19  ;;  %v1405_v31 = vpop.f32.mrb[89].mxu0  ;;  %v3399_v16 = vpop.f32.mrb[89].mxu1 }
 0x18f   :  { %16802 = vst [vmem:[#allocation49_spill] sm:$0xff] %v14139_v12  ;;  %v1406_v60 = vadd.f32 %v14091_v33, %v1405_v31  ;;  %v3400_v51 = vadd.f32 %v14091_v33, %v3399_v16  ;;  %v11849_v27 = vpop.f32.mrb[90].mxu0  ;;  %v12049_v36 = vpop.f32.mrb[90].mxu1 }
 0x190   :  { %v1926_v41 = vmax.f32 %v1414_v47, 0.0  ;;  %v3920_v34 = vmax.f32 %v3408_v39, 0.0  ;;  %v1417_v26 = vadd.f32 %v14091_v33, %v11849_v27  ;;  %v3411_v37 = vadd.f32 %v14091_v33, %v12049_v36  ;;  %v1408_v23 = vpop.f32.mrb[91].mxu0  ;;  %v3402_v19 = vpop.f32.mrb[91].mxu1 }
 0x191   :  { %v1924_v31 = vmax.f32 %v1406_v60, 0.0  ;;  %v3918_v16 = vmax.f32 %v3400_v51, 0.0  ;;  %v1409_v12 = vadd.f32 %v14091_v33, %v1408_v23  ;;  %v3403_v8 = vadd.f32 %v14091_v33, %v3402_v19  ;;  %v12761_v19 = vld [vmem:[%s16752_s0 + $0x950] sm:$0xff]  }
 0x192   :  { %v1927_v48 = vmax.f32 %v1417_v26, 0.0  ;;  %v3921_v30 = vmax.f32 %v3411_v37, 0.0  ;;  %12159 = vmatmul.mubr.msk.bf16.vlgmr.msra.gmra.mrb[196].mxu0 %vm724_vm0, %v12754_v54  ;;  %12359 = vmatmul.mubr.msk.bf16.vlgmr.msra.gmra.mrb[196].mxu1 %vm724_vm0, %v12755_v5  ;;  %v14163_v47 = vmax.f32 %v1926_v41, %v3920_v34  ;;  %v12760_v37 = vld [vmem:[%s16752_s0 + $0x640] sm:$0xff]  }
 0x193   :  { %v1925_v39 = vmax.f32 %v1409_v12, 0.0  ;;  %v3919_v27 = vmax.f32 %v3403_v8, 0.0  ;;  %12162 = vmatprep.mubr.msk.bf16.mxu0 %vm724_vm0, %v12756_v24  ;;  %12362 = vmatprep.mubr.msk.bf16.mxu1 %vm724_vm0, %v12757_v28  ;;  %v14167_v60 = vmax.f32 %v1924_v31, %v3918_v16  ;;  %v12758_v8 = vld [vmem:[%s16752_s0 + $0x638] sm:$0xff]   ;;  %v12759_v12 = vld [vmem:[%s16752_s0 + $0x948] sm:$0xff]  }
 0x194   :  { %16803 = vst [vmem:[#allocation50_spill] sm:$0xff] %v14163_v47  ;;  %v14169_v51 = vmax.f32 %v1927_v48, %v3921_v30 }
 0x195   :  { %16804 = vst [vmem:[#allocation51_spill] sm:$0xff] %v14167_v60  ;;  %v11852_v36 = vpop.f32.mrb[92].mxu0  ;;  %v12052_v23 = vpop.f32.mrb[92].mxu1  ;;  %v14171_v26 = vmax.f32 %v1925_v39, %v3919_v27 }
 0x196   :  { %16805 = vst [vmem:[#allocation52_spill] sm:$0xff] %v14169_v51  ;;  %v1430_v54 = vadd.f32 %v14091_v33, %v11852_v36  ;;  %v3424_v5 = vadd.f32 %v14091_v33, %v12052_v23  ;;  %v1421_v41 = vpop.f32.mrb[93].mxu0  ;;  %v3415_v34 = vpop.f32.mrb[93].mxu1 }
 0x197   :  { %16806 = vst [vmem:[#allocation53_spill] sm:$0xff] %v14171_v26  ;;  %v1422_v30 = vadd.f32 %v14091_v33, %v1421_v41  ;;  %v3416_v48 = vadd.f32 %v14091_v33, %v3415_v34  ;;  %v11853_v24 = vpop.f32.mrb[94].mxu0  ;;  %v12053_v28 = vpop.f32.mrb[94].mxu1 }
 0x198   :  { %v1930_v31 = vmax.f32 %v1430_v54, 0.0  ;;  %v3924_v16 = vmax.f32 %v3424_v5, 0.0  ;;  %v1433_v39 = vadd.f32 %v14091_v33, %v11853_v24  ;;  %v3427_v27 = vadd.f32 %v14091_v33, %v12053_v28  ;;  %v1424_v36 = vpop.f32.mrb[95].mxu0  ;;  %v3418_v23 = vpop.f32.mrb[95].mxu1 }
 0x199   :  { %v1928_v41 = vmax.f32 %v1422_v30, 0.0  ;;  %v3922_v34 = vmax.f32 %v3416_v48, 0.0  ;;  %v1425_v26 = vadd.f32 %v14091_v33, %v1424_v36  ;;  %v3419_v51 = vadd.f32 %v14091_v33, %v3418_v23  ;;  %v12765_v23 = vld [vmem:[%s16752_s0 + $0x960] sm:$0xff]  }
 0x19a   :  { %v1931_v60 = vmax.f32 %v1433_v39, 0.0  ;;  %v3925_v47 = vmax.f32 %v3427_v27, 0.0  ;;  %12163 = vmatmul.mubr.msk.bf16.gmra.mrb[200].mxu0 %vm724_vm0, %v12758_v8  ;;  %12363 = vmatmul.mubr.msk.bf16.gmra.mrb[200].mxu1 %vm724_vm0, %v12759_v12  ;;  %v14195_v54 = vmax.f32 %v1930_v31, %v3924_v16  ;;  %v12764_v27 = vld [vmem:[%s16752_s0 + $0x650] sm:$0xff]  }
 0x19b   :  { %v1929_v5 = vmax.f32 %v1425_v26, 0.0  ;;  %v3923_v24 = vmax.f32 %v3419_v51, 0.0  ;;  %12166 = vmatprep.mubr.msk.bf16.mxu0 %vm724_vm0, %v12760_v37  ;;  %12366 = vmatprep.mubr.msk.bf16.mxu1 %vm724_vm0, %v12761_v19  ;;  %v14199_v30 = vmax.f32 %v1928_v41, %v3922_v34  ;;  %v12762_v51 = vld [vmem:[%s16752_s0 + $0x648] sm:$0xff]   ;;  %v12763_v26 = vld [vmem:[%s16752_s0 + $0x958] sm:$0xff]  }
 0x19c   :  { %16807 = vst [vmem:[#allocation54_spill] sm:$0xff] %v14195_v54  ;;  %v14201_v48 = vmax.f32 %v1931_v60, %v3925_v47 }
 0x19d   :  { %16808 = vst [vmem:[#allocation55_spill] sm:$0xff] %v14199_v30  ;;  %v11856_v28 = vpop.f32.mrb[96].mxu0  ;;  %v12056_v36 = vpop.f32.mrb[96].mxu1  ;;  %v14203_v39 = vmax.f32 %v1929_v5, %v3923_v24 }
 0x19e   :  { %16809 = vst [vmem:[#allocation56_spill] sm:$0xff] %v14201_v48  ;;  %v1446_v8 = vadd.f32 %v14091_v33, %v11856_v28  ;;  %v3440_v12 = vadd.f32 %v14091_v33, %v12056_v36  ;;  %v1437_v31 = vpop.f32.mrb[97].mxu0  ;;  %v3431_v16 = vpop.f32.mrb[97].mxu1 }
 0x19f   :  { %16810 = vst [vmem:[#allocation57_spill] sm:$0xff] %v14203_v39  ;;  %v1438_v47 = vadd.f32 %v14091_v33, %v1437_v31  ;;  %v3432_v60 = vadd.f32 %v14091_v33, %v3431_v16  ;;  %v11857_v37 = vpop.f32.mrb[98].mxu0  ;;  %v12057_v19 = vpop.f32.mrb[98].mxu1 }
 0x1a0   :  { %v1934_v41 = vmax.f32 %v1446_v8, 0.0  ;;  %v3928_v34 = vmax.f32 %v3440_v12, 0.0  ;;  %v1449_v5 = vadd.f32 %v14091_v33, %v11857_v37  ;;  %v3443_v24 = vadd.f32 %v14091_v33, %v12057_v19  ;;  %v1440_v28 = vpop.f32.mrb[99].mxu0  ;;  %v3434_v36 = vpop.f32.mrb[99].mxu1 }
 0x1a1   :  { %v1932_v31 = vmax.f32 %v1438_v47, 0.0  ;;  %v3926_v16 = vmax.f32 %v3432_v60, 0.0  ;;  %v1441_v39 = vadd.f32 %v14091_v33, %v1440_v28  ;;  %v3435_v48 = vadd.f32 %v14091_v33, %v3434_v36  ;;  %v12769_v36 = vld [vmem:[%s16752_s0 + $0x970] sm:$0xff]  }
 0x1a2   :  { %v1935_v30 = vmax.f32 %v1449_v5, 0.0  ;;  %v3929_v54 = vmax.f32 %v3443_v24, 0.0  ;;  %12167 = vmatmul.mubr.msk.bf16.gmra.mrb[204].mxu0 %vm724_vm0, %v12762_v51  ;;  %12367 = vmatmul.mubr.msk.bf16.gmra.mrb[204].mxu1 %vm724_vm0, %v12763_v26  ;;  %v14227_v8 = vmax.f32 %v1934_v41, %v3928_v34  ;;  %v12768_v24 = vld [vmem:[%s16752_s0 + $0x660] sm:$0xff]  }
 0x1a3   :  { %v1933_v12 = vmax.f32 %v1441_v39, 0.0  ;;  %v3927_v37 = vmax.f32 %v3435_v48, 0.0  ;;  %12170 = vmatprep.mubr.msk.bf16.mxu0 %vm724_vm0, %v12764_v27  ;;  %12370 = vmatprep.mubr.msk.bf16.mxu1 %vm724_vm0, %v12765_v23  ;;  %v14231_v47 = vmax.f32 %v1932_v31, %v3926_v16  ;;  %v12766_v48 = vld [vmem:[%s16752_s0 + $0x658] sm:$0xff]   ;;  %v12767_v39 = vld [vmem:[%s16752_s0 + $0x968] sm:$0xff]  }
 0x1a4   :  { %16811 = vst [vmem:[#allocation58_spill] sm:$0xff] %v14227_v8  ;;  %v14233_v60 = vmax.f32 %v1935_v30, %v3929_v54 }
 0x1a5   :  { %16812 = vst [vmem:[#allocation59_spill] sm:$0xff] %v14231_v47  ;;  %v11860_v19 = vpop.f32.mrb[100].mxu0  ;;  %v12060_v28 = vpop.f32.mrb[100].mxu1  ;;  %v14235_v5 = vmax.f32 %v1933_v12, %v3927_v37 }
 0x1a6   :  { %16813 = vst [vmem:[#allocation60_spill] sm:$0xff] %v14233_v60  ;;  %v1462_v51 = vadd.f32 %v14091_v33, %v11860_v19  ;;  %v3456_v26 = vadd.f32 %v14091_v33, %v12060_v28  ;;  %v1453_v41 = vpop.f32.mrb[101].mxu0  ;;  %v3447_v34 = vpop.f32.mrb[101].mxu1 }
 0x1a7   :  { %16814 = vst [vmem:[#allocation61_spill] sm:$0xff] %v14235_v5  ;;  %v1454_v54 = vadd.f32 %v14091_v33, %v1453_v41  ;;  %v3448_v30 = vadd.f32 %v14091_v33, %v3447_v34  ;;  %v11861_v27 = vpop.f32.mrb[102].mxu0  ;;  %v12061_v23 = vpop.f32.mrb[102].mxu1 }
 0x1a8   :  { %v1938_v31 = vmax.f32 %v1462_v51, 0.0  ;;  %v3932_v16 = vmax.f32 %v3456_v26, 0.0  ;;  %v1465_v12 = vadd.f32 %v14091_v33, %v11861_v27  ;;  %v3459_v37 = vadd.f32 %v14091_v33, %v12061_v23  ;;  %v1456_v19 = vpop.f32.mrb[103].mxu0  ;;  %v3450_v28 = vpop.f32.mrb[103].mxu1 }
 0x1a9   :  { %v1936_v41 = vmax.f32 %v1454_v54, 0.0  ;;  %v3930_v34 = vmax.f32 %v3448_v30, 0.0  ;;  %v1457_v5 = vadd.f32 %v14091_v33, %v1456_v19  ;;  %v3451_v60 = vadd.f32 %v14091_v33, %v3450_v28  ;;  %v12773_v28 = vld [vmem:[%s16752_s0 + $0x980] sm:$0xff]  }
 0x1aa   :  { %v1939_v47 = vmax.f32 %v1465_v12, 0.0  ;;  %v3933_v8 = vmax.f32 %v3459_v37, 0.0  ;;  %12171 = vmatmul.mubr.msk.bf16.gmra.mrb[208].mxu0 %vm724_vm0, %v12766_v48  ;;  %12371 = vmatmul.mubr.msk.bf16.gmra.mrb[208].mxu1 %vm724_vm0, %v12767_v39  ;;  %v14259_v51 = vmax.f32 %v1938_v31, %v3932_v16  ;;  %v12772_v37 = vld [vmem:[%s16752_s0 + $0x670] sm:$0xff]  }
 0x1ab   :  { %v1937_v26 = vmax.f32 %v1457_v5, 0.0  ;;  %v3931_v27 = vmax.f32 %v3451_v60, 0.0  ;;  %12174 = vmatprep.mubr.msk.bf16.mxu0 %vm724_vm0, %v12768_v24  ;;  %12374 = vmatprep.mubr.msk.bf16.mxu1 %vm724_vm0, %v12769_v36  ;;  %v14263_v54 = vmax.f32 %v1936_v41, %v3930_v34  ;;  %v12770_v60 = vld [vmem:[%s16752_s0 + $0x668] sm:$0xff]   ;;  %v12771_v5 = vld [vmem:[%s16752_s0 + $0x978] sm:$0xff]  }
 0x1ac   :  { %16815 = vst [vmem:[#allocation62_spill] sm:$0xff] %v14259_v51  ;;  %v14265_v30 = vmax.f32 %v1939_v47, %v3933_v8 }
 0x1ad   :  { %16816 = vst [vmem:[#allocation63_spill] sm:$0xff] %v14263_v54  ;;  %v11864_v23 = vpop.f32.mrb[104].mxu0  ;;  %v12064_v19 = vpop.f32.mrb[104].mxu1  ;;  %v14267_v12 = vmax.f32 %v1937_v26, %v3931_v27 }
 0x1ae   :  { %16817 = vst [vmem:[#allocation64_spill] sm:$0xff] %v14265_v30  ;;  %v1478_v48 = vadd.f32 %v14091_v33, %v11864_v23  ;;  %v3472_v39 = vadd.f32 %v14091_v33, %v12064_v19  ;;  %v1469_v31 = vpop.f32.mrb[105].mxu0  ;;  %v3463_v16 = vpop.f32.mrb[105].mxu1 }
 0x1af   :  { %16818 = vst [vmem:[#allocation65_spill] sm:$0xff] %v14267_v12  ;;  %v1470_v8 = vadd.f32 %v14091_v33, %v1469_v31  ;;  %v3464_v47 = vadd.f32 %v14091_v33, %v3463_v16  ;;  %v11865_v24 = vpop.f32.mrb[106].mxu0  ;;  %v12065_v36 = vpop.f32.mrb[106].mxu1 }
 0x1b0   :  { %v1942_v41 = vmax.f32 %v1478_v48, 0.0  ;;  %v3936_v34 = vmax.f32 %v3472_v39, 0.0  ;;  %v1481_v26 = vadd.f32 %v14091_v33, %v11865_v24  ;;  %v3475_v27 = vadd.f32 %v14091_v33, %v12065_v36  ;;  %v1472_v23 = vpop.f32.mrb[107].mxu0  ;;  %v3466_v19 = vpop.f32.mrb[107].mxu1 }
 0x1b1   :  { %v1940_v31 = vmax.f32 %v1470_v8, 0.0  ;;  %v3934_v16 = vmax.f32 %v3464_v47, 0.0  ;;  %v1473_v12 = vadd.f32 %v14091_v33, %v1472_v23  ;;  %v3467_v30 = vadd.f32 %v14091_v33, %v3466_v19  ;;  %v12777_v19 = vld [vmem:[%s16752_s0 + $0x990] sm:$0xff]  }
 0x1b2   :  { %v1943_v54 = vmax.f32 %v1481_v26, 0.0  ;;  %v3937_v51 = vmax.f32 %v3475_v27, 0.0  ;;  %12175 = vmatmul.mubr.msk.bf16.gmra.mrb[212].mxu0 %vm724_vm0, %v12770_v60  ;;  %12375 = vmatmul.mubr.msk.bf16.gmra.mrb[212].mxu1 %vm724_vm0, %v12771_v5  ;;  %v14291_v48 = vmax.f32 %v1942_v41, %v3936_v34  ;;  %v12776_v27 = vld [vmem:[%s16752_s0 + $0x680] sm:$0xff]  }
 0x1b3   :  { %v1941_v39 = vmax.f32 %v1473_v12, 0.0  ;;  %v3935_v24 = vmax.f32 %v3467_v30, 0.0  ;;  %12178 = vmatprep.mubr.msk.bf16.mxu0 %vm724_vm0, %v12772_v37  ;;  %12378 = vmatprep.mubr.msk.bf16.mxu1 %vm724_vm0, %v12773_v28  ;;  %v14295_v8 = vmax.f32 %v1940_v31, %v3934_v16  ;;  %v12774_v30 = vld [vmem:[%s16752_s0 + $0x678] sm:$0xff]   ;;  %v12775_v12 = vld [vmem:[%s16752_s0 + $0x988] sm:$0xff]  }
 0x1b4   :  { %16819 = vst [vmem:[#allocation66_spill] sm:$0xff] %v14291_v48  ;;  %v14297_v47 = vmax.f32 %v1943_v54, %v3937_v51 }
 0x1b5   :  { %16820 = vst [vmem:[#allocation67_spill] sm:$0xff] %v14295_v8  ;;  %v11868_v36 = vpop.f32.mrb[108].mxu0  ;;  %v12068_v23 = vpop.f32.mrb[108].mxu1  ;;  %v14299_v26 = vmax.f32 %v1941_v39, %v3935_v24 }
 0x1b6   :  { %16821 = vst [vmem:[#allocation68_spill] sm:$0xff] %v14297_v47  ;;  %v1494_v60 = vadd.f32 %v14091_v33, %v11868_v36  ;;  %v3488_v5 = vadd.f32 %v14091_v33, %v12068_v23  ;;  %v1485_v41 = vpop.f32.mrb[109].mxu0  ;;  %v3479_v34 = vpop.f32.mrb[109].mxu1 }
 0x1b7   :  { %16822 = vst [vmem:[#allocation69_spill] sm:$0xff] %v14299_v26  ;;  %v1486_v51 = vadd.f32 %v14091_v33, %v1485_v41  ;;  %v3480_v54 = vadd.f32 %v14091_v33, %v3479_v34  ;;  %v11869_v37 = vpop.f32.mrb[110].mxu0  ;;  %v12069_v28 = vpop.f32.mrb[110].mxu1 }
 0x1b8   :  { %v1946_v31 = vmax.f32 %v1494_v60, 0.0  ;;  %v3940_v16 = vmax.f32 %v3488_v5, 0.0  ;;  %v1497_v39 = vadd.f32 %v14091_v33, %v11869_v37  ;;  %v3491_v24 = vadd.f32 %v14091_v33, %v12069_v28  ;;  %v1488_v36 = vpop.f32.mrb[111].mxu0  ;;  %v3482_v23 = vpop.f32.mrb[111].mxu1 }
 0x1b9   :  { %v1944_v41 = vmax.f32 %v1486_v51, 0.0  ;;  %v3938_v34 = vmax.f32 %v3480_v54, 0.0  ;;  %v1489_v26 = vadd.f32 %v14091_v33, %v1488_v36  ;;  %v3483_v47 = vadd.f32 %v14091_v33, %v3482_v23  ;;  %v12781_v23 = vld [vmem:[%s16752_s0 + $0x9a0] sm:$0xff]  }
 0x1ba   :  { %v1947_v8 = vmax.f32 %v1497_v39, 0.0  ;;  %v3941_v48 = vmax.f32 %v3491_v24, 0.0  ;;  %12179 = vmatmul.mubr.msk.bf16.gmra.mrb[216].mxu0 %vm724_vm0, %v12774_v30  ;;  %12379 = vmatmul.mubr.msk.bf16.gmra.mrb[216].mxu1 %vm724_vm0, %v12775_v12  ;;  %v14323_v60 = vmax.f32 %v1946_v31, %v3940_v16  ;;  %v12780_v24 = vld [vmem:[%s16752_s0 + $0x690] sm:$0xff]  }
 0x1bb   :  { %v1945_v5 = vmax.f32 %v1489_v26, 0.0  ;;  %v3939_v37 = vmax.f32 %v3483_v47, 0.0  ;;  %12182 = vmatprep.mubr.msk.bf16.mxu0 %vm724_vm0, %v12776_v27  ;;  %12382 = vmatprep.mubr.msk.bf16.mxu1 %vm724_vm0, %v12777_v19  ;;  %v14327_v51 = vmax.f32 %v1944_v41, %v3938_v34  ;;  %v12778_v47 = vld [vmem:[%s16752_s0 + $0x688] sm:$0xff]   ;;  %v12779_v26 = vld [vmem:[%s16752_s0 + $0x998] sm:$0xff]  }
 0x1bc   :  { %16823 = vst [vmem:[#allocation70_spill] sm:$0xff] %v14323_v60  ;;  %v14329_v54 = vmax.f32 %v1947_v8, %v3941_v48 }
 0x1bd   :  { %16824 = vst [vmem:[#allocation71_spill] sm:$0xff] %v14327_v51  ;;  %v11872_v28 = vpop.f32.mrb[112].mxu0  ;;  %v12072_v36 = vpop.f32.mrb[112].mxu1  ;;  %v14331_v39 = vmax.f32 %v1945_v5, %v3939_v37 }
 0x1be   :  { %16825 = vst [vmem:[#allocation72_spill] sm:$0xff] %v14329_v54  ;;  %v1510_v30 = vadd.f32 %v14091_v33, %v11872_v28  ;;  %v3504_v12 = vadd.f32 %v14091_v33, %v12072_v36  ;;  %v1501_v31 = vpop.f32.mrb[113].mxu0  ;;  %v3495_v16 = vpop.f32.mrb[113].mxu1 }
 0x1bf   :  { %16826 = vst [vmem:[#allocation73_spill] sm:$0xff] %v14331_v39  ;;  %v1502_v48 = vadd.f32 %v14091_v33, %v1501_v31  ;;  %v3496_v8 = vadd.f32 %v14091_v33, %v3495_v16  ;;  %v11873_v27 = vpop.f32.mrb[114].mxu0  ;;  %v12073_v19 = vpop.f32.mrb[114].mxu1 }
 0x1c0   :  { %v1950_v41 = vmax.f32 %v1510_v30, 0.0  ;;  %v3944_v34 = vmax.f32 %v3504_v12, 0.0  ;;  %v1513_v5 = vadd.f32 %v14091_v33, %v11873_v27  ;;  %v3507_v37 = vadd.f32 %v14091_v33, %v12073_v19  ;;  %v1504_v28 = vpop.f32.mrb[115].mxu0  ;;  %v3498_v36 = vpop.f32.mrb[115].mxu1 }
 0x1c1   :  { %v1948_v31 = vmax.f32 %v1502_v48, 0.0  ;;  %v3942_v16 = vmax.f32 %v3496_v8, 0.0  ;;  %v1505_v39 = vadd.f32 %v14091_v33, %v1504_v28  ;;  %v3499_v54 = vadd.f32 %v14091_v33, %v3498_v36  ;;  %v12785_v36 = vld [vmem:[%s16752_s0 + $0x9b0] sm:$0xff]  }
 0x1c2   :  { %v1951_v51 = vmax.f32 %v1513_v5, 0.0  ;;  %v3945_v60 = vmax.f32 %v3507_v37, 0.0  ;;  %12183 = vmatmul.mubr.msk.bf16.gmra.mrb[220].mxu0 %vm724_vm0, %v12778_v47  ;;  %12383 = vmatmul.mubr.msk.bf16.gmra.mrb[220].mxu1 %vm724_vm0, %v12779_v26  ;;  %v14355_v30 = vmax.f32 %v1950_v41, %v3944_v34  ;;  %v12784_v37 = vld [vmem:[%s16752_s0 + $0x6a0] sm:$0xff]  }
 0x1c3   :  { %v1949_v12 = vmax.f32 %v1505_v39, 0.0  ;;  %v3943_v27 = vmax.f32 %v3499_v54, 0.0  ;;  %12186 = vmatprep.mubr.msk.bf16.mxu0 %vm724_vm0, %v12780_v24  ;;  %12386 = vmatprep.mubr.msk.bf16.mxu1 %vm724_vm0, %v12781_v23  ;;  %v14359_v48 = vmax.f32 %v1948_v31, %v3942_v16  ;;  %v12782_v54 = vld [vmem:[%s16752_s0 + $0x698] sm:$0xff]   ;;  %v12783_v39 = vld [vmem:[%s16752_s0 + $0x9a8] sm:$0xff]  }
 0x1c4   :  { %16827 = vst [vmem:[#allocation74_spill] sm:$0xff] %v14355_v30  ;;  %v14361_v8 = vmax.f32 %v1951_v51, %v3945_v60 }
 0x1c5   :  { %16828 = vst [vmem:[#allocation75_spill] sm:$0xff] %v14359_v48  ;;  %v11876_v19 = vpop.f32.mrb[116].mxu0  ;;  %v12076_v28 = vpop.f32.mrb[116].mxu1  ;;  %v14363_v5 = vmax.f32 %v1949_v12, %v3943_v27 }
 0x1c6   :  { %16829 = vst [vmem:[#allocation76_spill] sm:$0xff] %v14361_v8  ;;  %v1526_v47 = vadd.f32 %v14091_v33, %v11876_v19  ;;  %v3520_v26 = vadd.f32 %v14091_v33, %v12076_v28  ;;  %v1517_v41 = vpop.f32.mrb[117].mxu0  ;;  %v3511_v34 = vpop.f32.mrb[117].mxu1 }
 0x1c7   :  { %16830 = vst [vmem:[#allocation77_spill] sm:$0xff] %v14363_v5  ;;  %v1518_v60 = vadd.f32 %v14091_v33, %v1517_v41  ;;  %v3512_v51 = vadd.f32 %v14091_v33, %v3511_v34  ;;  %v11877_v24 = vpop.f32.mrb[118].mxu0  ;;  %v12077_v23 = vpop.f32.mrb[118].mxu1 }
 0x1c8   :  { %v1954_v31 = vmax.f32 %v1526_v47, 0.0  ;;  %v3948_v16 = vmax.f32 %v3520_v26, 0.0  ;;  %v1529_v12 = vadd.f32 %v14091_v33, %v11877_v24  ;;  %v3523_v27 = vadd.f32 %v14091_v33, %v12077_v23  ;;  %v1520_v19 = vpop.f32.mrb[119].mxu0  ;;  %v3514_v28 = vpop.f32.mrb[119].mxu1 }
 0x1c9   :  { %v1952_v41 = vmax.f32 %v1518_v60, 0.0  ;;  %v3946_v34 = vmax.f32 %v3512_v51, 0.0  ;;  %v1521_v5 = vadd.f32 %v14091_v33, %v1520_v19  ;;  %v3515_v8 = vadd.f32 %v14091_v33, %v3514_v28  ;;  %v12789_v28 = vld [vmem:[%s16752_s0 + $0x9c0] sm:$0xff]  }
 0x1ca   :  { %v1955_v48 = vmax.f32 %v1529_v12, 0.0  ;;  %v3949_v30 = vmax.f32 %v3523_v27, 0.0  ;;  %12187 = vmatmul.mubr.msk.bf16.gmra.mrb[224].mxu0 %vm724_vm0, %v12782_v54  ;;  %12387 = vmatmul.mubr.msk.bf16.gmra.mrb[224].mxu1 %vm724_vm0, %v12783_v39  ;;  %v14387_v47 = vmax.f32 %v1954_v31, %v3948_v16  ;;  %v12788_v27 = vld [vmem:[%s16752_s0 + $0x6b0] sm:$0xff]  }
 0x1cb   :  { %v1953_v26 = vmax.f32 %v1521_v5, 0.0  ;;  %v3947_v24 = vmax.f32 %v3515_v8, 0.0  ;;  %12190 = vmatprep.mubr.msk.bf16.mxu0 %vm724_vm0, %v12784_v37  ;;  %12390 = vmatprep.mubr.msk.bf16.mxu1 %vm724_vm0, %v12785_v36  ;;  %v14391_v60 = vmax.f32 %v1952_v41, %v3946_v34  ;;  %v12786_v8 = vld [vmem:[%s16752_s0 + $0x6a8] sm:$0xff]   ;;  %v12787_v5 = vld [vmem:[%s16752_s0 + $0x9b8] sm:$0xff]  }
 0x1cc   :  { %16831 = vst [vmem:[#allocation78_spill] sm:$0xff] %v14387_v47  ;;  %v14393_v51 = vmax.f32 %v1955_v48, %v3949_v30 }
 0x1cd   :  { %16832 = vst [vmem:[#allocation79_spill] sm:$0xff] %v14391_v60  ;;  %v11880_v23 = vpop.f32.mrb[120].mxu0  ;;  %v12080_v19 = vpop.f32.mrb[120].mxu1  ;;  %v14395_v12 = vmax.f32 %v1953_v26, %v3947_v24 }
 0x1ce   :  { %16833 = vst [vmem:[#allocation80_spill] sm:$0xff] %v14393_v51  ;;  %v1542_v54 = vadd.f32 %v14091_v33, %v11880_v23  ;;  %v3536_v39 = vadd.f32 %v14091_v33, %v12080_v19  ;;  %v1533_v31 = vpop.f32.mrb[121].mxu0  ;;  %v3527_v16 = vpop.f32.mrb[121].mxu1 }
 0x1cf   :  { %16834 = vst [vmem:[#allocation81_spill] sm:$0xff] %v14395_v12  ;;  %v1534_v30 = vadd.f32 %v14091_v33, %v1533_v31  ;;  %v3528_v48 = vadd.f32 %v14091_v33, %v3527_v16  ;;  %v11881_v37 = vpop.f32.mrb[122].mxu0  ;;  %v12081_v36 = vpop.f32.mrb[122].mxu1 }
 0x1d0   :  { %v1958_v41 = vmax.f32 %v1542_v54, 0.0  ;;  %v3952_v34 = vmax.f32 %v3536_v39, 0.0  ;;  %v1545_v26 = vadd.f32 %v14091_v33, %v11881_v37  ;;  %v3539_v24 = vadd.f32 %v14091_v33, %v12081_v36  ;;  %v1536_v23 = vpop.f32.mrb[123].mxu0  ;;  %v3530_v19 = vpop.f32.mrb[123].mxu1 }
 0x1d1   :  { %v1956_v31 = vmax.f32 %v1534_v30, 0.0  ;;  %v3950_v16 = vmax.f32 %v3528_v48, 0.0  ;;  %v1537_v12 = vadd.f32 %v14091_v33, %v1536_v23  ;;  %v3531_v51 = vadd.f32 %v14091_v33, %v3530_v19  ;;  %v12793_v19 = vld [vmem:[%s16752_s0 + $0x9d0] sm:$0xff]  }
 0x1d2   :  { %v1959_v60 = vmax.f32 %v1545_v26, 0.0  ;;  %v3953_v47 = vmax.f32 %v3539_v24, 0.0  ;;  %12191 = vmatmul.mubr.msk.bf16.gmra.mrb[228].mxu0 %vm724_vm0, %v12786_v8  ;;  %12391 = vmatmul.mubr.msk.bf16.gmra.mrb[228].mxu1 %vm724_vm0, %v12787_v5  ;;  %v14419_v54 = vmax.f32 %v1958_v41, %v3952_v34  ;;  %v12792_v24 = vld [vmem:[%s16752_s0 + $0x6c0] sm:$0xff]  }
 0x1d3   :  { %v1957_v39 = vmax.f32 %v1537_v12, 0.0  ;;  %v3951_v37 = vmax.f32 %v3531_v51, 0.0  ;;  %12194 = vmatprep.mubr.msk.bf16.mxu0 %vm724_vm0, %v12788_v27  ;;  %12394 = vmatprep.mubr.msk.bf16.mxu1 %vm724_vm0, %v12789_v28  ;;  %v14423_v30 = vmax.f32 %v1956_v31, %v3950_v16  ;;  %v12790_v51 = vld [vmem:[%s16752_s0 + $0x6b8] sm:$0xff]   ;;  %v12791_v12 = vld [vmem:[%s16752_s0 + $0x9c8] sm:$0xff]  }
 0x1d4   :  { %16835 = vst [vmem:[#allocation82_spill] sm:$0xff] %v14419_v54  ;;  %v14425_v48 = vmax.f32 %v1959_v60, %v3953_v47 }
 0x1d5   :  { %16836 = vst [vmem:[#allocation83_spill] sm:$0xff] %v14423_v30  ;;  %v11884_v36 = vpop.f32.mrb[124].mxu0  ;;  %v12084_v23 = vpop.f32.mrb[124].mxu1  ;;  %v14427_v26 = vmax.f32 %v1957_v39, %v3951_v37 }
 0x1d6   :  { %16837 = vst [vmem:[#allocation84_spill] sm:$0xff] %v14425_v48  ;;  %v1558_v8 = vadd.f32 %v14091_v33, %v11884_v36  ;;  %v3552_v5 = vadd.f32 %v14091_v33, %v12084_v23  ;;  %v1549_v41 = vpop.f32.mrb[125].mxu0  ;;  %v3543_v34 = vpop.f32.mrb[125].mxu1 }
 0x1d7   :  { %16838 = vst [vmem:[#allocation85_spill] sm:$0xff] %v14427_v26  ;;  %v1550_v47 = vadd.f32 %v14091_v33, %v1549_v41  ;;  %v3544_v60 = vadd.f32 %v14091_v33, %v3543_v34  ;;  %v11885_v27 = vpop.f32.mrb[126].mxu0  ;;  %v12085_v28 = vpop.f32.mrb[126].mxu1 }
 0x1d8   :  { %v1962_v31 = vmax.f32 %v1558_v8, 0.0  ;;  %v3956_v16 = vmax.f32 %v3552_v5, 0.0  ;;  %v1561_v39 = vadd.f32 %v14091_v33, %v11885_v27  ;;  %v3555_v37 = vadd.f32 %v14091_v33, %v12085_v28  ;;  %v1552_v36 = vpop.f32.mrb[127].mxu0  ;;  %v3546_v23 = vpop.f32.mrb[127].mxu1 }
 0x1d9   :  { %v1960_v41 = vmax.f32 %v1550_v47, 0.0  ;;  %v3954_v34 = vmax.f32 %v3544_v60, 0.0  ;;  %v1553_v26 = vadd.f32 %v14091_v33, %v1552_v36  ;;  %v3547_v48 = vadd.f32 %v14091_v33, %v3546_v23  ;;  %v12797_v23 = vld [vmem:[%s16752_s0 + $0x9e0] sm:$0xff]  }
 0x1da   :  { %v1963_v30 = vmax.f32 %v1561_v39, 0.0  ;;  %v3957_v54 = vmax.f32 %v3555_v37, 0.0  ;;  %12195 = vmatmul.mubr.msk.bf16.gmra.mrb[232].mxu0 %vm724_vm0, %v12790_v51  ;;  %12395 = vmatmul.mubr.msk.bf16.gmra.mrb[232].mxu1 %vm724_vm0, %v12791_v12  ;;  %v14451_v8 = vmax.f32 %v1962_v31, %v3956_v16  ;;  %v12796_v37 = vld [vmem:[%s16752_s0 + $0x6d0] sm:$0xff]  }
 0x1db   :  { %v1961_v5 = vmax.f32 %v1553_v26, 0.0  ;;  %v3955_v27 = vmax.f32 %v3547_v48, 0.0  ;;  %12198 = vmatprep.mubr.msk.bf16.mxu0 %vm724_vm0, %v12792_v24  ;;  %12398 = vmatprep.mubr.msk.bf16.mxu1 %vm724_vm0, %v12793_v19  ;;  %v14455_v47 = vmax.f32 %v1960_v41, %v3954_v34  ;;  %v12794_v48 = vld [vmem:[%s16752_s0 + $0x6c8] sm:$0xff]   ;;  %v12795_v26 = vld [vmem:[%s16752_s0 + $0x9d8] sm:$0xff]  }
 0x1dc   :  { %16839 = vst [vmem:[#allocation86_spill] sm:$0xff] %v14451_v8  ;;  %v14457_v60 = vmax.f32 %v1963_v30, %v3957_v54 }
 0x1dd   :  { %16840 = vst [vmem:[#allocation87_spill] sm:$0xff] %v14455_v47  ;;  %v11888_v28 = vpop.f32.mrb[128].mxu0  ;;  %v12088_v36 = vpop.f32.mrb[128].mxu1  ;;  %v14459_v39 = vmax.f32 %v1961_v5, %v3955_v27 }
 0x1de   :  { %16841 = vst [vmem:[#allocation88_spill] sm:$0xff] %v14457_v60  ;;  %v1574_v51 = vadd.f32 %v14091_v33, %v11888_v28  ;;  %v3568_v12 = vadd.f32 %v14091_v33, %v12088_v36  ;;  %v1565_v31 = vpop.f32.mrb[129].mxu0  ;;  %v3559_v16 = vpop.f32.mrb[129].mxu1 }
 0x1df   :  { %16842 = vst [vmem:[#allocation89_spill] sm:$0xff] %v14459_v39  ;;  %v1566_v54 = vadd.f32 %v14091_v33, %v1565_v31  ;;  %v3560_v30 = vadd.f32 %v14091_v33, %v3559_v16  ;;  %v11889_v24 = vpop.f32.mrb[130].mxu0  ;;  %v12089_v19 = vpop.f32.mrb[130].mxu1 }
 0x1e0   :  { %v1966_v41 = vmax.f32 %v1574_v51, 0.0  ;;  %v3960_v34 = vmax.f32 %v3568_v12, 0.0  ;;  %v1577_v5 = vadd.f32 %v14091_v33, %v11889_v24  ;;  %v3571_v27 = vadd.f32 %v14091_v33, %v12089_v19  ;;  %v1568_v28 = vpop.f32.mrb[131].mxu0  ;;  %v3562_v36 = vpop.f32.mrb[131].mxu1 }
 0x1e1   :  { %v1964_v31 = vmax.f32 %v1566_v54, 0.0  ;;  %v3958_v16 = vmax.f32 %v3560_v30, 0.0  ;;  %v1569_v39 = vadd.f32 %v14091_v33, %v1568_v28  ;;  %v3563_v60 = vadd.f32 %v14091_v33, %v3562_v36  ;;  %v12801_v36 = vld [vmem:[%s16752_s0 + $0x9f0] sm:$0xff]  }
 0x1e2   :  { %v1967_v47 = vmax.f32 %v1577_v5, 0.0  ;;  %v3961_v8 = vmax.f32 %v3571_v27, 0.0  ;;  %12199 = vmatmul.mubr.msk.bf16.gmra.mrb[236].mxu0 %vm724_vm0, %v12794_v48  ;;  %12399 = vmatmul.mubr.msk.bf16.gmra.mrb[236].mxu1 %vm724_vm0, %v12795_v26  ;;  %v14483_v51 = vmax.f32 %v1966_v41, %v3960_v34  ;;  %v12800_v27 = vld [vmem:[%s16752_s0 + $0x6e0] sm:$0xff]  }
 0x1e3   :  { %v1965_v12 = vmax.f32 %v1569_v39, 0.0  ;;  %v3959_v24 = vmax.f32 %v3563_v60, 0.0  ;;  %12202 = vmatprep.mubr.msk.bf16.mxu0 %vm724_vm0, %v12796_v37  ;;  %12402 = vmatprep.mubr.msk.bf16.mxu1 %vm724_vm0, %v12797_v23  ;;  %v14487_v54 = vmax.f32 %v1964_v31, %v3958_v16  ;;  %v12798_v60 = vld [vmem:[%s16752_s0 + $0x6d8] sm:$0xff]   ;;  %v12799_v39 = vld [vmem:[%s16752_s0 + $0x9e8] sm:$0xff]  }
 0x1e4   :  { %16843 = vst [vmem:[#allocation90_spill] sm:$0xff] %v14483_v51  ;;  %v14489_v30 = vmax.f32 %v1967_v47, %v3961_v8 }
 0x1e5   :  { %16844 = vst [vmem:[#allocation91_spill] sm:$0xff] %v14487_v54  ;;  %v11892_v19 = vpop.f32.mrb[132].mxu0  ;;  %v12092_v28 = vpop.f32.mrb[132].mxu1  ;;  %v14491_v5 = vmax.f32 %v1965_v12, %v3959_v24 }
 0x1e6   :  { %16845 = vst [vmem:[#allocation92_spill] sm:$0xff] %v14489_v30  ;;  %v1590_v48 = vadd.f32 %v14091_v33, %v11892_v19  ;;  %v3584_v26 = vadd.f32 %v14091_v33, %v12092_v28  ;;  %v1581_v41 = vpop.f32.mrb[133].mxu0  ;;  %v3575_v34 = vpop.f32.mrb[133].mxu1 }
 0x1e7   :  { %16846 = vst [vmem:[#allocation93_spill] sm:$0xff] %v14491_v5  ;;  %v1582_v8 = vadd.f32 %v14091_v33, %v1581_v41  ;;  %v3576_v47 = vadd.f32 %v14091_v33, %v3575_v34  ;;  %v11893_v37 = vpop.f32.mrb[134].mxu0  ;;  %v12093_v23 = vpop.f32.mrb[134].mxu1 }
 0x1e8   :  { %v1970_v31 = vmax.f32 %v1590_v48, 0.0  ;;  %v3964_v16 = vmax.f32 %v3584_v26, 0.0  ;;  %v1593_v12 = vadd.f32 %v14091_v33, %v11893_v37  ;;  %v3587_v24 = vadd.f32 %v14091_v33, %v12093_v23  ;;  %v1584_v19 = vpop.f32.mrb[135].mxu0  ;;  %v3578_v28 = vpop.f32.mrb[135].mxu1 }
 0x1e9   :  { %v1968_v41 = vmax.f32 %v1582_v8, 0.0  ;;  %v3962_v34 = vmax.f32 %v3576_v47, 0.0  ;;  %v1585_v5 = vadd.f32 %v14091_v33, %v1584_v19  ;;  %v3579_v30 = vadd.f32 %v14091_v33, %v3578_v28  ;;  %v12804_v28 = vld [vmem:[%s16752_s0 + $0x6f0] sm:$0xff]  }
 0x1ea   :  { %v1971_v54 = vmax.f32 %v1593_v12, 0.0  ;;  %v3965_v51 = vmax.f32 %v3587_v24, 0.0  ;;  %12203 = vmatmul.mubr.msk.bf16.gmra.mrb[240].mxu0 %vm724_vm0, %v12798_v60  ;;  %12403 = vmatmul.mubr.msk.bf16.gmra.mrb[240].mxu1 %vm724_vm0, %v12799_v39  ;;  %v14515_v48 = vmax.f32 %v1970_v31, %v3964_v16 }
 0x1eb   :  { %v1969_v26 = vmax.f32 %v1585_v5, 0.0  ;;  %v3963_v37 = vmax.f32 %v3579_v30, 0.0  ;;  %12206 = vmatprep.mubr.msk.bf16.mxu0 %vm724_vm0, %v12800_v27  ;;  %12406 = vmatprep.mubr.msk.bf16.mxu1 %vm724_vm0, %v12801_v36  ;;  %v14519_v8 = vmax.f32 %v1968_v41, %v3962_v34  ;;  %v12802_v30 = vld [vmem:[%s16752_s0 + $0x6e8] sm:$0xff]   ;;  %v12803_v5 = vld [vmem:[%s16752_s0 + $0x9f8] sm:$0xff]   ;;  %v12805_v41 = vld [vmem:[%s16752_s0 + $0xa00] sm:$0xff]  }
 0x1ec   :  { %16847 = vst [vmem:[#allocation94_spill] sm:$0xff] %v14515_v48  ;;  %v14521_v47 = vmax.f32 %v1971_v54, %v3965_v51  ;;  %v14537_v54 = vld [vmem:[%s16753_s2] ss:$0 sm:$0xff] }
 0x1ed   :  { %16848 = vst [vmem:[#allocation95_spill] sm:$0xff] %v14519_v8  ;;  %v11896_v23 = vpop.f32.mrb[136].mxu0  ;;  %v12096_v19 = vpop.f32.mrb[136].mxu1  ;;  %v14523_v12 = vmax.f32 %v1969_v26, %v3963_v37 }
 0x1ee   :  { %16849 = vst [vmem:[#allocation96_spill] sm:$0xff] %v14521_v47  ;;  %v1606_v60 = vadd.f32 %v14091_v33, %v11896_v23  ;;  %v3600_v39 = vadd.f32 %v14091_v33, %v12096_v19  ;;  %v1597_v31 = vpop.f32.mrb[137].mxu0  ;;  %v3591_v16 = vpop.f32.mrb[137].mxu1 }
 0x1ef   :  { %16850 = vst [vmem:[#allocation97_spill] sm:$0xff] %v14523_v12  ;;  %v1598_v51 = vadd.f32 %v14091_v33, %v1597_v31  ;;  %v3592_v27 = vadd.f32 %v14537_v54, %v3591_v16  ;;  %v11897_v36 = vpop.f32.mrb[138].mxu0  ;;  %v12097_v24 = vpop.f32.mrb[138].mxu1 }
 0x1f0   :  { %v1974_v34 = vmax.f32 %v1606_v60, 0.0  ;;  %v3968_v26 = vmax.f32 %v3600_v39, 0.0  ;;  %v1609_v33 = vadd.f32 %v14537_v54, %v11897_v36  ;;  %v3603_v37 = vadd.f32 %v14537_v54, %v12097_v24  ;;  %v1600_v23 = vpop.f32.mrb[139].mxu0  ;;  %v3594_v19 = vpop.f32.mrb[139].mxu1 }
 0x1f1   :  { %v1972_v31 = vmax.f32 %v1598_v51, 0.0  ;;  %v3966_v16 = vmax.f32 %v3592_v27, 0.0  ;;  %v1601_v12 = vadd.f32 %v14537_v54, %v1600_v23  ;;  %v3595_v47 = vadd.f32 %v14537_v54, %v3594_v19  ;;  %v12809_v23 = vld [vmem:[%s16752_s0 + $0xa10] sm:$0xff]  }
 0x1f2   :  { %v14550_v8 = vmax.f32 %v1974_v34, %v3968_v26  ;;  %v1975_v48 = vmax.f32 %v1609_v33, 0.0  ;;  %v3969_v10 = vmax.f32 %v3603_v37, 0.0  ;;  %12207 = vmatmul.mubr.msk.bf16.gmra.mrb[244].mxu0 %vm724_vm0, %v12802_v30  ;;  %12407 = vmatmul.mubr.msk.bf16.gmra.mrb[244].mxu1 %vm724_vm0, %v12803_v5  ;;  %v12808_v37 = vld [vmem:[%s16752_s0 + $0x700] sm:$0xff]  }
 0x1f3   :  { %v14554_v60 = vmax.f32 %v1972_v31, %v3966_v16  ;;  %v1973_v39 = vmax.f32 %v1601_v12, 0.0  ;;  %v3967_v36 = vmax.f32 %v3595_v47, 0.0  ;;  %12210 = vmatprep.mubr.msk.bf16.mxu0 %vm724_vm0, %v12804_v28  ;;  %12410 = vmatprep.mubr.msk.bf16.mxu1 %vm724_vm0, %v12805_v41  ;;  %v12806_v47 = vld [vmem:[%s16752_s0 + $0x6f8] sm:$0xff]   ;;  %v12807_v12 = vld [vmem:[%s16752_s0 + $0xa08] sm:$0xff]  }
 0x1f4   :  { %16851 = vst [vmem:[#allocation98_spill] sm:$0xff] %v14550_v8  ;;  %v14558_v51 = vmax.f32 %v1975_v48, %v3969_v10 }
 0x1f5   :  { %16852 = vst [vmem:[#allocation99_spill] sm:$0xff] %v14554_v60  ;;  %v14560_v27 = vmax.f32 %v1973_v39, %v3967_v36  ;;  %v11900_v24 = vpop.f32.mrb[140].mxu0  ;;  %v12100_v34 = vpop.f32.mrb[140].mxu1 }
 0x1f6   :  { %16853 = vst [vmem:[#allocation100_spill] sm:$0xff] %v14558_v51  ;;  %v1622_v26 = vadd.f32 %v14537_v54, %v11900_v24  ;;  %v3616_v30 = vadd.f32 %v14537_v54, %v12100_v34  ;;  %v1613_v33 = vpop.f32.mrb[141].mxu0  ;;  %v3607_v5 = vpop.f32.mrb[141].mxu1 }
 0x1f7   :  { %16854 = vst [vmem:[#allocation101_spill] sm:$0xff] %v14560_v27  ;;  %v1614_v10 = vadd.f32 %v14537_v54, %v1613_v33  ;;  %v3608_v48 = vadd.f32 %v14537_v54, %v3607_v5  ;;  %v11901_v28 = vpop.f32.mrb[142].mxu0  ;;  %v12101_v41 = vpop.f32.mrb[142].mxu1 }
 0x1f8   :  { %v1978_v19 = vmax.f32 %v1622_v26, 0.0  ;;  %v3972_v31 = vmax.f32 %v3616_v30, 0.0  ;;  %v1625_v16 = vadd.f32 %v14537_v54, %v11901_v28  ;;  %v3619_v39 = vadd.f32 %v14537_v54, %v12101_v41  ;;  %v1616_v36 = vpop.f32.mrb[143].mxu0  ;;  %v3610_v24 = vpop.f32.mrb[143].mxu1 }
 0x1f9   :  { %v1976_v34 = vmax.f32 %v1614_v10, 0.0  ;;  %v3970_v33 = vmax.f32 %v3608_v48, 0.0  ;;  %v1617_v5 = vadd.f32 %v14537_v54, %v1616_v36  ;;  %v3611_v27 = vadd.f32 %v14537_v54, %v3610_v24  ;;  %v12812_v36 = vld [vmem:[%s16752_s0 + $0x710] sm:$0xff]   ;;  %v12813_v24 = vld [vmem:[%s16752_s0 + $0xa20] sm:$0xff]  }
 0x1fa   :  { %v14582_v51 = vmax.f32 %v1978_v19, %v3972_v31  ;;  %v1979_v60 = vmax.f32 %v1625_v16, 0.0  ;;  %v3973_v8 = vmax.f32 %v3619_v39, 0.0  ;;  %12211 = vmatmul.mubr.msk.bf16.gmra.mrb[248].mxu0 %vm724_vm0, %v12806_v47  ;;  %12411 = vmatmul.mubr.msk.bf16.gmra.mrb[248].mxu1 %vm724_vm0, %v12807_v12 }
 0x1fb   :  { %v14586_v26 = vmax.f32 %v1976_v34, %v3970_v33  ;;  %v1977_v30 = vmax.f32 %v1617_v5, 0.0  ;;  %v3971_v28 = vmax.f32 %v3611_v27, 0.0  ;;  %12214 = vmatprep.mubr.msk.bf16.mxu0 %vm724_vm0, %v12808_v37  ;;  %12414 = vmatprep.mubr.msk.bf16.mxu1 %vm724_vm0, %v12809_v23  ;;  %v12810_v27 = vld [vmem:[%s16752_s0 + $0x708] sm:$0xff]   ;;  %v12811_v37 = vld [vmem:[%s16752_s0 + $0xa18] sm:$0xff]  }
 0x1fc   :  { %16855 = vst [vmem:[#allocation102_spill] sm:$0xff] %v14582_v51  ;;  %v14590_v10 = vmax.f32 %v1979_v60, %v3973_v8 }
 0x1fd   :  { %16856 = vst [vmem:[#allocation103_spill] sm:$0xff] %v14586_v26  ;;  %v14592_v48 = vmax.f32 %v1977_v30, %v3971_v28  ;;  %v11904_v41 = vpop.f32.mrb[144].mxu0  ;;  %v12104_v19 = vpop.f32.mrb[144].mxu1 }
 0x1fe   :  { %16857 = vst [vmem:[#allocation104_spill] sm:$0xff] %v14590_v10  ;;  %v1638_v31 = vadd.f32 %v14537_v54, %v11904_v41  ;;  %v3632_v47 = vadd.f32 %v14537_v54, %v12104_v19  ;;  %v1629_v16 = vpop.f32.mrb[145].mxu0  ;;  %v3623_v12 = vpop.f32.mrb[145].mxu1 }
 0x1ff   :  { %16858 = vst [vmem:[#allocation105_spill] sm:$0xff] %v14592_v48  ;;  %v1630_v8 = vadd.f32 %v14537_v54, %v1629_v16  ;;  %v3624_v60 = vadd.f32 %v14537_v54, %v3623_v12  ;;  %v11905_v23 = vpop.f32.mrb[146].mxu0  ;;  %v12105_v39 = vpop.f32.mrb[146].mxu1 }
 0x200   :  { %v1982_v34 = vmax.f32 %v1638_v31, 0.0  ;;  %v3976_v33 = vmax.f32 %v3632_v47, 0.0  ;;  %v1641_v5 = vadd.f32 %v14537_v54, %v11905_v23  ;;  %v3635_v30 = vadd.f32 %v14537_v54, %v12105_v39  ;;  %v1632_v28 = vpop.f32.mrb[147].mxu0  ;;  %v3626_v41 = vpop.f32.mrb[147].mxu1 }
 0x201   :  { %v1980_v19 = vmax.f32 %v1630_v8, 0.0  ;;  %v3974_v16 = vmax.f32 %v3624_v60, 0.0  ;;  %v1633_v12 = vadd.f32 %v14537_v54, %v1632_v28  ;;  %v3627_v48 = vadd.f32 %v14537_v54, %v3626_v41  ;;  %v12816_v28 = vld [vmem:[%s16752_s0 + $0x720] sm:$0xff]   ;;  %v12817_v41 = vld [vmem:[%s16752_s0 + $0xa30] sm:$0xff]  }
 0x202   :  { %v14614_v10 = vmax.f32 %v1982_v34, %v3976_v33  ;;  %v1983_v26 = vmax.f32 %v1641_v5, 0.0  ;;  %v3977_v51 = vmax.f32 %v3635_v30, 0.0  ;;  %12215 = vmatmul.mubr.msk.bf16.gmra.mrb[252].mxu0 %vm724_vm0, %v12810_v27  ;;  %12415 = vmatmul.mubr.msk.bf16.gmra.mrb[252].mxu1 %vm724_vm0, %v12811_v37 }
 0x203   :  { %v14618_v31 = vmax.f32 %v1980_v19, %v3974_v16  ;;  %v1981_v47 = vmax.f32 %v1633_v12, 0.0  ;;  %v3975_v23 = vmax.f32 %v3627_v48, 0.0  ;;  %12218 = vmatprep.mubr.msk.bf16.mxu0 %vm724_vm0, %v12812_v36  ;;  %12418 = vmatprep.mubr.msk.bf16.mxu1 %vm724_vm0, %v12813_v24  ;;  %v12814_v48 = vld [vmem:[%s16752_s0 + $0x718] sm:$0xff]   ;;  %v12815_v36 = vld [vmem:[%s16752_s0 + $0xa28] sm:$0xff]  }
 0x204   :  { %16859 = vst [vmem:[#allocation106_spill] sm:$0xff] %v14614_v10  ;;  %v14622_v8 = vmax.f32 %v1983_v26, %v3977_v51 }
 0x205   :  { %16860 = vst [vmem:[#allocation107_spill] sm:$0xff] %v14618_v31  ;;  %v14624_v60 = vmax.f32 %v1981_v47, %v3975_v23  ;;  %v11908_v39 = vpop.f32.mrb[148].mxu0  ;;  %v12108_v34 = vpop.f32.mrb[148].mxu1 }
 0x206   :  { %16861 = vst [vmem:[#allocation108_spill] sm:$0xff] %v14622_v8  ;;  %v1654_v33 = vadd.f32 %v14537_v54, %v11908_v39  ;;  %v3648_v27 = vadd.f32 %v14537_v54, %v12108_v34  ;;  %v1645_v5 = vpop.f32.mrb[149].mxu0  ;;  %v3639_v37 = vpop.f32.mrb[149].mxu1 }
 0x207   :  { %16862 = vst [vmem:[#allocation109_spill] sm:$0xff] %v14624_v60  ;;  %v1646_v51 = vadd.f32 %v14537_v54, %v1645_v5  ;;  %v3640_v26 = vadd.f32 %v14537_v54, %v3639_v37  ;;  %v11909_v24 = vpop.f32.mrb[150].mxu0  ;;  %v12109_v30 = vpop.f32.mrb[150].mxu1 }
 0x208   :  { %v1986_v19 = vmax.f32 %v1654_v33, 0.0  ;;  %v3980_v16 = vmax.f32 %v3648_v27, 0.0  ;;  %v1657_v12 = vadd.f32 %v14537_v54, %v11909_v24  ;;  %v3651_v47 = vadd.f32 %v14537_v54, %v12109_v30  ;;  %v1648_v23 = vpop.f32.mrb[151].mxu0  ;;  %v3642_v39 = vpop.f32.mrb[151].mxu1 }
 0x209   :  { %v1984_v34 = vmax.f32 %v1646_v51, 0.0  ;;  %v3978_v5 = vmax.f32 %v3640_v26, 0.0  ;;  %v1649_v37 = vadd.f32 %v14537_v54, %v1648_v23  ;;  %v3643_v60 = vadd.f32 %v14537_v54, %v3642_v39  ;;  %v12820_v23 = vld [vmem:[%s16752_s0 + $0x730] sm:$0xff]   ;;  %v12821_v39 = vld [vmem:[%s16752_s0 + $0xa40] sm:$0xff]  }
 0x20a   :  { %v14646_v8 = vmax.f32 %v1986_v19, %v3980_v16  ;;  %v1987_v31 = vmax.f32 %v1657_v12, 0.0  ;;  %v3981_v10 = vmax.f32 %v3651_v47, 0.0  ;;  %12219 = vmatmul.mubr.msk.bf16.gmra.mrb[0].mxu0 %vm724_vm0, %v12814_v48  ;;  %12419 = vmatmul.mubr.msk.bf16.gmra.mrb[0].mxu1 %vm724_vm0, %v12815_v36 }
 0x20b   :  { %v14650_v33 = vmax.f32 %v1984_v34, %v3978_v5  ;;  %v1985_v27 = vmax.f32 %v1649_v37, 0.0  ;;  %v3979_v24 = vmax.f32 %v3643_v60, 0.0  ;;  %12222 = vmatprep.mubr.msk.bf16.mxu0 %vm724_vm0, %v12816_v28  ;;  %12422 = vmatprep.mubr.msk.bf16.mxu1 %vm724_vm0, %v12817_v41  ;;  %v12818_v60 = vld [vmem:[%s16752_s0 + $0x728] sm:$0xff]   ;;  %v12819_v28 = vld [vmem:[%s16752_s0 + $0xa38] sm:$0xff]  }
 0x20c   :  { %16863 = vst [vmem:[#allocation110_spill] sm:$0xff] %v14646_v8  ;;  %v14654_v51 = vmax.f32 %v1987_v31, %v3981_v10 }
 0x20d   :  { %16864 = vst [vmem:[#allocation111_spill] sm:$0xff] %v14650_v33  ;;  %v14656_v26 = vmax.f32 %v1985_v27, %v3979_v24  ;;  %v11912_v30 = vpop.f32.mrb[152].mxu0  ;;  %v12112_v19 = vpop.f32.mrb[152].mxu1 }
 0x20e   :  { %16865 = vst [vmem:[#allocation112_spill] sm:$0xff] %v14654_v51  ;;  %v1670_v16 = vadd.f32 %v14537_v54, %v11912_v30  ;;  %v3664_v48 = vadd.f32 %v14537_v54, %v12112_v19  ;;  %v1661_v12 = vpop.f32.mrb[153].mxu0  ;;  %v3655_v36 = vpop.f32.mrb[153].mxu1 }
 0x20f   :  { %16866 = vst [vmem:[#allocation113_spill] sm:$0xff] %v14656_v26  ;;  %v1662_v10 = vadd.f32 %v14537_v54, %v1661_v12  ;;  %v3656_v31 = vadd.f32 %v14537_v54, %v3655_v36  ;;  %v11913_v41 = vpop.f32.mrb[154].mxu0  ;;  %v12113_v47 = vpop.f32.mrb[154].mxu1 }
 0x210   :  { %v1990_v34 = vmax.f32 %v1670_v16, 0.0  ;;  %v3984_v5 = vmax.f32 %v3664_v48, 0.0  ;;  %v1673_v37 = vadd.f32 %v14537_v54, %v11913_v41  ;;  %v3667_v27 = vadd.f32 %v14537_v54, %v12113_v47  ;;  %v1664_v24 = vpop.f32.mrb[155].mxu0  ;;  %v3658_v30 = vpop.f32.mrb[155].mxu1 }
 0x211   :  { %v1988_v19 = vmax.f32 %v1662_v10, 0.0  ;;  %v3982_v12 = vmax.f32 %v3656_v31, 0.0  ;;  %v1665_v36 = vadd.f32 %v14537_v54, %v1664_v24  ;;  %v3659_v26 = vadd.f32 %v14537_v54, %v3658_v30  ;;  %v12824_v24 = vld [vmem:[%s16752_s0 + $0x740] sm:$0xff]   ;;  %v12825_v30 = vld [vmem:[%s16752_s0 + $0xa50] sm:$0xff]  }
 0x212   :  { %v14678_v51 = vmax.f32 %v1990_v34, %v3984_v5  ;;  %v1991_v33 = vmax.f32 %v1673_v37, 0.0  ;;  %v3985_v8 = vmax.f32 %v3667_v27, 0.0  ;;  %12223 = vmatmul.mubr.msk.bf16.gmra.mrb[4].mxu0 %vm724_vm0, %v12818_v60  ;;  %12423 = vmatmul.mubr.msk.bf16.gmra.mrb[4].mxu1 %vm724_vm0, %v12819_v28 }
 0x213   :  { %v14682_v16 = vmax.f32 %v1988_v19, %v3982_v12  ;;  %v1989_v48 = vmax.f32 %v1665_v36, 0.0  ;;  %v3983_v41 = vmax.f32 %v3659_v26, 0.0  ;;  %12226 = vmatprep.mubr.msk.bf16.mxu0 %vm724_vm0, %v12820_v23  ;;  %12426 = vmatprep.mubr.msk.bf16.mxu1 %vm724_vm0, %v12821_v39  ;;  %v12822_v26 = vld [vmem:[%s16752_s0 + $0x738] sm:$0xff]   ;;  %v12823_v23 = vld [vmem:[%s16752_s0 + $0xa48] sm:$0xff]  }
 0x214   :  { %16867 = vst [vmem:[#allocation114_spill] sm:$0xff] %v14678_v51  ;;  %v14686_v10 = vmax.f32 %v1991_v33, %v3985_v8 }
 0x215   :  { %16868 = vst [vmem:[#allocation115_spill] sm:$0xff] %v14682_v16  ;;  %v14688_v31 = vmax.f32 %v1989_v48, %v3983_v41  ;;  %v11916_v47 = vpop.f32.mrb[156].mxu0  ;;  %v12116_v34 = vpop.f32.mrb[156].mxu1 }
 0x216   :  { %16869 = vst [vmem:[#allocation116_spill] sm:$0xff] %v14686_v10  ;;  %v1686_v5 = vadd.f32 %v14537_v54, %v11916_v47  ;;  %v3680_v60 = vadd.f32 %v14537_v54, %v12116_v34  ;;  %v1677_v37 = vpop.f32.mrb[157].mxu0  ;;  %v3671_v28 = vpop.f32.mrb[157].mxu1 }
 0x217   :  { %16870 = vst [vmem:[#allocation117_spill] sm:$0xff] %v14688_v31  ;;  %v1678_v8 = vadd.f32 %v14537_v54, %v1677_v37  ;;  %v3672_v33 = vadd.f32 %v14537_v54, %v3671_v28  ;;  %v11917_v39 = vpop.f32.mrb[158].mxu0  ;;  %v12117_v27 = vpop.f32.mrb[158].mxu1 }
 0x218   :  { %v1994_v19 = vmax.f32 %v1686_v5, 0.0  ;;  %v3988_v12 = vmax.f32 %v3680_v60, 0.0  ;;  %v1689_v36 = vadd.f32 %v14537_v54, %v11917_v39  ;;  %v3683_v48 = vadd.f32 %v14537_v54, %v12117_v27  ;;  %v1680_v41 = vpop.f32.mrb[159].mxu0  ;;  %v3674_v47 = vpop.f32.mrb[159].mxu1 }
 0x219   :  { %v1992_v34 = vmax.f32 %v1678_v8, 0.0  ;;  %v3986_v37 = vmax.f32 %v3672_v33, 0.0  ;;  %v1681_v28 = vadd.f32 %v14537_v54, %v1680_v41  ;;  %v3675_v31 = vadd.f32 %v14537_v54, %v3674_v47  ;;  %v12828_v41 = vld [vmem:[%s16752_s0 + $0x750] sm:$0xff]   ;;  %v12829_v47 = vld [vmem:[%s16752_s0 + $0xa60] sm:$0xff]  }
 0x21a   :  { %v14710_v10 = vmax.f32 %v1994_v19, %v3988_v12  ;;  %v1995_v16 = vmax.f32 %v1689_v36, 0.0  ;;  %v3989_v51 = vmax.f32 %v3683_v48, 0.0  ;;  %12227 = vmatmul.mubr.msk.bf16.gmra.mrb[8].mxu0 %vm724_vm0, %v12822_v26  ;;  %12427 = vmatmul.mubr.msk.bf16.gmra.mrb[8].mxu1 %vm724_vm0, %v12823_v23 }
 0x21b   :  { %v14714_v5 = vmax.f32 %v1992_v34, %v3986_v37  ;;  %v1993_v60 = vmax.f32 %v1681_v28, 0.0  ;;  %v3987_v39 = vmax.f32 %v3675_v31, 0.0  ;;  %12230 = vmatprep.mubr.msk.bf16.mxu0 %vm724_vm0, %v12824_v24  ;;  %12430 = vmatprep.mubr.msk.bf16.mxu1 %vm724_vm0, %v12825_v30  ;;  %v12826_v31 = vld [vmem:[%s16752_s0 + $0x748] sm:$0xff]   ;;  %v12827_v24 = vld [vmem:[%s16752_s0 + $0xa58] sm:$0xff]  }
 0x21c   :  { %16871 = vst [vmem:[#allocation118_spill] sm:$0xff] %v14710_v10  ;;  %v14718_v8 = vmax.f32 %v1995_v16, %v3989_v51 }
 0x21d   :  { %16872 = vst [vmem:[#allocation119_spill] sm:$0xff] %v14714_v5  ;;  %v14720_v33 = vmax.f32 %v1993_v60, %v3987_v39  ;;  %v11920_v27 = vpop.f32.mrb[160].mxu0  ;;  %v12120_v19 = vpop.f32.mrb[160].mxu1 }
 0x21e   :  { %16873 = vst [vmem:[#allocation120_spill] sm:$0xff] %v14718_v8  ;;  %v1702_v12 = vadd.f32 %v14537_v54, %v11920_v27  ;;  %v3696_v26 = vadd.f32 %v14537_v54, %v12120_v19  ;;  %v1693_v36 = vpop.f32.mrb[161].mxu0  ;;  %v3687_v23 = vpop.f32.mrb[161].mxu1 }
 0x21f   :  { %16874 = vst [vmem:[#allocation121_spill] sm:$0xff] %v14720_v33  ;;  %v1694_v51 = vadd.f32 %v14537_v54, %v1693_v36  ;;  %v3688_v16 = vadd.f32 %v14537_v54, %v3687_v23  ;;  %v11921_v30 = vpop.f32.mrb[162].mxu0  ;;  %v12121_v48 = vpop.f32.mrb[162].mxu1 }
 0x220   :  { %v1998_v34 = vmax.f32 %v1702_v12, 0.0  ;;  %v3992_v37 = vmax.f32 %v3696_v26, 0.0  ;;  %v1705_v28 = vadd.f32 %v14537_v54, %v11921_v30  ;;  %v3699_v60 = vadd.f32 %v14537_v54, %v12121_v48  ;;  %v1696_v39 = vpop.f32.mrb[163].mxu0  ;;  %v3690_v27 = vpop.f32.mrb[163].mxu1 }
 0x221   :  { %v1996_v19 = vmax.f32 %v1694_v51, 0.0  ;;  %v3990_v36 = vmax.f32 %v3688_v16, 0.0  ;;  %v1697_v23 = vadd.f32 %v14537_v54, %v1696_v39  ;;  %v3691_v33 = vadd.f32 %v14537_v54, %v3690_v27  ;;  %v12832_v39 = vld [vmem:[%s16752_s0 + $0x760] sm:$0xff]   ;;  %v12833_v27 = vld [vmem:[%s16752_s0 + $0xa70] sm:$0xff]  }
 0x222   :  { %v14742_v8 = vmax.f32 %v1998_v34, %v3992_v37  ;;  %v1999_v5 = vmax.f32 %v1705_v28, 0.0  ;;  %v3993_v10 = vmax.f32 %v3699_v60, 0.0  ;;  %12231 = vmatmul.mubr.msk.bf16.gmra.mrb[12].mxu0 %vm724_vm0, %v12826_v31  ;;  %12431 = vmatmul.mubr.msk.bf16.gmra.mrb[12].mxu1 %vm724_vm0, %v12827_v24 }
 0x223   :  { %v14746_v12 = vmax.f32 %v1996_v19, %v3990_v36  ;;  %v1997_v26 = vmax.f32 %v1697_v23, 0.0  ;;  %v3991_v30 = vmax.f32 %v3691_v33, 0.0  ;;  %12234 = vmatprep.mubr.msk.bf16.mxu0 %vm724_vm0, %v12828_v41  ;;  %12434 = vmatprep.mubr.msk.bf16.mxu1 %vm724_vm0, %v12829_v47  ;;  %v12830_v33 = vld [vmem:[%s16752_s0 + $0x758] sm:$0xff]   ;;  %v12831_v41 = vld [vmem:[%s16752_s0 + $0xa68] sm:$0xff]  }
 0x224   :  { %16875 = vst [vmem:[#allocation122_spill] sm:$0xff] %v14742_v8  ;;  %v14750_v51 = vmax.f32 %v1999_v5, %v3993_v10 }
 0x225   :  { %16876 = vst [vmem:[#allocation123_spill] sm:$0xff] %v14746_v12  ;;  %v14752_v16 = vmax.f32 %v1997_v26, %v3991_v30  ;;  %v11924_v48 = vpop.f32.mrb[164].mxu0  ;;  %v12124_v34 = vpop.f32.mrb[164].mxu1 }
 0x226   :  { %16877 = vst [vmem:[#allocation124_spill] sm:$0xff] %v14750_v51  ;;  %v1718_v37 = vadd.f32 %v14537_v54, %v11924_v48  ;;  %v3712_v31 = vadd.f32 %v14537_v54, %v12124_v34  ;;  %v1709_v28 = vpop.f32.mrb[165].mxu0  ;;  %v3703_v24 = vpop.f32.mrb[165].mxu1 }
 0x227   :  { %16878 = vst [vmem:[#allocation125_spill] sm:$0xff] %v14752_v16  ;;  %v1710_v10 = vadd.f32 %v14537_v54, %v1709_v28  ;;  %v3704_v5 = vadd.f32 %v14537_v54, %v3703_v24  ;;  %v11925_v47 = vpop.f32.mrb[166].mxu0  ;;  %v12125_v60 = vpop.f32.mrb[166].mxu1 }
 0x228   :  { %v2002_v19 = vmax.f32 %v1718_v37, 0.0  ;;  %v3996_v36 = vmax.f32 %v3712_v31, 0.0  ;;  %v1721_v23 = vadd.f32 %v14537_v54, %v11925_v47  ;;  %v3715_v26 = vadd.f32 %v14537_v54, %v12125_v60  ;;  %v1712_v30 = vpop.f32.mrb[167].mxu0  ;;  %v3706_v48 = vpop.f32.mrb[167].mxu1 }
 0x229   :  { %v2000_v34 = vmax.f32 %v1710_v10, 0.0  ;;  %v3994_v28 = vmax.f32 %v3704_v5, 0.0  ;;  %v1713_v24 = vadd.f32 %v14537_v54, %v1712_v30  ;;  %v3707_v16 = vadd.f32 %v14537_v54, %v3706_v48  ;;  %v12836_v30 = vld [vmem:[%s16752_s0 + $0x770] sm:$0xff]   ;;  %v12837_v48 = vld [vmem:[%s16752_s0 + $0xa80] sm:$0xff]  }
 0x22a   :  { %v14774_v51 = vmax.f32 %v2002_v19, %v3996_v36  ;;  %v2003_v12 = vmax.f32 %v1721_v23, 0.0  ;;  %v3997_v8 = vmax.f32 %v3715_v26, 0.0  ;;  %12235 = vmatmul.mubr.msk.bf16.gmra.mrb[16].mxu0 %vm724_vm0, %v12830_v33  ;;  %12435 = vmatmul.mubr.msk.bf16.gmra.mrb[16].mxu1 %vm724_vm0, %v12831_v41 }
 0x22b   :  { %v14778_v37 = vmax.f32 %v2000_v34, %v3994_v28  ;;  %v2001_v31 = vmax.f32 %v1713_v24, 0.0  ;;  %v3995_v47 = vmax.f32 %v3707_v16, 0.0  ;;  %12238 = vmatprep.mubr.msk.bf16.mxu0 %vm724_vm0, %v12832_v39  ;;  %12438 = vmatprep.mubr.msk.bf16.mxu1 %vm724_vm0, %v12833_v27  ;;  %v12834_v16 = vld [vmem:[%s16752_s0 + $0x768] sm:$0xff]   ;;  %v12835_v39 = vld [vmem:[%s16752_s0 + $0xa78] sm:$0xff]  }
 0x22c   :  { %16879 = vst [vmem:[#allocation126_spill] sm:$0xff] %v14774_v51  ;;  %v14782_v10 = vmax.f32 %v2003_v12, %v3997_v8 }
 0x22d   :  { %16880 = vst [vmem:[#allocation127_spill] sm:$0xff] %v14778_v37  ;;  %v14784_v5 = vmax.f32 %v2001_v31, %v3995_v47  ;;  %v11928_v60 = vpop.f32.mrb[168].mxu0  ;;  %v12128_v19 = vpop.f32.mrb[168].mxu1 }
 0x22e   :  { %16881 = vst [vmem:[#allocation128_spill] sm:$0xff] %v14782_v10  ;;  %v1734_v36 = vadd.f32 %v14537_v54, %v11928_v60  ;;  %v3728_v33 = vadd.f32 %v14537_v54, %v12128_v19  ;;  %v1725_v23 = vpop.f32.mrb[169].mxu0  ;;  %v3719_v41 = vpop.f32.mrb[169].mxu1 }
 0x22f   :  { %16882 = vst [vmem:[#allocation129_spill] sm:$0xff] %v14784_v5  ;;  %v1726_v8 = vadd.f32 %v14537_v54, %v1725_v23  ;;  %v3720_v12 = vadd.f32 %v14537_v54, %v3719_v41  ;;  %v11929_v27 = vpop.f32.mrb[170].mxu0  ;;  %v12129_v26 = vpop.f32.mrb[170].mxu1 }
 0x230   :  { %v2006_v34 = vmax.f32 %v1734_v36, 0.0  ;;  %v4000_v28 = vmax.f32 %v3728_v33, 0.0  ;;  %v1737_v24 = vadd.f32 %v14537_v54, %v11929_v27  ;;  %v3731_v31 = vadd.f32 %v14537_v54, %v12129_v26  ;;  %v1728_v47 = vpop.f32.mrb[171].mxu0  ;;  %v3722_v60 = vpop.f32.mrb[171].mxu1 }
 0x231   :  { %v2004_v19 = vmax.f32 %v1726_v8, 0.0  ;;  %v3998_v23 = vmax.f32 %v3720_v12, 0.0  ;;  %v1729_v41 = vadd.f32 %v14537_v54, %v1728_v47  ;;  %v3723_v5 = vadd.f32 %v14537_v54, %v3722_v60  ;;  %v12840_v47 = vld [vmem:[%s16752_s0 + $0x780] sm:$0xff]   ;;  %v12841_v60 = vld [vmem:[%s16752_s0 + $0xa90] sm:$0xff]  }
 0x232   :  { %v14806_v10 = vmax.f32 %v2006_v34, %v4000_v28  ;;  %v2007_v37 = vmax.f32 %v1737_v24, 0.0  ;;  %v4001_v51 = vmax.f32 %v3731_v31, 0.0  ;;  %12239 = vmatmul.mubr.msk.bf16.gmra.mrb[20].mxu0 %vm724_vm0, %v12834_v16  ;;  %12439 = vmatmul.mubr.msk.bf16.gmra.mrb[20].mxu1 %vm724_vm0, %v12835_v39 }
 0x233   :  { %v14810_v36 = vmax.f32 %v2004_v19, %v3998_v23  ;;  %v2005_v33 = vmax.f32 %v1729_v41, 0.0  ;;  %v3999_v27 = vmax.f32 %v3723_v5, 0.0  ;;  %12242 = vmatprep.mubr.msk.bf16.mxu0 %vm724_vm0, %v12836_v30  ;;  %12442 = vmatprep.mubr.msk.bf16.mxu1 %vm724_vm0, %v12837_v48  ;;  %v12838_v5 = vld [vmem:[%s16752_s0 + $0x778] sm:$0xff]   ;;  %v12839_v30 = vld [vmem:[%s16752_s0 + $0xa88] sm:$0xff]  }
 0x234   :  { %16883 = vst [vmem:[#allocation130_spill] sm:$0xff] %v14806_v10  ;;  %v14814_v8 = vmax.f32 %v2007_v37, %v4001_v51 }
 0x235   :  { %16884 = vst [vmem:[#allocation131_spill] sm:$0xff] %v14810_v36  ;;  %v14816_v12 = vmax.f32 %v2005_v33, %v3999_v27  ;;  %v11932_v26 = vpop.f32.mrb[172].mxu0  ;;  %v12132_v34 = vpop.f32.mrb[172].mxu1 }
 0x236   :  { %16885 = vst [vmem:[#allocation132_spill] sm:$0xff] %v14814_v8  ;;  %v1750_v28 = vadd.f32 %v14537_v54, %v11932_v26  ;;  %v3744_v16 = vadd.f32 %v14537_v54, %v12132_v34  ;;  %v1741_v24 = vpop.f32.mrb[173].mxu0  ;;  %v3735_v39 = vpop.f32.mrb[173].mxu1 }
 0x237   :  { %16886 = vst [vmem:[#allocation133_spill] sm:$0xff] %v14816_v12  ;;  %v1742_v51 = vadd.f32 %v14537_v54, %v1741_v24  ;;  %v3736_v37 = vadd.f32 %v14537_v54, %v3735_v39  ;;  %v11933_v48 = vpop.f32.mrb[174].mxu0  ;;  %v12133_v31 = vpop.f32.mrb[174].mxu1 }
 0x238   :  { %v2010_v19 = vmax.f32 %v1750_v28, 0.0  ;;  %v4004_v23 = vmax.f32 %v3744_v16, 0.0  ;;  %v1753_v41 = vadd.f32 %v14537_v54, %v11933_v48  ;;  %v3747_v33 = vadd.f32 %v14537_v54, %v12133_v31  ;;  %v1744_v27 = vpop.f32.mrb[175].mxu0  ;;  %v3738_v26 = vpop.f32.mrb[175].mxu1 }
 0x239   :  { %v2008_v34 = vmax.f32 %v1742_v51, 0.0  ;;  %v4002_v24 = vmax.f32 %v3736_v37, 0.0  ;;  %v1745_v39 = vadd.f32 %v14537_v54, %v1744_v27  ;;  %v3739_v12 = vadd.f32 %v14537_v54, %v3738_v26  ;;  %v12844_v27 = vld [vmem:[%s16752_s0 + $0x790] sm:$0xff]   ;;  %v12845_v26 = vld [vmem:[%s16752_s0 + $0xaa0] sm:$0xff]  }
 0x23a   :  { %v14838_v8 = vmax.f32 %v2010_v19, %v4004_v23  ;;  %v2011_v36 = vmax.f32 %v1753_v41, 0.0  ;;  %v4005_v10 = vmax.f32 %v3747_v33, 0.0  ;;  %12243 = vmatmul.mubr.msk.bf16.gmra.mrb[24].mxu0 %vm724_vm0, %v12838_v5  ;;  %12443 = vmatmul.mubr.msk.bf16.gmra.mrb[24].mxu1 %vm724_vm0, %v12839_v30 }
 0x23b   :  { %v14842_v28 = vmax.f32 %v2008_v34, %v4002_v24  ;;  %v2009_v16 = vmax.f32 %v1745_v39, 0.0  ;;  %v4003_v48 = vmax.f32 %v3739_v12, 0.0  ;;  %12246 = vmatprep.mubr.msk.bf16.mxu0 %vm724_vm0, %v12840_v47  ;;  %12446 = vmatprep.mubr.msk.bf16.mxu1 %vm724_vm0, %v12841_v60  ;;  %v12842_v12 = vld [vmem:[%s16752_s0 + $0x788] sm:$0xff]   ;;  %v12843_v47 = vld [vmem:[%s16752_s0 + $0xa98] sm:$0xff]  }
 0x23c   :  { %16887 = vst [vmem:[#allocation134_spill] sm:$0xff] %v14838_v8  ;;  %v14846_v51 = vmax.f32 %v2011_v36, %v4005_v10 }
 0x23d   :  { %16888 = vst [vmem:[#allocation135_spill] sm:$0xff] %v14842_v28  ;;  %v14848_v37 = vmax.f32 %v2009_v16, %v4003_v48  ;;  %v11936_v31 = vpop.f32.mrb[176].mxu0  ;;  %v12136_v19 = vpop.f32.mrb[176].mxu1 }
 0x23e   :  { %16889 = vst [vmem:[#allocation136_spill] sm:$0xff] %v14846_v51  ;;  %v1766_v23 = vadd.f32 %v14537_v54, %v11936_v31  ;;  %v3760_v5 = vadd.f32 %v14537_v54, %v12136_v19  ;;  %v1757_v41 = vpop.f32.mrb[177].mxu0  ;;  %v3751_v30 = vpop.f32.mrb[177].mxu1 }
 0x23f   :  { %16890 = vst [vmem:[#allocation137_spill] sm:$0xff] %v14848_v37  ;;  %v1758_v10 = vadd.f32 %v14537_v54, %v1757_v41  ;;  %v3752_v36 = vadd.f32 %v14537_v54, %v3751_v30  ;;  %v11937_v60 = vpop.f32.mrb[178].mxu0  ;;  %v12137_v33 = vpop.f32.mrb[178].mxu1 }
 0x240   :  { %v2014_v34 = vmax.f32 %v1766_v23, 0.0  ;;  %v4008_v24 = vmax.f32 %v3760_v5, 0.0  ;;  %v1769_v39 = vadd.f32 %v14537_v54, %v11937_v60  ;;  %v3763_v16 = vadd.f32 %v14537_v54, %v12137_v33  ;;  %v1760_v48 = vpop.f32.mrb[179].mxu0  ;;  %v3754_v31 = vpop.f32.mrb[179].mxu1 }
 0x241   :  { %v2012_v19 = vmax.f32 %v1758_v10, 0.0  ;;  %v4006_v41 = vmax.f32 %v3752_v36, 0.0  ;;  %v1761_v30 = vadd.f32 %v14537_v54, %v1760_v48  ;;  %v3755_v37 = vadd.f32 %v14537_v54, %v3754_v31  ;;  %v12848_v48 = vld [vmem:[%s16752_s0 + $0x7a0] sm:$0xff]   ;;  %v12849_v31 = vld [vmem:[%s16752_s0 + $0xab0] sm:$0xff]  }
 0x242   :  { %v14870_v51 = vmax.f32 %v2014_v34, %v4008_v24  ;;  %v2015_v28 = vmax.f32 %v1769_v39, 0.0  ;;  %v4009_v8 = vmax.f32 %v3763_v16, 0.0  ;;  %12247 = vmatmul.mubr.msk.bf16.gmra.mrb[28].mxu0 %vm724_vm0, %v12842_v12  ;;  %12447 = vmatmul.mubr.msk.bf16.gmra.mrb[28].mxu1 %vm724_vm0, %v12843_v47 }
 0x243   :  { %v14874_v23 = vmax.f32 %v2012_v19, %v4006_v41  ;;  %v2013_v5 = vmax.f32 %v1761_v30, 0.0  ;;  %v4007_v60 = vmax.f32 %v3755_v37, 0.0  ;;  %12250 = vmatprep.mubr.msk.bf16.mxu0 %vm724_vm0, %v12844_v27  ;;  %12450 = vmatprep.mubr.msk.bf16.mxu1 %vm724_vm0, %v12845_v26  ;;  %v12846_v37 = vld [vmem:[%s16752_s0 + $0x798] sm:$0xff]   ;;  %v12847_v27 = vld [vmem:[%s16752_s0 + $0xaa8] sm:$0xff]  }
 0x244   :  { %16891 = vst [vmem:[#allocation138_spill] sm:$0xff] %v14870_v51  ;;  %v14878_v10 = vmax.f32 %v2015_v28, %v4009_v8 }
 0x245   :  { %16892 = vst [vmem:[#allocation139_spill] sm:$0xff] %v14874_v23  ;;  %v14880_v36 = vmax.f32 %v2013_v5, %v4007_v60  ;;  %v11940_v33 = vpop.f32.mrb[180].mxu0  ;;  %v12140_v34 = vpop.f32.mrb[180].mxu1 }
 0x246   :  { %16893 = vst [vmem:[#allocation140_spill] sm:$0xff] %v14878_v10  ;;  %v1782_v24 = vadd.f32 %v14537_v54, %v11940_v33  ;;  %v3776_v12 = vadd.f32 %v14537_v54, %v12140_v34  ;;  %v1773_v39 = vpop.f32.mrb[181].mxu0  ;;  %v3767_v47 = vpop.f32.mrb[181].mxu1 }
 0x247   :  { %16894 = vst [vmem:[#allocation141_spill] sm:$0xff] %v14880_v36  ;;  %v1774_v8 = vadd.f32 %v14537_v54, %v1773_v39  ;;  %v3768_v28 = vadd.f32 %v14537_v54, %v3767_v47  ;;  %v11941_v26 = vpop.f32.mrb[182].mxu0  ;;  %v12141_v16 = vpop.f32.mrb[182].mxu1 }
 0x248   :  { %v2018_v19 = vmax.f32 %v1782_v24, 0.0  ;;  %v4012_v41 = vmax.f32 %v3776_v12, 0.0  ;;  %v1785_v30 = vadd.f32 %v14537_v54, %v11941_v26  ;;  %v3779_v5 = vadd.f32 %v14537_v54, %v12141_v16  ;;  %v1776_v60 = vpop.f32.mrb[183].mxu0  ;;  %v3770_v33 = vpop.f32.mrb[183].mxu1 }
 0x249   :  { %v2016_v34 = vmax.f32 %v1774_v8, 0.0  ;;  %v4010_v39 = vmax.f32 %v3768_v28, 0.0  ;;  %v1777_v47 = vadd.f32 %v14537_v54, %v1776_v60  ;;  %v3771_v36 = vadd.f32 %v14537_v54, %v3770_v33  ;;  %v12852_v60 = vld [vmem:[%s16752_s0 + $0x7b0] sm:$0xff]   ;;  %v12853_v33 = vld [vmem:[%s16752_s0 + $0xac0] sm:$0xff]  }
 0x24a   :  { %v14902_v10 = vmax.f32 %v2018_v19, %v4012_v41  ;;  %v2019_v23 = vmax.f32 %v1785_v30, 0.0  ;;  %v4013_v51 = vmax.f32 %v3779_v5, 0.0  ;;  %12251 = vmatmul.mubr.msk.bf16.gmra.mrb[32].mxu0 %vm724_vm0, %v12846_v37  ;;  %12451 = vmatmul.mubr.msk.bf16.gmra.mrb[32].mxu1 %vm724_vm0, %v12847_v27 }
 0x24b   :  { %v14906_v24 = vmax.f32 %v2016_v34, %v4010_v39  ;;  %v2017_v12 = vmax.f32 %v1777_v47, 0.0  ;;  %v4011_v26 = vmax.f32 %v3771_v36, 0.0  ;;  %12254 = vmatprep.mubr.msk.bf16.mxu0 %vm724_vm0, %v12848_v48  ;;  %12454 = vmatprep.mubr.msk.bf16.mxu1 %vm724_vm0, %v12849_v31  ;;  %v12850_v36 = vld [vmem:[%s16752_s0 + $0x7a8] sm:$0xff]   ;;  %v12851_v48 = vld [vmem:[%s16752_s0 + $0xab8] sm:$0xff]  }
 0x24c   :  { %16895 = vst [vmem:[#allocation142_spill] sm:$0xff] %v14902_v10  ;;  %v14910_v8 = vmax.f32 %v2019_v23, %v4013_v51 }
 0x24d   :  { %16896 = vst [vmem:[#allocation143_spill] sm:$0xff] %v14906_v24  ;;  %v14912_v28 = vmax.f32 %v2017_v12, %v4011_v26  ;;  %v11944_v16 = vpop.f32.mrb[184].mxu0  ;;  %v12144_v19 = vpop.f32.mrb[184].mxu1 }
 0x24e   :  { %16897 = vst [vmem:[#allocation144_spill] sm:$0xff] %v14910_v8  ;;  %v1798_v41 = vadd.f32 %v14537_v54, %v11944_v16  ;;  %v3792_v37 = vadd.f32 %v14537_v54, %v12144_v19  ;;  %v1789_v30 = vpop.f32.mrb[185].mxu0  ;;  %v3783_v27 = vpop.f32.mrb[185].mxu1 }
 0x24f   :  { %16898 = vst [vmem:[#allocation145_spill] sm:$0xff] %v14912_v28  ;;  %v1790_v51 = vadd.f32 %v14537_v54, %v1789_v30  ;;  %v3784_v23 = vadd.f32 %v14537_v54, %v3783_v27  ;;  %v11945_v31 = vpop.f32.mrb[186].mxu0  ;;  %v12145_v5 = vpop.f32.mrb[186].mxu1 }
 0x250   :  { %v2022_v34 = vmax.f32 %v1798_v41, 0.0  ;;  %v4016_v39 = vmax.f32 %v3792_v37, 0.0  ;;  %v1801_v47 = vadd.f32 %v14537_v54, %v11945_v31  ;;  %v3795_v12 = vadd.f32 %v14537_v54, %v12145_v5  ;;  %v1792_v26 = vpop.f32.mrb[187].mxu0  ;;  %v3786_v16 = vpop.f32.mrb[187].mxu1 }
 0x251   :  { %v2020_v19 = vmax.f32 %v1790_v51, 0.0  ;;  %v4014_v30 = vmax.f32 %v3784_v23, 0.0  ;;  %v1793_v27 = vadd.f32 %v14537_v54, %v1792_v26  ;;  %v3787_v28 = vadd.f32 %v14537_v54, %v3786_v16  ;;  %v12856_v26 = vld [vmem:[%s16752_s0 + $0x7c0] sm:$0xff]   ;;  %v12857_v16 = vld [vmem:[%s16752_s0 + $0xad0] sm:$0xff]  }
 0x252   :  { %v14934_v8 = vmax.f32 %v2022_v34, %v4016_v39  ;;  %v2023_v24 = vmax.f32 %v1801_v47, 0.0  ;;  %v4017_v10 = vmax.f32 %v3795_v12, 0.0  ;;  %12255 = vmatmul.mubr.msk.bf16.gmra.mrb[36].mxu0 %vm724_vm0, %v12850_v36  ;;  %12455 = vmatmul.mubr.msk.bf16.gmra.mrb[36].mxu1 %vm724_vm0, %v12851_v48 }
 0x253   :  { %v14938_v41 = vmax.f32 %v2020_v19, %v4014_v30  ;;  %v2021_v37 = vmax.f32 %v1793_v27, 0.0  ;;  %v4015_v31 = vmax.f32 %v3787_v28, 0.0  ;;  %12258 = vmatprep.mubr.msk.bf16.mxu0 %vm724_vm0, %v12852_v60  ;;  %12458 = vmatprep.mubr.msk.bf16.mxu1 %vm724_vm0, %v12853_v33  ;;  %v12854_v28 = vld [vmem:[%s16752_s0 + $0x7b8] sm:$0xff]   ;;  %v12855_v60 = vld [vmem:[%s16752_s0 + $0xac8] sm:$0xff]  }
 0x254   :  { %16899 = vst [vmem:[#allocation146_spill] sm:$0xff] %v14934_v8  ;;  %v14942_v51 = vmax.f32 %v2023_v24, %v4017_v10 }
 0x255   :  { %16900 = vst [vmem:[#allocation147_spill] sm:$0xff] %v14938_v41  ;;  %v14944_v23 = vmax.f32 %v2021_v37, %v4015_v31  ;;  %v11948_v5 = vpop.f32.mrb[188].mxu0  ;;  %v12148_v34 = vpop.f32.mrb[188].mxu1 }
 0x256   :  { %16901 = vst [vmem:[#allocation148_spill] sm:$0xff] %v14942_v51  ;;  %v1814_v39 = vadd.f32 %v14537_v54, %v11948_v5  ;;  %v3808_v36 = vadd.f32 %v14537_v54, %v12148_v34  ;;  %v1805_v47 = vpop.f32.mrb[189].mxu0  ;;  %v3799_v48 = vpop.f32.mrb[189].mxu1 }
 0x257   :  { %16902 = vst [vmem:[#allocation149_spill] sm:$0xff] %v14944_v23  ;;  %v1806_v10 = vadd.f32 %v14537_v54, %v1805_v47  ;;  %v3800_v24 = vadd.f32 %v14537_v54, %v3799_v48  ;;  %v11949_v33 = vpop.f32.mrb[190].mxu0  ;;  %v12149_v12 = vpop.f32.mrb[190].mxu1 }
 0x258   :  { %v2026_v19 = vmax.f32 %v1814_v39, 0.0  ;;  %v4020_v30 = vmax.f32 %v3808_v36, 0.0  ;;  %v1817_v27 = vadd.f32 %v14537_v54, %v11949_v33  ;;  %v3811_v37 = vadd.f32 %v14537_v54, %v12149_v12  ;;  %v1808_v31 = vpop.f32.mrb[191].mxu0  ;;  %v3802_v5 = vpop.f32.mrb[191].mxu1 }
 0x259   :  { %v2024_v34 = vmax.f32 %v1806_v10, 0.0  ;;  %v4018_v47 = vmax.f32 %v3800_v24, 0.0  ;;  %v1809_v48 = vadd.f32 %v14537_v54, %v1808_v31  ;;  %v3803_v23 = vadd.f32 %v14537_v54, %v3802_v5  ;;  %v12860_v31 = vld [vmem:[%s16752_s0 + $0x7d0] sm:$0xff]   ;;  %v12861_v5 = vld [vmem:[%s16752_s0 + $0xae0] sm:$0xff]  }
 0x25a   :  { %v14966_v51 = vmax.f32 %v2026_v19, %v4020_v30  ;;  %v2027_v41 = vmax.f32 %v1817_v27, 0.0  ;;  %v4021_v8 = vmax.f32 %v3811_v37, 0.0  ;;  %12259 = vmatmul.mubr.msk.bf16.gmra.mrb[40].mxu0 %vm724_vm0, %v12854_v28  ;;  %12459 = vmatmul.mubr.msk.bf16.gmra.mrb[40].mxu1 %vm724_vm0, %v12855_v60 }
 0x25b   :  { %v14970_v39 = vmax.f32 %v2024_v34, %v4018_v47  ;;  %v2025_v36 = vmax.f32 %v1809_v48, 0.0  ;;  %v4019_v33 = vmax.f32 %v3803_v23, 0.0  ;;  %12262 = vmatprep.mubr.msk.bf16.mxu0 %vm724_vm0, %v12856_v26  ;;  %12462 = vmatprep.mubr.msk.bf16.mxu1 %vm724_vm0, %v12857_v16  ;;  %v12858_v23 = vld [vmem:[%s16752_s0 + $0x7c8] sm:$0xff]   ;;  %v12859_v26 = vld [vmem:[%s16752_s0 + $0xad8] sm:$0xff]  }
 0x25c   :  { %v14974_v10 = vmax.f32 %v2027_v41, %v4021_v8 }
 0x25d   :  { %16903 = vst [vmem:[#allocation150_spill] sm:$0xff] %v14970_v39  ;;  %v14976_v24 = vmax.f32 %v2025_v36, %v4019_v33  ;;  %v11952_v12 = vpop.f32.mrb[192].mxu0  ;;  %v12152_v19 = vpop.f32.mrb[192].mxu1  ;;  %v14998_v36 = vld [vmem:[%s16753_s2] ss:$0 sm:$0xff] }
 0x25e   :  { %16904 = vst [vmem:[#allocation151_spill] sm:$0xff] %v14974_v10  ;;  %v1830_v30 = vadd.f32 %v14537_v54, %v11952_v12  ;;  %v3824_v28 = vadd.f32 %v14537_v54, %v12152_v19  ;;  %v1821_v27 = vpop.f32.mrb[193].mxu0  ;;  %v3815_v60 = vpop.f32.mrb[193].mxu1 }
 0x25f   :  { %16905 = vst [vmem:[#allocation152_spill] sm:$0xff] %v14976_v24  ;;  %v1822_v8 = vadd.f32 %v14537_v54, %v1821_v27  ;;  %v3816_v41 = vadd.f32 %v14537_v54, %v3815_v60  ;;  %v11953_v16 = vpop.f32.mrb[194].mxu0  ;;  %v12153_v37 = vpop.f32.mrb[194].mxu1 }
 0x260   :  { %v2030_v34 = vmax.f32 %v1830_v30, 0.0  ;;  %v4024_v47 = vmax.f32 %v3824_v28, 0.0  ;;  %v1833_v48 = vadd.f32 %v14537_v54, %v11953_v16  ;;  %v3827_v33 = vadd.f32 %v14998_v36, %v12153_v37  ;;  %v1824_v12 = vpop.f32.mrb[195].mxu0  ;;  %v3818_v19 = vpop.f32.mrb[195].mxu1 }
 0x261   :  { %v2028_v27 = vmax.f32 %v1822_v8, 0.0  ;;  %v4022_v60 = vmax.f32 %v3816_v41, 0.0  ;;  %v1825_v24 = vadd.f32 %v14998_v36, %v1824_v12  ;;  %v3819_v10 = vadd.f32 %v14998_v36, %v3818_v19 }
 0x262   :  { %v15003_v39 = vmax.f32 %v2030_v34, %v4024_v47  ;;  %v2031_v30 = vmax.f32 %v1833_v48, 0.0  ;;  %v4025_v28 = vmax.f32 %v3827_v33, 0.0  ;;  %12263 = vmatmul.mubr.msk.bf16.gmra.mrb[44].mxu0 %vm724_vm0, %v12858_v23  ;;  %12463 = vmatmul.mubr.msk.bf16.gmra.mrb[44].mxu1 %vm724_vm0, %v12859_v26 }
 0x263   :  { %v15007_v54 = vmax.f32 %v2028_v27, %v4022_v60  ;;  %v2029_v16 = vmax.f32 %v1825_v24, 0.0  ;;  %v4023_v37 = vmax.f32 %v3819_v10, 0.0  ;;  %12266 = vmatprep.mubr.msk.bf16.mxu0 %vm724_vm0, %v12860_v31  ;;  %12466 = vmatprep.mubr.msk.bf16.mxu1 %vm724_vm0, %v12861_v5  ;;  %v12862_v10 = vld [vmem:[%s16752_s0 + $0x7d8] sm:$0xff]   ;;  %v12863_v24 = vld [vmem:[%s16752_s0 + $0xae8] sm:$0xff]   ;;  %v12864_v27 = vld [vmem:[%s16752_s0 + $0x7e0] sm:$0xff]  }
 0x264   :  { %16906 = vst [vmem:[#allocation153_spill] sm:$0xff] %v15003_v39  ;;  %v15011_v8 = vmax.f32 %v2031_v30, %v4025_v28  ;;  %v12865_v60 = vld [vmem:[%s16752_s0 + $0xaf0] sm:$0xff]  }
 0x265   :  { %16907 = vst [vmem:[#allocation154_spill] sm:$0xff] %v15007_v54  ;;  %v15013_v41 = vmax.f32 %v2029_v16, %v4023_v37  ;;  %v12160_v34 = vpop.f32.mrb[196].mxu0  ;;  %v12360_v47 = vpop.f32.mrb[196].mxu1 }
 0x266   :  { %16908 = vst [vmem:[#allocation155_spill] sm:$0xff] %v15011_v8  ;;  %v5246_v48 = vadd.f32 %v14998_v36, %v12160_v34  ;;  %v7436_v23 = vadd.f32 %v14998_v36, %v12360_v47  ;;  %v5237_v33 = vpop.f32.mrb[197].mxu0  ;;  %v7427_v26 = vpop.f32.mrb[197].mxu1 }
 0x267   :  { %16909 = vst [vmem:[#allocation156_spill] sm:$0xff] %v15013_v41  ;;  %v5238_v31 = vadd.f32 %v14998_v36, %v5237_v33  ;;  %v7428_v5 = vadd.f32 %v14998_v36, %v7427_v26  ;;  %v12161_v12 = vpop.f32.mrb[198].mxu0  ;;  %v12361_v19 = vpop.f32.mrb[198].mxu1 }
 0x268   :  { %v6022_v30 = vmax.f32 %v5246_v48, 0.0  ;;  %v8212_v28 = vmax.f32 %v7436_v23, 0.0  ;;  %v5249_v16 = vadd.f32 %v14998_v36, %v12161_v12  ;;  %v7439_v37 = vadd.f32 %v14998_v36, %v12361_v19  ;;  %v5240_v34 = vpop.f32.mrb[199].mxu0  ;;  %v7430_v47 = vpop.f32.mrb[199].mxu1 }
 0x269   :  { %v6020_v33 = vmax.f32 %v5238_v31, 0.0  ;;  %v8210_v26 = vmax.f32 %v7428_v5, 0.0  ;;  %v5241_v41 = vadd.f32 %v14998_v36, %v5240_v34  ;;  %v7431_v8 = vadd.f32 %v14998_v36, %v7430_v47 }
 0x26a   :  { %v6218_v54 = vmax.f32 %v13449_v11, %v6022_v30  ;;  %v6023_v39 = vmax.f32 %v5249_v16, 0.0  ;;  %12267 = vmatmul.mubr.msk.bf16.gmra.mrb[48].mxu0 %vm724_vm0, %v12862_v10  ;;  %12467 = vmatmul.mubr.msk.bf16.gmra.mrb[48].mxu1 %vm724_vm0, %v12863_v24  ;;  %v8213_v12 = vmax.f32 %v7439_v37, 0.0 }
 0x26b   :  { %v6216_v48 = vmax.f32 %v13453_v14, %v6020_v33  ;;  %v6021_v23 = vmax.f32 %v5241_v41, 0.0  ;;  %12270 = vmatprep.mubr.msk.bf16.mxu0 %vm724_vm0, %v12864_v27  ;;  %12470 = vmatprep.mubr.msk.bf16.mxu1 %vm724_vm0, %v12865_v60  ;;  %v8211_v30 = vmax.f32 %v7431_v8, 0.0  ;;  %v12868_v33 = vld [vmem:[%s16752_s0 + $0x7f0] sm:$0xff]  }
 0x26c   :  { %v8408_v31 = vmax.f32 %v6218_v54, %v8212_v28  ;;  %v6219_v5 = vmax.f32 %v13461_v17, %v6023_v39  ;;  %v12866_v17 = vld [vmem:[%s16752_s0 + $0x7e8] sm:$0xff]   ;;  %v12867_v39 = vld [vmem:[%s16752_s0 + $0xaf8] sm:$0xff]  }
 0x26d   :  { %v8406_v19 = vmax.f32 %v6216_v48, %v8210_v26  ;;  %v6217_v11 = vmax.f32 %v13463_v20, %v6021_v23  ;;  %v12164_v16 = vpop.f32.mrb[200].mxu0  ;;  %v12364_v10 = vpop.f32.mrb[200].mxu1  ;;  %v12869_v26 = vld [vmem:[%s16752_s0 + $0xb00] sm:$0xff]  }
 0x26e   :  { %v11160_v34 = vpack.c.bf16 %v8408_v31, %v8408_v31  ;;  %v8409_v24 = vmax.f32 %v6219_v5, %v8213_v12  ;;  %v5262_v14 = vadd.f32 %v14998_v36, %v12164_v16  ;;  %v7452_v41 = vadd.f32 %v14998_v36, %v12364_v10  ;;  %v5253_v27 = vpop.f32.mrb[201].mxu0  ;;  %v7443_v47 = vpop.f32.mrb[201].mxu1 }
 0x26f   :  { %v11158_v20 = vpack.c.bf16 %v8406_v19, %v8406_v19  ;;  %v8407_v54 = vmax.f32 %v6217_v11, %v8211_v30  ;;  %v5254_v8 = vadd.f32 %v14998_v36, %v5253_v27  ;;  %v7444_v60 = vadd.f32 %v14998_v36, %v7443_v47  ;;  %v12165_v28 = vpop.f32.mrb[202].mxu0  ;;  %v12365_v37 = vpop.f32.mrb[202].mxu1 }
 0x270   :  { %9389 = vst.msk [vmem:[%s16754_s3 + $0x8] sm:$0xf] %vm9386_vm1, %v11160_v34  ;;  %v11161_v48 = vpack.c.bf16 %v8409_v24, %v8409_v24  ;;  %v6026_v23 = vmax.f32 %v5262_v14, 0.0  ;;  %v8216_v31 = vmax.f32 %v7452_v41, 0.0  ;;  %v5265_v5 = vadd.f32 %v14998_v36, %v12165_v28  ;;  %v5256_v12 = vpop.f32.mrb[203].mxu0  ;;  %v7446_v19 = vpop.f32.mrb[203].mxu1 }
 0x271   :  { %9387 = vst.msk [vmem:[%s16754_s3] sm:$0xf] %vm9386_vm1, %v11158_v20  ;;  %v11159_v11 = vpack.c.bf16 %v8407_v54, %v8407_v54  ;;  %v6024_v30 = vmax.f32 %v5254_v8, 0.0  ;;  %v8214_v16 = vmax.f32 %v7444_v60, 0.0  ;;  %v7455_v10 = vadd.f32 %v14998_v36, %v12365_v37 }
 0x272   :  { %9390 = vst.msk [vmem:[%s16754_s3 + $0xc] sm:$0xf] %vm9386_vm1, %v11161_v48  ;;  %v6222_v34 = vmax.f32 %v13481_v43, %v6026_v23  ;;  %v6027_v24 = vmax.f32 %v5265_v5, 0.0  ;;  %v5257_v14 = vadd.f32 %v14998_v36, %v5256_v12  ;;  %v7447_v41 = vadd.f32 %v14998_v36, %v7446_v19  ;;  %12271 = vmatmul.mubr.msk.bf16.gmra.mrb[52].mxu0 %vm724_vm0, %v12866_v17 }
 0x273   :  { %12471 = vmatmul.mubr.msk.bf16.gmra.mrb[52].mxu1 %vm724_vm0, %v12867_v39  ;;  %9388 = vst.msk [vmem:[%s16754_s3 + $0x4] sm:$0xf] %vm9386_vm1, %v11159_v11  ;;  %v6220_v27 = vmax.f32 %v13485_v46, %v6024_v30  ;;  %12274 = vmatprep.mubr.msk.bf16.mxu0 %vm724_vm0, %v12868_v33  ;;  %v8217_v20 = vmax.f32 %v7455_v10, 0.0  ;;  %v12870_v33 = vld [vmem:[%s16752_s0 + $0x7f8] sm:$0xff]   ;;  %v12872_v30 = vld [vmem:[%s16752_s0 + $0x800] sm:$0xff]  }
 0x274   :  { %12474 = vmatprep.mubr.msk.bf16.mxu1 %vm724_vm0, %v12869_v26  ;;  %v8412_v43 = vmax.f32 %v6222_v34, %v8216_v31  ;;  %v6223_v47 = vmax.f32 %v13493_v50, %v6027_v24  ;;  %v6025_v54 = vmax.f32 %v5257_v14, 0.0  ;;  %v8215_v17 = vmax.f32 %v7447_v41, 0.0  ;;  %v12871_v50 = vld [vmem:[%s16752_s0 + $0xb08] sm:$0xff]  }
 0x275   :  { %v8410_v8 = vmax.f32 %v6220_v27, %v8214_v16  ;;  %v12168_v60 = vpop.f32.mrb[204].mxu0  ;;  %v12368_v39 = vpop.f32.mrb[204].mxu1  ;;  %v12873_v16 = vld [vmem:[%s16752_s0 + $0xb10] sm:$0xff]  }
 0x276   :  { %v11164_v28 = vpack.c.bf16 %v8412_v43, %v8412_v43  ;;  %v8413_v37 = vmax.f32 %v6223_v47, %v8217_v20  ;;  %v6221_v48 = vmax.f32 %v13495_v53, %v6025_v54  ;;  %v5278_v23 = vadd.f32 %v14998_v36, %v12168_v60  ;;  %v5269_v46 = vpop.f32.mrb[205].mxu0  ;;  %v7459_v5 = vpop.f32.mrb[205].mxu1 }
 0x277   :  { %v11162_v26 = vpack.c.bf16 %v8410_v8, %v8410_v8  ;;  %v7468_v31 = vadd.f32 %v14998_v36, %v12368_v39  ;;  %v5270_v12 = vadd.f32 %v14998_v36, %v5269_v46  ;;  %v7460_v19 = vadd.f32 %v14998_v36, %v7459_v5  ;;  %v12169_v53 = vpop.f32.mrb[206].mxu0  ;;  %v12369_v11 = vpop.f32.mrb[206].mxu1 }
 0x278   :  { %9393 = vst.msk [vmem:[%s16754_s3 + $0x18] sm:$0xf] %vm9386_vm1, %v11164_v28  ;;  %v11165_v10 = vpack.c.bf16 %v8413_v37, %v8413_v37  ;;  %v8411_v34 = vmax.f32 %v6221_v48, %v8215_v17  ;;  %v6030_v24 = vmax.f32 %v5278_v23, 0.0  ;;  %v5281_v14 = vadd.f32 %v14998_v36, %v12169_v53  ;;  %v5272_v41 = vpop.f32.mrb[207].mxu0  ;;  %v7462_v27 = vpop.f32.mrb[207].mxu1 }
 0x279   :  { %9391 = vst.msk [vmem:[%s16754_s3 + $0x10] sm:$0xf] %vm9386_vm1, %v11162_v26  ;;  %v8220_v43 = vmax.f32 %v7468_v31, 0.0  ;;  %v6028_v47 = vmax.f32 %v5270_v12, 0.0  ;;  %v8218_v20 = vmax.f32 %v7460_v19, 0.0  ;;  %v7471_v54 = vadd.f32 %v14998_v36, %v12369_v11 }
 0x27a   :  { %9394 = vst.msk [vmem:[%s16754_s3 + $0x1c] sm:$0xf] %vm9386_vm1, %v11165_v10  ;;  %v11163_v8 = vpack.c.bf16 %v8411_v34, %v8411_v34  ;;  %v6226_v17 = vmax.f32 %v13513_v13, %v6030_v24  ;;  %v6031_v60 = vmax.f32 %v5281_v14, 0.0  ;;  %v5273_v39 = vadd.f32 %v14998_v36, %v5272_v41  ;;  %12275 = vmatmul.mubr.msk.bf16.gmra.mrb[56].mxu0 %vm724_vm0, %v12870_v33  ;;  %v12876_v41 = vld [vmem:[%s16752_s0 + $0x810] sm:$0xff]  }
 0x27b   :  { %12475 = vmatmul.mubr.msk.bf16.gmra.mrb[56].mxu1 %vm724_vm0, %v12871_v50  ;;  %v6224_v28 = vmax.f32 %v13517_v18, %v6028_v47  ;;  %v7463_v37 = vadd.f32 %v14998_v36, %v7462_v27  ;;  %12278 = vmatprep.mubr.msk.bf16.mxu0 %vm724_vm0, %v12872_v30  ;;  %v8221_v23 = vmax.f32 %v7471_v54, 0.0  ;;  %v12874_v30 = vld [vmem:[%s16752_s0 + $0x808] sm:$0xff]   ;;  %v12877_v27 = vld [vmem:[%s16752_s0 + $0xb20] sm:$0xff]  }
 0x27c   :  { %12478 = vmatprep.mubr.msk.bf16.mxu1 %vm724_vm0, %v12873_v16  ;;  %9392 = vst.msk [vmem:[%s16754_s3 + $0x14] sm:$0xf] %vm9386_vm1, %v11163_v8  ;;  %v8416_v13 = vmax.f32 %v6226_v17, %v8220_v43  ;;  %v6227_v48 = vmax.f32 %v13525_v22, %v6031_v60  ;;  %v6029_v46 = vmax.f32 %v5273_v39, 0.0  ;;  %v12875_v22 = vld [vmem:[%s16752_s0 + $0xb18] sm:$0xff]  }
 0x27d   :  { %v8414_v5 = vmax.f32 %v6224_v28, %v8218_v20  ;;  %v8219_v33 = vmax.f32 %v7463_v37, 0.0  ;;  %v12172_v50 = vpop.f32.mrb[208].mxu0  ;;  %v12372_v18 = vpop.f32.mrb[208].mxu1 }
 0x27e   :  { %v11168_v26 = vpack.c.bf16 %v8416_v13, %v8416_v13  ;;  %v8417_v31 = vmax.f32 %v6227_v48, %v8221_v23  ;;  %v6225_v12 = vmax.f32 %v13527_v25, %v6029_v46  ;;  %v5294_v19 = vadd.f32 %v14998_v36, %v12172_v50  ;;  %v5285_v53 = vpop.f32.mrb[209].mxu0  ;;  %v7475_v11 = vpop.f32.mrb[209].mxu1 }
 0x27f   :  { %v11166_v16 = vpack.c.bf16 %v8414_v5, %v8414_v5  ;;  %v7484_v10 = vadd.f32 %v14998_v36, %v12372_v18  ;;  %v5286_v34 = vadd.f32 %v14998_v36, %v5285_v53  ;;  %v7476_v24 = vadd.f32 %v14998_v36, %v7475_v11  ;;  %v12173_v25 = vpop.f32.mrb[210].mxu0  ;;  %v12373_v14 = vpop.f32.mrb[210].mxu1 }
 0x280   :  { %9397 = vst.msk [vmem:[%s16754_s3 + $0x28] sm:$0xf] %vm9386_vm1, %v11168_v26  ;;  %v11169_v43 = vpack.c.bf16 %v8417_v31, %v8417_v31  ;;  %v8415_v47 = vmax.f32 %v6225_v12, %v8219_v33  ;;  %v6034_v20 = vmax.f32 %v5294_v19, 0.0  ;;  %v5297_v54 = vadd.f32 %v14998_v36, %v12173_v25  ;;  %v5288_v8 = vpop.f32.mrb[211].mxu0  ;;  %v7478_v17 = vpop.f32.mrb[211].mxu1 }
 0x281   :  { %9395 = vst.msk [vmem:[%s16754_s3 + $0x20] sm:$0xf] %vm9386_vm1, %v11166_v16  ;;  %v8224_v60 = vmax.f32 %v7484_v10, 0.0  ;;  %v6032_v39 = vmax.f32 %v5286_v34, 0.0  ;;  %v8222_v28 = vmax.f32 %v7476_v24, 0.0  ;;  %v7487_v37 = vadd.f32 %v14998_v36, %v12373_v14  ;;  %v12878_v34 = vld [vmem:[%s16752_s0 + $0x818] sm:$0xff]  }
 0x282   :  { %9398 = vst.msk [vmem:[%s16754_s3 + $0x2c] sm:$0xf] %vm9386_vm1, %v11169_v43  ;;  %v11167_v13 = vpack.c.bf16 %v8415_v47, %v8415_v47  ;;  %v6230_v48 = vmax.f32 %v13545_v52, %v6034_v20  ;;  %v6035_v23 = vmax.f32 %v5297_v54, 0.0  ;;  %v5289_v46 = vadd.f32 %v14998_v36, %v5288_v8  ;;  %12279 = vmatmul.mubr.msk.bf16.gmra.mrb[60].mxu0 %vm724_vm0, %v12874_v30  ;;  %v12880_v43 = vld [vmem:[%s16752_s0 + $0x820] sm:$0xff]   ;;  %v12881_v47 = vld [vmem:[%s16752_s0 + $0xb30] sm:$0xff]  }
 0x283   :  { %12479 = vmatmul.mubr.msk.bf16.gmra.mrb[60].mxu1 %vm724_vm0, %v12875_v22  ;;  %v6228_v5 = vmax.f32 %v13549_v56, %v6032_v39  ;;  %v7479_v33 = vadd.f32 %v14998_v36, %v7478_v17  ;;  %12282 = vmatprep.mubr.msk.bf16.mxu0 %vm724_vm0, %v12876_v41  ;;  %v8225_v18 = vmax.f32 %v7487_v37, 0.0 }
 0x284   :  { %12482 = vmatprep.mubr.msk.bf16.mxu1 %vm724_vm0, %v12877_v27  ;;  %9396 = vst.msk [vmem:[%s16754_s3 + $0x24] sm:$0xf] %vm9386_vm1, %v11167_v13  ;;  %v8420_v52 = vmax.f32 %v6230_v48, %v8224_v60  ;;  %v6231_v50 = vmax.f32 %v13557_v59, %v6035_v23  ;;  %v6033_v26 = vmax.f32 %v5289_v46, 0.0  ;;  %v12879_v59 = vld [vmem:[%s16752_s0 + $0xb28] sm:$0xff]  }
 0x285   :  { %v8418_v31 = vmax.f32 %v6228_v5, %v8222_v28  ;;  %v8223_v12 = vmax.f32 %v7479_v33, 0.0  ;;  %v12176_v19 = vpop.f32.mrb[212].mxu0  ;;  %v12376_v56 = vpop.f32.mrb[212].mxu1 }
 0x286   :  { %v11172_v53 = vpack.c.bf16 %v8420_v52, %v8420_v52  ;;  %v8421_v11 = vmax.f32 %v6231_v50, %v8225_v18  ;;  %v6229_v30 = vmax.f32 %v13559_v62, %v6033_v26  ;;  %v5310_v22 = vadd.f32 %v14998_v36, %v12176_v19  ;;  %v5301_v16 = vpop.f32.mrb[213].mxu0  ;;  %v7491_v10 = vpop.f32.mrb[213].mxu1 }
 0x287   :  { %v11170_v24 = vpack.c.bf16 %v8418_v31, %v8418_v31  ;;  %v7500_v25 = vadd.f32 %v14998_v36, %v12376_v56  ;;  %v5302_v14 = vadd.f32 %v14998_v36, %v5301_v16  ;;  %v7492_v41 = vadd.f32 %v14998_v36, %v7491_v10  ;;  %v12177_v62 = vpop.f32.mrb[214].mxu0  ;;  %v12377_v27 = vpop.f32.mrb[214].mxu1 }
 0x288   :  { %9401 = vst.msk [vmem:[%s16754_s3 + $0x38] sm:$0xf] %vm9386_vm1, %v11172_v53  ;;  %v11173_v20 = vpack.c.bf16 %v8421_v11, %v8421_v11  ;;  %v8419_v54 = vmax.f32 %v6229_v30, %v8223_v12  ;;  %v6038_v8 = vmax.f32 %v5310_v22, 0.0  ;;  %v5313_v17 = vadd.f32 %v14998_v36, %v12177_v62  ;;  %v5304_v60 = vpop.f32.mrb[215].mxu0  ;;  %v7494_v39 = vpop.f32.mrb[215].mxu1  ;;  %v12884_v62 = vld [vmem:[%s16752_s0 + $0x830] sm:$0xff]  }
 0x289   :  { %9399 = vst.msk [vmem:[%s16754_s3 + $0x30] sm:$0xf] %vm9386_vm1, %v11170_v24  ;;  %v8228_v28 = vmax.f32 %v7500_v25, 0.0  ;;  %v6036_v37 = vmax.f32 %v5302_v14, 0.0  ;;  %v8226_v13 = vmax.f32 %v7492_v41, 0.0  ;;  %v7503_v48 = vadd.f32 %v14998_v36, %v12377_v27  ;;  %v12885_v27 = vld [vmem:[%s16752_s0 + $0xb40] sm:$0xff]  }
 0x28a   :  { %9402 = vst.msk [vmem:[%s16754_s3 + $0x3c] sm:$0xf] %vm9386_vm1, %v11173_v20  ;;  %v11171_v23 = vpack.c.bf16 %v8419_v54, %v8419_v54  ;;  %v6234_v46 = vmax.f32 %v13577_v29, %v6038_v8  ;;  %v6039_v5 = vmax.f32 %v5313_v17, 0.0  ;;  %v5305_v33 = vadd.f32 %v14998_v36, %v5304_v60  ;;  %12283 = vmatmul.mubr.msk.bf16.gmra.mrb[64].mxu0 %vm724_vm0, %v12878_v34  ;;  %v12882_v34 = vld [vmem:[%s16752_s0 + $0x828] sm:$0xff]  }
 0x28b   :  { %12483 = vmatmul.mubr.msk.bf16.gmra.mrb[64].mxu1 %vm724_vm0, %v12879_v59  ;;  %v6232_v52 = vmax.f32 %v13581_v32, %v6036_v37  ;;  %v7495_v50 = vadd.f32 %v14998_v36, %v7494_v39  ;;  %12286 = vmatprep.mubr.msk.bf16.mxu0 %vm724_vm0, %v12880_v43  ;;  %v8229_v26 = vmax.f32 %v7503_v48, 0.0 }
 0x28c   :  { %12486 = vmatprep.mubr.msk.bf16.mxu1 %vm724_vm0, %v12881_v47  ;;  %9400 = vst.msk [vmem:[%s16754_s3 + $0x34] sm:$0xf] %vm9386_vm1, %v11171_v23  ;;  %v8424_v29 = vmax.f32 %v6234_v46, %v8228_v28  ;;  %v6235_v18 = vmax.f32 %v13589_v35, %v6039_v5  ;;  %v6037_v31 = vmax.f32 %v5305_v33, 0.0  ;;  %v12883_v35 = vld [vmem:[%s16752_s0 + $0xb38] sm:$0xff]  }
 0x28d   :  { %v8422_v12 = vmax.f32 %v6232_v52, %v8226_v13  ;;  %v8227_v19 = vmax.f32 %v7495_v50, 0.0  ;;  %v12180_v56 = vpop.f32.mrb[216].mxu0  ;;  %v12380_v32 = vpop.f32.mrb[216].mxu1 }
 0x28e   :  { %v11176_v53 = vpack.c.bf16 %v8424_v29, %v8424_v29  ;;  %v8425_v11 = vmax.f32 %v6235_v18, %v8229_v26  ;;  %v6233_v30 = vmax.f32 %v13591_v38, %v6037_v31  ;;  %v5326_v22 = vadd.f32 %v14998_v36, %v12180_v56  ;;  %v5317_v16 = vpop.f32.mrb[217].mxu0  ;;  %v7507_v10 = vpop.f32.mrb[217].mxu1 }
 0x28f   :  { %v11174_v59 = vpack.c.bf16 %v8422_v12, %v8422_v12  ;;  %v7516_v24 = vadd.f32 %v14998_v36, %v12380_v32  ;;  %v5318_v25 = vadd.f32 %v14998_v36, %v5317_v16  ;;  %v7508_v14 = vadd.f32 %v14998_v36, %v7507_v10  ;;  %v12181_v38 = vpop.f32.mrb[218].mxu0  ;;  %v12381_v41 = vpop.f32.mrb[218].mxu1 }
 0x290   :  { %9405 = vst.msk [vmem:[%s16754_s3 + $0x48] sm:$0xf] %vm9386_vm1, %v11176_v53  ;;  %v11177_v43 = vpack.c.bf16 %v8425_v11, %v8425_v11  ;;  %v8423_v47 = vmax.f32 %v6233_v30, %v8227_v19  ;;  %v6042_v20 = vmax.f32 %v5326_v22, 0.0  ;;  %v5329_v54 = vadd.f32 %v14998_v36, %v12181_v38  ;;  %v5320_v8 = vpop.f32.mrb[219].mxu0  ;;  %v7510_v17 = vpop.f32.mrb[219].mxu1  ;;  %v12886_v30 = vld [vmem:[%s16752_s0 + $0x838] sm:$0xff]  }
 0x291   :  { %9403 = vst.msk [vmem:[%s16754_s3 + $0x40] sm:$0xf] %vm9386_vm1, %v11174_v59  ;;  %v8232_v60 = vmax.f32 %v7516_v24, 0.0  ;;  %v6040_v39 = vmax.f32 %v5318_v25, 0.0  ;;  %v8230_v28 = vmax.f32 %v7508_v14, 0.0  ;;  %v7519_v37 = vadd.f32 %v14998_v36, %v12381_v41  ;;  %v12888_v59 = vld [vmem:[%s16752_s0 + $0x840] sm:$0xff]  }
 0x292   :  { %9406 = vst.msk [vmem:[%s16754_s3 + $0x4c] sm:$0xf] %vm9386_vm1, %v11177_v43  ;;  %v11175_v13 = vpack.c.bf16 %v8423_v47, %v8423_v47  ;;  %v6238_v48 = vmax.f32 %v13609_v6, %v6042_v20  ;;  %v6043_v23 = vmax.f32 %v5329_v54, 0.0  ;;  %v5321_v46 = vadd.f32 %v14998_v36, %v5320_v8  ;;  %12287 = vmatmul.mubr.msk.bf16.gmra.mrb[68].mxu0 %vm724_vm0, %v12882_v34  ;;  %v12889_v24 = vld [vmem:[%s16752_s0 + $0xb50] sm:$0xff]  }
 0x293   :  { %12487 = vmatmul.mubr.msk.bf16.gmra.mrb[68].mxu1 %vm724_vm0, %v12883_v35  ;;  %v6236_v5 = vmax.f32 %v13613_v9, %v6040_v39  ;;  %v7511_v33 = vadd.f32 %v14998_v36, %v7510_v17  ;;  %12290 = vmatprep.mubr.msk.bf16.mxu0 %vm724_vm0, %v12884_v62  ;;  %v8233_v50 = vmax.f32 %v7519_v37, 0.0 }
 0x294   :  { %12490 = vmatprep.mubr.msk.bf16.mxu1 %vm724_vm0, %v12885_v27  ;;  %9404 = vst.msk [vmem:[%s16754_s3 + $0x44] sm:$0xf] %vm9386_vm1, %v11175_v13  ;;  %v8428_v6 = vmax.f32 %v6238_v48, %v8232_v60  ;;  %v6239_v52 = vmax.f32 %v13621_v15, %v6043_v23  ;;  %v6041_v29 = vmax.f32 %v5321_v46, 0.0  ;;  %v12887_v15 = vld [vmem:[%s16752_s0 + $0xb48] sm:$0xff]  }
 0x295   :  { %v8426_v18 = vmax.f32 %v6236_v5, %v8230_v28  ;;  %v8231_v26 = vmax.f32 %v7511_v33, 0.0  ;;  %v12184_v31 = vpop.f32.mrb[220].mxu0  ;;  %v12384_v9 = vpop.f32.mrb[220].mxu1 }
 0x296   :  { %v11180_v12 = vpack.c.bf16 %v8428_v6, %v8428_v6  ;;  %v8429_v19 = vmax.f32 %v6239_v52, %v8233_v50  ;;  %v6237_v56 = vmax.f32 %v13623_v21, %v6041_v29  ;;  %v5342_v32 = vadd.f32 %v14998_v36, %v12184_v31  ;;  %v5333_v53 = vpop.f32.mrb[221].mxu0  ;;  %v7523_v11 = vpop.f32.mrb[221].mxu1  ;;  %v12890_v31 = vld [vmem:[%s16752_s0 + $0x848] sm:$0xff]  }
 0x297   :  { %v11178_v22 = vpack.c.bf16 %v8426_v18, %v8426_v18  ;;  %v7532_v16 = vadd.f32 %v14998_v36, %v12384_v9  ;;  %v5334_v10 = vadd.f32 %v14998_v36, %v5333_v53  ;;  %v7524_v34 = vadd.f32 %v14998_v36, %v7523_v11  ;;  %v12185_v21 = vpop.f32.mrb[222].mxu0  ;;  %v12385_v35 = vpop.f32.mrb[222].mxu1  ;;  %v12892_v53 = vld [vmem:[%s16752_s0 + $0x850] sm:$0xff]   ;;  %v12893_v11 = vld [vmem:[%s16752_s0 + $0xb60] sm:$0xff]  }
 0x298   :  { %9409 = vst.msk [vmem:[%s16754_s3 + $0x58] sm:$0xf] %vm9386_vm1, %v11180_v12  ;;  %v11181_v25 = vpack.c.bf16 %v8429_v19, %v8429_v19  ;;  %v8427_v14 = vmax.f32 %v6237_v56, %v8231_v26  ;;  %v6046_v38 = vmax.f32 %v5342_v32, 0.0  ;;  %v5345_v41 = vadd.f32 %v14998_v36, %v12185_v21  ;;  %v5336_v62 = vpop.f32.mrb[223].mxu0  ;;  %v7526_v27 = vpop.f32.mrb[223].mxu1 }
 0x299   :  { %9407 = vst.msk [vmem:[%s16754_s3 + $0x50] sm:$0xf] %vm9386_vm1, %v11178_v22  ;;  %v8236_v43 = vmax.f32 %v7532_v16, 0.0  ;;  %v6044_v47 = vmax.f32 %v5334_v10, 0.0  ;;  %v8234_v20 = vmax.f32 %v7524_v34, 0.0  ;;  %v7535_v54 = vadd.f32 %v14998_v36, %v12385_v35 }
 0x29a   :  { %9410 = vst.msk [vmem:[%s16754_s3 + $0x5c] sm:$0xf] %vm9386_vm1, %v11181_v25  ;;  %v11179_v8 = vpack.c.bf16 %v8427_v14, %v8427_v14  ;;  %v6242_v17 = vmax.f32 %v13641_v57, %v6046_v38  ;;  %v6047_v60 = vmax.f32 %v5345_v41, 0.0  ;;  %v5337_v39 = vadd.f32 %v14998_v36, %v5336_v62  ;;  %12291 = vmatmul.mubr.msk.bf16.gmra.mrb[72].mxu0 %vm724_vm0, %v12886_v30 }
 0x29b   :  { %12491 = vmatmul.mubr.msk.bf16.gmra.mrb[72].mxu1 %vm724_vm0, %v12887_v15  ;;  %v6240_v28 = vmax.f32 %v13645_v61, %v6044_v47  ;;  %v7527_v37 = vadd.f32 %v14998_v36, %v7526_v27  ;;  %12294 = vmatprep.mubr.msk.bf16.mxu0 %vm724_vm0, %v12888_v59  ;;  %v8237_v48 = vmax.f32 %v7535_v54, 0.0 }
 0x29c   :  { %12494 = vmatprep.mubr.msk.bf16.mxu1 %vm724_vm0, %v12889_v24  ;;  %9408 = vst.msk [vmem:[%s16754_s3 + $0x54] sm:$0xf] %vm9386_vm1, %v11179_v8  ;;  %v8432_v57 = vmax.f32 %v6242_v17, %v8236_v43  ;;  %v6243_v13 = vmax.f32 %v13653_v1, %v6047_v60  ;;  %v6045_v23 = vmax.f32 %v5337_v39, 0.0  ;;  %v12891_v1 = vld [vmem:[%s16752_s0 + $0xb58] sm:$0xff]  }
 0x29d   :  { %v8430_v46 = vmax.f32 %v6240_v28, %v8234_v20  ;;  %v8235_v5 = vmax.f32 %v7527_v37, 0.0  ;;  %v12188_v33 = vpop.f32.mrb[224].mxu0  ;;  %v12388_v61 = vpop.f32.mrb[224].mxu1 }
 0x29e   :  { %v11184_v6 = vpack.c.bf16 %v8432_v57, %v8432_v57  ;;  %v8433_v52 = vmax.f32 %v6243_v13, %v8237_v48  ;;  %v6241_v50 = vmax.f32 %v13655_v4, %v6045_v23  ;;  %v5358_v29 = vadd.f32 %v14998_v36, %v12188_v33  ;;  %v5349_v18 = vpop.f32.mrb[225].mxu0  ;;  %v7539_v26 = vpop.f32.mrb[225].mxu1  ;;  %v12894_v48 = vld [vmem:[%s16752_s0 + $0x858] sm:$0xff]  }
 0x29f   :  { %v11182_v9 = vpack.c.bf16 %v8430_v46, %v8430_v46  ;;  %v7548_v12 = vadd.f32 %v14998_v36, %v12388_v61  ;;  %v5350_v19 = vadd.f32 %v14998_v36, %v5349_v18  ;;  %v7540_v56 = vadd.f32 %v14998_v36, %v7539_v26  ;;  %v12189_v4 = vpop.f32.mrb[226].mxu0  ;;  %v12389_v32 = vpop.f32.mrb[226].mxu1 }
 0x2a0   :  { %9413 = vst.msk [vmem:[%s16754_s3 + $0x68] sm:$0xf] %vm9386_vm1, %v11184_v6  ;;  %v11185_v30 = vpack.c.bf16 %v8433_v52, %v8433_v52  ;;  %v8431_v15 = vmax.f32 %v6241_v50, %v8235_v5  ;;  %v6050_v22 = vmax.f32 %v5358_v29, 0.0  ;;  %v5361_v16 = vadd.f32 %v14998_v36, %v12189_v4  ;;  %v5352_v10 = vpop.f32.mrb[227].mxu0  ;;  %v7542_v34 = vpop.f32.mrb[227].mxu1  ;;  %v12896_v6 = vld [vmem:[%s16752_s0 + $0x860] sm:$0xff]  }
 0x2a1   :  { %9411 = vst.msk [vmem:[%s16754_s3 + $0x60] sm:$0xf] %vm9386_vm1, %v11182_v9  ;;  %v8240_v21 = vmax.f32 %v7548_v12, 0.0  ;;  %v6048_v35 = vmax.f32 %v5350_v19, 0.0  ;;  %v8238_v59 = vmax.f32 %v7540_v56, 0.0  ;;  %v7551_v24 = vadd.f32 %v14998_v36, %v12389_v32  ;;  %v12897_v52 = vld [vmem:[%s16752_s0 + $0xb70] sm:$0xff]  }
 0x2a2   :  { %9414 = vst.msk [vmem:[%s16754_s3 + $0x6c] sm:$0xf] %vm9386_vm1, %v11185_v30  ;;  %v11183_v25 = vpack.c.bf16 %v8431_v15, %v8431_v15  ;;  %v6246_v14 = vmax.f32 %v13673_v44, %v6050_v22  ;;  %v6051_v38 = vmax.f32 %v5361_v16, 0.0  ;;  %v5353_v41 = vadd.f32 %v14998_v36, %v5352_v10  ;;  %12295 = vmatmul.mubr.msk.bf16.gmra.mrb[76].mxu0 %vm724_vm0, %v12890_v31 }
 0x2a3   :  { %12495 = vmatmul.mubr.msk.bf16.gmra.mrb[76].mxu1 %vm724_vm0, %v12891_v1  ;;  %v6244_v62 = vmax.f32 %v13677_v49, %v6048_v35  ;;  %v7543_v27 = vadd.f32 %v14998_v36, %v7542_v34  ;;  %12298 = vmatprep.mubr.msk.bf16.mxu0 %vm724_vm0, %v12892_v53  ;;  %v8241_v47 = vmax.f32 %v7551_v24, 0.0 }
 0x2a4   :  { %12498 = vmatprep.mubr.msk.bf16.mxu1 %vm724_vm0, %v12893_v11  ;;  %9412 = vst.msk [vmem:[%s16754_s3 + $0x64] sm:$0xf] %vm9386_vm1, %v11183_v25  ;;  %v8436_v44 = vmax.f32 %v6246_v14, %v8240_v21  ;;  %v6247_v43 = vmax.f32 %v13685_v55, %v6051_v38  ;;  %v6049_v20 = vmax.f32 %v5353_v41, 0.0  ;;  %v12895_v55 = vld [vmem:[%s16752_s0 + $0xb68] sm:$0xff]  }
 0x2a5   :  { %v8434_v54 = vmax.f32 %v6244_v62, %v8238_v59  ;;  %v8239_v8 = vmax.f32 %v7543_v27, 0.0  ;;  %v12192_v17 = vpop.f32.mrb[228].mxu0  ;;  %v12392_v49 = vpop.f32.mrb[228].mxu1  ;;  %v12898_v62 = vld [vmem:[%s16752_s0 + $0x868] sm:$0xff]  }
 0x2a6   :  { %v11188_v60 = vpack.c.bf16 %v8436_v44, %v8436_v44  ;;  %v8437_v39 = vmax.f32 %v6247_v43, %v8241_v47  ;;  %v6245_v28 = vmax.f32 %v13687_v63, %v6049_v20  ;;  %v5374_v37 = vadd.f32 %v14998_v36, %v12192_v17  ;;  %v5365_v57 = vpop.f32.mrb[229].mxu0  ;;  %v7555_v13 = vpop.f32.mrb[229].mxu1 }
 0x2a7   :  { %v11186_v23 = vpack.c.bf16 %v8434_v54, %v8434_v54  ;;  %v7564_v46 = vadd.f32 %v14998_v36, %v12392_v49  ;;  %v5366_v5 = vadd.f32 %v14998_v36, %v5365_v57  ;;  %v7556_v33 = vadd.f32 %v14998_v36, %v7555_v13  ;;  %v12193_v63 = vpop.f32.mrb[230].mxu0  ;;  %v12393_v61 = vpop.f32.mrb[230].mxu1  ;;  %v12900_v54 = vld [vmem:[%s16752_s0 + $0x870] sm:$0xff]  }
 0x2a8   :  { %9417 = vst.msk [vmem:[%s16754_s3 + $0x78] sm:$0xf] %vm9386_vm1, %v11188_v60  ;;  %v11189_v50 = vpack.c.bf16 %v8437_v39, %v8437_v39  ;;  %v8435_v29 = vmax.f32 %v6245_v28, %v8239_v8  ;;  %v6054_v18 = vmax.f32 %v5374_v37, 0.0  ;;  %v5377_v26 = vadd.f32 %v14998_v36, %v12193_v63  ;;  %v5368_v31 = vpop.f32.mrb[231].mxu0  ;;  %v7558_v1 = vpop.f32.mrb[231].mxu1  ;;  %v12901_v8 = vld [vmem:[%s16752_s0 + $0xb80] sm:$0xff]  }
 0x2a9   :  { %9415 = vst.msk [vmem:[%s16754_s3 + $0x70] sm:$0xf] %vm9386_vm1, %v11186_v23  ;;  %v8244_v9 = vmax.f32 %v7564_v46, 0.0  ;;  %v6052_v12 = vmax.f32 %v5366_v5, 0.0  ;;  %v8242_v19 = vmax.f32 %v7556_v33, 0.0  ;;  %v7567_v56 = vadd.f32 %v14998_v36, %v12393_v61 }
 0x2aa   :  { %9418 = vst.msk [vmem:[%s16754_s3 + $0x7c] sm:$0xf] %vm9386_vm1, %v11189_v50  ;;  %v11187_v4 = vpack.c.bf16 %v8435_v29, %v8435_v29  ;;  %v6250_v32 = vmax.f32 %v13705_v40, %v6054_v18  ;;  %v6055_v53 = vmax.f32 %v5377_v26, 0.0  ;;  %v5369_v11 = vadd.f32 %v14998_v36, %v5368_v31  ;;  %12299 = vmatmul.mubr.msk.bf16.gmra.mrb[80].mxu0 %vm724_vm0, %v12894_v48 }
 0x2ab   :  { %12499 = vmatmul.mubr.msk.bf16.gmra.mrb[80].mxu1 %vm724_vm0, %v12895_v55  ;;  %v6248_v30 = vmax.f32 %v13709_v45, %v6052_v12  ;;  %v7559_v15 = vadd.f32 %v14998_v36, %v7558_v1  ;;  %12302 = vmatprep.mubr.msk.bf16.mxu0 %vm724_vm0, %v12896_v6  ;;  %v8245_v16 = vmax.f32 %v7567_v56, 0.0 }
 0x2ac   :  { %12502 = vmatprep.mubr.msk.bf16.mxu1 %vm724_vm0, %v12897_v52  ;;  %9416 = vst.msk [vmem:[%s16754_s3 + $0x74] sm:$0xf] %vm9386_vm1, %v11187_v4  ;;  %v8440_v40 = vmax.f32 %v6250_v32, %v8244_v9  ;;  %v6251_v22 = vmax.f32 %v13717_v58, %v6055_v53  ;;  %v6053_v10 = vmax.f32 %v5369_v11, 0.0  ;;  %v12899_v58 = vld [vmem:[%s16752_s0 + $0xb78] sm:$0xff]  }
 0x2ad   :  { %v8438_v34 = vmax.f32 %v6248_v30, %v8242_v19  ;;  %v8243_v21 = vmax.f32 %v7559_v15, 0.0  ;;  %v12196_v35 = vpop.f32.mrb[232].mxu0  ;;  %v12396_v45 = vpop.f32.mrb[232].mxu1  ;;  %v12902_v4 = vld [vmem:[%s16752_s0 + $0x878] sm:$0xff]  }
 0x2ae   :  { %v11192_v59 = vpack.c.bf16 %v8440_v40, %v8440_v40  ;;  %v8441_v24 = vmax.f32 %v6251_v22, %v8245_v16  ;;  %v6249_v25 = vmax.f32 %v13719_v0, %v6053_v10  ;;  %v5390_v14 = vadd.f32 %v14998_v36, %v12196_v35  ;;  %v5381_v38 = vpop.f32.mrb[233].mxu0  ;;  %v7571_v41 = vpop.f32.mrb[233].mxu1  ;;  %v12904_v40 = vld [vmem:[%s16752_s0 + $0x880] sm:$0xff]   ;;  %v12905_v22 = vld [vmem:[%s16752_s0 + $0xb90] sm:$0xff]  }
 0x2af   :  { %v11190_v27 = vpack.c.bf16 %v8438_v34, %v8438_v34  ;;  %v7580_v44 = vadd.f32 %v14998_v36, %v12396_v45  ;;  %v5382_v43 = vadd.f32 %v14998_v36, %v5381_v38  ;;  %v7572_v47 = vadd.f32 %v14998_v36, %v7571_v41  ;;  %v12197_v0 = vpop.f32.mrb[234].mxu0  ;;  %v12397_v20 = vpop.f32.mrb[234].mxu1  ;;  %v16910_v41 = vld [vmem:[#allocation2_spill] sm:$0xff] }
 0x2b0   :  { %9421 = vst.msk [vmem:[%s16754_s3 + $0x88] sm:$0xf] %vm9386_vm1, %v11192_v59  ;;  %v11193_v17 = vpack.c.bf16 %v8441_v24, %v8441_v24  ;;  %v8439_v49 = vmax.f32 %v6249_v25, %v8243_v21  ;;  %v6058_v60 = vmax.f32 %v5390_v14, 0.0  ;;  %v5393_v39 = vadd.f32 %v14998_v36, %v12197_v0  ;;  %v5384_v28 = vpop.f32.mrb[235].mxu0  ;;  %v7574_v37 = vpop.f32.mrb[235].mxu1 }
 0x2b1   :  { %9419 = vst.msk [vmem:[%s16754_s3 + $0x80] sm:$0xf] %vm9386_vm1, %v11190_v27  ;;  %v8248_v57 = vmax.f32 %v7580_v44, 0.0  ;;  %v6056_v13 = vmax.f32 %v5382_v43, 0.0  ;;  %v8246_v48 = vmax.f32 %v7572_v47, 0.0  ;;  %v7583_v55 = vadd.f32 %v14998_v36, %v12397_v20  ;;  %v16911_v44 = vld [vmem:[#allocation3_spill] sm:$0xff] }
 0x2b2   :  { %9422 = vst.msk [vmem:[%s16754_s3 + $0x8c] sm:$0xf] %vm9386_vm1, %v11193_v17  ;;  %v11191_v23 = vpack.c.bf16 %v8439_v49, %v8439_v49  ;;  %v6254_v46 = vmax.f32 %v13737_v42, %v6058_v60  ;;  %v6059_v5 = vmax.f32 %v5393_v39, 0.0  ;;  %v5385_v33 = vadd.f32 %v14998_v36, %v5384_v28  ;;  %12303 = vmatmul.mubr.msk.bf16.gmra.mrb[84].mxu0 %vm724_vm0, %v12898_v62  ;;  %v16912_v20 = vld [vmem:[#allocation4_spill] sm:$0xff] }
 0x2b3   :  { %12503 = vmatmul.mubr.msk.bf16.gmra.mrb[84].mxu1 %vm724_vm0, %v12899_v58  ;;  %v6252_v63 = vmax.f32 %v13741_v2, %v6056_v13  ;;  %v7575_v61 = vadd.f32 %v14998_v36, %v7574_v37  ;;  %12306 = vmatprep.mubr.msk.bf16.mxu0 %vm724_vm0, %v12900_v54  ;;  %v8249_v52 = vmax.f32 %v7583_v55, 0.0  ;;  %v16913_v13 = vld [vmem:[#allocation5_spill] sm:$0xff] }
 0x2b4   :  { %12506 = vmatprep.mubr.msk.bf16.mxu1 %vm724_vm0, %v12901_v8  ;;  %9420 = vst.msk [vmem:[%s16754_s3 + $0x84] sm:$0xf] %vm9386_vm1, %v11191_v23  ;;  %v8444_v42 = vmax.f32 %v6254_v46, %v8248_v57  ;;  %v6255_v6 = vmax.f32 %v13749_v3, %v6059_v5  ;;  %v6057_v50 = vmax.f32 %v5385_v33, 0.0  ;;  %v12903_v3 = vld [vmem:[%s16752_s0 + $0xb88] sm:$0xff]   ;;  %v12907_v33 = vld [vmem:[%s16752_s0 + $0xb98] sm:$0xff]  }
 0x2b5   :  { %v8442_v29 = vmax.f32 %v6252_v63, %v8246_v48  ;;  %v8247_v18 = vmax.f32 %v7575_v61, 0.0  ;;  %v12200_v26 = vpop.f32.mrb[236].mxu0  ;;  %v12400_v2 = vpop.f32.mrb[236].mxu1  ;;  %v12906_v5 = vld [vmem:[%s16752_s0 + $0x888] sm:$0xff]  }
 0x2b6   :  { %v11196_v31 = vpack.c.bf16 %v8444_v42, %v8444_v42  ;;  %v8445_v1 = vmax.f32 %v6255_v6, %v8249_v52  ;;  %v6253_v9 = vmax.f32 %v13751_v7, %v6057_v50  ;;  %v5406_v12 = vadd.f32 %v14998_v36, %v12200_v26  ;;  %v5397_v19 = vpop.f32.mrb[237].mxu0  ;;  %v7587_v56 = vpop.f32.mrb[237].mxu1 }
 0x2b7   :  { %v11194_v32 = vpack.c.bf16 %v8442_v29, %v8442_v29  ;;  %v7596_v53 = vadd.f32 %v14998_v36, %v12400_v2  ;;  %v5398_v11 = vadd.f32 %v14998_v36, %v5397_v19  ;;  %v7588_v30 = vadd.f32 %v14998_v36, %v7587_v56  ;;  %v12201_v7 = vpop.f32.mrb[238].mxu0  ;;  %v12401_v15 = vpop.f32.mrb[238].mxu1  ;;  %v15462_v36 = vld [vmem:[%s16753_s2] ss:$0 sm:$0xff]  ;;  %v12908_v29 = vld [vmem:[%s16752_s0 + $0x890] sm:$0xff]  }
 0x2b8   :  { %9425 = vst.msk [vmem:[%s16754_s3 + $0x98] sm:$0xf] %vm9386_vm1, %v11196_v31  ;;  %v11197_v16 = vpack.c.bf16 %v8445_v1, %v8445_v1  ;;  %v8443_v10 = vmax.f32 %v6253_v9, %v8247_v18  ;;  %v6062_v34 = vmax.f32 %v5406_v12, 0.0  ;;  %v5409_v21 = vadd.f32 %v15462_v36, %v12201_v7  ;;  %v5400_v35 = vpop.f32.mrb[239].mxu0  ;;  %v7590_v45 = vpop.f32.mrb[239].mxu1  ;;  %v12909_v18 = vld [vmem:[%s16752_s0 + $0xba0] sm:$0xff]  }
 0x2b9   :  { %9423 = vst.msk [vmem:[%s16754_s3 + $0x90] sm:$0xf] %vm9386_vm1, %v11194_v32  ;;  %v8252_v59 = vmax.f32 %v7596_v53, 0.0  ;;  %v6060_v24 = vmax.f32 %v5398_v11, 0.0  ;;  %v8250_v25 = vmax.f32 %v7588_v30, 0.0  ;;  %v7599_v14 = vadd.f32 %v15462_v36, %v12401_v15  ;;  %v16914_v53 = vld [vmem:[#allocation6_spill] sm:$0xff] }
 0x2ba   :  { %9426 = vst.msk [vmem:[%s16754_s3 + $0x9c] sm:$0xf] %vm9386_vm1, %v11197_v16  ;;  %v11195_v38 = vpack.c.bf16 %v8443_v10, %v8443_v10  ;;  %v6258_v62 = vmax.f32 %v16910_v41, %v6062_v34  ;;  %v6063_v58 = vmax.f32 %v5409_v21, 0.0  ;;  %v5401_v27 = vadd.f32 %v15462_v36, %v5400_v35  ;;  %12307 = vmatmul.mubr.msk.bf16.gmra.mrb[88].mxu0 %vm724_vm0, %v12902_v4  ;;  %v16915_v15 = vld [vmem:[#allocation7_spill] sm:$0xff]  ;;  %v16916_v10 = vld [vmem:[#allocation8_spill] sm:$0xff]  ;;  %v16917_v41 = vld [vmem:[#allocation9_spill] sm:$0xff] }
 0x2bb   :  { %12507 = vmatmul.mubr.msk.bf16.gmra.mrb[88].mxu1 %vm724_vm0, %v12903_v3  ;;  %v6256_v43 = vmax.f32 %v16911_v44, %v6060_v24  ;;  %v7591_v47 = vadd.f32 %v15462_v36, %v7590_v45  ;;  %12310 = vmatprep.mubr.msk.bf16.mxu0 %vm724_vm0, %v12904_v40  ;;  %v8253_v8 = vmax.f32 %v7599_v14, 0.0 }
 0x2bc   :  { %12510 = vmatprep.mubr.msk.bf16.mxu1 %vm724_vm0, %v12905_v22  ;;  %9424 = vst.msk [vmem:[%s16754_s3 + $0x94] sm:$0xf] %vm9386_vm1, %v11195_v38  ;;  %v8448_v0 = vmax.f32 %v6258_v62, %v8252_v59  ;;  %v6259_v54 = vmax.f32 %v16912_v20, %v6063_v58  ;;  %v6061_v17 = vmax.f32 %v5401_v27, 0.0 }
 0x2bd   :  { %v8446_v49 = vmax.f32 %v6256_v43, %v8250_v25  ;;  %v8251_v60 = vmax.f32 %v7591_v47, 0.0  ;;  %v12204_v39 = vpop.f32.mrb[240].mxu0  ;;  %v12404_v28 = vpop.f32.mrb[240].mxu1  ;;  %v12910_v43 = vld [vmem:[%s16752_s0 + $0x898] sm:$0xff]   ;;  %v12911_v47 = vld [vmem:[%s16752_s0 + $0xba8] sm:$0xff]  }
 0x2be   :  { %v11200_v37 = vpack.c.bf16 %v8448_v0, %v8448_v0  ;;  %v8449_v57 = vmax.f32 %v6259_v54, %v8253_v8  ;;  %v6257_v48 = vmax.f32 %v16913_v13, %v6061_v17  ;;  %v5422_v55 = vadd.f32 %v15462_v36, %v12204_v39  ;;  %v5413_v23 = vpop.f32.mrb[241].mxu0  ;;  %v7603_v46 = vpop.f32.mrb[241].mxu1  ;;  %v12913_v39 = vld [vmem:[%s16752_s0 + $0xbb0] sm:$0xff]  }
 0x2bf   :  { %v11198_v63 = vpack.c.bf16 %v8446_v49, %v8446_v49  ;;  %v7612_v61 = vadd.f32 %v15462_v36, %v12404_v28  ;;  %v5414_v42 = vadd.f32 %v15462_v36, %v5413_v23  ;;  %v7604_v6 = vadd.f32 %v15462_v36, %v7603_v46  ;;  %v12205_v52 = vpop.f32.mrb[242].mxu0  ;;  %v12405_v50 = vpop.f32.mrb[242].mxu1 }
 0x2c0   :  { %9429 = vst.msk [vmem:[%s16754_s3 + $0xa8] sm:$0xf] %vm9386_vm1, %v11200_v37  ;;  %v11201_v26 = vpack.c.bf16 %v8449_v57, %v8449_v57  ;;  %v8447_v2 = vmax.f32 %v6257_v48, %v8251_v60  ;;  %v6066_v31 = vmax.f32 %v5422_v55, 0.0  ;;  %v5425_v1 = vadd.f32 %v15462_v36, %v12205_v52  ;;  %v5416_v9 = vpop.f32.mrb[243].mxu0  ;;  %v7606_v12 = vpop.f32.mrb[243].mxu1  ;;  %v12912_v60 = vld [vmem:[%s16752_s0 + $0x8a0] sm:$0xff]  }
 0x2c1   :  { %9427 = vst.msk [vmem:[%s16754_s3 + $0xa0] sm:$0xf] %vm9386_vm1, %v11198_v63  ;;  %v8256_v19 = vmax.f32 %v7612_v61, 0.0  ;;  %v6064_v56 = vmax.f32 %v5414_v42, 0.0  ;;  %v8254_v4 = vmax.f32 %v7604_v6, 0.0  ;;  %v7615_v3 = vadd.f32 %v15462_v36, %v12405_v50  ;;  %v16918_v61 = vld [vmem:[#allocation10_spill] sm:$0xff] }
 0x2c2   :  { %9430 = vst.msk [vmem:[%s16754_s3 + $0xac] sm:$0xf] %vm9386_vm1, %v11201_v26  ;;  %v11199_v32 = vpack.c.bf16 %v8447_v2, %v8447_v2  ;;  %v6262_v11 = vmax.f32 %v16914_v53, %v6066_v31  ;;  %v6067_v30 = vmax.f32 %v5425_v1, 0.0  ;;  %v5417_v7 = vadd.f32 %v15462_v36, %v5416_v9  ;;  %12311 = vmatmul.mubr.msk.bf16.gmra.mrb[92].mxu0 %vm724_vm0, %v12906_v5  ;;  %v16919_v50 = vld [vmem:[#allocation11_spill] sm:$0xff]  ;;  %v16920_v2 = vld [vmem:[#allocation12_spill] sm:$0xff]  ;;  %v16921_v53 = vld [vmem:[#allocation13_spill] sm:$0xff] }
 0x2c3   :  { %12511 = vmatmul.mubr.msk.bf16.gmra.mrb[92].mxu1 %vm724_vm0, %v12907_v33  ;;  %v6260_v40 = vmax.f32 %v16915_v15, %v6064_v56  ;;  %v7607_v22 = vadd.f32 %v15462_v36, %v7606_v12  ;;  %12314 = vmatprep.mubr.msk.bf16.mxu0 %vm724_vm0, %v12908_v29  ;;  %v8257_v21 = vmax.f32 %v7615_v3, 0.0 }
 0x2c4   :  { %12514 = vmatprep.mubr.msk.bf16.mxu1 %vm724_vm0, %v12909_v18  ;;  %9428 = vst.msk [vmem:[%s16754_s3 + $0xa4] sm:$0xf] %vm9386_vm1, %v11199_v32  ;;  %v8452_v16 = vmax.f32 %v6262_v11, %v8256_v19  ;;  %v6263_v34 = vmax.f32 %v16916_v10, %v6067_v30  ;;  %v6065_v35 = vmax.f32 %v5417_v7, 0.0 }
 0x2c5   :  { %v8450_v45 = vmax.f32 %v6260_v40, %v8254_v4  ;;  %v8255_v59 = vmax.f32 %v7607_v22, 0.0  ;;  %v12208_v24 = vpop.f32.mrb[244].mxu0  ;;  %v12408_v25 = vpop.f32.mrb[244].mxu1  ;;  %v12914_v40 = vld [vmem:[%s16752_s0 + $0x8a8] sm:$0xff]   ;;  %v12915_v22 = vld [vmem:[%s16752_s0 + $0xbb8] sm:$0xff]  }
 0x2c6   :  { %v11204_v14 = vpack.c.bf16 %v8452_v16, %v8452_v16  ;;  %v8453_v38 = vmax.f32 %v6263_v34, %v8257_v21  ;;  %v6261_v62 = vmax.f32 %v16917_v41, %v6065_v35  ;;  %v5438_v58 = vadd.f32 %v15462_v36, %v12208_v24  ;;  %v5429_v27 = vpop.f32.mrb[245].mxu0  ;;  %v7619_v44 = vpop.f32.mrb[245].mxu1  ;;  %v12917_v24 = vld [vmem:[%s16752_s0 + $0xbc0] sm:$0xff]  }
 0x2c7   :  { %v11202_v0 = vpack.c.bf16 %v8450_v45, %v8450_v45  ;;  %v7628_v20 = vadd.f32 %v15462_v36, %v12408_v25  ;;  %v5430_v54 = vadd.f32 %v15462_v36, %v5429_v27  ;;  %v7620_v8 = vadd.f32 %v15462_v36, %v7619_v44  ;;  %v12209_v17 = vpop.f32.mrb[246].mxu0  ;;  %v12409_v49 = vpop.f32.mrb[246].mxu1 }
 0x2c8   :  { %9433 = vst.msk [vmem:[%s16754_s3 + $0xb8] sm:$0xf] %vm9386_vm1, %v11204_v14  ;;  %v11205_v28 = vpack.c.bf16 %v8453_v38, %v8453_v38  ;;  %v8451_v37 = vmax.f32 %v6261_v62, %v8255_v59  ;;  %v6070_v57 = vmax.f32 %v5438_v58, 0.0  ;;  %v5441_v13 = vadd.f32 %v15462_v36, %v12209_v17  ;;  %v5432_v48 = vpop.f32.mrb[247].mxu0  ;;  %v7622_v55 = vpop.f32.mrb[247].mxu1  ;;  %v12916_v59 = vld [vmem:[%s16752_s0 + $0x8b0] sm:$0xff]  }
 0x2c9   :  { %9431 = vst.msk [vmem:[%s16754_s3 + $0xb0] sm:$0xf] %vm9386_vm1, %v11202_v0  ;;  %v8260_v23 = vmax.f32 %v7628_v20, 0.0  ;;  %v6068_v46 = vmax.f32 %v5430_v54, 0.0  ;;  %v8258_v5 = vmax.f32 %v7620_v8, 0.0  ;;  %v7631_v33 = vadd.f32 %v15462_v36, %v12409_v49  ;;  %v16922_v20 = vld [vmem:[#allocation14_spill] sm:$0xff] }
 0x2ca   :  { %9434 = vst.msk [vmem:[%s16754_s3 + $0xbc] sm:$0xf] %vm9386_vm1, %v11205_v28  ;;  %v11203_v63 = vpack.c.bf16 %v8451_v37, %v8451_v37  ;;  %v6266_v42 = vmax.f32 %v16918_v61, %v6070_v57  ;;  %v6071_v6 = vmax.f32 %v5441_v13, 0.0  ;;  %v5433_v52 = vadd.f32 %v15462_v36, %v5432_v48  ;;  %12315 = vmatmul.mubr.msk.bf16.gmra.mrb[96].mxu0 %vm724_vm0, %v12910_v43  ;;  %v16923_v49 = vld [vmem:[#allocation15_spill] sm:$0xff]  ;;  %v16924_v37 = vld [vmem:[#allocation16_spill] sm:$0xff]  ;;  %v16925_v61 = vld [vmem:[#allocation17_spill] sm:$0xff] }
 0x2cb   :  { %12515 = vmatmul.mubr.msk.bf16.gmra.mrb[96].mxu1 %vm724_vm0, %v12911_v47  ;;  %v6264_v29 = vmax.f32 %v16919_v50, %v6068_v46  ;;  %v7623_v18 = vadd.f32 %v15462_v36, %v7622_v55  ;;  %12318 = vmatprep.mubr.msk.bf16.mxu0 %vm724_vm0, %v12912_v60  ;;  %v8261_v1 = vmax.f32 %v7631_v33, 0.0 }
 0x2cc   :  { %12518 = vmatprep.mubr.msk.bf16.mxu1 %vm724_vm0, %v12913_v39  ;;  %9432 = vst.msk [vmem:[%s16754_s3 + $0xb4] sm:$0xf] %vm9386_vm1, %v11203_v63  ;;  %v8456_v26 = vmax.f32 %v6266_v42, %v8260_v23  ;;  %v6267_v31 = vmax.f32 %v16920_v2, %v6071_v6  ;;  %v6069_v9 = vmax.f32 %v5433_v52, 0.0 }
 0x2cd   :  { %v8454_v12 = vmax.f32 %v6264_v29, %v8258_v5  ;;  %v8259_v19 = vmax.f32 %v7623_v18, 0.0  ;;  %v12212_v56 = vpop.f32.mrb[248].mxu0  ;;  %v12412_v4 = vpop.f32.mrb[248].mxu1  ;;  %v12918_v29 = vld [vmem:[%s16752_s0 + $0x8b8] sm:$0xff]   ;;  %v12919_v18 = vld [vmem:[%s16752_s0 + $0xbc8] sm:$0xff]  }
 0x2ce   :  { %v11208_v3 = vpack.c.bf16 %v8456_v26, %v8456_v26  ;;  %v8457_v32 = vmax.f32 %v6267_v31, %v8261_v1  ;;  %v6265_v11 = vmax.f32 %v16921_v53, %v6069_v9  ;;  %v5454_v30 = vadd.f32 %v15462_v36, %v12212_v56  ;;  %v5445_v7 = vpop.f32.mrb[249].mxu0  ;;  %v7635_v15 = vpop.f32.mrb[249].mxu1  ;;  %v12921_v56 = vld [vmem:[%s16752_s0 + $0xbd0] sm:$0xff]  }
 0x2cf   :  { %v11206_v16 = vpack.c.bf16 %v8454_v12, %v8454_v12  ;;  %v7644_v10 = vadd.f32 %v15462_v36, %v12412_v4  ;;  %v5446_v34 = vadd.f32 %v15462_v36, %v5445_v7  ;;  %v7636_v21 = vadd.f32 %v15462_v36, %v7635_v15  ;;  %v12213_v35 = vpop.f32.mrb[250].mxu0  ;;  %v12413_v45 = vpop.f32.mrb[250].mxu1 }
 0x2d0   :  { %9437 = vst.msk [vmem:[%s16754_s3 + $0xc8] sm:$0xf] %vm9386_vm1, %v11208_v3  ;;  %v11209_v25 = vpack.c.bf16 %v8457_v32, %v8457_v32  ;;  %v8455_v14 = vmax.f32 %v6265_v11, %v8259_v19  ;;  %v6074_v38 = vmax.f32 %v5454_v30, 0.0  ;;  %v5457_v41 = vadd.f32 %v15462_v36, %v12213_v35  ;;  %v5448_v62 = vpop.f32.mrb[251].mxu0  ;;  %v7638_v58 = vpop.f32.mrb[251].mxu1  ;;  %v12920_v19 = vld [vmem:[%s16752_s0 + $0x8c0] sm:$0xff]  }
 0x2d1   :  { %9435 = vst.msk [vmem:[%s16754_s3 + $0xc0] sm:$0xf] %vm9386_vm1, %v11206_v16  ;;  %v8264_v27 = vmax.f32 %v7644_v10, 0.0  ;;  %v6072_v44 = vmax.f32 %v5446_v34, 0.0  ;;  %v8262_v43 = vmax.f32 %v7636_v21, 0.0  ;;  %v7647_v47 = vadd.f32 %v15462_v36, %v12413_v45  ;;  %v16926_v10 = vld [vmem:[#allocation18_spill] sm:$0xff] }
 0x2d2   :  { %9438 = vst.msk [vmem:[%s16754_s3 + $0xcc] sm:$0xf] %vm9386_vm1, %v11209_v25  ;;  %v11207_v0 = vpack.c.bf16 %v8455_v14, %v8455_v14  ;;  %v6270_v54 = vmax.f32 %v16922_v20, %v6074_v38  ;;  %v6075_v8 = vmax.f32 %v5457_v41, 0.0  ;;  %v5449_v17 = vadd.f32 %v15462_v36, %v5448_v62  ;;  %12319 = vmatmul.mubr.msk.bf16.gmra.mrb[100].mxu0 %vm724_vm0, %v12914_v40  ;;  %v16927_v45 = vld [vmem:[#allocation19_spill] sm:$0xff]  ;;  %v16928_v14 = vld [vmem:[#allocation20_spill] sm:$0xff]  ;;  %v16929_v20 = vld [vmem:[#allocation21_spill] sm:$0xff] }
 0x2d3   :  { %12519 = vmatmul.mubr.msk.bf16.gmra.mrb[100].mxu1 %vm724_vm0, %v12915_v22  ;;  %v6268_v60 = vmax.f32 %v16923_v49, %v6072_v44  ;;  %v7639_v39 = vadd.f32 %v15462_v36, %v7638_v58  ;;  %12322 = vmatprep.mubr.msk.bf16.mxu0 %vm724_vm0, %v12916_v59  ;;  %v8265_v13 = vmax.f32 %v7647_v47, 0.0 }
 0x2d4   :  { %12522 = vmatprep.mubr.msk.bf16.mxu1 %vm724_vm0, %v12917_v24  ;;  %9436 = vst.msk [vmem:[%s16754_s3 + $0xc4] sm:$0xf] %vm9386_vm1, %v11207_v0  ;;  %v8460_v28 = vmax.f32 %v6270_v54, %v8264_v27  ;;  %v6271_v57 = vmax.f32 %v16924_v37, %v6075_v8  ;;  %v6073_v48 = vmax.f32 %v5449_v17, 0.0 }
 0x2d5   :  { %v8458_v55 = vmax.f32 %v6268_v60, %v8262_v43  ;;  %v8263_v23 = vmax.f32 %v7639_v39, 0.0  ;;  %v12216_v46 = vpop.f32.mrb[252].mxu0  ;;  %v12416_v5 = vpop.f32.mrb[252].mxu1  ;;  %v12922_v60 = vld [vmem:[%s16752_s0 + $0x8c8] sm:$0xff]   ;;  %v12923_v39 = vld [vmem:[%s16752_s0 + $0xbd8] sm:$0xff]  }
 0x2d6   :  { %v11212_v33 = vpack.c.bf16 %v8460_v28, %v8460_v28  ;;  %v8461_v63 = vmax.f32 %v6271_v57, %v8265_v13  ;;  %v6269_v42 = vmax.f32 %v16925_v61, %v6073_v48  ;;  %v5470_v6 = vadd.f32 %v15462_v36, %v12216_v46  ;;  %v5461_v52 = vpop.f32.mrb[253].mxu0  ;;  %v7651_v50 = vpop.f32.mrb[253].mxu1  ;;  %v12925_v46 = vld [vmem:[%s16752_s0 + $0xbe0] sm:$0xff]  }
 0x2d7   :  { %v11210_v26 = vpack.c.bf16 %v8458_v55, %v8458_v55  ;;  %v7660_v2 = vadd.f32 %v15462_v36, %v12416_v5  ;;  %v5462_v31 = vadd.f32 %v15462_v36, %v5461_v52  ;;  %v7652_v1 = vadd.f32 %v15462_v36, %v7651_v50  ;;  %v12217_v9 = vpop.f32.mrb[254].mxu0  ;;  %v12417_v12 = vpop.f32.mrb[254].mxu1 }
 0x2d8   :  { %9441 = vst.msk [vmem:[%s16754_s3 + $0xd8] sm:$0xf] %vm9386_vm1, %v11212_v33  ;;  %v11213_v4 = vpack.c.bf16 %v8461_v63, %v8461_v63  ;;  %v8459_v3 = vmax.f32 %v6269_v42, %v8263_v23  ;;  %v6078_v32 = vmax.f32 %v5470_v6, 0.0  ;;  %v5473_v53 = vadd.f32 %v15462_v36, %v12217_v9  ;;  %v5464_v11 = vpop.f32.mrb[255].mxu0  ;;  %v7654_v30 = vpop.f32.mrb[255].mxu1  ;;  %v12924_v23 = vld [vmem:[%s16752_s0 + $0x8d0] sm:$0xff]  }
 0x2d9   :  { %9439 = vst.msk [vmem:[%s16754_s3 + $0xd0] sm:$0xf] %vm9386_vm1, %v11210_v26  ;;  %v8268_v7 = vmax.f32 %v7660_v2, 0.0  ;;  %v6076_v15 = vmax.f32 %v5462_v31, 0.0  ;;  %v8266_v40 = vmax.f32 %v7652_v1, 0.0  ;;  %v7663_v22 = vadd.f32 %v15462_v36, %v12417_v12  ;;  %v16930_v2 = vld [vmem:[#allocation22_spill] sm:$0xff] }
 0x2da   :  { %9442 = vst.msk [vmem:[%s16754_s3 + $0xdc] sm:$0xf] %vm9386_vm1, %v11213_v4  ;;  %v11211_v16 = vpack.c.bf16 %v8459_v3, %v8459_v3  ;;  %v6274_v34 = vmax.f32 %v16926_v10, %v6078_v32  ;;  %v6079_v21 = vmax.f32 %v5473_v53, 0.0  ;;  %v5465_v35 = vadd.f32 %v15462_v36, %v5464_v11  ;;  %12323 = vmatmul.mubr.msk.bf16.gmra.mrb[104].mxu0 %vm724_vm0, %v12918_v29  ;;  %v16931_v12 = vld [vmem:[#allocation23_spill] sm:$0xff]  ;;  %v16932_v3 = vld [vmem:[#allocation24_spill] sm:$0xff]  ;;  %v16933_v10 = vld [vmem:[#allocation25_spill] sm:$0xff] }
 0x2db   :  { %12523 = vmatmul.mubr.msk.bf16.gmra.mrb[104].mxu1 %vm724_vm0, %v12919_v18  ;;  %v6272_v59 = vmax.f32 %v16927_v45, %v6076_v15  ;;  %v7655_v24 = vadd.f32 %v15462_v36, %v7654_v30  ;;  %12326 = vmatprep.mubr.msk.bf16.mxu0 %vm724_vm0, %v12920_v19  ;;  %v8269_v41 = vmax.f32 %v7663_v22, 0.0 }
 0x2dc   :  { %12526 = vmatprep.mubr.msk.bf16.mxu1 %vm724_vm0, %v12921_v56  ;;  %9440 = vst.msk [vmem:[%s16754_s3 + $0xd4] sm:$0xf] %vm9386_vm1, %v11211_v16  ;;  %v8464_v25 = vmax.f32 %v6274_v34, %v8268_v7  ;;  %v6275_v38 = vmax.f32 %v16928_v14, %v6079_v21  ;;  %v6077_v62 = vmax.f32 %v5465_v35, 0.0 }
 0x2dd   :  { %v8462_v58 = vmax.f32 %v6272_v59, %v8266_v40  ;;  %v8267_v27 = vmax.f32 %v7655_v24, 0.0  ;;  %v12220_v44 = vpop.f32.mrb[0].mxu0  ;;  %v12420_v43 = vpop.f32.mrb[0].mxu1  ;;  %v12926_v59 = vld [vmem:[%s16752_s0 + $0x8d8] sm:$0xff]   ;;  %v12927_v24 = vld [vmem:[%s16752_s0 + $0xbe8] sm:$0xff]  }
 0x2de   :  { %v11216_v47 = vpack.c.bf16 %v8464_v25, %v8464_v25  ;;  %v8465_v0 = vmax.f32 %v6275_v38, %v8269_v41  ;;  %v6273_v54 = vmax.f32 %v16929_v20, %v6077_v62  ;;  %v5486_v8 = vadd.f32 %v15462_v36, %v12220_v44  ;;  %v5477_v17 = vpop.f32.mrb[1].mxu0  ;;  %v7667_v49 = vpop.f32.mrb[1].mxu1  ;;  %v12929_v44 = vld [vmem:[%s16752_s0 + $0xbf0] sm:$0xff]  }
 0x2df   :  { %v11214_v28 = vpack.c.bf16 %v8462_v58, %v8462_v58  ;;  %v7676_v37 = vadd.f32 %v15462_v36, %v12420_v43  ;;  %v5478_v57 = vadd.f32 %v15462_v36, %v5477_v17  ;;  %v7668_v13 = vadd.f32 %v15462_v36, %v7667_v49  ;;  %v12221_v48 = vpop.f32.mrb[2].mxu0  ;;  %v12421_v55 = vpop.f32.mrb[2].mxu1 }
 0x2e0   :  { %9445 = vst.msk [vmem:[%s16754_s3 + $0xe8] sm:$0xf] %vm9386_vm1, %v11216_v47  ;;  %v11217_v5 = vpack.c.bf16 %v8465_v0, %v8465_v0  ;;  %v8463_v33 = vmax.f32 %v6273_v54, %v8267_v27  ;;  %v6082_v63 = vmax.f32 %v5486_v8, 0.0  ;;  %v5489_v61 = vadd.f32 %v15462_v36, %v12221_v48  ;;  %v5480_v42 = vpop.f32.mrb[3].mxu0  ;;  %v7670_v6 = vpop.f32.mrb[3].mxu1  ;;  %v12928_v27 = vld [vmem:[%s16752_s0 + $0x8e0] sm:$0xff]  }
 0x2e1   :  { %9443 = vst.msk [vmem:[%s16754_s3 + $0xe0] sm:$0xf] %vm9386_vm1, %v11214_v28  ;;  %v8272_v52 = vmax.f32 %v7676_v37, 0.0  ;;  %v6080_v50 = vmax.f32 %v5478_v57, 0.0  ;;  %v8270_v29 = vmax.f32 %v7668_v13, 0.0  ;;  %v7679_v18 = vadd.f32 %v15462_v36, %v12421_v55  ;;  %v16934_v37 = vld [vmem:[#allocation26_spill] sm:$0xff] }
 0x2e2   :  { %9446 = vst.msk [vmem:[%s16754_s3 + $0xec] sm:$0xf] %vm9386_vm1, %v11217_v5  ;;  %v11215_v26 = vpack.c.bf16 %v8463_v33, %v8463_v33  ;;  %v6278_v31 = vmax.f32 %v16930_v2, %v6082_v63  ;;  %v6083_v1 = vmax.f32 %v5489_v61, 0.0  ;;  %v5481_v9 = vadd.f32 %v15462_v36, %v5480_v42  ;;  %12327 = vmatmul.mubr.msk.bf16.gmra.mrb[108].mxu0 %vm724_vm0, %v12922_v60  ;;  %v16935_v55 = vld [vmem:[#allocation27_spill] sm:$0xff]  ;;  %v16936_v33 = vld [vmem:[#allocation28_spill] sm:$0xff]  ;;  %v16937_v2 = vld [vmem:[#allocation29_spill] sm:$0xff] }
 0x2e3   :  { %12527 = vmatmul.mubr.msk.bf16.gmra.mrb[108].mxu1 %vm724_vm0, %v12923_v39  ;;  %v6276_v19 = vmax.f32 %v16931_v12, %v6080_v50  ;;  %v7671_v56 = vadd.f32 %v15462_v36, %v7670_v6  ;;  %12330 = vmatprep.mubr.msk.bf16.mxu0 %vm724_vm0, %v12924_v23  ;;  %v8273_v53 = vmax.f32 %v7679_v18, 0.0 }
 0x2e4   :  { %12530 = vmatprep.mubr.msk.bf16.mxu1 %vm724_vm0, %v12925_v46  ;;  %9444 = vst.msk [vmem:[%s16754_s3 + $0xe4] sm:$0xf] %vm9386_vm1, %v11215_v26  ;;  %v8468_v4 = vmax.f32 %v6278_v31, %v8272_v52  ;;  %v6279_v32 = vmax.f32 %v16932_v3, %v6083_v1  ;;  %v6081_v11 = vmax.f32 %v5481_v9, 0.0 }
 0x2e5   :  { %v8466_v30 = vmax.f32 %v6276_v19, %v8270_v29  ;;  %v8271_v7 = vmax.f32 %v7671_v56, 0.0  ;;  %v12224_v15 = vpop.f32.mrb[4].mxu0  ;;  %v12424_v40 = vpop.f32.mrb[4].mxu1  ;;  %v12930_v19 = vld [vmem:[%s16752_s0 + $0x8e8] sm:$0xff]   ;;  %v12931_v56 = vld [vmem:[%s16752_s0 + $0xbf8] sm:$0xff]  }
 0x2e6   :  { %v11220_v22 = vpack.c.bf16 %v8468_v4, %v8468_v4  ;;  %v8469_v16 = vmax.f32 %v6279_v32, %v8273_v53  ;;  %v6277_v34 = vmax.f32 %v16933_v10, %v6081_v11  ;;  %v5502_v21 = vadd.f32 %v15462_v36, %v12224_v15  ;;  %v5493_v35 = vpop.f32.mrb[5].mxu0  ;;  %v7683_v45 = vpop.f32.mrb[5].mxu1  ;;  %v12933_v15 = vld [vmem:[%s16752_s0 + $0xc00] sm:$0xff]  }
 0x2e7   :  { %v11218_v25 = vpack.c.bf16 %v8466_v30, %v8466_v30  ;;  %v7692_v14 = vadd.f32 %v15462_v36, %v12424_v40  ;;  %v5494_v38 = vadd.f32 %v15462_v36, %v5493_v35  ;;  %v7684_v41 = vadd.f32 %v15462_v36, %v7683_v45  ;;  %v12225_v62 = vpop.f32.mrb[6].mxu0  ;;  %v12425_v58 = vpop.f32.mrb[6].mxu1 }
 0x2e8   :  { %9449 = vst.msk [vmem:[%s16754_s3 + $0xf8] sm:$0xf] %vm9386_vm1, %v11220_v22  ;;  %v11221_v43 = vpack.c.bf16 %v8469_v16, %v8469_v16  ;;  %v8467_v47 = vmax.f32 %v6277_v34, %v8271_v7  ;;  %v6086_v0 = vmax.f32 %v5502_v21, 0.0  ;;  %v5505_v20 = vadd.f32 %v15462_v36, %v12225_v62  ;;  %v5496_v54 = vpop.f32.mrb[7].mxu0  ;;  %v7686_v8 = vpop.f32.mrb[7].mxu1  ;;  %v12932_v7 = vld [vmem:[%s16752_s0 + $0x8f0] sm:$0xff]  }
 0x2e9   :  { %9447 = vst.msk [vmem:[%s16754_s3 + $0xf0] sm:$0xf] %vm9386_vm1, %v11218_v25  ;;  %v8276_v17 = vmax.f32 %v7692_v14, 0.0  ;;  %v6084_v49 = vmax.f32 %v5494_v38, 0.0  ;;  %v8274_v60 = vmax.f32 %v7684_v41, 0.0  ;;  %v7695_v39 = vadd.f32 %v15462_v36, %v12425_v58  ;;  %v16938_v14 = vld [vmem:[#allocation30_spill] sm:$0xff] }
 0x2ea   :  { %9450 = vst.msk [vmem:[%s16754_s3 + $0xfc] sm:$0xf] %vm9386_vm1, %v11221_v43  ;;  %v11219_v28 = vpack.c.bf16 %v8467_v47, %v8467_v47  ;;  %v6282_v57 = vmax.f32 %v16934_v37, %v6086_v0  ;;  %v6087_v13 = vmax.f32 %v5505_v20, 0.0  ;;  %v5497_v48 = vadd.f32 %v15462_v36, %v5496_v54  ;;  %12331 = vmatmul.mubr.msk.bf16.gmra.mrb[112].mxu0 %vm724_vm0, %v12926_v59  ;;  %v16939_v58 = vld [vmem:[#allocation31_spill] sm:$0xff]  ;;  %v16940_v47 = vld [vmem:[#allocation32_spill] sm:$0xff]  ;;  %v16941_v37 = vld [vmem:[#allocation33_spill] sm:$0xff] }
 0x2eb   :  { %12531 = vmatmul.mubr.msk.bf16.gmra.mrb[112].mxu1 %vm724_vm0, %v12927_v24  ;;  %v6280_v23 = vmax.f32 %v16935_v55, %v6084_v49  ;;  %v7687_v46 = vadd.f32 %v15462_v36, %v7686_v8  ;;  %12334 = vmatprep.mubr.msk.bf16.mxu0 %vm724_vm0, %v12928_v27  ;;  %v8277_v61 = vmax.f32 %v7695_v39, 0.0 }
 0x2ec   :  { %12534 = vmatprep.mubr.msk.bf16.mxu1 %vm724_vm0, %v12929_v44  ;;  %9448 = vst.msk [vmem:[%s16754_s3 + $0xf4] sm:$0xf] %vm9386_vm1, %v11219_v28  ;;  %v8472_v5 = vmax.f32 %v6282_v57, %v8276_v17  ;;  %v6283_v63 = vmax.f32 %v16936_v33, %v6087_v13  ;;  %v6085_v42 = vmax.f32 %v5497_v48, 0.0 }
 0x2ed   :  { %v8470_v6 = vmax.f32 %v6280_v23, %v8274_v60  ;;  %v8275_v52 = vmax.f32 %v7687_v46, 0.0  ;;  %v12228_v50 = vpop.f32.mrb[8].mxu0  ;;  %v12428_v29 = vpop.f32.mrb[8].mxu1  ;;  %v12934_v23 = vld [vmem:[%s16752_s0 + $0x8f8] sm:$0xff]   ;;  %v12935_v46 = vld [vmem:[%s16752_s0 + $0xc08] sm:$0xff]  }
 0x2ee   :  { %v11224_v18 = vpack.c.bf16 %v8472_v5, %v8472_v5  ;;  %v8473_v26 = vmax.f32 %v6283_v63, %v8277_v61  ;;  %v6281_v31 = vmax.f32 %v16937_v2, %v6085_v42  ;;  %v5518_v1 = vadd.f32 %v15462_v36, %v12228_v50  ;;  %v5509_v9 = vpop.f32.mrb[9].mxu0  ;;  %v7699_v12 = vpop.f32.mrb[9].mxu1  ;;  %v12937_v50 = vld [vmem:[%s16752_s0 + $0xc10] sm:$0xff]  }
 0x2ef   :  { %v11222_v4 = vpack.c.bf16 %v8470_v6, %v8470_v6  ;;  %v7708_v3 = vadd.f32 %v15462_v36, %v12428_v29  ;;  %v5510_v32 = vadd.f32 %v15462_v36, %v5509_v9  ;;  %v7700_v53 = vadd.f32 %v15462_v36, %v7699_v12  ;;  %v12229_v11 = vpop.f32.mrb[10].mxu0  ;;  %v12429_v30 = vpop.f32.mrb[10].mxu1 }
 0x2f0   :  { %9453 = vst.msk [vmem:[%s16754_s3 + $0x108] sm:$0xf] %vm9386_vm1, %v11224_v18  ;;  %v11225_v40 = vpack.c.bf16 %v8473_v26, %v8473_v26  ;;  %v8471_v22 = vmax.f32 %v6281_v31, %v8275_v52  ;;  %v6090_v16 = vmax.f32 %v5518_v1, 0.0  ;;  %v5521_v10 = vadd.f32 %v15462_v36, %v12229_v11  ;;  %v5512_v34 = vpop.f32.mrb[11].mxu0  ;;  %v7702_v21 = vpop.f32.mrb[11].mxu1  ;;  %v12936_v52 = vld [vmem:[%s16752_s0 + $0x900] sm:$0xff]  }
 0x2f1   :  { %9451 = vst.msk [vmem:[%s16754_s3 + $0x100] sm:$0xf] %vm9386_vm1, %v11222_v4  ;;  %v8280_v35 = vmax.f32 %v7708_v3, 0.0  ;;  %v6088_v45 = vmax.f32 %v5510_v32, 0.0  ;;  %v8278_v59 = vmax.f32 %v7700_v53, 0.0  ;;  %v7711_v24 = vadd.f32 %v15462_v36, %v12429_v30  ;;  %v16942_v3 = vld [vmem:[#allocation34_spill] sm:$0xff] }
 0x2f2   :  { %9454 = vst.msk [vmem:[%s16754_s3 + $0x10c] sm:$0xf] %vm9386_vm1, %v11225_v40  ;;  %v11223_v25 = vpack.c.bf16 %v8471_v22, %v8471_v22  ;;  %v6286_v38 = vmax.f32 %v16938_v14, %v6090_v16  ;;  %v6091_v41 = vmax.f32 %v5521_v10, 0.0  ;;  %v5513_v62 = vadd.f32 %v15462_v36, %v5512_v34  ;;  %12335 = vmatmul.mubr.msk.bf16.gmra.mrb[116].mxu0 %vm724_vm0, %v12930_v19  ;;  %v16943_v30 = vld [vmem:[#allocation35_spill] sm:$0xff]  ;;  %v16944_v22 = vld [vmem:[#allocation36_spill] sm:$0xff]  ;;  %v16945_v14 = vld [vmem:[#allocation37_spill] sm:$0xff] }
 0x2f3   :  { %12535 = vmatmul.mubr.msk.bf16.gmra.mrb[116].mxu1 %vm724_vm0, %v12931_v56  ;;  %v6284_v27 = vmax.f32 %v16939_v58, %v6088_v45  ;;  %v7703_v44 = vadd.f32 %v15462_v36, %v7702_v21  ;;  %12338 = vmatprep.mubr.msk.bf16.mxu0 %vm724_vm0, %v12932_v7  ;;  %v8281_v20 = vmax.f32 %v7711_v24, 0.0 }
 0x2f4   :  { %12538 = vmatprep.mubr.msk.bf16.mxu1 %vm724_vm0, %v12933_v15  ;;  %9452 = vst.msk [vmem:[%s16754_s3 + $0x104] sm:$0xf] %vm9386_vm1, %v11223_v25  ;;  %v8476_v43 = vmax.f32 %v6286_v38, %v8280_v35  ;;  %v6287_v0 = vmax.f32 %v16940_v47, %v6091_v41  ;;  %v6089_v54 = vmax.f32 %v5513_v62, 0.0 }
 0x2f5   :  { %v8474_v8 = vmax.f32 %v6284_v27, %v8278_v59  ;;  %v8279_v17 = vmax.f32 %v7703_v44, 0.0  ;;  %v12232_v49 = vpop.f32.mrb[12].mxu0  ;;  %v12432_v60 = vpop.f32.mrb[12].mxu1  ;;  %v12938_v27 = vld [vmem:[%s16752_s0 + $0x908] sm:$0xff]   ;;  %v12939_v44 = vld [vmem:[%s16752_s0 + $0xc18] sm:$0xff]  }
 0x2f6   :  { %v11228_v39 = vpack.c.bf16 %v8476_v43, %v8476_v43  ;;  %v8477_v28 = vmax.f32 %v6287_v0, %v8281_v20  ;;  %v6285_v57 = vmax.f32 %v16941_v37, %v6089_v54  ;;  %v5534_v13 = vadd.f32 %v15462_v36, %v12232_v49  ;;  %v5525_v48 = vpop.f32.mrb[13].mxu0  ;;  %v7715_v55 = vpop.f32.mrb[13].mxu1  ;;  %v12941_v49 = vld [vmem:[%s16752_s0 + $0xc20] sm:$0xff]  }
 0x2f7   :  { %v11226_v5 = vpack.c.bf16 %v8474_v8, %v8474_v8  ;;  %v7724_v33 = vadd.f32 %v15462_v36, %v12432_v60  ;;  %v5526_v63 = vadd.f32 %v15462_v36, %v5525_v48  ;;  %v7716_v61 = vadd.f32 %v15462_v36, %v7715_v55  ;;  %v12233_v42 = vpop.f32.mrb[14].mxu0  ;;  %v12433_v6 = vpop.f32.mrb[14].mxu1 }
 0x2f8   :  { %9457 = vst.msk [vmem:[%s16754_s3 + $0x118] sm:$0xf] %vm9386_vm1, %v11228_v39  ;;  %v11229_v29 = vpack.c.bf16 %v8477_v28, %v8477_v28  ;;  %v8475_v18 = vmax.f32 %v6285_v57, %v8279_v17  ;;  %v6094_v26 = vmax.f32 %v5534_v13, 0.0  ;;  %v5537_v2 = vadd.f32 %v15462_v36, %v12233_v42  ;;  %v5528_v31 = vpop.f32.mrb[15].mxu0  ;;  %v7718_v1 = vpop.f32.mrb[15].mxu1  ;;  %v12940_v17 = vld [vmem:[%s16752_s0 + $0x910] sm:$0xff]  }
 0x2f9   :  { %9455 = vst.msk [vmem:[%s16754_s3 + $0x110] sm:$0xf] %vm9386_vm1, %v11226_v5  ;;  %v8284_v9 = vmax.f32 %v7724_v33, 0.0  ;;  %v6092_v12 = vmax.f32 %v5526_v63, 0.0  ;;  %v8282_v19 = vmax.f32 %v7716_v61, 0.0  ;;  %v7727_v56 = vadd.f32 %v15462_v36, %v12433_v6  ;;  %v16946_v33 = vld [vmem:[#allocation38_spill] sm:$0xff] }
 0x2fa   :  { %9458 = vst.msk [vmem:[%s16754_s3 + $0x11c] sm:$0xf] %vm9386_vm1, %v11229_v29  ;;  %v11227_v4 = vpack.c.bf16 %v8475_v18, %v8475_v18  ;;  %v6290_v32 = vmax.f32 %v16942_v3, %v6094_v26  ;;  %v6095_v53 = vmax.f32 %v5537_v2, 0.0  ;;  %v5529_v11 = vadd.f32 %v15462_v36, %v5528_v31  ;;  %12339 = vmatmul.mubr.msk.bf16.gmra.mrb[120].mxu0 %vm724_vm0, %v12934_v23  ;;  %v16947_v6 = vld [vmem:[#allocation39_spill] sm:$0xff]  ;;  %v16948_v18 = vld [vmem:[#allocation40_spill] sm:$0xff]  ;;  %v16949_v3 = vld [vmem:[#allocation41_spill] sm:$0xff] }
 0x2fb   :  { %12539 = vmatmul.mubr.msk.bf16.gmra.mrb[120].mxu1 %vm724_vm0, %v12935_v46  ;;  %v6288_v7 = vmax.f32 %v16943_v30, %v6092_v12  ;;  %v7719_v15 = vadd.f32 %v15462_v36, %v7718_v1  ;;  %12342 = vmatprep.mubr.msk.bf16.mxu0 %vm724_vm0, %v12936_v52  ;;  %v8285_v10 = vmax.f32 %v7727_v56, 0.0 }
 0x2fc   :  { %12542 = vmatprep.mubr.msk.bf16.mxu1 %vm724_vm0, %v12937_v50  ;;  %9456 = vst.msk [vmem:[%s16754_s3 + $0x114] sm:$0xf] %vm9386_vm1, %v11227_v4  ;;  %v8480_v40 = vmax.f32 %v6290_v32, %v8284_v9  ;;  %v6291_v16 = vmax.f32 %v16944_v22, %v6095_v53  ;;  %v6093_v34 = vmax.f32 %v5529_v11, 0.0 }
 0x2fd   :  { %v8478_v21 = vmax.f32 %v6288_v7, %v8282_v19  ;;  %v8283_v35 = vmax.f32 %v7719_v15, 0.0  ;;  %v12236_v45 = vpop.f32.mrb[16].mxu0  ;;  %v12436_v59 = vpop.f32.mrb[16].mxu1  ;;  %v12942_v7 = vld [vmem:[%s16752_s0 + $0x918] sm:$0xff]   ;;  %v12943_v15 = vld [vmem:[%s16752_s0 + $0xc28] sm:$0xff]  }
 0x2fe   :  { %v11232_v24 = vpack.c.bf16 %v8480_v40, %v8480_v40  ;;  %v8481_v25 = vmax.f32 %v6291_v16, %v8285_v10  ;;  %v6289_v38 = vmax.f32 %v16945_v14, %v6093_v34  ;;  %v5550_v41 = vadd.f32 %v15462_v36, %v12236_v45  ;;  %v5541_v62 = vpop.f32.mrb[17].mxu0  ;;  %v7731_v58 = vpop.f32.mrb[17].mxu1  ;;  %v12945_v45 = vld [vmem:[%s16752_s0 + $0xc30] sm:$0xff]  }
 0x2ff   :  { %v11230_v43 = vpack.c.bf16 %v8478_v21, %v8478_v21  ;;  %v7740_v47 = vadd.f32 %v15462_v36, %v12436_v59  ;;  %v5542_v0 = vadd.f32 %v15462_v36, %v5541_v62  ;;  %v7732_v20 = vadd.f32 %v15462_v36, %v7731_v58  ;;  %v12237_v54 = vpop.f32.mrb[18].mxu0  ;;  %v12437_v8 = vpop.f32.mrb[18].mxu1 }
 0x300   :  { %9461 = vst.msk [vmem:[%s16754_s3 + $0x128] sm:$0xf] %vm9386_vm1, %v11232_v24  ;;  %v11233_v60 = vpack.c.bf16 %v8481_v25, %v8481_v25  ;;  %v8479_v39 = vmax.f32 %v6289_v38, %v8283_v35  ;;  %v6098_v28 = vmax.f32 %v5550_v41, 0.0  ;;  %v5553_v37 = vadd.f32 %v15462_v36, %v12237_v54  ;;  %v5544_v57 = vpop.f32.mrb[19].mxu0  ;;  %v7734_v13 = vpop.f32.mrb[19].mxu1  ;;  %v12944_v35 = vld [vmem:[%s16752_s0 + $0x920] sm:$0xff]  }
 0x301   :  { %9459 = vst.msk [vmem:[%s16754_s3 + $0x120] sm:$0xf] %vm9386_vm1, %v11230_v43  ;;  %v8288_v48 = vmax.f32 %v7740_v47, 0.0  ;;  %v6096_v55 = vmax.f32 %v5542_v0, 0.0  ;;  %v8286_v23 = vmax.f32 %v7732_v20, 0.0  ;;  %v7743_v46 = vadd.f32 %v15462_v36, %v12437_v8  ;;  %v16950_v47 = vld [vmem:[#allocation42_spill] sm:$0xff] }
 0x302   :  { %9462 = vst.msk [vmem:[%s16754_s3 + $0x12c] sm:$0xf] %vm9386_vm1, %v11233_v60  ;;  %v11231_v5 = vpack.c.bf16 %v8479_v39, %v8479_v39  ;;  %v6294_v63 = vmax.f32 %v16946_v33, %v6098_v28  ;;  %v6099_v61 = vmax.f32 %v5553_v37, 0.0  ;;  %v5545_v42 = vadd.f32 %v15462_v36, %v5544_v57  ;;  %12343 = vmatmul.mubr.msk.bf16.gmra.mrb[124].mxu0 %vm724_vm0, %v12938_v27  ;;  %v16951_v8 = vld [vmem:[#allocation43_spill] sm:$0xff]  ;;  %v16952_v39 = vld [vmem:[#allocation44_spill] sm:$0xff]  ;;  %v16953_v33 = vld [vmem:[#allocation45_spill] sm:$0xff] }
 0x303   :  { %12543 = vmatmul.mubr.msk.bf16.gmra.mrb[124].mxu1 %vm724_vm0, %v12939_v44  ;;  %v6292_v52 = vmax.f32 %v16947_v6, %v6096_v55  ;;  %v7735_v50 = vadd.f32 %v15462_v36, %v7734_v13  ;;  %12346 = vmatprep.mubr.msk.bf16.mxu0 %vm724_vm0, %v12940_v17  ;;  %v8289_v2 = vmax.f32 %v7743_v46, 0.0 }
 0x304   :  { %12546 = vmatprep.mubr.msk.bf16.mxu1 %vm724_vm0, %v12941_v49  ;;  %9460 = vst.msk [vmem:[%s16754_s3 + $0x124] sm:$0xf] %vm9386_vm1, %v11231_v5  ;;  %v8484_v29 = vmax.f32 %v6294_v63, %v8288_v48  ;;  %v6295_v26 = vmax.f32 %v16948_v18, %v6099_v61  ;;  %v6097_v31 = vmax.f32 %v5545_v42, 0.0  ;;  %v15938_v18 = vld [vmem:[%s16753_s2] ss:$0 sm:$0xff] }
 0x305   :  { %v8482_v1 = vmax.f32 %v6292_v52, %v8286_v23  ;;  %v8287_v9 = vmax.f32 %v7735_v50, 0.0  ;;  %v12240_v12 = vpop.f32.mrb[20].mxu0  ;;  %v12440_v19 = vpop.f32.mrb[20].mxu1  ;;  %v12946_v52 = vld [vmem:[%s16752_s0 + $0x928] sm:$0xff]   ;;  %v12947_v50 = vld [vmem:[%s16752_s0 + $0xc38] sm:$0xff]  }
 0x306   :  { %v11236_v56 = vpack.c.bf16 %v8484_v29, %v8484_v29  ;;  %v8485_v4 = vmax.f32 %v6295_v26, %v8289_v2  ;;  %v6293_v32 = vmax.f32 %v16949_v3, %v6097_v31  ;;  %v5566_v53 = vadd.f32 %v15462_v36, %v12240_v12  ;;  %v5557_v11 = vpop.f32.mrb[21].mxu0  ;;  %v7747_v30 = vpop.f32.mrb[21].mxu1 }
 0x307   :  { %v11234_v40 = vpack.c.bf16 %v8482_v1, %v8482_v1  ;;  %v7756_v22 = vadd.f32 %v15462_v36, %v12440_v19  ;;  %v5558_v16 = vadd.f32 %v15462_v36, %v5557_v11  ;;  %v7748_v10 = vadd.f32 %v15462_v36, %v7747_v30  ;;  %v12241_v34 = vpop.f32.mrb[22].mxu0  ;;  %v12441_v21 = vpop.f32.mrb[22].mxu1 }
 0x308   :  { %9465 = vst.msk [vmem:[%s16754_s3 + $0x138] sm:$0xf] %vm9386_vm1, %v11236_v56  ;;  %v11237_v59 = vpack.c.bf16 %v8485_v4, %v8485_v4  ;;  %v8483_v24 = vmax.f32 %v6293_v32, %v8287_v9  ;;  %v6102_v25 = vmax.f32 %v5566_v53, 0.0  ;;  %v5569_v14 = vadd.f32 %v15462_v36, %v12241_v34  ;;  %v5560_v38 = vpop.f32.mrb[23].mxu0  ;;  %v7750_v41 = vpop.f32.mrb[23].mxu1 }
 0x309   :  { %9463 = vst.msk [vmem:[%s16754_s3 + $0x130] sm:$0xf] %vm9386_vm1, %v11234_v40  ;;  %v8292_v62 = vmax.f32 %v7756_v22, 0.0  ;;  %v6100_v58 = vmax.f32 %v5558_v16, 0.0  ;;  %v8290_v27 = vmax.f32 %v7748_v10, 0.0  ;;  %v7759_v44 = vadd.f32 %v15462_v36, %v12441_v21  ;;  %v16955_v10 = vld [vmem:[#allocation47_spill] sm:$0xff] }
 0x30a   :  { %9466 = vst.msk [vmem:[%s16754_s3 + $0x13c] sm:$0xf] %vm9386_vm1, %v11237_v59  ;;  %v11235_v43 = vpack.c.bf16 %v8483_v24, %v8483_v24  ;;  %v6298_v0 = vmax.f32 %v16950_v47, %v6102_v25  ;;  %v6103_v20 = vmax.f32 %v5569_v14, 0.0  ;;  %v5561_v54 = vadd.f32 %v15462_v36, %v5560_v38  ;;  %12347 = vmatmul.mubr.msk.bf16.gmra.mrb[128].mxu0 %vm724_vm0, %v12942_v7 }
 0x30b   :  { %12547 = vmatmul.mubr.msk.bf16.gmra.mrb[128].mxu1 %vm724_vm0, %v12943_v15  ;;  %v6296_v17 = vmax.f32 %v16951_v8, %v6100_v58  ;;  %v7751_v49 = vadd.f32 %v15462_v36, %v7750_v41  ;;  %12350 = vmatprep.mubr.msk.bf16.mxu0 %vm724_vm0, %v12944_v35  ;;  %v8293_v37 = vmax.f32 %v7759_v44, 0.0  ;;  %v16954_v15 = vld [vmem:[#allocation46_spill] sm:$0xff]  ;;  %v16957_v44 = vld [vmem:[#allocation49_spill] sm:$0xff] }
 0x30c   :  { %12550 = vmatprep.mubr.msk.bf16.mxu1 %vm724_vm0, %v12945_v45  ;;  %9464 = vst.msk [vmem:[%s16754_s3 + $0x134] sm:$0xf] %vm9386_vm1, %v11235_v43  ;;  %v8488_v60 = vmax.f32 %v6298_v0, %v8292_v62  ;;  %v6299_v28 = vmax.f32 %v16952_v39, %v6103_v20  ;;  %v6101_v57 = vmax.f32 %v5561_v54, 0.0  ;;  %v16956_v45 = vld [vmem:[#allocation48_spill] sm:$0xff] }
 0x30d   :  { %v8486_v13 = vmax.f32 %v6296_v17, %v8290_v27  ;;  %v8291_v48 = vmax.f32 %v7751_v49, 0.0  ;;  %v12244_v55 = vpop.f32.mrb[24].mxu0  ;;  %v12444_v23 = vpop.f32.mrb[24].mxu1 }
 0x30e   :  { %v11240_v46 = vpack.c.bf16 %v8488_v60, %v8488_v60  ;;  %v8489_v5 = vmax.f32 %v6299_v28, %v8293_v37  ;;  %v6297_v63 = vmax.f32 %v16953_v33, %v6101_v57  ;;  %v5582_v61 = vadd.f32 %v15462_v36, %v12244_v55  ;;  %v5573_v42 = vpop.f32.mrb[25].mxu0  ;;  %v7763_v6 = vpop.f32.mrb[25].mxu1 }
 0x30f   :  { %v11238_v29 = vpack.c.bf16 %v8486_v13, %v8486_v13  ;;  %v7772_v26 = vadd.f32 %v15938_v18, %v12444_v23  ;;  %v5574_v36 = vadd.f32 %v15938_v18, %v5573_v42  ;;  %v7764_v2 = vadd.f32 %v15938_v18, %v7763_v6  ;;  %v12245_v31 = vpop.f32.mrb[26].mxu0  ;;  %v12445_v1 = vpop.f32.mrb[26].mxu1 }
 0x310   :  { %9469 = vst.msk [vmem:[%s16754_s3 + $0x148] sm:$0xf] %vm9386_vm1, %v11240_v46  ;;  %v11241_v9 = vpack.c.bf16 %v8489_v5, %v8489_v5  ;;  %v8487_v12 = vmax.f32 %v6297_v63, %v8291_v48  ;;  %v6106_v19 = vmax.f32 %v5582_v61, 0.0  ;;  %v5585_v56 = vadd.f32 %v15938_v18, %v12245_v31  ;;  %v5576_v4 = vpop.f32.mrb[27].mxu0  ;;  %v7766_v3 = vpop.f32.mrb[27].mxu1  ;;  %v16958_v61 = vld [vmem:[#allocation50_spill] sm:$0xff] }
 0x311   :  { %9467 = vst.msk [vmem:[%s16754_s3 + $0x140] sm:$0xf] %vm9386_vm1, %v11238_v29  ;;  %v8296_v32 = vmax.f32 %v7772_v26, 0.0  ;;  %v6104_v53 = vmax.f32 %v5574_v36, 0.0  ;;  %v8294_v11 = vmax.f32 %v7764_v2, 0.0  ;;  %v7775_v30 = vadd.f32 %v15938_v18, %v12445_v1  ;;  %v16960_v2 = vld [vmem:[#allocation52_spill] sm:$0xff] }
 0x312   :  { %9470 = vst.msk [vmem:[%s16754_s3 + $0x14c] sm:$0xf] %vm9386_vm1, %v11241_v9  ;;  %v11239_v7 = vpack.c.bf16 %v8487_v12, %v8487_v12  ;;  %v6302_v40 = vmax.f32 %v16954_v15, %v6106_v19  ;;  %v6107_v22 = vmax.f32 %v5585_v56, 0.0  ;;  %v5577_v16 = vadd.f32 %v15938_v18, %v5576_v4  ;;  %12351 = vmatmul.mubr.msk.bf16.gmra.mrb[132].mxu0 %vm724_vm0, %v12946_v52 }
 0x313   :  { %12551 = vmatmul.mubr.msk.bf16.gmra.mrb[132].mxu1 %vm724_vm0, %v12947_v50  ;;  %v6300_v34 = vmax.f32 %v16955_v10, %v6104_v53  ;;  %v7767_v21 = vadd.f32 %v15938_v18, %v7766_v3  ;;  %v8297_v24 = vmax.f32 %v7775_v30, 0.0  ;;  %v16959_v50 = vld [vmem:[#allocation51_spill] sm:$0xff]  ;;  %v16961_v53 = vld [vmem:[#allocation53_spill] sm:$0xff] }
 0x314   :  { %9468 = vst.msk [vmem:[%s16754_s3 + $0x144] sm:$0xf] %vm9386_vm1, %v11239_v7  ;;  %v8492_v35 = vmax.f32 %v6302_v40, %v8296_v32  ;;  %v6303_v59 = vmax.f32 %v16956_v45, %v6107_v22  ;;  %v6105_v25 = vmax.f32 %v5577_v16, 0.0 }
 0x315   :  { %v8490_v14 = vmax.f32 %v6300_v34, %v8294_v11  ;;  %v8295_v38 = vmax.f32 %v7767_v21, 0.0  ;;  %v12248_v41 = vpop.f32.mrb[28].mxu0  ;;  %v12448_v62 = vpop.f32.mrb[28].mxu1 }
 0x316   :  { %v11244_v58 = vpack.c.bf16 %v8492_v35, %v8492_v35  ;;  %v8493_v27 = vmax.f32 %v6303_v59, %v8297_v24  ;;  %v6301_v43 = vmax.f32 %v16957_v44, %v6105_v25  ;;  %v5598_v47 = vadd.f32 %v15938_v18, %v12248_v41  ;;  %v5589_v0 = vpop.f32.mrb[29].mxu0  ;;  %v7779_v20 = vpop.f32.mrb[29].mxu1  ;;  %v16962_v44 = vld [vmem:[#allocation54_spill] sm:$0xff] }
 0x317   :  { %v11242_v54 = vpack.c.bf16 %v8490_v14, %v8490_v14  ;;  %v7788_v8 = vadd.f32 %v15938_v18, %v12448_v62  ;;  %v5590_v17 = vadd.f32 %v15938_v18, %v5589_v0  ;;  %v7780_v49 = vadd.f32 %v15938_v18, %v7779_v20  ;;  %v12249_v60 = vpop.f32.mrb[30].mxu0  ;;  %v12449_v39 = vpop.f32.mrb[30].mxu1  ;;  %v16963_v20 = vld [vmem:[#allocation55_spill] sm:$0xff] }
 0x318   :  { %9473 = vst.msk [vmem:[%s16754_s3 + $0x158] sm:$0xf] %vm9386_vm1, %v11244_v58  ;;  %v11245_v28 = vpack.c.bf16 %v8493_v27, %v8493_v27  ;;  %v8491_v37 = vmax.f32 %v6301_v43, %v8295_v38  ;;  %v6110_v57 = vmax.f32 %v5598_v47, 0.0  ;;  %v5601_v13 = vadd.f32 %v15938_v18, %v12249_v60  ;;  %v5592_v48 = vpop.f32.mrb[31].mxu0  ;;  %v7782_v55 = vpop.f32.mrb[31].mxu1 }
 0x319   :  { %9471 = vst.msk [vmem:[%s16754_s3 + $0x150] sm:$0xf] %vm9386_vm1, %v11242_v54  ;;  %v8300_v23 = vmax.f32 %v7788_v8, 0.0  ;;  %v6108_v46 = vmax.f32 %v5590_v17, 0.0  ;;  %v8298_v5 = vmax.f32 %v7780_v49, 0.0  ;;  %v7791_v33 = vadd.f32 %v15938_v18, %v12449_v39  ;;  %v16964_v49 = vld [vmem:[#allocation56_spill] sm:$0xff] }
 0x31a   :  { %9474 = vst.msk [vmem:[%s16754_s3 + $0x15c] sm:$0xf] %vm9386_vm1, %v11245_v28  ;;  %v11243_v63 = vpack.c.bf16 %v8491_v37, %v8491_v37  ;;  %v6306_v42 = vmax.f32 %v16958_v61, %v6110_v57  ;;  %v6111_v6 = vmax.f32 %v5601_v13, 0.0  ;;  %v5593_v52 = vadd.f32 %v15938_v18, %v5592_v48 }
 0x31b   :  { %v6304_v29 = vmax.f32 %v16959_v50, %v6108_v46  ;;  %v7783_v26 = vadd.f32 %v15938_v18, %v7782_v55  ;;  %v8301_v1 = vmax.f32 %v7791_v33, 0.0  ;;  %v16965_v46 = vld [vmem:[#allocation57_spill] sm:$0xff] }
 0x31c   :  { %9472 = vst.msk [vmem:[%s16754_s3 + $0x154] sm:$0xf] %vm9386_vm1, %v11243_v63  ;;  %v8496_v36 = vmax.f32 %v6306_v42, %v8300_v23  ;;  %v6307_v31 = vmax.f32 %v16960_v2, %v6111_v6  ;;  %v6109_v9 = vmax.f32 %v5593_v52, 0.0 }
 0x31d   :  { %v8494_v12 = vmax.f32 %v6304_v29, %v8298_v5  ;;  %v8299_v19 = vmax.f32 %v7783_v26, 0.0  ;;  %v12252_v56 = vpop.f32.mrb[32].mxu0  ;;  %v12452_v4 = vpop.f32.mrb[32].mxu1 }
 0x31e   :  { %v11248_v3 = vpack.c.bf16 %v8496_v36, %v8496_v36  ;;  %v8497_v32 = vmax.f32 %v6307_v31, %v8301_v1  ;;  %v6305_v11 = vmax.f32 %v16961_v53, %v6109_v9  ;;  %v5614_v30 = vadd.f32 %v15938_v18, %v12252_v56  ;;  %v5605_v7 = vpop.f32.mrb[33].mxu0  ;;  %v7795_v15 = vpop.f32.mrb[33].mxu1  ;;  %v16966_v53 = vld [vmem:[#allocation58_spill] sm:$0xff] }
 0x31f   :  { %v11246_v40 = vpack.c.bf16 %v8494_v12, %v8494_v12  ;;  %v7804_v22 = vadd.f32 %v15938_v18, %v12452_v4  ;;  %v5606_v16 = vadd.f32 %v15938_v18, %v5605_v7  ;;  %v7796_v10 = vadd.f32 %v15938_v18, %v7795_v15  ;;  %v12253_v34 = vpop.f32.mrb[34].mxu0  ;;  %v12453_v21 = vpop.f32.mrb[34].mxu1  ;;  %v16967_v15 = vld [vmem:[#allocation59_spill] sm:$0xff] }
 0x320   :  { %9477 = vst.msk [vmem:[%s16754_s3 + $0x168] sm:$0xf] %vm9386_vm1, %v11248_v3  ;;  %v11249_v35 = vpack.c.bf16 %v8497_v32, %v8497_v32  ;;  %v8495_v45 = vmax.f32 %v6305_v11, %v8299_v19  ;;  %v6114_v59 = vmax.f32 %v5614_v30, 0.0  ;;  %v5617_v24 = vadd.f32 %v15938_v18, %v12253_v34  ;;  %v5608_v25 = vpop.f32.mrb[35].mxu0  ;;  %v7798_v14 = vpop.f32.mrb[35].mxu1 }
 0x321   :  { %9475 = vst.msk [vmem:[%s16754_s3 + $0x160] sm:$0xf] %vm9386_vm1, %v11246_v40  ;;  %v8304_v38 = vmax.f32 %v7804_v22, 0.0  ;;  %v6112_v41 = vmax.f32 %v5606_v16, 0.0  ;;  %v8302_v62 = vmax.f32 %v7796_v10, 0.0  ;;  %v7807_v58 = vadd.f32 %v15938_v18, %v12453_v21  ;;  %v16968_v10 = vld [vmem:[#allocation60_spill] sm:$0xff] }
 0x322   :  { %9478 = vst.msk [vmem:[%s16754_s3 + $0x16c] sm:$0xf] %vm9386_vm1, %v11249_v35  ;;  %v11247_v27 = vpack.c.bf16 %v8495_v45, %v8495_v45  ;;  %v6310_v43 = vmax.f32 %v16962_v44, %v6114_v59  ;;  %v6115_v47 = vmax.f32 %v5617_v24, 0.0  ;;  %v5609_v0 = vadd.f32 %v15938_v18, %v5608_v25 }
 0x323   :  { %v6308_v54 = vmax.f32 %v16963_v20, %v6112_v41  ;;  %v7799_v8 = vadd.f32 %v15938_v18, %v7798_v14  ;;  %v8305_v39 = vmax.f32 %v7807_v58, 0.0  ;;  %v16969_v41 = vld [vmem:[#allocation61_spill] sm:$0xff] }
 0x324   :  { %9476 = vst.msk [vmem:[%s16754_s3 + $0x164] sm:$0xf] %vm9386_vm1, %v11247_v27  ;;  %v8500_v17 = vmax.f32 %v6310_v43, %v8304_v38  ;;  %v6311_v60 = vmax.f32 %v16964_v49, %v6115_v47  ;;  %v6113_v28 = vmax.f32 %v5609_v0, 0.0 }
 0x325   :  { %v8498_v37 = vmax.f32 %v6308_v54, %v8302_v62  ;;  %v8303_v57 = vmax.f32 %v7799_v8, 0.0  ;;  %v12256_v13 = vpop.f32.mrb[36].mxu0  ;;  %v12456_v48 = vpop.f32.mrb[36].mxu1 }
 0x326   :  { %v11252_v55 = vpack.c.bf16 %v8500_v17, %v8500_v17  ;;  %v8501_v23 = vmax.f32 %v6311_v60, %v8305_v39  ;;  %v6309_v5 = vmax.f32 %v16965_v46, %v6113_v28  ;;  %v5630_v33 = vadd.f32 %v15938_v18, %v12256_v13  ;;  %v5621_v63 = vpop.f32.mrb[37].mxu0  ;;  %v7811_v61 = vpop.f32.mrb[37].mxu1  ;;  %v16970_v46 = vld [vmem:[#allocation62_spill] sm:$0xff] }
 0x327   :  { %v11250_v42 = vpack.c.bf16 %v8498_v37, %v8498_v37  ;;  %v7820_v6 = vadd.f32 %v15938_v18, %v12456_v48  ;;  %v5622_v52 = vadd.f32 %v15938_v18, %v5621_v63  ;;  %v7812_v50 = vadd.f32 %v15938_v18, %v7811_v61  ;;  %v12257_v29 = vpop.f32.mrb[38].mxu0  ;;  %v12457_v26 = vpop.f32.mrb[38].mxu1  ;;  %v16971_v61 = vld [vmem:[#allocation63_spill] sm:$0xff] }
 0x328   :  { %9481 = vst.msk [vmem:[%s16754_s3 + $0x178] sm:$0xf] %vm9386_vm1, %v11252_v55  ;;  %v11253_v36 = vpack.c.bf16 %v8501_v23, %v8501_v23  ;;  %v8499_v2 = vmax.f32 %v6309_v5, %v8303_v57  ;;  %v6118_v31 = vmax.f32 %v5630_v33, 0.0  ;;  %v5633_v1 = vadd.f32 %v15938_v18, %v12257_v29  ;;  %v5624_v9 = vpop.f32.mrb[39].mxu0  ;;  %v7814_v12 = vpop.f32.mrb[39].mxu1 }
 0x329   :  { %9479 = vst.msk [vmem:[%s16754_s3 + $0x170] sm:$0xf] %vm9386_vm1, %v11250_v42  ;;  %v8308_v19 = vmax.f32 %v7820_v6, 0.0  ;;  %v6116_v56 = vmax.f32 %v5622_v52, 0.0  ;;  %v8306_v4 = vmax.f32 %v7812_v50, 0.0  ;;  %v7823_v3 = vadd.f32 %v15938_v18, %v12457_v26  ;;  %v16972_v50 = vld [vmem:[#allocation64_spill] sm:$0xff] }
 0x32a   :  { %9482 = vst.msk [vmem:[%s16754_s3 + $0x17c] sm:$0xf] %vm9386_vm1, %v11253_v36  ;;  %v11251_v32 = vpack.c.bf16 %v8499_v2, %v8499_v2  ;;  %v6314_v11 = vmax.f32 %v16966_v53, %v6118_v31  ;;  %v6119_v30 = vmax.f32 %v5633_v1, 0.0  ;;  %v5625_v7 = vadd.f32 %v15938_v18, %v5624_v9 }
 0x32b   :  { %v6312_v40 = vmax.f32 %v16967_v15, %v6116_v56  ;;  %v7815_v22 = vadd.f32 %v15938_v18, %v7814_v12  ;;  %v8309_v21 = vmax.f32 %v7823_v3, 0.0  ;;  %v16973_v56 = vld [vmem:[#allocation65_spill] sm:$0xff] }
 0x32c   :  { %9480 = vst.msk [vmem:[%s16754_s3 + $0x174] sm:$0xf] %vm9386_vm1, %v11251_v32  ;;  %v8504_v16 = vmax.f32 %v6314_v11, %v8308_v19  ;;  %v6315_v34 = vmax.f32 %v16968_v10, %v6119_v30  ;;  %v6117_v35 = vmax.f32 %v5625_v7, 0.0 }
 0x32d   :  { %v8502_v45 = vmax.f32 %v6312_v40, %v8306_v4  ;;  %v8307_v59 = vmax.f32 %v7815_v22, 0.0  ;;  %v12260_v24 = vpop.f32.mrb[40].mxu0  ;;  %v12460_v25 = vpop.f32.mrb[40].mxu1 }
 0x32e   :  { %v11256_v14 = vpack.c.bf16 %v8504_v16, %v8504_v16  ;;  %v8505_v38 = vmax.f32 %v6315_v34, %v8309_v21  ;;  %v6313_v62 = vmax.f32 %v16969_v41, %v6117_v35  ;;  %v5646_v58 = vadd.f32 %v15938_v18, %v12260_v24  ;;  %v5637_v27 = vpop.f32.mrb[41].mxu0  ;;  %v7827_v44 = vpop.f32.mrb[41].mxu1  ;;  %v16974_v41 = vld [vmem:[#allocation66_spill] sm:$0xff] }
 0x32f   :  { %v11254_v43 = vpack.c.bf16 %v8502_v45, %v8502_v45  ;;  %v7836_v47 = vadd.f32 %v15938_v18, %v12460_v25  ;;  %v5638_v0 = vadd.f32 %v15938_v18, %v5637_v27  ;;  %v7828_v20 = vadd.f32 %v15938_v18, %v7827_v44  ;;  %v12261_v54 = vpop.f32.mrb[42].mxu0  ;;  %v12461_v8 = vpop.f32.mrb[42].mxu1  ;;  %v16975_v44 = vld [vmem:[#allocation67_spill] sm:$0xff] }
 0x330   :  { %9485 = vst.msk [vmem:[%s16754_s3 + $0x188] sm:$0xf] %vm9386_vm1, %v11256_v14  ;;  %v11257_v17 = vpack.c.bf16 %v8505_v38, %v8505_v38  ;;  %v8503_v49 = vmax.f32 %v6313_v62, %v8307_v59  ;;  %v6122_v60 = vmax.f32 %v5646_v58, 0.0  ;;  %v5649_v39 = vadd.f32 %v15938_v18, %v12261_v54  ;;  %v5640_v28 = vpop.f32.mrb[43].mxu0  ;;  %v7830_v37 = vpop.f32.mrb[43].mxu1 }
 0x331   :  { %9483 = vst.msk [vmem:[%s16754_s3 + $0x180] sm:$0xf] %vm9386_vm1, %v11254_v43  ;;  %v8312_v57 = vmax.f32 %v7836_v47, 0.0  ;;  %v6120_v13 = vmax.f32 %v5638_v0, 0.0  ;;  %v8310_v48 = vmax.f32 %v7828_v20, 0.0  ;;  %v7839_v55 = vadd.f32 %v15938_v18, %v12461_v8  ;;  %v16976_v20 = vld [vmem:[#allocation68_spill] sm:$0xff] }
 0x332   :  { %9486 = vst.msk [vmem:[%s16754_s3 + $0x18c] sm:$0xf] %vm9386_vm1, %v11257_v17  ;;  %v11255_v23 = vpack.c.bf16 %v8503_v49, %v8503_v49  ;;  %v6318_v5 = vmax.f32 %v16970_v46, %v6122_v60  ;;  %v6123_v33 = vmax.f32 %v5649_v39, 0.0  ;;  %v5641_v63 = vadd.f32 %v15938_v18, %v5640_v28 }
 0x333   :  { %v6316_v42 = vmax.f32 %v16971_v61, %v6120_v13  ;;  %v7831_v6 = vadd.f32 %v15938_v18, %v7830_v37  ;;  %v8313_v26 = vmax.f32 %v7839_v55, 0.0  ;;  %v16977_v13 = vld [vmem:[#allocation69_spill] sm:$0xff] }
 0x334   :  { %9484 = vst.msk [vmem:[%s16754_s3 + $0x184] sm:$0xf] %vm9386_vm1, %v11255_v23  ;;  %v8508_v52 = vmax.f32 %v6318_v5, %v8312_v57  ;;  %v6319_v29 = vmax.f32 %v16972_v50, %v6123_v33  ;;  %v6121_v36 = vmax.f32 %v5641_v63, 0.0 }
 0x335   :  { %v8506_v2 = vmax.f32 %v6316_v42, %v8310_v48  ;;  %v8311_v31 = vmax.f32 %v7831_v6, 0.0  ;;  %v12264_v1 = vpop.f32.mrb[44].mxu0  ;;  %v12464_v9 = vpop.f32.mrb[44].mxu1 }
 0x336   :  { %v11260_v12 = vpack.c.bf16 %v8508_v52, %v8508_v52  ;;  %v8509_v19 = vmax.f32 %v6319_v29, %v8313_v26  ;;  %v6317_v4 = vmax.f32 %v16973_v56, %v6121_v36  ;;  %v5662_v3 = vadd.f32 %v15938_v18, %v12264_v1  ;;  %v5653_v32 = vpop.f32.mrb[45].mxu0  ;;  %v7843_v53 = vpop.f32.mrb[45].mxu1  ;;  %v16978_v56 = vld [vmem:[#allocation70_spill] sm:$0xff] }
 0x337   :  { %v11258_v11 = vpack.c.bf16 %v8506_v2, %v8506_v2  ;;  %v7852_v30 = vadd.f32 %v15938_v18, %v12464_v9  ;;  %v5654_v7 = vadd.f32 %v15938_v18, %v5653_v32  ;;  %v7844_v15 = vadd.f32 %v15938_v18, %v7843_v53  ;;  %v12265_v40 = vpop.f32.mrb[46].mxu0  ;;  %v12465_v22 = vpop.f32.mrb[46].mxu1  ;;  %v16979_v53 = vld [vmem:[#allocation71_spill] sm:$0xff] }
 0x338   :  { %9489 = vst.msk [vmem:[%s16754_s3 + $0x198] sm:$0xf] %vm9386_vm1, %v11260_v12  ;;  %v11261_v16 = vpack.c.bf16 %v8509_v19, %v8509_v19  ;;  %v8507_v10 = vmax.f32 %v6317_v4, %v8311_v31  ;;  %v6126_v34 = vmax.f32 %v5662_v3, 0.0  ;;  %v5665_v21 = vadd.f32 %v15938_v18, %v12265_v40  ;;  %v5656_v35 = vpop.f32.mrb[47].mxu0  ;;  %v7846_v45 = vpop.f32.mrb[47].mxu1 }
 0x339   :  { %9487 = vst.msk [vmem:[%s16754_s3 + $0x190] sm:$0xf] %vm9386_vm1, %v11258_v11  ;;  %v8316_v59 = vmax.f32 %v7852_v30, 0.0  ;;  %v6124_v24 = vmax.f32 %v5654_v7, 0.0  ;;  %v8314_v25 = vmax.f32 %v7844_v15, 0.0  ;;  %v7855_v14 = vadd.f32 %v15938_v18, %v12465_v22  ;;  %v16980_v15 = vld [vmem:[#allocation72_spill] sm:$0xff] }
 0x33a   :  { %9490 = vst.msk [vmem:[%s16754_s3 + $0x19c] sm:$0xf] %vm9386_vm1, %v11261_v16  ;;  %v11259_v38 = vpack.c.bf16 %v8507_v10, %v8507_v10  ;;  %v6322_v62 = vmax.f32 %v16974_v41, %v6126_v34  ;;  %v6127_v58 = vmax.f32 %v5665_v21, 0.0  ;;  %v5657_v27 = vadd.f32 %v15938_v18, %v5656_v35 }
 0x33b   :  { %v6320_v43 = vmax.f32 %v16975_v44, %v6124_v24  ;;  %v7847_v47 = vadd.f32 %v15938_v18, %v7846_v45  ;;  %v8317_v8 = vmax.f32 %v7855_v14, 0.0  ;;  %v16981_v24 = vld [vmem:[#allocation73_spill] sm:$0xff] }
 0x33c   :  { %9488 = vst.msk [vmem:[%s16754_s3 + $0x194] sm:$0xf] %vm9386_vm1, %v11259_v38  ;;  %v8512_v0 = vmax.f32 %v6322_v62, %v8316_v59  ;;  %v6323_v54 = vmax.f32 %v16976_v20, %v6127_v58  ;;  %v6125_v17 = vmax.f32 %v5657_v27, 0.0 }
 0x33d   :  { %v8510_v49 = vmax.f32 %v6320_v43, %v8314_v25  ;;  %v8315_v60 = vmax.f32 %v7847_v47, 0.0  ;;  %v12268_v39 = vpop.f32.mrb[48].mxu0  ;;  %v12468_v28 = vpop.f32.mrb[48].mxu1 }
 0x33e   :  { %v11264_v37 = vpack.c.bf16 %v8512_v0, %v8512_v0  ;;  %v8513_v57 = vmax.f32 %v6323_v54, %v8317_v8  ;;  %v6321_v48 = vmax.f32 %v16977_v13, %v6125_v17  ;;  %v5678_v55 = vadd.f32 %v15938_v18, %v12268_v39  ;;  %v5669_v23 = vpop.f32.mrb[49].mxu0  ;;  %v7859_v46 = vpop.f32.mrb[49].mxu1  ;;  %v16982_v13 = vld [vmem:[#allocation74_spill] sm:$0xff] }
 0x33f   :  { %v11262_v5 = vpack.c.bf16 %v8510_v49, %v8510_v49  ;;  %v7868_v33 = vadd.f32 %v15938_v18, %v12468_v28  ;;  %v5670_v63 = vadd.f32 %v15938_v18, %v5669_v23  ;;  %v7860_v61 = vadd.f32 %v15938_v18, %v7859_v46  ;;  %v12269_v42 = vpop.f32.mrb[50].mxu0  ;;  %v12469_v6 = vpop.f32.mrb[50].mxu1  ;;  %v16983_v46 = vld [vmem:[#allocation75_spill] sm:$0xff] }
 0x340   :  { %9493 = vst.msk [vmem:[%s16754_s3 + $0x1a8] sm:$0xf] %vm9386_vm1, %v11264_v37  ;;  %v11265_v52 = vpack.c.bf16 %v8513_v57, %v8513_v57  ;;  %v8511_v50 = vmax.f32 %v6321_v48, %v8315_v60  ;;  %v6130_v29 = vmax.f32 %v5678_v55, 0.0  ;;  %v5681_v26 = vadd.f32 %v15938_v18, %v12269_v42  ;;  %v5672_v36 = vpop.f32.mrb[51].mxu0  ;;  %v7862_v2 = vpop.f32.mrb[51].mxu1 }
 0x341   :  { %9491 = vst.msk [vmem:[%s16754_s3 + $0x1a0] sm:$0xf] %vm9386_vm1, %v11262_v5  ;;  %v8320_v31 = vmax.f32 %v7868_v33, 0.0  ;;  %v6128_v1 = vmax.f32 %v5670_v63, 0.0  ;;  %v8318_v9 = vmax.f32 %v7860_v61, 0.0  ;;  %v7871_v12 = vadd.f32 %v15938_v18, %v12469_v6  ;;  %v16984_v61 = vld [vmem:[#allocation76_spill] sm:$0xff] }
 0x342   :  { %9494 = vst.msk [vmem:[%s16754_s3 + $0x1ac] sm:$0xf] %vm9386_vm1, %v11265_v52  ;;  %v11263_v19 = vpack.c.bf16 %v8511_v50, %v8511_v50  ;;  %v6326_v4 = vmax.f32 %v16978_v56, %v6130_v29  ;;  %v6131_v3 = vmax.f32 %v5681_v26, 0.0  ;;  %v5673_v32 = vadd.f32 %v15938_v18, %v5672_v36 }
 0x343   :  { %v6324_v11 = vmax.f32 %v16979_v53, %v6128_v1  ;;  %v7863_v30 = vadd.f32 %v15938_v18, %v7862_v2  ;;  %v8321_v22 = vmax.f32 %v7871_v12, 0.0  ;;  %v16985_v1 = vld [vmem:[#allocation77_spill] sm:$0xff] }
 0x344   :  { %9492 = vst.msk [vmem:[%s16754_s3 + $0x1a4] sm:$0xf] %vm9386_vm1, %v11263_v19  ;;  %v8516_v7 = vmax.f32 %v6326_v4, %v8320_v31  ;;  %v6327_v40 = vmax.f32 %v16980_v15, %v6131_v3  ;;  %v6129_v16 = vmax.f32 %v5673_v32, 0.0 }
 0x345   :  { %v8514_v10 = vmax.f32 %v6324_v11, %v8318_v9  ;;  %v8319_v34 = vmax.f32 %v7863_v30, 0.0  ;;  %v12272_v21 = vpop.f32.mrb[52].mxu0 }
 0x346   :  { %v12472_v35 = vpop.f32.mrb[52].mxu1  ;;  %v11268_v45 = vpack.c.bf16 %v8516_v7, %v8516_v7  ;;  %v8517_v59 = vmax.f32 %v6327_v40, %v8321_v22  ;;  %v6325_v25 = vmax.f32 %v16981_v24, %v6129_v16  ;;  %v5694_v14 = vadd.f32 %v15938_v18, %v12272_v21  ;;  %v5685_v38 = vpop.f32.mrb[53].mxu0  ;;  %v16986_v24 = vld [vmem:[#allocation78_spill] sm:$0xff] }
 0x347   :  { %v7875_v41 = vpop.f32.mrb[53].mxu1  ;;  %v11266_v62 = vpack.c.bf16 %v8514_v10, %v8514_v10  ;;  %v7884_v58 = vadd.f32 %v15938_v18, %v12472_v35  ;;  %v5686_v27 = vadd.f32 %v15938_v18, %v5685_v38  ;;  %v12273_v43 = vpop.f32.mrb[54].mxu0 }
 0x348   :  { %v7876_v44 = vadd.f32 %v15938_v18, %v7875_v41  ;;  %v12473_v47 = vpop.f32.mrb[54].mxu1  ;;  %9497 = vst.msk [vmem:[%s16754_s3 + $0x1b8] sm:$0xf] %vm9386_vm1, %v11268_v45  ;;  %v11269_v0 = vpack.c.bf16 %v8517_v59, %v8517_v59  ;;  %v8515_v20 = vmax.f32 %v6325_v25, %v8319_v34  ;;  %v6134_v54 = vmax.f32 %v5694_v14, 0.0  ;;  %v5688_v17 = vpop.f32.mrb[55].mxu0  ;;  %v16987_v41 = vld [vmem:[#allocation79_spill] sm:$0xff] }
 0x349   :  { %v5697_v8 = vadd.f32 %v15938_v18, %v12273_v43  ;;  %v7878_v49 = vpop.f32.mrb[55].mxu1  ;;  %9495 = vst.msk [vmem:[%s16754_s3 + $0x1b0] sm:$0xf] %vm9386_vm1, %v11266_v62  ;;  %v8324_v60 = vmax.f32 %v7884_v58, 0.0  ;;  %v6132_v39 = vmax.f32 %v5686_v27, 0.0  ;;  %v7887_v37 = vadd.f32 %v15938_v18, %v12473_v47 }
 0x34a   :  { %v8322_v28 = vmax.f32 %v7876_v44, 0.0  ;;  %9498 = vst.msk [vmem:[%s16754_s3 + $0x1bc] sm:$0xf] %vm9386_vm1, %v11269_v0  ;;  %v11267_v57 = vpack.c.bf16 %v8515_v20, %v8515_v20  ;;  %v6330_v48 = vmax.f32 %v16982_v13, %v6134_v54  ;;  %v5689_v23 = vadd.f32 %v15938_v18, %v5688_v17  ;;  %v16988_v44 = vld [vmem:[#allocation80_spill] sm:$0xff] }
 0x34b   :  { %v6135_v55 = vmax.f32 %v5697_v8, 0.0  ;;  %v6328_v5 = vmax.f32 %v16983_v46, %v6132_v39  ;;  %v7879_v33 = vadd.f32 %v15938_v18, %v7878_v49  ;;  %v8325_v6 = vmax.f32 %v7887_v37, 0.0  ;;  %v16989_v39 = vld [vmem:[#allocation81_spill] sm:$0xff] }
 0x34c   :  { %9496 = vst.msk [vmem:[%s16754_s3 + $0x1b4] sm:$0xf] %vm9386_vm1, %v11267_v57  ;;  %v8520_v63 = vmax.f32 %v6330_v48, %v8324_v60  ;;  %v6133_v52 = vmax.f32 %v5689_v23, 0.0 }
 0x34d   :  { %v6331_v42 = vmax.f32 %v16984_v61, %v6135_v55  ;;  %v8518_v50 = vmax.f32 %v6328_v5, %v8322_v28  ;;  %v8323_v29 = vmax.f32 %v7879_v33, 0.0  ;;  %v12276_v26 = vpop.f32.mrb[56].mxu0 }
 0x34e   :  { %v12476_v36 = vpop.f32.mrb[56].mxu1  ;;  %v11272_v2 = vpack.c.bf16 %v8520_v63, %v8520_v63  ;;  %v6329_v9 = vmax.f32 %v16985_v1, %v6133_v52  ;;  %v5710_v12 = vadd.f32 %v15938_v18, %v12276_v26  ;;  %v5701_v19 = vpop.f32.mrb[57].mxu0  ;;  %v16990_v1 = vld [vmem:[#allocation82_spill] sm:$0xff] }
 0x34f   :  { %v8521_v31 = vmax.f32 %v6331_v42, %v8325_v6  ;;  %v7891_v56 = vpop.f32.mrb[57].mxu1  ;;  %v11270_v4 = vpack.c.bf16 %v8518_v50, %v8518_v50  ;;  %v7900_v3 = vadd.f32 %v15938_v18, %v12476_v36  ;;  %v5702_v32 = vadd.f32 %v15938_v18, %v5701_v19  ;;  %v12277_v11 = vpop.f32.mrb[58].mxu0 }
 0x350   :  { %v7892_v53 = vadd.f32 %v15938_v18, %v7891_v56  ;;  %v12477_v30 = vpop.f32.mrb[58].mxu1  ;;  %9501 = vst.msk [vmem:[%s16754_s3 + $0x1c8] sm:$0xf] %vm9386_vm1, %v11272_v2  ;;  %v8519_v15 = vmax.f32 %v6329_v9, %v8323_v29  ;;  %v6138_v40 = vmax.f32 %v5710_v12, 0.0  ;;  %v5713_v22 = vadd.f32 %v15938_v18, %v12277_v11  ;;  %v5704_v16 = vpop.f32.mrb[59].mxu0  ;;  %v16991_v56 = vld [vmem:[#allocation83_spill] sm:$0xff] }
 0x351   :  { %v11273_v7 = vpack.c.bf16 %v8521_v31, %v8521_v31  ;;  %v7894_v10 = vpop.f32.mrb[59].mxu1  ;;  %9499 = vst.msk [vmem:[%s16754_s3 + $0x1c0] sm:$0xf] %vm9386_vm1, %v11270_v4  ;;  %v8328_v34 = vmax.f32 %v7900_v3, 0.0  ;;  %v6136_v21 = vmax.f32 %v5702_v32, 0.0  ;;  %v7903_v45 = vadd.f32 %v15938_v18, %v12477_v30 }
 0x352   :  { %v8326_v35 = vmax.f32 %v7892_v53, 0.0  ;;  %v11271_v59 = vpack.c.bf16 %v8519_v15, %v8519_v15  ;;  %v6334_v25 = vmax.f32 %v16986_v24, %v6138_v40  ;;  %v6139_v14 = vmax.f32 %v5713_v22, 0.0  ;;  %v16992_v53 = vld [vmem:[#allocation84_spill] sm:$0xff] }
 0x353   :  { %9502 = vst.msk [vmem:[%s16754_s3 + $0x1cc] sm:$0xf] %vm9386_vm1, %v11273_v7  ;;  %v5705_v38 = vadd.f32 %v15938_v18, %v5704_v16  ;;  %v6332_v62 = vmax.f32 %v16987_v41, %v6136_v21  ;;  %v7895_v58 = vadd.f32 %v15938_v18, %v7894_v10  ;;  %v8329_v47 = vmax.f32 %v7903_v45, 0.0  ;;  %v16993_v21 = vld [vmem:[#allocation85_spill] sm:$0xff] }
 0x354   :  { %9500 = vst.msk [vmem:[%s16754_s3 + $0x1c4] sm:$0xf] %vm9386_vm1, %v11271_v59  ;;  %v8524_v27 = vmax.f32 %v6334_v25, %v8328_v34  ;;  %v6335_v43 = vmax.f32 %v16988_v44, %v6139_v14 }
 0x355   :  { %v6137_v0 = vmax.f32 %v5705_v38, 0.0  ;;  %v8522_v20 = vmax.f32 %v6332_v62, %v8326_v35  ;;  %v8327_v54 = vmax.f32 %v7895_v58, 0.0  ;;  %v12280_v8 = vpop.f32.mrb[60].mxu0 }
 0x356   :  { %v12480_v17 = vpop.f32.mrb[60].mxu1  ;;  %v11276_v49 = vpack.c.bf16 %v8524_v27, %v8524_v27  ;;  %v8525_v60 = vmax.f32 %v6335_v43, %v8329_v47  ;;  %v5726_v37 = vadd.f32 %v15938_v18, %v12280_v8  ;;  %v5717_v57 = vpop.f32.mrb[61].mxu0 }
 0x357   :  { %v6333_v28 = vmax.f32 %v16989_v39, %v6137_v0  ;;  %v7907_v13 = vpop.f32.mrb[61].mxu1  ;;  %v11274_v48 = vpack.c.bf16 %v8522_v20, %v8522_v20  ;;  %v7916_v55 = vadd.f32 %v15938_v18, %v12480_v17  ;;  %v5718_v23 = vadd.f32 %v15938_v18, %v5717_v57  ;;  %v12281_v5 = vpop.f32.mrb[62].mxu0  ;;  %v16994_v39 = vld [vmem:[#allocation86_spill] sm:$0xff] }
 0x358   :  { %v7908_v46 = vadd.f32 %v15938_v18, %v7907_v13  ;;  %v12481_v33 = vpop.f32.mrb[62].mxu1  ;;  %9505 = vst.msk [vmem:[%s16754_s3 + $0x1d8] sm:$0xf] %vm9386_vm1, %v11276_v49  ;;  %v11277_v63 = vpack.c.bf16 %v8525_v60, %v8525_v60  ;;  %v6142_v42 = vmax.f32 %v5726_v37, 0.0  ;;  %v5729_v6 = vadd.f32 %v15938_v18, %v12281_v5  ;;  %v5720_v52 = vpop.f32.mrb[63].mxu0  ;;  %v16995_v13 = vld [vmem:[#allocation87_spill] sm:$0xff] }
 0x359   :  { %v8523_v61 = vmax.f32 %v6333_v28, %v8327_v54  ;;  %v7910_v50 = vpop.f32.mrb[63].mxu1  ;;  %9503 = vst.msk [vmem:[%s16754_s3 + $0x1d0] sm:$0xf] %vm9386_vm1, %v11274_v48  ;;  %v8332_v29 = vmax.f32 %v7916_v55, 0.0  ;;  %v6140_v26 = vmax.f32 %v5718_v23, 0.0  ;;  %v7919_v2 = vadd.f32 %v15938_v18, %v12481_v33 }
 0x35a   :  { %v8330_v36 = vmax.f32 %v7908_v46, 0.0  ;;  %9506 = vst.msk [vmem:[%s16754_s3 + $0x1dc] sm:$0xf] %vm9386_vm1, %v11277_v63  ;;  %v6338_v9 = vmax.f32 %v16990_v1, %v6142_v42  ;;  %v6143_v12 = vmax.f32 %v5729_v6, 0.0  ;;  %v5721_v19 = vadd.f32 %v15938_v18, %v5720_v52  ;;  %v16996_v46 = vld [vmem:[#allocation88_spill] sm:$0xff] }
 0x35b   :  { %v11275_v31 = vpack.c.bf16 %v8523_v61, %v8523_v61  ;;  %v6336_v4 = vmax.f32 %v16991_v56, %v6140_v26  ;;  %v7911_v3 = vadd.f32 %v15938_v18, %v7910_v50  ;;  %v8333_v30 = vmax.f32 %v7919_v2, 0.0  ;;  %v16997_v26 = vld [vmem:[#allocation89_spill] sm:$0xff] }
 0x35c   :  { %v8528_v32 = vmax.f32 %v6338_v9, %v8332_v29  ;;  %v6339_v11 = vmax.f32 %v16992_v53, %v6143_v12  ;;  %v6141_v7 = vmax.f32 %v5721_v19, 0.0 }
 0x35d   :  { %9504 = vst.msk [vmem:[%s16754_s3 + $0x1d4] sm:$0xf] %vm9386_vm1, %v11275_v31  ;;  %v8526_v15 = vmax.f32 %v6336_v4, %v8330_v36  ;;  %v8331_v40 = vmax.f32 %v7911_v3, 0.0  ;;  %v12284_v22 = vpop.f32.mrb[64].mxu0 }
 0x35e   :  { %v12484_v16 = vpop.f32.mrb[64].mxu1  ;;  %v11280_v10 = vpack.c.bf16 %v8528_v32, %v8528_v32  ;;  %v8529_v34 = vmax.f32 %v6339_v11, %v8333_v30  ;;  %v6337_v35 = vmax.f32 %v16993_v21, %v6141_v7  ;;  %v5742_v45 = vadd.f32 %v15938_v18, %v12284_v22  ;;  %v5733_v59 = vpop.f32.mrb[65].mxu0  ;;  %v16998_v21 = vld [vmem:[#allocation90_spill] sm:$0xff] }
 0x35f   :  { %v7923_v24 = vpop.f32.mrb[65].mxu1  ;;  %v11278_v25 = vpack.c.bf16 %v8526_v15, %v8526_v15  ;;  %v7932_v14 = vadd.f32 %v15938_v18, %v12484_v16  ;;  %v5734_v38 = vadd.f32 %v15938_v18, %v5733_v59  ;;  %v12285_v62 = vpop.f32.mrb[66].mxu0 }
 0x360   :  { %v7924_v41 = vadd.f32 %v15938_v18, %v7923_v24  ;;  %v12485_v58 = vpop.f32.mrb[66].mxu1  ;;  %9509 = vst.msk [vmem:[%s16754_s3 + $0x1e8] sm:$0xf] %vm9386_vm1, %v11280_v10  ;;  %v11281_v27 = vpack.c.bf16 %v8529_v34, %v8529_v34  ;;  %v8527_v44 = vmax.f32 %v6337_v35, %v8331_v40  ;;  %v6146_v43 = vmax.f32 %v5742_v45, 0.0  ;;  %v5736_v0 = vpop.f32.mrb[67].mxu0  ;;  %v16999_v24 = vld [vmem:[#allocation91_spill] sm:$0xff] }
 0x361   :  { %v5745_v47 = vadd.f32 %v15938_v18, %v12285_v62  ;;  %v7926_v20 = vpop.f32.mrb[67].mxu1  ;;  %9507 = vst.msk [vmem:[%s16754_s3 + $0x1e0] sm:$0xf] %vm9386_vm1, %v11278_v25  ;;  %v8336_v54 = vmax.f32 %v7932_v14, 0.0  ;;  %v6144_v8 = vmax.f32 %v5734_v38, 0.0  ;;  %v7935_v49 = vadd.f32 %v15938_v18, %v12485_v58 }
 0x362   :  { %v8334_v17 = vmax.f32 %v7924_v41, 0.0  ;;  %9510 = vst.msk [vmem:[%s16754_s3 + $0x1ec] sm:$0xf] %vm9386_vm1, %v11281_v27  ;;  %v11279_v60 = vpack.c.bf16 %v8527_v44, %v8527_v44  ;;  %v6342_v28 = vmax.f32 %v16994_v39, %v6146_v43  ;;  %v5737_v57 = vadd.f32 %v15938_v18, %v5736_v0  ;;  %v17000_v41 = vld [vmem:[#allocation92_spill] sm:$0xff] }
 0x363   :  { %v6147_v37 = vmax.f32 %v5745_v47, 0.0  ;;  %v6340_v48 = vmax.f32 %v16995_v13, %v6144_v8  ;;  %v7927_v55 = vadd.f32 %v15938_v18, %v7926_v20  ;;  %v8337_v33 = vmax.f32 %v7935_v49, 0.0  ;;  %v17001_v8 = vld [vmem:[#allocation93_spill] sm:$0xff] }
 0x364   :  { %9508 = vst.msk [vmem:[%s16754_s3 + $0x1e4] sm:$0xf] %vm9386_vm1, %v11279_v60  ;;  %v8532_v23 = vmax.f32 %v6342_v28, %v8336_v54  ;;  %v6145_v63 = vmax.f32 %v5737_v57, 0.0 }
 0x365   :  { %v6343_v5 = vmax.f32 %v16996_v46, %v6147_v37  ;;  %v8530_v61 = vmax.f32 %v6340_v48, %v8334_v17  ;;  %v8335_v42 = vmax.f32 %v7927_v55, 0.0  ;;  %v12288_v6 = vpop.f32.mrb[68].mxu0 }
 0x366   :  { %v12488_v52 = vpop.f32.mrb[68].mxu1  ;;  %v11284_v50 = vpack.c.bf16 %v8532_v23, %v8532_v23  ;;  %v6341_v36 = vmax.f32 %v16997_v26, %v6145_v63  ;;  %v5758_v2 = vadd.f32 %v15938_v18, %v12288_v6  ;;  %v5749_v31 = vpop.f32.mrb[69].mxu0  ;;  %v17002_v26 = vld [vmem:[#allocation94_spill] sm:$0xff] }
 0x367   :  { %v8533_v29 = vmax.f32 %v6343_v5, %v8337_v33  ;;  %v7939_v1 = vpop.f32.mrb[69].mxu1  ;;  %v11282_v9 = vpack.c.bf16 %v8530_v61, %v8530_v61  ;;  %v7948_v12 = vadd.f32 %v15938_v18, %v12488_v52  ;;  %v5750_v19 = vadd.f32 %v15938_v18, %v5749_v31  ;;  %v12289_v4 = vpop.f32.mrb[70].mxu0 }
 0x368   :  { %v7940_v56 = vadd.f32 %v15938_v18, %v7939_v1  ;;  %v12489_v3 = vpop.f32.mrb[70].mxu1  ;;  %9513 = vst.msk [vmem:[%s16754_s3 + $0x1f8] sm:$0xf] %vm9386_vm1, %v11284_v50  ;;  %v8531_v53 = vmax.f32 %v6341_v36, %v8335_v42  ;;  %v6150_v11 = vmax.f32 %v5758_v2, 0.0  ;;  %v5761_v30 = vadd.f32 %v15938_v18, %v12289_v4  ;;  %v5752_v7 = vpop.f32.mrb[71].mxu0  ;;  %v17003_v1 = vld [vmem:[#allocation95_spill] sm:$0xff] }
 0x369   :  { %v11285_v32 = vpack.c.bf16 %v8533_v29, %v8533_v29  ;;  %v7942_v15 = vpop.f32.mrb[71].mxu1  ;;  %9511 = vst.msk [vmem:[%s16754_s3 + $0x1f0] sm:$0xf] %vm9386_vm1, %v11282_v9  ;;  %v8340_v40 = vmax.f32 %v7948_v12, 0.0  ;;  %v6148_v22 = vmax.f32 %v5750_v19, 0.0  ;;  %v7951_v10 = vadd.f32 %v15938_v18, %v12489_v3 }
 0x36a   :  { %v8338_v16 = vmax.f32 %v7940_v56, 0.0  ;;  %v11283_v34 = vpack.c.bf16 %v8531_v53, %v8531_v53  ;;  %v6346_v35 = vmax.f32 %v16998_v21, %v6150_v11  ;;  %v6151_v45 = vmax.f32 %v5761_v30, 0.0  ;;  %v17004_v56 = vld [vmem:[#allocation96_spill] sm:$0xff] }
 0x36b   :  { %9514 = vst.msk [vmem:[%s16754_s3 + $0x1fc] sm:$0xf] %vm9386_vm1, %v11285_v32  ;;  %v5753_v59 = vadd.f32 %v15938_v18, %v5752_v7  ;;  %v6344_v25 = vmax.f32 %v16999_v24, %v6148_v22  ;;  %v7943_v14 = vadd.f32 %v15938_v18, %v7942_v15  ;;  %v8341_v58 = vmax.f32 %v7951_v10, 0.0  ;;  %v17005_v22 = vld [vmem:[#allocation97_spill] sm:$0xff] }
 0x36c   :  { %9512 = vst.msk [vmem:[%s16754_s3 + $0x1f4] sm:$0xf] %vm9386_vm1, %v11283_v34  ;;  %v8536_v38 = vmax.f32 %v6346_v35, %v8340_v40  ;;  %v6347_v62 = vmax.f32 %v17000_v41, %v6151_v45 }
 0x36d   :  { %v6149_v27 = vmax.f32 %v5753_v59, 0.0  ;;  %v8534_v44 = vmax.f32 %v6344_v25, %v8338_v16  ;;  %v8339_v43 = vmax.f32 %v7943_v14, 0.0  ;;  %v12292_v47 = vpop.f32.mrb[72].mxu0 }
 0x36e   :  { %v12492_v0 = vpop.f32.mrb[72].mxu1  ;;  %v11288_v20 = vpack.c.bf16 %v8536_v38, %v8536_v38  ;;  %v8537_v54 = vmax.f32 %v6347_v62, %v8341_v58  ;;  %v5774_v49 = vadd.f32 %v15938_v18, %v12292_v47  ;;  %v5765_v60 = vpop.f32.mrb[73].mxu0 }
 0x36f   :  { %v6345_v17 = vmax.f32 %v17001_v8, %v6149_v27  ;;  %v7955_v39 = vpop.f32.mrb[73].mxu1  ;;  %v11286_v28 = vpack.c.bf16 %v8534_v44, %v8534_v44  ;;  %v7964_v37 = vadd.f32 %v15938_v18, %v12492_v0  ;;  %v5766_v57 = vadd.f32 %v15938_v18, %v5765_v60  ;;  %v12293_v48 = vpop.f32.mrb[74].mxu0  ;;  %v17006_v8 = vld [vmem:[#allocation98_spill] sm:$0xff] }
 0x370   :  { %v7956_v13 = vadd.f32 %v15938_v18, %v7955_v39  ;;  %v12493_v55 = vpop.f32.mrb[74].mxu1  ;;  %9517 = vst.msk [vmem:[%s16754_s3 + $0x208] sm:$0xf] %vm9386_vm1, %v11288_v20  ;;  %v11289_v23 = vpack.c.bf16 %v8537_v54, %v8537_v54  ;;  %v6154_v5 = vmax.f32 %v5774_v49, 0.0  ;;  %v5777_v33 = vadd.f32 %v15938_v18, %v12293_v48  ;;  %v5768_v63 = vpop.f32.mrb[75].mxu0  ;;  %v17007_v39 = vld [vmem:[#allocation99_spill] sm:$0xff] }
 0x371   :  { %v8535_v46 = vmax.f32 %v6345_v17, %v8339_v43  ;;  %v7958_v61 = vpop.f32.mrb[75].mxu1  ;;  %9515 = vst.msk [vmem:[%s16754_s3 + $0x200] sm:$0xf] %vm9386_vm1, %v11286_v28  ;;  %v8344_v42 = vmax.f32 %v7964_v37, 0.0  ;;  %v6152_v6 = vmax.f32 %v5766_v57, 0.0  ;;  %v7967_v50 = vadd.f32 %v15938_v18, %v12493_v55 }
 0x372   :  { %v8342_v52 = vmax.f32 %v7956_v13, 0.0  ;;  %9518 = vst.msk [vmem:[%s16754_s3 + $0x20c] sm:$0xf] %vm9386_vm1, %v11289_v23  ;;  %v6350_v36 = vmax.f32 %v17002_v26, %v6154_v5  ;;  %v6155_v2 = vmax.f32 %v5777_v33, 0.0  ;;  %v5769_v31 = vadd.f32 %v15938_v18, %v5768_v63  ;;  %v17008_v13 = vld [vmem:[#allocation100_spill] sm:$0xff] }
 0x373   :  { %v11287_v29 = vpack.c.bf16 %v8535_v46, %v8535_v46  ;;  %v6348_v9 = vmax.f32 %v17003_v1, %v6152_v6  ;;  %v7959_v12 = vadd.f32 %v15938_v18, %v7958_v61  ;;  %v8345_v3 = vmax.f32 %v7967_v50, 0.0  ;;  %v16308_v18 = vld [vmem:[%s16753_s2] ss:$0 sm:$0xff]  ;;  %v17009_v6 = vld [vmem:[#allocation101_spill] sm:$0xff] }
 0x374   :  { %v8540_v19 = vmax.f32 %v6350_v36, %v8344_v42  ;;  %v6351_v4 = vmax.f32 %v17004_v56, %v6155_v2  ;;  %v6153_v32 = vmax.f32 %v5769_v31, 0.0 }
 0x375   :  { %9516 = vst.msk [vmem:[%s16754_s3 + $0x204] sm:$0xf] %vm9386_vm1, %v11287_v29  ;;  %v8538_v53 = vmax.f32 %v6348_v9, %v8342_v52  ;;  %v8343_v11 = vmax.f32 %v7959_v12, 0.0  ;;  %v12296_v30 = vpop.f32.mrb[76].mxu0 }
 0x376   :  { %v12496_v7 = vpop.f32.mrb[76].mxu1  ;;  %v11292_v15 = vpack.c.bf16 %v8540_v19, %v8540_v19  ;;  %v8541_v40 = vmax.f32 %v6351_v4, %v8345_v3  ;;  %v6349_v16 = vmax.f32 %v17005_v22, %v6153_v32  ;;  %v5790_v10 = vadd.f32 %v16308_v18, %v12296_v30  ;;  %v5781_v34 = vpop.f32.mrb[77].mxu0  ;;  %v17010_v22 = vld [vmem:[#allocation102_spill] sm:$0xff] }
 0x377   :  { %v7971_v21 = vpop.f32.mrb[77].mxu1  ;;  %v11290_v35 = vpack.c.bf16 %v8538_v53, %v8538_v53  ;;  %v7980_v45 = vadd.f32 %v16308_v18, %v12496_v7  ;;  %v5782_v59 = vadd.f32 %v16308_v18, %v5781_v34  ;;  %v12297_v25 = vpop.f32.mrb[78].mxu0 }
 0x378   :  { %v7972_v24 = vadd.f32 %v16308_v18, %v7971_v21  ;;  %v12497_v14 = vpop.f32.mrb[78].mxu1  ;;  %9521 = vst.msk [vmem:[%s16754_s3 + $0x218] sm:$0xf] %vm9386_vm1, %v11292_v15  ;;  %v11293_v38 = vpack.c.bf16 %v8541_v40, %v8541_v40  ;;  %v8539_v41 = vmax.f32 %v6349_v16, %v8343_v11  ;;  %v6158_v62 = vmax.f32 %v5790_v10, 0.0  ;;  %v5784_v27 = vpop.f32.mrb[79].mxu0  ;;  %v17011_v21 = vld [vmem:[#allocation103_spill] sm:$0xff] }
 0x379   :  { %v5793_v58 = vadd.f32 %v16308_v18, %v12297_v25  ;;  %v7974_v44 = vpop.f32.mrb[79].mxu1  ;;  %9519 = vst.msk [vmem:[%s16754_s3 + $0x210] sm:$0xf] %vm9386_vm1, %v11290_v35  ;;  %v8348_v43 = vmax.f32 %v7980_v45, 0.0  ;;  %v6156_v47 = vmax.f32 %v5782_v59, 0.0  ;;  %v7983_v20 = vadd.f32 %v16308_v18, %v12497_v14 }
 0x37a   :  { %v8346_v0 = vmax.f32 %v7972_v24, 0.0  ;;  %9522 = vst.msk [vmem:[%s16754_s3 + $0x21c] sm:$0xf] %vm9386_vm1, %v11293_v38  ;;  %v11291_v54 = vpack.c.bf16 %v8539_v41, %v8539_v41  ;;  %v6354_v17 = vmax.f32 %v17006_v8, %v6158_v62  ;;  %v5785_v60 = vadd.f32 %v16308_v18, %v5784_v27  ;;  %v17012_v24 = vld [vmem:[#allocation104_spill] sm:$0xff] }
 0x37b   :  { %v6159_v49 = vmax.f32 %v5793_v58, 0.0  ;;  %v6352_v28 = vmax.f32 %v17007_v39, %v6156_v47  ;;  %v7975_v37 = vadd.f32 %v16308_v18, %v7974_v44  ;;  %v8349_v55 = vmax.f32 %v7983_v20, 0.0  ;;  %v17013_v47 = vld [vmem:[#allocation105_spill] sm:$0xff] }
 0x37c   :  { %9520 = vst.msk [vmem:[%s16754_s3 + $0x214] sm:$0xf] %vm9386_vm1, %v11291_v54  ;;  %v8544_v57 = vmax.f32 %v6354_v17, %v8348_v43  ;;  %v6157_v23 = vmax.f32 %v5785_v60, 0.0 }
 0x37d   :  { %v6355_v48 = vmax.f32 %v17008_v13, %v6159_v49  ;;  %v8542_v46 = vmax.f32 %v6352_v28, %v8346_v0  ;;  %v8347_v5 = vmax.f32 %v7975_v37, 0.0  ;;  %v12300_v33 = vpop.f32.mrb[80].mxu0 }
 0x37e   :  { %v12500_v63 = vpop.f32.mrb[80].mxu1  ;;  %v11296_v61 = vpack.c.bf16 %v8544_v57, %v8544_v57  ;;  %v6353_v52 = vmax.f32 %v17009_v6, %v6157_v23  ;;  %v5806_v50 = vadd.f32 %v16308_v18, %v12300_v33  ;;  %v5797_v29 = vpop.f32.mrb[81].mxu0  ;;  %v17014_v6 = vld [vmem:[#allocation106_spill] sm:$0xff] }
 0x37f   :  { %v8545_v42 = vmax.f32 %v6355_v48, %v8349_v55  ;;  %v7987_v26 = vpop.f32.mrb[81].mxu1  ;;  %v11294_v36 = vpack.c.bf16 %v8542_v46, %v8542_v46  ;;  %v7996_v2 = vadd.f32 %v16308_v18, %v12500_v63  ;;  %v5798_v31 = vadd.f32 %v16308_v18, %v5797_v29  ;;  %v12301_v9 = vpop.f32.mrb[82].mxu0 }
 0x380   :  { %v7988_v1 = vadd.f32 %v16308_v18, %v7987_v26  ;;  %v12501_v12 = vpop.f32.mrb[82].mxu1  ;;  %9525 = vst.msk [vmem:[%s16754_s3 + $0x228] sm:$0xf] %vm9386_vm1, %v11296_v61  ;;  %v8543_v56 = vmax.f32 %v6353_v52, %v8347_v5  ;;  %v6162_v4 = vmax.f32 %v5806_v50, 0.0  ;;  %v5809_v3 = vadd.f32 %v16308_v18, %v12301_v9  ;;  %v5800_v32 = vpop.f32.mrb[83].mxu0  ;;  %v17015_v26 = vld [vmem:[#allocation107_spill] sm:$0xff] }
 0x381   :  { %v11297_v19 = vpack.c.bf16 %v8545_v42, %v8545_v42  ;;  %v7990_v53 = vpop.f32.mrb[83].mxu1  ;;  %9523 = vst.msk [vmem:[%s16754_s3 + $0x220] sm:$0xf] %vm9386_vm1, %v11294_v36  ;;  %v8352_v11 = vmax.f32 %v7996_v2, 0.0  ;;  %v6160_v30 = vmax.f32 %v5798_v31, 0.0  ;;  %v7999_v15 = vadd.f32 %v16308_v18, %v12501_v12 }
 0x382   :  { %v8350_v7 = vmax.f32 %v7988_v1, 0.0  ;;  %v11295_v40 = vpack.c.bf16 %v8543_v56, %v8543_v56  ;;  %v6358_v16 = vmax.f32 %v17010_v22, %v6162_v4  ;;  %v6163_v10 = vmax.f32 %v5809_v3, 0.0  ;;  %v17016_v1 = vld [vmem:[#allocation108_spill] sm:$0xff] }
 0x383   :  { %9526 = vst.msk [vmem:[%s16754_s3 + $0x22c] sm:$0xf] %vm9386_vm1, %v11297_v19  ;;  %v5801_v34 = vadd.f32 %v16308_v18, %v5800_v32  ;;  %v6356_v35 = vmax.f32 %v17011_v21, %v6160_v30  ;;  %v7991_v45 = vadd.f32 %v16308_v18, %v7990_v53  ;;  %v8353_v14 = vmax.f32 %v7999_v15, 0.0  ;;  %v17017_v30 = vld [vmem:[#allocation109_spill] sm:$0xff] }
 0x384   :  { %9524 = vst.msk [vmem:[%s16754_s3 + $0x224] sm:$0xf] %vm9386_vm1, %v11295_v40  ;;  %v8548_v59 = vmax.f32 %v6358_v16, %v8352_v11  ;;  %v6359_v25 = vmax.f32 %v17012_v24, %v6163_v10 }
 0x385   :  { %v6161_v38 = vmax.f32 %v5801_v34, 0.0  ;;  %v8546_v41 = vmax.f32 %v6356_v35, %v8350_v7  ;;  %v8351_v62 = vmax.f32 %v7991_v45, 0.0  ;;  %v12304_v58 = vpop.f32.mrb[84].mxu0 }
 0x386   :  { %v12504_v27 = vpop.f32.mrb[84].mxu1  ;;  %v11300_v44 = vpack.c.bf16 %v8548_v59, %v8548_v59  ;;  %v8549_v43 = vmax.f32 %v6359_v25, %v8353_v14  ;;  %v5822_v20 = vadd.f32 %v16308_v18, %v12304_v58  ;;  %v5813_v54 = vpop.f32.mrb[85].mxu0 }
 0x387   :  { %v6357_v0 = vmax.f32 %v17013_v47, %v6161_v38  ;;  %v8003_v8 = vpop.f32.mrb[85].mxu1  ;;  %v11298_v17 = vpack.c.bf16 %v8546_v41, %v8546_v41  ;;  %v8012_v49 = vadd.f32 %v16308_v18, %v12504_v27  ;;  %v5814_v60 = vadd.f32 %v16308_v18, %v5813_v54  ;;  %v12305_v28 = vpop.f32.mrb[86].mxu0  ;;  %v17018_v47 = vld [vmem:[#allocation110_spill] sm:$0xff] }
 0x388   :  { %v8004_v39 = vadd.f32 %v16308_v18, %v8003_v8  ;;  %v12505_v37 = vpop.f32.mrb[86].mxu1  ;;  %9529 = vst.msk [vmem:[%s16754_s3 + $0x238] sm:$0xf] %vm9386_vm1, %v11300_v44  ;;  %v11301_v57 = vpack.c.bf16 %v8549_v43, %v8549_v43  ;;  %v6166_v48 = vmax.f32 %v5822_v20, 0.0  ;;  %v5825_v55 = vadd.f32 %v16308_v18, %v12305_v28  ;;  %v5816_v23 = vpop.f32.mrb[87].mxu0  ;;  %v17019_v8 = vld [vmem:[#allocation111_spill] sm:$0xff] }
 0x389   :  { %v8547_v13 = vmax.f32 %v6357_v0, %v8351_v62  ;;  %v8006_v46 = vpop.f32.mrb[87].mxu1  ;;  %9527 = vst.msk [vmem:[%s16754_s3 + $0x230] sm:$0xf] %vm9386_vm1, %v11298_v17  ;;  %v8356_v5 = vmax.f32 %v8012_v49, 0.0  ;;  %v6164_v33 = vmax.f32 %v5814_v60, 0.0  ;;  %v8015_v61 = vadd.f32 %v16308_v18, %v12505_v37 }
 0x38a   :  { %v8354_v63 = vmax.f32 %v8004_v39, 0.0  ;;  %9530 = vst.msk [vmem:[%s16754_s3 + $0x23c] sm:$0xf] %vm9386_vm1, %v11301_v57  ;;  %v6362_v52 = vmax.f32 %v17014_v6, %v6166_v48  ;;  %v6167_v50 = vmax.f32 %v5825_v55, 0.0  ;;  %v5817_v29 = vadd.f32 %v16308_v18, %v5816_v23  ;;  %v17020_v39 = vld [vmem:[#allocation112_spill] sm:$0xff] }
 0x38b   :  { %v11299_v42 = vpack.c.bf16 %v8547_v13, %v8547_v13  ;;  %v6360_v36 = vmax.f32 %v17015_v26, %v6164_v33  ;;  %v8007_v2 = vadd.f32 %v16308_v18, %v8006_v46  ;;  %v8357_v12 = vmax.f32 %v8015_v61, 0.0  ;;  %v17021_v33 = vld [vmem:[#allocation113_spill] sm:$0xff] }
 0x38c   :  { %v8552_v31 = vmax.f32 %v6362_v52, %v8356_v5  ;;  %v6363_v9 = vmax.f32 %v17016_v1, %v6167_v50  ;;  %v6165_v19 = vmax.f32 %v5817_v29, 0.0 }
 0x38d   :  { %9528 = vst.msk [vmem:[%s16754_s3 + $0x234] sm:$0xf] %vm9386_vm1, %v11299_v42  ;;  %v8550_v56 = vmax.f32 %v6360_v36, %v8354_v63  ;;  %v8355_v4 = vmax.f32 %v8007_v2, 0.0  ;;  %v12308_v3 = vpop.f32.mrb[88].mxu0 }
 0x38e   :  { %v12508_v32 = vpop.f32.mrb[88].mxu1  ;;  %v11304_v53 = vpack.c.bf16 %v8552_v31, %v8552_v31  ;;  %v8553_v11 = vmax.f32 %v6363_v9, %v8357_v12  ;;  %v6361_v7 = vmax.f32 %v17017_v30, %v6165_v19  ;;  %v5838_v15 = vadd.f32 %v16308_v18, %v12308_v3  ;;  %v5829_v40 = vpop.f32.mrb[89].mxu0  ;;  %v17022_v30 = vld [vmem:[#allocation114_spill] sm:$0xff] }
 0x38f   :  { %v8019_v22 = vpop.f32.mrb[89].mxu1  ;;  %v11302_v16 = vpack.c.bf16 %v8550_v56, %v8550_v56  ;;  %v8028_v10 = vadd.f32 %v16308_v18, %v12508_v32  ;;  %v5830_v34 = vadd.f32 %v16308_v18, %v5829_v40  ;;  %v12309_v35 = vpop.f32.mrb[90].mxu0 }
 0x390   :  { %v8020_v21 = vadd.f32 %v16308_v18, %v8019_v22  ;;  %v12509_v45 = vpop.f32.mrb[90].mxu1  ;;  %9533 = vst.msk [vmem:[%s16754_s3 + $0x248] sm:$0xf] %vm9386_vm1, %v11304_v53  ;;  %v11305_v59 = vpack.c.bf16 %v8553_v11, %v8553_v11  ;;  %v8551_v24 = vmax.f32 %v6361_v7, %v8355_v4  ;;  %v6170_v25 = vmax.f32 %v5838_v15, 0.0  ;;  %v5832_v38 = vpop.f32.mrb[91].mxu0  ;;  %v17023_v22 = vld [vmem:[#allocation115_spill] sm:$0xff] }
 0x391   :  { %v5841_v14 = vadd.f32 %v16308_v18, %v12309_v35  ;;  %v8022_v41 = vpop.f32.mrb[91].mxu1  ;;  %9531 = vst.msk [vmem:[%s16754_s3 + $0x240] sm:$0xf] %vm9386_vm1, %v11302_v16  ;;  %v8360_v62 = vmax.f32 %v8028_v10, 0.0  ;;  %v6168_v58 = vmax.f32 %v5830_v34, 0.0  ;;  %v8031_v44 = vadd.f32 %v16308_v18, %v12509_v45 }
 0x392   :  { %v8358_v27 = vmax.f32 %v8020_v21, 0.0  ;;  %9534 = vst.msk [vmem:[%s16754_s3 + $0x24c] sm:$0xf] %vm9386_vm1, %v11305_v59  ;;  %v11303_v43 = vpack.c.bf16 %v8551_v24, %v8551_v24  ;;  %v6366_v0 = vmax.f32 %v17018_v47, %v6170_v25  ;;  %v5833_v54 = vadd.f32 %v16308_v18, %v5832_v38  ;;  %v17024_v21 = vld [vmem:[#allocation116_spill] sm:$0xff] }
 0x393   :  { %v6171_v20 = vmax.f32 %v5841_v14, 0.0  ;;  %v6364_v17 = vmax.f32 %v17019_v8, %v6168_v58  ;;  %v8023_v49 = vadd.f32 %v16308_v18, %v8022_v41  ;;  %v8361_v37 = vmax.f32 %v8031_v44, 0.0  ;;  %v17025_v58 = vld [vmem:[#allocation117_spill] sm:$0xff] }
 0x394   :  { %9532 = vst.msk [vmem:[%s16754_s3 + $0x244] sm:$0xf] %vm9386_vm1, %v11303_v43  ;;  %v8556_v60 = vmax.f32 %v6366_v0, %v8360_v62  ;;  %v6169_v57 = vmax.f32 %v5833_v54, 0.0 }
 0x395   :  { %v6367_v28 = vmax.f32 %v17020_v39, %v6171_v20  ;;  %v8554_v13 = vmax.f32 %v6364_v17, %v8358_v27  ;;  %v8359_v48 = vmax.f32 %v8023_v49, 0.0  ;;  %v12312_v55 = vpop.f32.mrb[92].mxu0 }
 0x396   :  { %v12512_v23 = vpop.f32.mrb[92].mxu1  ;;  %v11308_v46 = vpack.c.bf16 %v8556_v60, %v8556_v60  ;;  %v6365_v63 = vmax.f32 %v17021_v33, %v6169_v57  ;;  %v5854_v61 = vadd.f32 %v16308_v18, %v12312_v55  ;;  %v5845_v42 = vpop.f32.mrb[93].mxu0  ;;  %v17026_v33 = vld [vmem:[#allocation118_spill] sm:$0xff] }
 0x397   :  { %v8557_v5 = vmax.f32 %v6367_v28, %v8361_v37  ;;  %v8035_v6 = vpop.f32.mrb[93].mxu1  ;;  %v11306_v52 = vpack.c.bf16 %v8554_v13, %v8554_v13  ;;  %v8044_v50 = vadd.f32 %v16308_v18, %v12512_v23  ;;  %v5846_v29 = vadd.f32 %v16308_v18, %v5845_v42  ;;  %v12313_v36 = vpop.f32.mrb[94].mxu0 }
 0x398   :  { %v8036_v26 = vadd.f32 %v16308_v18, %v8035_v6  ;;  %v12513_v2 = vpop.f32.mrb[94].mxu1  ;;  %9537 = vst.msk [vmem:[%s16754_s3 + $0x258] sm:$0xf] %vm9386_vm1, %v11308_v46  ;;  %v8555_v1 = vmax.f32 %v6365_v63, %v8359_v48  ;;  %v6174_v9 = vmax.f32 %v5854_v61, 0.0  ;;  %v5857_v12 = vadd.f32 %v16308_v18, %v12313_v36  ;;  %v5848_v19 = vpop.f32.mrb[95].mxu0  ;;  %v17027_v6 = vld [vmem:[#allocation119_spill] sm:$0xff] }
 0x399   :  { %v11309_v31 = vpack.c.bf16 %v8557_v5, %v8557_v5  ;;  %v8038_v56 = vpop.f32.mrb[95].mxu1  ;;  %9535 = vst.msk [vmem:[%s16754_s3 + $0x250] sm:$0xf] %vm9386_vm1, %v11306_v52  ;;  %v8364_v4 = vmax.f32 %v8044_v50, 0.0  ;;  %v6172_v3 = vmax.f32 %v5846_v29, 0.0  ;;  %v8047_v53 = vadd.f32 %v16308_v18, %v12513_v2 }
 0x39a   :  { %v8362_v32 = vmax.f32 %v8036_v26, 0.0  ;;  %v11307_v11 = vpack.c.bf16 %v8555_v1, %v8555_v1  ;;  %v6370_v7 = vmax.f32 %v17022_v30, %v6174_v9  ;;  %v6175_v15 = vmax.f32 %v5857_v12, 0.0  ;;  %v17028_v26 = vld [vmem:[#allocation120_spill] sm:$0xff] }
 0x39b   :  { %9538 = vst.msk [vmem:[%s16754_s3 + $0x25c] sm:$0xf] %vm9386_vm1, %v11309_v31  ;;  %v5849_v40 = vadd.f32 %v16308_v18, %v5848_v19  ;;  %v6368_v16 = vmax.f32 %v17023_v22, %v6172_v3  ;;  %v8039_v10 = vadd.f32 %v16308_v18, %v8038_v56  ;;  %v8365_v45 = vmax.f32 %v8047_v53, 0.0  ;;  %v17029_v3 = vld [vmem:[#allocation121_spill] sm:$0xff] }
 0x39c   :  { %9536 = vst.msk [vmem:[%s16754_s3 + $0x254] sm:$0xf] %vm9386_vm1, %v11307_v11  ;;  %v8560_v34 = vmax.f32 %v6370_v7, %v8364_v4  ;;  %v6371_v35 = vmax.f32 %v17024_v21, %v6175_v15 }
 0x39d   :  { %v6173_v59 = vmax.f32 %v5849_v40, 0.0  ;;  %v8558_v24 = vmax.f32 %v6368_v16, %v8362_v32  ;;  %v8363_v25 = vmax.f32 %v8039_v10, 0.0  ;;  %v12316_v14 = vpop.f32.mrb[96].mxu0 }
 0x39e   :  { %v12516_v38 = vpop.f32.mrb[96].mxu1  ;;  %v11312_v41 = vpack.c.bf16 %v8560_v34, %v8560_v34  ;;  %v8561_v62 = vmax.f32 %v6371_v35, %v8365_v45  ;;  %v5870_v44 = vadd.f32 %v16308_v18, %v12316_v14  ;;  %v5861_v43 = vpop.f32.mrb[97].mxu0 }
 0x39f   :  { %v6369_v27 = vmax.f32 %v17025_v58, %v6173_v59  ;;  %v8051_v47 = vpop.f32.mrb[97].mxu1  ;;  %v11310_v0 = vpack.c.bf16 %v8558_v24, %v8558_v24  ;;  %v8060_v20 = vadd.f32 %v16308_v18, %v12516_v38  ;;  %v5862_v54 = vadd.f32 %v16308_v18, %v5861_v43  ;;  %v12317_v17 = vpop.f32.mrb[98].mxu0  ;;  %v17030_v58 = vld [vmem:[#allocation122_spill] sm:$0xff] }
 0x3a0   :  { %v8052_v8 = vadd.f32 %v16308_v18, %v8051_v47  ;;  %v12517_v49 = vpop.f32.mrb[98].mxu1  ;;  %9541 = vst.msk [vmem:[%s16754_s3 + $0x268] sm:$0xf] %vm9386_vm1, %v11312_v41  ;;  %v11313_v60 = vpack.c.bf16 %v8561_v62, %v8561_v62  ;;  %v6178_v28 = vmax.f32 %v5870_v44, 0.0  ;;  %v5873_v37 = vadd.f32 %v16308_v18, %v12317_v17  ;;  %v5864_v57 = vpop.f32.mrb[99].mxu0  ;;  %v17031_v47 = vld [vmem:[#allocation123_spill] sm:$0xff] }
 0x3a1   :  { %v8559_v39 = vmax.f32 %v6369_v27, %v8363_v25  ;;  %v8054_v13 = vpop.f32.mrb[99].mxu1  ;;  %9539 = vst.msk [vmem:[%s16754_s3 + $0x260] sm:$0xf] %vm9386_vm1, %v11310_v0  ;;  %v8368_v48 = vmax.f32 %v8060_v20, 0.0  ;;  %v6176_v55 = vmax.f32 %v5862_v54, 0.0  ;;  %v8063_v46 = vadd.f32 %v16308_v18, %v12517_v49 }
 0x3a2   :  { %v8366_v23 = vmax.f32 %v8052_v8, 0.0  ;;  %9542 = vst.msk [vmem:[%s16754_s3 + $0x26c] sm:$0xf] %vm9386_vm1, %v11313_v60  ;;  %v6374_v63 = vmax.f32 %v17026_v33, %v6178_v28  ;;  %v6179_v61 = vmax.f32 %v5873_v37, 0.0  ;;  %v5865_v42 = vadd.f32 %v16308_v18, %v5864_v57  ;;  %v17032_v8 = vld [vmem:[#allocation124_spill] sm:$0xff] }
 0x3a3   :  { %v11311_v5 = vpack.c.bf16 %v8559_v39, %v8559_v39  ;;  %v6372_v52 = vmax.f32 %v17027_v6, %v6176_v55  ;;  %v8055_v50 = vadd.f32 %v16308_v18, %v8054_v13  ;;  %v8369_v2 = vmax.f32 %v8063_v46, 0.0  ;;  %v17033_v55 = vld [vmem:[#allocation125_spill] sm:$0xff] }
 0x3a4   :  { %v8564_v29 = vmax.f32 %v6374_v63, %v8368_v48  ;;  %v6375_v36 = vmax.f32 %v17028_v26, %v6179_v61  ;;  %v6177_v31 = vmax.f32 %v5865_v42, 0.0 }
 0x3a5   :  { %9540 = vst.msk [vmem:[%s16754_s3 + $0x264] sm:$0xf] %vm9386_vm1, %v11311_v5  ;;  %v8562_v1 = vmax.f32 %v6372_v52, %v8366_v23  ;;  %v8367_v9 = vmax.f32 %v8055_v50, 0.0  ;;  %v12320_v12 = vpop.f32.mrb[100].mxu0 }
 0x3a6   :  { %v12520_v19 = vpop.f32.mrb[100].mxu1  ;;  %v11316_v56 = vpack.c.bf16 %v8564_v29, %v8564_v29  ;;  %v8565_v4 = vmax.f32 %v6375_v36, %v8369_v2  ;;  %v6373_v32 = vmax.f32 %v17029_v3, %v6177_v31  ;;  %v5886_v53 = vadd.f32 %v16308_v18, %v12320_v12  ;;  %v5877_v11 = vpop.f32.mrb[101].mxu0  ;;  %v17034_v3 = vld [vmem:[#allocation126_spill] sm:$0xff] }
 0x3a7   :  { %v8067_v30 = vpop.f32.mrb[101].mxu1  ;;  %v11314_v7 = vpack.c.bf16 %v8562_v1, %v8562_v1  ;;  %v8076_v15 = vadd.f32 %v16308_v18, %v12520_v19  ;;  %v5878_v40 = vadd.f32 %v16308_v18, %v5877_v11  ;;  %v12321_v16 = vpop.f32.mrb[102].mxu0 }
 0x3a8   :  { %v8068_v22 = vadd.f32 %v16308_v18, %v8067_v30  ;;  %v12521_v10 = vpop.f32.mrb[102].mxu1  ;;  %9545 = vst.msk [vmem:[%s16754_s3 + $0x278] sm:$0xf] %vm9386_vm1, %v11316_v56  ;;  %v11317_v34 = vpack.c.bf16 %v8565_v4, %v8565_v4  ;;  %v8563_v21 = vmax.f32 %v6373_v32, %v8367_v9  ;;  %v6182_v35 = vmax.f32 %v5886_v53, 0.0  ;;  %v5880_v59 = vpop.f32.mrb[103].mxu0  ;;  %v17035_v30 = vld [vmem:[#allocation127_spill] sm:$0xff] }
 0x3a9   :  { %v5889_v45 = vadd.f32 %v16308_v18, %v12321_v16  ;;  %v8070_v24 = vpop.f32.mrb[103].mxu1  ;;  %9543 = vst.msk [vmem:[%s16754_s3 + $0x270] sm:$0xf] %vm9386_vm1, %v11314_v7  ;;  %v8372_v25 = vmax.f32 %v8076_v15, 0.0  ;;  %v6180_v14 = vmax.f32 %v5878_v40, 0.0  ;;  %v8079_v41 = vadd.f32 %v16308_v18, %v12521_v10 }
 0x3aa   :  { %v8370_v38 = vmax.f32 %v8068_v22, 0.0  ;;  %9546 = vst.msk [vmem:[%s16754_s3 + $0x27c] sm:$0xf] %vm9386_vm1, %v11317_v34  ;;  %v11315_v62 = vpack.c.bf16 %v8563_v21, %v8563_v21  ;;  %v6378_v27 = vmax.f32 %v17030_v58, %v6182_v35  ;;  %v5881_v43 = vadd.f32 %v16308_v18, %v5880_v59  ;;  %v17036_v22 = vld [vmem:[#allocation128_spill] sm:$0xff] }
 0x3ab   :  { %v6183_v44 = vmax.f32 %v5889_v45, 0.0  ;;  %v6376_v0 = vmax.f32 %v17031_v47, %v6180_v14  ;;  %v8071_v20 = vadd.f32 %v16308_v18, %v8070_v24  ;;  %v8373_v49 = vmax.f32 %v8079_v41, 0.0  ;;  %v17037_v14 = vld [vmem:[#allocation129_spill] sm:$0xff] }
 0x3ac   :  { %9544 = vst.msk [vmem:[%s16754_s3 + $0x274] sm:$0xf] %vm9386_vm1, %v11315_v62  ;;  %v8568_v54 = vmax.f32 %v6378_v27, %v8372_v25  ;;  %v6181_v60 = vmax.f32 %v5881_v43, 0.0 }
 0x3ad   :  { %v6379_v17 = vmax.f32 %v17032_v8, %v6183_v44  ;;  %v8566_v39 = vmax.f32 %v6376_v0, %v8370_v38  ;;  %v8371_v28 = vmax.f32 %v8071_v20, 0.0  ;;  %v12324_v37 = vpop.f32.mrb[104].mxu0 }
 0x3ae   :  { %v12524_v57 = vpop.f32.mrb[104].mxu1  ;;  %v11320_v13 = vpack.c.bf16 %v8568_v54, %v8568_v54  ;;  %v6377_v23 = vmax.f32 %v17033_v55, %v6181_v60  ;;  %v5902_v46 = vadd.f32 %v16308_v18, %v12324_v37  ;;  %v5893_v5 = vpop.f32.mrb[105].mxu0  ;;  %v17038_v55 = vld [vmem:[#allocation130_spill] sm:$0xff] }
 0x3af   :  { %v8569_v48 = vmax.f32 %v6379_v17, %v8373_v49  ;;  %v8083_v33 = vpop.f32.mrb[105].mxu1  ;;  %v11318_v63 = vpack.c.bf16 %v8566_v39, %v8566_v39  ;;  %v8092_v61 = vadd.f32 %v16308_v18, %v12524_v57  ;;  %v5894_v42 = vadd.f32 %v16308_v18, %v5893_v5  ;;  %v12325_v52 = vpop.f32.mrb[106].mxu0 }
 0x3b0   :  { %v8084_v6 = vadd.f32 %v16308_v18, %v8083_v33  ;;  %v12525_v50 = vpop.f32.mrb[106].mxu1  ;;  %9549 = vst.msk [vmem:[%s16754_s3 + $0x288] sm:$0xf] %vm9386_vm1, %v11320_v13  ;;  %v8567_v26 = vmax.f32 %v6377_v23, %v8371_v28  ;;  %v6186_v36 = vmax.f32 %v5902_v46, 0.0  ;;  %v5905_v2 = vadd.f32 %v16308_v18, %v12325_v52  ;;  %v5896_v31 = vpop.f32.mrb[107].mxu0  ;;  %v17039_v33 = vld [vmem:[#allocation131_spill] sm:$0xff] }
 0x3b1   :  { %v11321_v29 = vpack.c.bf16 %v8569_v48, %v8569_v48  ;;  %v8086_v1 = vpop.f32.mrb[107].mxu1  ;;  %9547 = vst.msk [vmem:[%s16754_s3 + $0x280] sm:$0xf] %vm9386_vm1, %v11318_v63  ;;  %v8376_v9 = vmax.f32 %v8092_v61, 0.0  ;;  %v6184_v12 = vmax.f32 %v5894_v42, 0.0  ;;  %v8095_v56 = vadd.f32 %v16308_v18, %v12525_v50 }
 0x3b2   :  { %v8374_v19 = vmax.f32 %v8084_v6, 0.0  ;;  %v11319_v4 = vpack.c.bf16 %v8567_v26, %v8567_v26  ;;  %v6382_v32 = vmax.f32 %v17034_v3, %v6186_v36  ;;  %v6187_v53 = vmax.f32 %v5905_v2, 0.0  ;;  %v17040_v6 = vld [vmem:[#allocation132_spill] sm:$0xff] }
 0x3b3   :  { %9550 = vst.msk [vmem:[%s16754_s3 + $0x28c] sm:$0xf] %vm9386_vm1, %v11321_v29  ;;  %v5897_v11 = vadd.f32 %v16308_v18, %v5896_v31  ;;  %v6380_v7 = vmax.f32 %v17035_v30, %v6184_v12  ;;  %v8087_v15 = vadd.f32 %v16308_v18, %v8086_v1  ;;  %v8377_v10 = vmax.f32 %v8095_v56, 0.0  ;;  %v17041_v12 = vld [vmem:[#allocation133_spill] sm:$0xff] }
 0x3b4   :  { %9548 = vst.msk [vmem:[%s16754_s3 + $0x284] sm:$0xf] %vm9386_vm1, %v11319_v4  ;;  %v8572_v40 = vmax.f32 %v6382_v32, %v8376_v9  ;;  %v6383_v16 = vmax.f32 %v17036_v22, %v6187_v53 }
 0x3b5   :  { %v6185_v34 = vmax.f32 %v5897_v11, 0.0  ;;  %v8570_v21 = vmax.f32 %v6380_v7, %v8374_v19  ;;  %v8375_v35 = vmax.f32 %v8087_v15, 0.0  ;;  %v12328_v45 = vpop.f32.mrb[108].mxu0 }
 0x3b6   :  { %v12528_v59 = vpop.f32.mrb[108].mxu1  ;;  %v11324_v24 = vpack.c.bf16 %v8572_v40, %v8572_v40  ;;  %v8573_v25 = vmax.f32 %v6383_v16, %v8377_v10  ;;  %v5918_v41 = vadd.f32 %v16308_v18, %v12328_v45  ;;  %v5909_v62 = vpop.f32.mrb[109].mxu0 }
 0x3b7   :  { %v6381_v38 = vmax.f32 %v17037_v14, %v6185_v34  ;;  %v8099_v58 = vpop.f32.mrb[109].mxu1  ;;  %v11322_v27 = vpack.c.bf16 %v8570_v21, %v8570_v21  ;;  %v8108_v44 = vadd.f32 %v16308_v18, %v12528_v59  ;;  %v5910_v43 = vadd.f32 %v16308_v18, %v5909_v62  ;;  %v12329_v0 = vpop.f32.mrb[110].mxu0  ;;  %v17042_v14 = vld [vmem:[#allocation134_spill] sm:$0xff] }
 0x3b8   :  { %v8100_v47 = vadd.f32 %v16308_v18, %v8099_v58  ;;  %v12529_v20 = vpop.f32.mrb[110].mxu1  ;;  %9553 = vst.msk [vmem:[%s16754_s3 + $0x298] sm:$0xf] %vm9386_vm1, %v11324_v24  ;;  %v11325_v54 = vpack.c.bf16 %v8573_v25, %v8573_v25  ;;  %v6190_v17 = vmax.f32 %v5918_v41, 0.0  ;;  %v5921_v49 = vadd.f32 %v16308_v18, %v12329_v0  ;;  %v5912_v60 = vpop.f32.mrb[111].mxu0  ;;  %v17043_v58 = vld [vmem:[#allocation135_spill] sm:$0xff] }
 0x3b9   :  { %v8571_v8 = vmax.f32 %v6381_v38, %v8375_v35  ;;  %v8102_v39 = vpop.f32.mrb[111].mxu1  ;;  %9551 = vst.msk [vmem:[%s16754_s3 + $0x290] sm:$0xf] %vm9386_vm1, %v11322_v27  ;;  %v8380_v28 = vmax.f32 %v8108_v44, 0.0  ;;  %v6188_v37 = vmax.f32 %v5910_v43, 0.0  ;;  %v8111_v13 = vadd.f32 %v16308_v18, %v12529_v20 }
 0x3ba   :  { %v8378_v57 = vmax.f32 %v8100_v47, 0.0  ;;  %9554 = vst.msk [vmem:[%s16754_s3 + $0x29c] sm:$0xf] %vm9386_vm1, %v11325_v54  ;;  %v6386_v23 = vmax.f32 %v17038_v55, %v6190_v17  ;;  %v6191_v46 = vmax.f32 %v5921_v49, 0.0  ;;  %v5913_v5 = vadd.f32 %v16308_v18, %v5912_v60  ;;  %v17044_v47 = vld [vmem:[#allocation136_spill] sm:$0xff] }
 0x3bb   :  { %v11323_v48 = vpack.c.bf16 %v8571_v8, %v8571_v8  ;;  %v6384_v63 = vmax.f32 %v17039_v33, %v6188_v37  ;;  %v8103_v61 = vadd.f32 %v16308_v18, %v8102_v39  ;;  %v8381_v50 = vmax.f32 %v8111_v13, 0.0  ;;  %v17045_v37 = vld [vmem:[#allocation137_spill] sm:$0xff] }
 0x3bc   :  { %v8576_v42 = vmax.f32 %v6386_v23, %v8380_v28  ;;  %v6387_v52 = vmax.f32 %v17040_v6, %v6191_v46  ;;  %v6189_v29 = vmax.f32 %v5913_v5, 0.0 }
 0x3bd   :  { %9552 = vst.msk [vmem:[%s16754_s3 + $0x294] sm:$0xf] %vm9386_vm1, %v11323_v48  ;;  %v8574_v26 = vmax.f32 %v6384_v63, %v8378_v57  ;;  %v8379_v36 = vmax.f32 %v8103_v61, 0.0  ;;  %v12332_v2 = vpop.f32.mrb[112].mxu0 }
 0x3be   :  { %v12532_v31 = vpop.f32.mrb[112].mxu1  ;;  %v11328_v1 = vpack.c.bf16 %v8576_v42, %v8576_v42  ;;  %v8577_v9 = vmax.f32 %v6387_v52, %v8381_v50  ;;  %v6385_v19 = vmax.f32 %v17041_v12, %v6189_v29  ;;  %v5934_v56 = vadd.f32 %v16308_v18, %v12332_v2  ;;  %v5925_v4 = vpop.f32.mrb[113].mxu0  ;;  %v17046_v12 = vld [vmem:[#allocation138_spill] sm:$0xff] }
 0x3bf   :  { %v8115_v3 = vpop.f32.mrb[113].mxu1  ;;  %v11326_v32 = vpack.c.bf16 %v8574_v26, %v8574_v26  ;;  %v8124_v53 = vadd.f32 %v16308_v18, %v12532_v31  ;;  %v5926_v11 = vadd.f32 %v16308_v18, %v5925_v4  ;;  %v12333_v7 = vpop.f32.mrb[114].mxu0 }
 0x3c0   :  { %v8116_v30 = vadd.f32 %v16308_v18, %v8115_v3  ;;  %v12533_v15 = vpop.f32.mrb[114].mxu1  ;;  %9557 = vst.msk [vmem:[%s16754_s3 + $0x2a8] sm:$0xf] %vm9386_vm1, %v11328_v1  ;;  %v11329_v40 = vpack.c.bf16 %v8577_v9, %v8577_v9  ;;  %v8575_v22 = vmax.f32 %v6385_v19, %v8379_v36  ;;  %v6194_v16 = vmax.f32 %v5934_v56, 0.0  ;;  %v5928_v34 = vpop.f32.mrb[115].mxu0  ;;  %v17047_v3 = vld [vmem:[#allocation139_spill] sm:$0xff] }
 0x3c1   :  { %v5937_v10 = vadd.f32 %v16308_v18, %v12333_v7  ;;  %v8118_v21 = vpop.f32.mrb[115].mxu1  ;;  %9555 = vst.msk [vmem:[%s16754_s3 + $0x2a0] sm:$0xf] %vm9386_vm1, %v11326_v32  ;;  %v8384_v35 = vmax.f32 %v8124_v53, 0.0  ;;  %v6192_v45 = vmax.f32 %v5926_v11, 0.0  ;;  %v8127_v24 = vadd.f32 %v16308_v18, %v12533_v15 }
 0x3c2   :  { %v8382_v59 = vmax.f32 %v8116_v30, 0.0  ;;  %9558 = vst.msk [vmem:[%s16754_s3 + $0x2ac] sm:$0xf] %vm9386_vm1, %v11329_v40  ;;  %v11327_v25 = vpack.c.bf16 %v8575_v22, %v8575_v22  ;;  %v6390_v38 = vmax.f32 %v17042_v14, %v6194_v16  ;;  %v5929_v62 = vadd.f32 %v16308_v18, %v5928_v34  ;;  %v17048_v30 = vld [vmem:[#allocation140_spill] sm:$0xff] }
 0x3c3   :  { %v6195_v41 = vmax.f32 %v5937_v10, 0.0  ;;  %v6388_v27 = vmax.f32 %v17043_v58, %v6192_v45  ;;  %v8119_v44 = vadd.f32 %v16308_v18, %v8118_v21  ;;  %v8385_v20 = vmax.f32 %v8127_v24, 0.0  ;;  %v17049_v45 = vld [vmem:[#allocation141_spill] sm:$0xff] }
 0x3c4   :  { %9556 = vst.msk [vmem:[%s16754_s3 + $0x2a4] sm:$0xf] %vm9386_vm1, %v11327_v25  ;;  %v8580_v43 = vmax.f32 %v6390_v38, %v8384_v35  ;;  %v6193_v54 = vmax.f32 %v5929_v62, 0.0 }
 0x3c5   :  { %v6391_v0 = vmax.f32 %v17044_v47, %v6195_v41  ;;  %v8578_v8 = vmax.f32 %v6388_v27, %v8382_v59  ;;  %v8383_v17 = vmax.f32 %v8119_v44, 0.0  ;;  %v12336_v49 = vpop.f32.mrb[116].mxu0 }
 0x3c6   :  { %v12536_v60 = vpop.f32.mrb[116].mxu1  ;;  %v11332_v39 = vpack.c.bf16 %v8580_v43, %v8580_v43  ;;  %v6389_v57 = vmax.f32 %v17045_v37, %v6193_v54  ;;  %v5950_v13 = vadd.f32 %v16308_v18, %v12336_v49  ;;  %v5941_v48 = vpop.f32.mrb[117].mxu0  ;;  %v17050_v37 = vld [vmem:[#allocation142_spill] sm:$0xff] }
 0x3c7   :  { %v8581_v28 = vmax.f32 %v6391_v0, %v8385_v20  ;;  %v8131_v55 = vpop.f32.mrb[117].mxu1  ;;  %v11330_v23 = vpack.c.bf16 %v8578_v8, %v8578_v8  ;;  %v8140_v46 = vadd.f32 %v16308_v18, %v12536_v60  ;;  %v5942_v5 = vadd.f32 %v16308_v18, %v5941_v48  ;;  %v12337_v63 = vpop.f32.mrb[118].mxu0 }
 0x3c8   :  { %v8132_v33 = vadd.f32 %v16308_v18, %v8131_v55  ;;  %v12537_v61 = vpop.f32.mrb[118].mxu1  ;;  %9561 = vst.msk [vmem:[%s16754_s3 + $0x2b8] sm:$0xf] %vm9386_vm1, %v11332_v39  ;;  %v8579_v6 = vmax.f32 %v6389_v57, %v8383_v17  ;;  %v6198_v52 = vmax.f32 %v5950_v13, 0.0  ;;  %v5953_v50 = vadd.f32 %v16308_v18, %v12337_v63  ;;  %v5944_v29 = vpop.f32.mrb[119].mxu0  ;;  %v17051_v55 = vld [vmem:[#allocation143_spill] sm:$0xff] }
 0x3c9   :  { %v11333_v42 = vpack.c.bf16 %v8581_v28, %v8581_v28  ;;  %v8134_v26 = vpop.f32.mrb[119].mxu1  ;;  %9559 = vst.msk [vmem:[%s16754_s3 + $0x2b0] sm:$0xf] %vm9386_vm1, %v11330_v23  ;;  %v8388_v36 = vmax.f32 %v8140_v46, 0.0  ;;  %v6196_v2 = vmax.f32 %v5942_v5, 0.0  ;;  %v8143_v1 = vadd.f32 %v16308_v18, %v12537_v61 }
 0x3ca   :  { %v8386_v31 = vmax.f32 %v8132_v33, 0.0  ;;  %v11331_v9 = vpack.c.bf16 %v8579_v6, %v8579_v6  ;;  %v6394_v19 = vmax.f32 %v17046_v12, %v6198_v52  ;;  %v6199_v56 = vmax.f32 %v5953_v50, 0.0  ;;  %v17052_v33 = vld [vmem:[#allocation144_spill] sm:$0xff] }
 0x3cb   :  { %9562 = vst.msk [vmem:[%s16754_s3 + $0x2bc] sm:$0xf] %vm9386_vm1, %v11333_v42  ;;  %v5945_v4 = vadd.f32 %v16308_v18, %v5944_v29  ;;  %v6392_v32 = vmax.f32 %v17047_v3, %v6196_v2  ;;  %v8135_v53 = vadd.f32 %v16308_v18, %v8134_v26  ;;  %v8389_v15 = vmax.f32 %v8143_v1, 0.0  ;;  %v17053_v2 = vld [vmem:[#allocation145_spill] sm:$0xff] }
 0x3cc   :  { %9560 = vst.msk [vmem:[%s16754_s3 + $0x2b4] sm:$0xf] %vm9386_vm1, %v11331_v9  ;;  %v8584_v11 = vmax.f32 %v6394_v19, %v8388_v36  ;;  %v6395_v7 = vmax.f32 %v17048_v30, %v6199_v56 }
 0x3cd   :  { %v6197_v40 = vmax.f32 %v5945_v4, 0.0  ;;  %v8582_v22 = vmax.f32 %v6392_v32, %v8386_v31  ;;  %v8387_v16 = vmax.f32 %v8135_v53, 0.0  ;;  %v12340_v10 = vpop.f32.mrb[120].mxu0 }
 0x3ce   :  { %v12540_v34 = vpop.f32.mrb[120].mxu1  ;;  %v11336_v21 = vpack.c.bf16 %v8584_v11, %v8584_v11  ;;  %v8585_v35 = vmax.f32 %v6395_v7, %v8389_v15  ;;  %v5966_v24 = vadd.f32 %v16308_v18, %v12340_v10  ;;  %v5957_v25 = vpop.f32.mrb[121].mxu0 }
 0x3cf   :  { %v6393_v59 = vmax.f32 %v17049_v45, %v6197_v40  ;;  %v8147_v14 = vpop.f32.mrb[121].mxu1  ;;  %v11334_v38 = vpack.c.bf16 %v8582_v22, %v8582_v22  ;;  %v8156_v41 = vadd.f32 %v16308_v18, %v12540_v34  ;;  %v5958_v62 = vadd.f32 %v16308_v18, %v5957_v25  ;;  %v12341_v27 = vpop.f32.mrb[122].mxu0  ;;  %v17054_v45 = vld [vmem:[#allocation146_spill] sm:$0xff] }
 0x3d0   :  { %v8148_v58 = vadd.f32 %v16308_v18, %v8147_v14  ;;  %v12541_v44 = vpop.f32.mrb[122].mxu1  ;;  %9565 = vst.msk [vmem:[%s16754_s3 + $0x2c8] sm:$0xf] %vm9386_vm1, %v11336_v21  ;;  %v11337_v43 = vpack.c.bf16 %v8585_v35, %v8585_v35  ;;  %v6202_v0 = vmax.f32 %v5966_v24, 0.0  ;;  %v5969_v20 = vadd.f32 %v16308_v18, %v12341_v27  ;;  %v5960_v54 = vpop.f32.mrb[123].mxu0  ;;  %v17055_v14 = vld [vmem:[#allocation147_spill] sm:$0xff] }
 0x3d1   :  { %v8583_v47 = vmax.f32 %v6393_v59, %v8387_v16  ;;  %v8150_v8 = vpop.f32.mrb[123].mxu1  ;;  %9563 = vst.msk [vmem:[%s16754_s3 + $0x2c0] sm:$0xf] %vm9386_vm1, %v11334_v38  ;;  %v8392_v17 = vmax.f32 %v8156_v41, 0.0  ;;  %v6200_v49 = vmax.f32 %v5958_v62, 0.0  ;;  %v8159_v39 = vadd.f32 %v16308_v18, %v12541_v44 }
 0x3d2   :  { %v8390_v60 = vmax.f32 %v8148_v58, 0.0  ;;  %9566 = vst.msk [vmem:[%s16754_s3 + $0x2cc] sm:$0xf] %vm9386_vm1, %v11337_v43  ;;  %v6398_v57 = vmax.f32 %v17050_v37, %v6202_v0  ;;  %v6203_v13 = vmax.f32 %v5969_v20, 0.0  ;;  %v5961_v48 = vadd.f32 %v16308_v18, %v5960_v54  ;;  %v17056_v58 = vld [vmem:[#allocation148_spill] sm:$0xff] }
 0x3d3   :  { %v11335_v28 = vpack.c.bf16 %v8583_v47, %v8583_v47  ;;  %v6396_v23 = vmax.f32 %v17051_v55, %v6200_v49  ;;  %v8151_v46 = vadd.f32 %v16308_v18, %v8150_v8  ;;  %v8393_v61 = vmax.f32 %v8159_v39, 0.0  ;;  %v17057_v49 = vld [vmem:[#allocation149_spill] sm:$0xff] }
 0x3d4   :  { %v8588_v5 = vmax.f32 %v6398_v57, %v8392_v17  ;;  %v6399_v63 = vmax.f32 %v17052_v33, %v6203_v13  ;;  %v6201_v42 = vmax.f32 %v5961_v48, 0.0 }
 0x3d5   :  { %9564 = vst.msk [vmem:[%s16754_s3 + $0x2c4] sm:$0xf] %vm9386_vm1, %v11335_v28  ;;  %v8586_v6 = vmax.f32 %v6396_v23, %v8390_v60  ;;  %v8391_v52 = vmax.f32 %v8151_v46, 0.0  ;;  %v12344_v50 = vpop.f32.mrb[124].mxu0 }
 0x3d6   :  { %v12544_v29 = vpop.f32.mrb[124].mxu1  ;;  %v11340_v26 = vpack.c.bf16 %v8588_v5, %v8588_v5  ;;  %v8589_v36 = vmax.f32 %v6399_v63, %v8393_v61  ;;  %v6397_v31 = vmax.f32 %v17053_v2, %v6201_v42  ;;  %v5982_v1 = vadd.f32 %v16308_v18, %v12344_v50  ;;  %v5973_v9 = vpop.f32.mrb[125].mxu0 }
 0x3d7   :  { %v8163_v12 = vpop.f32.mrb[125].mxu1  ;;  %v11338_v19 = vpack.c.bf16 %v8586_v6, %v8586_v6  ;;  %v8172_v56 = vadd.f32 %v16308_v18, %v12544_v29  ;;  %v5974_v4 = vadd.f32 %v16308_v18, %v5973_v9  ;;  %v12345_v32 = vpop.f32.mrb[126].mxu0  ;;  %v17058_v9 = vld [vmem:[#allocation150_spill] sm:$0xff] }
 0x3d8   :  { %v8164_v3 = vadd.f32 %v16308_v18, %v8163_v12  ;;  %v12545_v53 = vpop.f32.mrb[126].mxu1  ;;  %9569 = vst.msk [vmem:[%s16754_s3 + $0x2d8] sm:$0xf] %vm9386_vm1, %v11340_v26  ;;  %v11341_v11 = vpack.c.bf16 %v8589_v36, %v8589_v36  ;;  %v8587_v30 = vmax.f32 %v6397_v31, %v8391_v52  ;;  %v6206_v7 = vmax.f32 %v5982_v1, 0.0  ;;  %v5976_v40 = vpop.f32.mrb[127].mxu0 }
 0x3d9   :  { %v5985_v15 = vadd.f32 %v16308_v18, %v12345_v32  ;;  %v8166_v22 = vpop.f32.mrb[127].mxu1  ;;  %9567 = vst.msk [vmem:[%s16754_s3 + $0x2d0] sm:$0xf] %vm9386_vm1, %v11338_v19  ;;  %v8396_v16 = vmax.f32 %v8172_v56, 0.0  ;;  %v6204_v10 = vmax.f32 %v5974_v4, 0.0  ;;  %v8175_v21 = vadd.f32 %v16308_v18, %v12545_v53  ;;  %v17059_v4 = vld [vmem:[#allocation151_spill] sm:$0xff] }
 0x3da   :  { %v8394_v34 = vmax.f32 %v8164_v3, 0.0  ;;  %9570 = vst.msk [vmem:[%s16754_s3 + $0x2dc] sm:$0xf] %vm9386_vm1, %v11341_v11  ;;  %v11339_v35 = vpack.c.bf16 %v8587_v30, %v8587_v30  ;;  %v6402_v59 = vmax.f32 %v17054_v45, %v6206_v7  ;;  %v5977_v25 = vadd.f32 %v16308_v18, %v5976_v40 }
 0x3db   :  { %v6207_v24 = vmax.f32 %v5985_v15, 0.0  ;;  %v6400_v38 = vmax.f32 %v17055_v14, %v6204_v10  ;;  %v8167_v41 = vadd.f32 %v16308_v18, %v8166_v22  ;;  %v8397_v44 = vmax.f32 %v8175_v21, 0.0  ;;  %v16677_v18 = vld [vmem:[%s16753_s2] ss:$0 sm:$0xff]  ;;  %v17060_v22 = vld [vmem:[#allocation152_spill] sm:$0xff] }
 0x3dc   :  { %9568 = vst.msk [vmem:[%s16754_s3 + $0x2d4] sm:$0xf] %vm9386_vm1, %v11339_v35  ;;  %v8592_v62 = vmax.f32 %v6402_v59, %v8396_v16  ;;  %v6205_v43 = vmax.f32 %v5977_v25, 0.0 }
 0x3dd   :  { %v6403_v27 = vmax.f32 %v17056_v58, %v6207_v24  ;;  %v8590_v47 = vmax.f32 %v6400_v38, %v8394_v34  ;;  %v8395_v0 = vmax.f32 %v8167_v41, 0.0  ;;  %v12348_v20 = vpop.f32.mrb[128].mxu0 }
 0x3de   :  { %v12548_v54 = vpop.f32.mrb[128].mxu1  ;;  %v11344_v8 = vpack.c.bf16 %v8592_v62, %v8592_v62  ;;  %v6401_v60 = vmax.f32 %v17057_v49, %v6205_v43  ;;  %v5998_v39 = vadd.f32 %v16677_v18, %v12348_v20  ;;  %v5989_v28 = vpop.f32.mrb[129].mxu0 }
 0x3df   :  { %v8593_v17 = vmax.f32 %v6403_v27, %v8397_v44  ;;  %v8179_v37 = vpop.f32.mrb[129].mxu1  ;;  %v11342_v57 = vpack.c.bf16 %v8590_v47, %v8590_v47  ;;  %v8188_v13 = vadd.f32 %v16677_v18, %v12548_v54  ;;  %v5990_v48 = vadd.f32 %v16677_v18, %v5989_v28  ;;  %v12349_v23 = vpop.f32.mrb[130].mxu0 }
 0x3e0   :  { %v8180_v55 = vadd.f32 %v16677_v18, %v8179_v37  ;;  %v12549_v46 = vpop.f32.mrb[130].mxu1  ;;  %9573 = vst.msk [vmem:[%s16754_s3 + $0x2e8] sm:$0xf] %vm9386_vm1, %v11344_v8  ;;  %v8591_v33 = vmax.f32 %v6401_v60, %v8395_v0  ;;  %v6210_v63 = vmax.f32 %v5998_v39, 0.0  ;;  %v6001_v61 = vadd.f32 %v16677_v18, %v12349_v23  ;;  %v5992_v42 = vpop.f32.mrb[131].mxu0  ;;  %v17061_v8 = vld [vmem:[#allocation153_spill] sm:$0xff] }
 0x3e1   :  { %v11345_v5 = vpack.c.bf16 %v8593_v17, %v8593_v17  ;;  %v8182_v6 = vpop.f32.mrb[131].mxu1  ;;  %9571 = vst.msk [vmem:[%s16754_s3 + $0x2e0] sm:$0xf] %vm9386_vm1, %v11342_v57  ;;  %v8400_v52 = vmax.f32 %v8188_v13, 0.0  ;;  %v6208_v50 = vmax.f32 %v5990_v48, 0.0  ;;  %v8191_v26 = vadd.f32 %v16677_v18, %v12549_v46  ;;  %v17062_v39 = vld [vmem:[#allocation154_spill] sm:$0xff] }
 0x3e2   :  { %v8398_v29 = vmax.f32 %v8180_v55, 0.0  ;;  %v11343_v36 = vpack.c.bf16 %v8591_v33, %v8591_v33  ;;  %v6406_v2 = vmax.f32 %v14966_v51, %v6210_v63  ;;  %v6211_v31 = vmax.f32 %v6001_v61, 0.0  ;;  %v17063_v13 = vld [vmem:[#allocation155_spill] sm:$0xff]  ;;  %v17064_v63 = vld [vmem:[#allocation156_spill] sm:$0xff] }
 0x3e3   :  { %9574 = vst.msk [vmem:[%s16754_s3 + $0x2ec] sm:$0xf] %vm9386_vm1, %v11345_v5  ;;  %v5993_v1 = vadd.f32 %v16677_v18, %v5992_v42  ;;  %v6404_v12 = vmax.f32 %v17058_v9, %v6208_v50  ;;  %v8183_v19 = vadd.f32 %v16677_v18, %v8182_v6  ;;  %v8401_v32 = vmax.f32 %v8191_v26, 0.0 }
 0x3e4   :  { %9572 = vst.msk [vmem:[%s16754_s3 + $0x2e4] sm:$0xf] %vm9386_vm1, %v11343_v36  ;;  %v8596_v56 = vmax.f32 %v6406_v2, %v8400_v52  ;;  %v6407_v3 = vmax.f32 %v17059_v4, %v6211_v31 }
 0x3e5   :  { %v6209_v53 = vmax.f32 %v5993_v1, 0.0  ;;  %v8594_v11 = vmax.f32 %v6404_v12, %v8398_v29  ;;  %v8399_v30 = vmax.f32 %v8183_v19, 0.0  ;;  %v12352_v51 = vpop.f32.mrb[132].mxu0 }
 0x3e6   :  { %v12552_v7 = vpop.f32.mrb[132].mxu1  ;;  %v11348_v15 = vpack.c.bf16 %v8596_v56, %v8596_v56  ;;  %v8597_v40 = vmax.f32 %v6407_v3, %v8401_v32  ;;  %v6014_v10 = vadd.f32 %v16677_v18, %v12352_v51  ;;  %v6005_v34 = vpop.f32.mrb[133].mxu0 }
 0x3e7   :  { %v6405_v16 = vmax.f32 %v17060_v22, %v6209_v53  ;;  %v8195_v21 = vpop.f32.mrb[133].mxu1  ;;  %v11346_v35 = vpack.c.bf16 %v8594_v11, %v8594_v11  ;;  %v8204_v45 = vadd.f32 %v16677_v18, %v12552_v7  ;;  %v6006_v59 = vadd.f32 %v16677_v18, %v6005_v34  ;;  %v12353_v25 = vpop.f32.mrb[134].mxu0 }
 0x3e8   :  { %v8196_v24 = vadd.f32 %v16677_v18, %v8195_v21  ;;  %v12553_v14 = vpop.f32.mrb[134].mxu1  ;;  %9577 = vst.msk [vmem:[%s16754_s3 + $0x2f8] sm:$0xf] %vm9386_vm1, %v11348_v15  ;;  %v11349_v38 = vpack.c.bf16 %v8597_v40, %v8597_v40  ;;  %v6214_v62 = vmax.f32 %v6014_v10, 0.0  ;;  %v6017_v58 = vadd.f32 %v16677_v18, %v12353_v25  ;;  %v6008_v27 = vpop.f32.mrb[135].mxu0 }
 0x3e9   :  { %v8595_v41 = vmax.f32 %v6405_v16, %v8399_v30  ;;  %v8198_v44 = vpop.f32.mrb[135].mxu1  ;;  %9575 = vst.msk [vmem:[%s16754_s3 + $0x2f0] sm:$0xf] %vm9386_vm1, %v11346_v35  ;;  %v8404_v43 = vmax.f32 %v8204_v45, 0.0  ;;  %v6212_v47 = vmax.f32 %v6006_v59, 0.0  ;;  %v8207_v20 = vadd.f32 %v16677_v18, %v12553_v14 }
 0x3ea   :  { %v8402_v0 = vmax.f32 %v8196_v24, 0.0  ;;  %9578 = vst.msk [vmem:[%s16754_s3 + $0x2fc] sm:$0xf] %vm9386_vm1, %v11349_v38  ;;  %v6410_v17 = vmax.f32 %v17061_v8, %v6214_v62  ;;  %v6215_v49 = vmax.f32 %v6017_v58, 0.0  ;;  %v6009_v60 = vadd.f32 %v16677_v18, %v6008_v27 }
 0x3eb   :  { %v11347_v54 = vpack.c.bf16 %v8595_v41, %v8595_v41  ;;  %v6408_v28 = vmax.f32 %v17062_v39, %v6212_v47  ;;  %v8199_v37 = vadd.f32 %v16677_v18, %v8198_v44  ;;  %v8405_v55 = vmax.f32 %v8207_v20, 0.0 }
 0x3ec   :  { %v8600_v57 = vmax.f32 %v6410_v17, %v8404_v43  ;;  %v6411_v48 = vmax.f32 %v17063_v13, %v6215_v49  ;;  %v6213_v23 = vmax.f32 %v6009_v60, 0.0 }
 0x3ed   :  { %9576 = vst.msk [vmem:[%s16754_s3 + $0x2f4] sm:$0xf] %vm9386_vm1, %v11347_v54  ;;  %v8598_v46 = vmax.f32 %v6408_v28, %v8402_v0  ;;  %v8403_v42 = vmax.f32 %v8199_v37, 0.0 }
 0x3ee   :  { %v11352_v5 = vpack.c.bf16 %v8600_v57, %v8600_v57  ;;  %v8601_v33 = vmax.f32 %v6411_v48, %v8405_v55  ;;  %v6409_v61 = vmax.f32 %v17064_v63, %v6213_v23 }
 0x3ef   :  { %v11350_v6 = vpack.c.bf16 %v8598_v46, %v8598_v46 }
 0x3f0   :  { %9581 = vst.msk [vmem:[%s16754_s3 + $0x308] sm:$0xf] %vm9386_vm1, %v11352_v5  ;;  %v11353_v18 = vpack.c.bf16 %v8601_v33, %v8601_v33  ;;  %v8599_v52 = vmax.f32 %v6409_v61, %v8403_v42 }
 0x3f1   :  { %9579 = vst.msk [vmem:[%s16754_s3 + $0x300] sm:$0xf] %vm9386_vm1, %v11350_v6 }
 0x3f2   :  { %9582 = vst.msk [vmem:[%s16754_s3 + $0x30c] sm:$0xf] %vm9386_vm1, %v11353_v18  ;;  %v11351_v50 = vpack.c.bf16 %v8599_v52, %v8599_v52 }
 0x3f4   :  { %9580 = vst.msk [vmem:[%s16754_s3 + $0x304] sm:$0xf] %vm9386_vm1, %v11351_v50 }

// kernel: forward.3
= control target key start
LH: loop header
LB: loop body
LE: loop exit
PB: predicated region body
PF: predicated region fallthrough
CT: control target
= control target key end

     0   :  { %v3996_v0 = vmov 0   ;;  %vm279_vm0 = vcmask 588800   ;;  %vm319_vm1 = vcmask 1043456   ;;  %vm3998_vm2 = vmmov 0   ;;  %s5010_s1 = inlined_call_operand.vmem [shape: bf16[200,128], index: 1, kind: input, shape index: {}]   ;;  %s5011_s0 = inlined_call_operand.vmem [shape: bf16[4,200,200], index: 0, kind: input, shape index: {}]   ;;  %s5012_s3 = inlined_call_operand.vmem [shape: bf16[25,16,128], index: 3, kind: input, shape index: {}]   ;;  %s5013_s2 = inlined_call_operand.vmem [shape: f32[1,128], index: 2, kind: input, shape index: {}]   ;;  %s5014_s5 = inlined_call_operand.vmem [shape: bf16[128,128], index: 5, kind: input, shape index: {}]   ;;  %s5015_s7 = inlined_call_operand.vmem [shape: bf16[128,128], index: 7, kind: input, shape index: {}]   ;;  %s5016_s4 = inlined_call_operand.vmem [shape: f32[1,128], index: 4, kind: input, shape index: {}]   ;;  %s5017_s6 = inlined_call_operand.vmem [shape: f32[1,128], index: 6, kind: input, shape index: {}]   ;;  %s5018_s8 = inlined_call_operand.vmem [shape: f32[1,128], index: 8, kind: input, shape index: {}]   ;;  %s5019_s9 = inlined_call_operand.vmem [shape: f32[8,128], index: 9, kind: output, shape index: {}]  }
   0x1   :  { %323 = vmatprep.subr.bf16.mxu0 %v3996_v0  ;;  %663 = vmatprep.subr.bf16.mxu1 %v3996_v0  ;;  %v4054_v1 = vld [vmem:[%s5010_s1] sm:$0xff]   ;;  %v4061_v2 = vld [vmem:[%s5010_s1 + $0x8] sm:$0xff]   ;;  %v4070_v3 = vld [vmem:[%s5010_s1 + $0x10] sm:$0xff]   ;;  %vm1592_vm3 = vcmask 130048  }
   0x2   :  { %324 = vmatpush1.bf16.msra.mxu0 %v4054_v1  ;;  %664 = vmatpush1.bf16.msra.mxu1 %v4054_v1  ;;  %v4079_v4 = vld [vmem:[%s5010_s1 + $0x18] sm:$0xff]   ;;  %v3804_v5 = vld [vmem:[%s5011_s0 + $0x4] ss:$8 sps:$4 sm:$0xff]   ;;  %v4114_v9 = vld [vmem:[%s5010_s1 + $0x30] sm:$0xff]  }
   0x3   :  { %325 = vmatprep.subr.bf16.mxu0 %v3996_v0  ;;  %665 = vmatprep.subr.bf16.mxu1 %v3996_v0  ;;  %v4091_v6 = vld [vmem:[%s5010_s1 + $0x20] sm:$0xff]   ;;  %v3807_v7 = vld [vmem:[%s5011_s0 + $0xcc] ss:$8 sps:$4 sm:$0xff]   ;;  %v4123_v10 = vld [vmem:[%s5010_s1 + $0x38] sm:$0xff]  }
   0x4   :  { %3206 = vmatprep.mubr.msk.bf16.mxu0 %vm279_vm0, %v3804_v5  ;;  %3270 = vmatprep.mubr.msk.bf16.mxu1 %vm279_vm0, %v3807_v7  ;;  %v4105_v8 = vld [vmem:[%s5010_s1 + $0x28] sm:$0xff]   ;;  %v4132_v11 = vld [vmem:[%s5010_s1 + $0x40] sm:$0xff]   ;;  %v4150_v13 = vld [vmem:[%s5010_s1 + $0x50] sm:$0xff]  }
   0x5   :  { %v4141_v12 = vld [vmem:[%s5010_s1 + $0x48] sm:$0xff]   ;;  %v4159_v14 = vld [vmem:[%s5010_s1 + $0x58] sm:$0xff]   ;;  %v3801_v15 = vld [vmem:[%s5010_s1 + $0x60] ss:$0 sps:$4 sm:$0xff]  }
   0x6   :  { %326 = vmatpush1.bf16.msra.mxu0 %v4061_v2  ;;  %666 = vmatpush1.bf16.msra.mxu1 %v4061_v2  ;;  %v4170_v16 = vsel %vm319_vm1, %v3801_v15, 0  ;;  %v3802_v17 = vld [vmem:[%s5011_s0] ss:$8 sps:$4 sm:$0xff]   ;;  %v3808_v19 = vld [vmem:[%s5011_s0 + $0x14] ss:$8 sps:$4 sm:$0xff]  }
   0x7   :  { %327 = vmatprep.subr.bf16.mxu0 %v3996_v0  ;;  %667 = vmatprep.subr.bf16.mxu1 %v3996_v0  ;;  %v3805_v18 = vld [vmem:[%s5011_s0 + $0xc8] ss:$8 sps:$4 sm:$0xff]   ;;  %v3810_v20 = vld [vmem:[%s5011_s0 + $0xdc] ss:$8 sps:$4 sm:$0xff]   ;;  %v3813_v22 = vld [vmem:[%s5011_s0 + $0xd8] ss:$8 sps:$4 sm:$0xff]  }
   0x8   :  { %v3812_v21 = vld [vmem:[%s5011_s0 + $0x10] ss:$8 sps:$4 sm:$0xff]   ;;  %v3814_v23 = vld [vmem:[%s5011_s0 + $0x24] ss:$8 sps:$4 sm:$0xff]   ;;  %v3818_v25 = vld [vmem:[%s5011_s0 + $0x20] ss:$8 sps:$4 sm:$0xff]  }
   0x9   :  { %v3816_v24 = vld [vmem:[%s5011_s0 + $0xec] ss:$8 sps:$4 sm:$0xff]   ;;  %v3819_v26 = vld [vmem:[%s5011_s0 + $0xe8] ss:$8 sps:$4 sm:$0xff]   ;;  %v3822_v28 = vld [vmem:[%s5011_s0 + $0xfc] ss:$8 sps:$4 sm:$0xff]  }
   0xa   :  { %328 = vmatpush1.bf16.msra.mxu0 %v4070_v3  ;;  %668 = vmatpush1.bf16.msra.mxu1 %v4070_v3  ;;  %v3820_v27 = vld [vmem:[%s5011_s0 + $0x34] ss:$8 sps:$4 sm:$0xff]   ;;  %v3824_v29 = vld [vmem:[%s5011_s0 + $0x30] ss:$8 sps:$4 sm:$0xff]   ;;  %v3826_v31 = vld [vmem:[%s5011_s0 + $0x44] ss:$8 sps:$4 sm:$0xff]  }
   0xb   :  { %329 = vmatprep.subr.bf16.mxu0 %v3996_v0  ;;  %669 = vmatprep.subr.bf16.mxu1 %v3996_v0  ;;  %v3825_v30 = vld [vmem:[%s5011_s0 + $0xf8] ss:$8 sps:$4 sm:$0xff]   ;;  %v3828_v32 = vld [vmem:[%s5011_s0 + $0x10c] ss:$8 sps:$4 sm:$0xff]   ;;  %v3831_v34 = vld [vmem:[%s5011_s0 + $0x108] ss:$8 sps:$4 sm:$0xff]  }
   0xc   :  { %v3830_v33 = vld [vmem:[%s5011_s0 + $0x40] ss:$8 sps:$4 sm:$0xff]   ;;  %v3832_v35 = vld [vmem:[%s5011_s0 + $0x54] ss:$8 sps:$4 sm:$0xff]   ;;  %v3836_v37 = vld [vmem:[%s5011_s0 + $0x50] ss:$8 sps:$4 sm:$0xff]  }
   0xd   :  { %v3834_v36 = vld [vmem:[%s5011_s0 + $0x11c] ss:$8 sps:$4 sm:$0xff]   ;;  %v3837_v38 = vld [vmem:[%s5011_s0 + $0x118] ss:$8 sps:$4 sm:$0xff]   ;;  %v3840_v40 = vld [vmem:[%s5011_s0 + $0x12c] ss:$8 sps:$4 sm:$0xff]  }
   0xe   :  { %330 = vmatpush1.bf16.msra.mxu0 %v4079_v4  ;;  %670 = vmatpush1.bf16.msra.mxu1 %v4079_v4  ;;  %v3838_v39 = vld [vmem:[%s5011_s0 + $0x64] ss:$8 sps:$4 sm:$0xff]   ;;  %v3842_v41 = vld [vmem:[%s5011_s0 + $0x60] ss:$8 sps:$4 sm:$0xff]   ;;  %v3844_v43 = vld [vmem:[%s5011_s0 + $0x74] ss:$8 sps:$4 sm:$0xff]  }
   0xf   :  { %331 = vmatprep.subr.bf16.mxu0 %v3996_v0  ;;  %671 = vmatprep.subr.bf16.mxu1 %v3996_v0  ;;  %v3843_v42 = vld [vmem:[%s5011_s0 + $0x128] ss:$8 sps:$4 sm:$0xff]   ;;  %v3846_v44 = vld [vmem:[%s5011_s0 + $0x13c] ss:$8 sps:$4 sm:$0xff]   ;;  %v3849_v46 = vld [vmem:[%s5011_s0 + $0x138] ss:$8 sps:$4 sm:$0xff]  }
  0x10   :  { %v3848_v45 = vld [vmem:[%s5011_s0 + $0x70] ss:$8 sps:$4 sm:$0xff]   ;;  %v3850_v47 = vld [vmem:[%s5011_s0 + $0x84] ss:$8 sps:$4 sm:$0xff]   ;;  %v3854_v49 = vld [vmem:[%s5011_s0 + $0x80] ss:$8 sps:$4 sm:$0xff]  }
  0x11   :  { %v3852_v48 = vld [vmem:[%s5011_s0 + $0x14c] ss:$8 sps:$4 sm:$0xff]   ;;  %v3855_v50 = vld [vmem:[%s5011_s0 + $0x148] ss:$8 sps:$4 sm:$0xff]   ;;  %v3858_v52 = vld [vmem:[%s5011_s0 + $0x15c] ss:$8 sps:$4 sm:$0xff]  }
  0x12   :  { %332 = vmatpush1.bf16.msra.mxu0 %v4091_v6  ;;  %672 = vmatpush1.bf16.msra.mxu1 %v4091_v6  ;;  %v3856_v51 = vld [vmem:[%s5011_s0 + $0x94] ss:$8 sps:$4 sm:$0xff]   ;;  %v3860_v53 = vld [vmem:[%s5011_s0 + $0x90] ss:$8 sps:$4 sm:$0xff]   ;;  %v3862_v55 = vld [vmem:[%s5011_s0 + $0xa4] ss:$8 sps:$4 sm:$0xff]  }
  0x13   :  { %333 = vmatprep.subr.bf16.mxu0 %v3996_v0  ;;  %673 = vmatprep.subr.bf16.mxu1 %v3996_v0  ;;  %v3861_v54 = vld [vmem:[%s5011_s0 + $0x158] ss:$8 sps:$4 sm:$0xff]   ;;  %v3864_v56 = vld [vmem:[%s5011_s0 + $0x16c] ss:$8 sps:$4 sm:$0xff]   ;;  %v3867_v58 = vld [vmem:[%s5011_s0 + $0x168] ss:$8 sps:$4 sm:$0xff]  }
  0x14   :  { %v3866_v57 = vld [vmem:[%s5011_s0 + $0xa0] ss:$8 sps:$4 sm:$0xff]   ;;  %v3868_v59 = vld [vmem:[%s5011_s0 + $0xb4] ss:$8 sps:$4 sm:$0xff]   ;;  %v3872_v63 = vld [vmem:[%s5011_s0 + $0xb0] ss:$8 sps:$4 sm:$0xff]  }
  0x15   :  { %v3870_v60 = vld [vmem:[%s5011_s0 + $0x17c] ss:$8 sps:$4 sm:$0xff]   ;;  %v3243_v62 = vld [vmem:[%s5011_s0 + $0x188] sm:$0xff]  ;;  %v3878_v7 = vld [vmem:[%s5011_s0 + $0x190] ss:$8 sps:$4 sm:$0xff]  }
  0x16   :  { %334 = vmatpush1.bf16.msra.mxu0 %v4105_v8  ;;  %674 = vmatpush1.bf16.msra.mxu1 %v4105_v8  ;;  %v83_v61 = vld [vmem:[%s5011_s0 + $0xc0] sm:$0xff]  ;;  %v3880_v5 = vld [vmem:[%s5011_s0 + $0x194] ss:$8 sps:$4 sm:$0xff]  }
  0x17   :  { %335 = vmatprep.subr.bf16.mxu0 %v3996_v0  ;;  %675 = vmatprep.subr.bf16.mxu1 %v3996_v0  ;;  %v3955_v15 = vld [vmem:[%s5012_s3] sm:$0xff]  }
  0x1a   :  { %336 = vmatpush1.bf16.msra.mxu0 %v4114_v9  ;;  %676 = vmatpush1.bf16.msra.mxu1 %v4114_v9 }
  0x1b   :  { %337 = vmatprep.subr.bf16.mxu0 %v3996_v0  ;;  %677 = vmatprep.subr.bf16.mxu1 %v3996_v0 }
  0x1e   :  { %338 = vmatpush1.bf16.msra.mxu0 %v4123_v10  ;;  %678 = vmatpush1.bf16.msra.mxu1 %v4123_v10 }
  0x1f   :  { %339 = vmatprep.subr.bf16.mxu0 %v3996_v0  ;;  %679 = vmatprep.subr.bf16.mxu1 %v3996_v0 }
  0x22   :  { %340 = vmatpush1.bf16.msra.mxu0 %v4132_v11  ;;  %680 = vmatpush1.bf16.msra.mxu1 %v4132_v11 }
  0x23   :  { %341 = vmatprep.subr.bf16.mxu0 %v3996_v0  ;;  %681 = vmatprep.subr.bf16.mxu1 %v3996_v0 }
  0x26   :  { %342 = vmatpush1.bf16.msra.mxu0 %v4141_v12  ;;  %682 = vmatpush1.bf16.msra.mxu1 %v4141_v12 }
  0x27   :  { %343 = vmatprep.subr.bf16.mxu0 %v3996_v0  ;;  %683 = vmatprep.subr.bf16.mxu1 %v3996_v0 }
  0x2a   :  { %344 = vmatpush1.bf16.msra.mxu0 %v4150_v13  ;;  %684 = vmatpush1.bf16.msra.mxu1 %v4150_v13 }
  0x2b   :  { %345 = vmatprep.subr.bf16.mxu0 %v3996_v0  ;;  %685 = vmatprep.subr.bf16.mxu1 %v3996_v0 }
  0x2e   :  { %346 = vmatpush1.bf16.msra.mxu0 %v4159_v14  ;;  %686 = vmatpush1.bf16.msra.mxu1 %v4159_v14 }
  0x2f   :  { %347 = vmatprep.subr.bf16.mxu0 %v3996_v0  ;;  %687 = vmatprep.subr.bf16.mxu1 %v3996_v0 }
  0x32   :  { %348 = vmatpush1.bf16.msra.mxu0 %v4170_v16  ;;  %688 = vmatpush1.bf16.msra.mxu1 %v4170_v16 }
  0x33   :  { %1028 = vmatprep.subr.bf16.mxu0 %v3996_v0  ;;  %1393 = vmatprep.subr.bf16.mxu1 %v3996_v0 }
  0x35   :  { %356 = vmatmul.mubr.bf16.vlgmr.msra.gmra.mrb[0].mxu0 %v3802_v17  ;;  %696 = vmatmul.mubr.bf16.vlgmr.msra.gmra.mrb[0].mxu1 %v3805_v18  ;;  %v3893_v17 = vld [vmem:[%s5011_s0 + $0x27c] ss:$8 sps:$4 sm:$0xff]   ;;  %v3892_v18 = vld [vmem:[%s5011_s0 + $0x1b0] ss:$8 sps:$4 sm:$0xff]  }
  0x36   :  { %1029 = vmatpush1.bf16.msra.mxu0 %v4054_v1  ;;  %1394 = vmatpush1.bf16.msra.mxu1 %v4054_v1  ;;  %v3192_v1 = vcombine.high %v83_v61, %v83_v61 }
  0x37   :  { %3207 = vmatprep.mubr.msk.bf16.mxu0 %vm279_vm0, %v3808_v19  ;;  %3271 = vmatprep.mubr.msk.bf16.mxu1 %vm279_vm0, %v3810_v20  ;;  %v3895_v19 = vld [vmem:[%s5011_s0 + $0x278] ss:$8 sps:$4 sm:$0xff]   ;;  %v3896_v20 = vld [vmem:[%s5011_s0 + $0x1c4] ss:$8 sps:$4 sm:$0xff]  }
  0x38   :  { %1030 = vmatprep.subr.bf16.mxu0 %v3996_v0  ;;  %1395 = vmatprep.subr.bf16.mxu1 %v3996_v0 }
  0x3a   :  { %1031 = vmatpush1.bf16.msra.mxu0 %v4061_v2  ;;  %1396 = vmatpush1.bf16.msra.mxu1 %v4061_v2  ;;  %v3269_v2 = vcombine.high %v3243_v62, %v3243_v62 }
  0x3b   :  { %1032 = vmatprep.subr.bf16.mxu0 %v3996_v0  ;;  %1397 = vmatprep.subr.bf16.mxu1 %v3996_v0 }
  0x3d   :  { %364 = vmatmul.mubr.bf16.gmra.mrb[4].mxu0 %v3812_v21  ;;  %704 = vmatmul.mubr.bf16.gmra.mrb[4].mxu1 %v3813_v22  ;;  %v3899_v21 = vld [vmem:[%s5011_s0 + $0x28c] ss:$8 sps:$4 sm:$0xff]   ;;  %v3898_v22 = vld [vmem:[%s5011_s0 + $0x1c0] ss:$8 sps:$4 sm:$0xff]  }
  0x3e   :  { %3208 = vmatprep.mubr.msk.bf16.mxu0 %vm279_vm0, %v3814_v23  ;;  %3272 = vmatprep.mubr.msk.bf16.mxu1 %vm279_vm0, %v3816_v24  ;;  %v3901_v23 = vld [vmem:[%s5011_s0 + $0x288] ss:$8 sps:$4 sm:$0xff]   ;;  %v3902_v24 = vld [vmem:[%s5011_s0 + $0x1d4] ss:$8 sps:$4 sm:$0xff]  }
  0x3f   :  { %1033 = vmatpush1.bf16.msra.mxu0 %v4070_v3  ;;  %1398 = vmatpush1.bf16.msra.mxu1 %v4070_v3  ;;  %v3191_v3 = vcombine.low %v83_v61, %v83_v61 }
  0x40   :  { %1034 = vmatprep.subr.bf16.mxu0 %v3996_v0  ;;  %1399 = vmatprep.subr.bf16.mxu1 %v3996_v0 }
  0x43   :  { %1035 = vmatpush1.bf16.msra.mxu0 %v4079_v4  ;;  %1400 = vmatpush1.bf16.msra.mxu1 %v4079_v4  ;;  %v3268_v4 = vcombine.low %v3243_v62, %v3243_v62  ;;  %v4587_v62 = vld [vmem:[%s5013_s2] ss:$0 sm:$0xff] }
  0x44   :  { %1036 = vmatprep.subr.bf16.mxu0 %v3996_v0  ;;  %1401 = vmatprep.subr.bf16.mxu1 %v3996_v0 }
  0x45   :  { %372 = vmatmul.mubr.bf16.gmra.mrb[8].mxu0 %v3818_v25  ;;  %712 = vmatmul.mubr.bf16.gmra.mrb[8].mxu1 %v3819_v26  ;;  %v3905_v25 = vld [vmem:[%s5011_s0 + $0x29c] ss:$8 sps:$4 sm:$0xff]   ;;  %v3904_v26 = vld [vmem:[%s5011_s0 + $0x1d0] ss:$8 sps:$4 sm:$0xff]  }
  0x46   :  { %3209 = vmatprep.mubr.msk.bf16.mxu0 %vm279_vm0, %v3820_v27  ;;  %3273 = vmatprep.mubr.msk.bf16.mxu1 %vm279_vm0, %v3822_v28  ;;  %v3907_v27 = vld [vmem:[%s5011_s0 + $0x298] ss:$8 sps:$4 sm:$0xff]   ;;  %v3908_v28 = vld [vmem:[%s5011_s0 + $0x1e4] ss:$8 sps:$4 sm:$0xff]  }
  0x47   :  { %1037 = vmatpush1.bf16.msra.mxu0 %v4091_v6  ;;  %1402 = vmatpush1.bf16.msra.mxu1 %v4091_v6  ;;  %v3883_v6 = vld [vmem:[%s5011_s0 + $0x25c] ss:$8 sps:$4 sm:$0xff]  }
  0x48   :  { %1038 = vmatprep.subr.bf16.mxu0 %v3996_v0  ;;  %1403 = vmatprep.subr.bf16.mxu1 %v3996_v0 }
  0x4b   :  { %1039 = vmatpush1.bf16.msra.mxu0 %v4105_v8  ;;  %1404 = vmatpush1.bf16.msra.mxu1 %v4105_v8  ;;  %v3881_v8 = vld [vmem:[%s5011_s0 + $0x258] ss:$8 sps:$4 sm:$0xff]  }
  0x4c   :  { %1040 = vmatprep.subr.bf16.mxu0 %v3996_v0  ;;  %1405 = vmatprep.subr.bf16.mxu1 %v3996_v0 }
  0x4d   :  { %380 = vmatmul.mubr.bf16.gmra.mrb[12].mxu0 %v3824_v29  ;;  %720 = vmatmul.mubr.bf16.gmra.mrb[12].mxu1 %v3825_v30  ;;  %v3911_v29 = vld [vmem:[%s5011_s0 + $0x2ac] ss:$8 sps:$4 sm:$0xff]   ;;  %v3910_v30 = vld [vmem:[%s5011_s0 + $0x1e0] ss:$8 sps:$4 sm:$0xff]  }
  0x4e   :  { %3210 = vmatprep.mubr.msk.bf16.mxu0 %vm279_vm0, %v3826_v31  ;;  %3274 = vmatprep.mubr.msk.bf16.mxu1 %vm279_vm0, %v3828_v32  ;;  %v3913_v31 = vld [vmem:[%s5011_s0 + $0x2a8] ss:$8 sps:$4 sm:$0xff]   ;;  %v3914_v32 = vld [vmem:[%s5011_s0 + $0x1f4] ss:$8 sps:$4 sm:$0xff]  }
  0x4f   :  { %1041 = vmatpush1.bf16.msra.mxu0 %v4114_v9  ;;  %1406 = vmatpush1.bf16.msra.mxu1 %v4114_v9  ;;  %v3884_v9 = vld [vmem:[%s5011_s0 + $0x1a4] ss:$8 sps:$4 sm:$0xff]  }
  0x50   :  { %1042 = vmatprep.subr.bf16.mxu0 %v3996_v0  ;;  %1407 = vmatprep.subr.bf16.mxu1 %v3996_v0 }
  0x53   :  { %1043 = vmatpush1.bf16.msra.mxu0 %v4123_v10  ;;  %1408 = vmatpush1.bf16.msra.mxu1 %v4123_v10  ;;  %v3887_v10 = vld [vmem:[%s5011_s0 + $0x26c] ss:$8 sps:$4 sm:$0xff]  }
  0x54   :  { %1044 = vmatprep.subr.bf16.mxu0 %v3996_v0  ;;  %1409 = vmatprep.subr.bf16.mxu1 %v3996_v0 }
  0x55   :  { %388 = vmatmul.mubr.bf16.gmra.mrb[16].mxu0 %v3830_v33  ;;  %728 = vmatmul.mubr.bf16.gmra.mrb[16].mxu1 %v3831_v34  ;;  %v3917_v33 = vld [vmem:[%s5011_s0 + $0x2bc] ss:$8 sps:$4 sm:$0xff]   ;;  %v3916_v34 = vld [vmem:[%s5011_s0 + $0x1f0] ss:$8 sps:$4 sm:$0xff]  }
  0x56   :  { %3211 = vmatprep.mubr.msk.bf16.mxu0 %vm279_vm0, %v3832_v35  ;;  %3275 = vmatprep.mubr.msk.bf16.mxu1 %vm279_vm0, %v3834_v36  ;;  %v3919_v35 = vld [vmem:[%s5011_s0 + $0x2b8] ss:$8 sps:$4 sm:$0xff]   ;;  %v3920_v36 = vld [vmem:[%s5011_s0 + $0x204] ss:$8 sps:$4 sm:$0xff]  }
  0x57   :  { %1045 = vmatpush1.bf16.msra.mxu0 %v4132_v11  ;;  %1410 = vmatpush1.bf16.msra.mxu1 %v4132_v11  ;;  %v3997_v11 = vmov 0.0  }
  0x58   :  { %1046 = vmatprep.subr.bf16.mxu0 %v3996_v0  ;;  %1411 = vmatprep.subr.bf16.mxu1 %v3996_v0 }
  0x5b   :  { %1047 = vmatpush1.bf16.msra.mxu0 %v4141_v12  ;;  %1412 = vmatpush1.bf16.msra.mxu1 %v4141_v12  ;;  %v3954_v12 = vld [vmem:[%s5012_s3 + $0x8] sm:$0xff]  }
  0x5c   :  { %1048 = vmatprep.subr.bf16.mxu0 %v3996_v0  ;;  %1413 = vmatprep.subr.bf16.mxu1 %v3996_v0 }
  0x5d   :  { %396 = vmatmul.mubr.bf16.gmra.mrb[20].mxu0 %v3836_v37  ;;  %736 = vmatmul.mubr.bf16.gmra.mrb[20].mxu1 %v3837_v38  ;;  %v3923_v37 = vld [vmem:[%s5011_s0 + $0x2cc] ss:$8 sps:$4 sm:$0xff]   ;;  %v3922_v38 = vld [vmem:[%s5011_s0 + $0x200] ss:$8 sps:$4 sm:$0xff]  }
  0x5e   :  { %3212 = vmatprep.mubr.msk.bf16.mxu0 %vm279_vm0, %v3838_v39  ;;  %3276 = vmatprep.mubr.msk.bf16.mxu1 %vm279_vm0, %v3840_v40  ;;  %v3925_v39 = vld [vmem:[%s5011_s0 + $0x2c8] ss:$8 sps:$4 sm:$0xff]   ;;  %v3926_v40 = vld [vmem:[%s5011_s0 + $0x214] ss:$8 sps:$4 sm:$0xff]  }
  0x5f   :  { %1049 = vmatpush1.bf16.msra.mxu0 %v4150_v13  ;;  %1414 = vmatpush1.bf16.msra.mxu1 %v4150_v13  ;;  %v3886_v13 = vld [vmem:[%s5011_s0 + $0x1a0] ss:$8 sps:$4 sm:$0xff]  }
  0x60   :  { %1050 = vmatprep.subr.bf16.mxu0 %v3996_v0  ;;  %1415 = vmatprep.subr.bf16.mxu1 %v3996_v0 }
  0x63   :  { %1051 = vmatpush1.bf16.msra.mxu0 %v4159_v14  ;;  %1416 = vmatpush1.bf16.msra.mxu1 %v4159_v14  ;;  %v3889_v14 = vld [vmem:[%s5011_s0 + $0x268] ss:$8 sps:$4 sm:$0xff]  }
  0x64   :  { %1052 = vmatprep.subr.bf16.mxu0 %v3996_v0  ;;  %1417 = vmatprep.subr.bf16.mxu1 %v3996_v0  ;;  %v3873_v0 = vld [vmem:[%s5011_s0 + $0x178] ss:$8 sps:$4 sm:$0xff]  }
  0x65   :  { %404 = vmatmul.mubr.bf16.gmra.mrb[24].mxu0 %v3842_v41  ;;  %744 = vmatmul.mubr.bf16.gmra.mrb[24].mxu1 %v3843_v42  ;;  %v3929_v41 = vld [vmem:[%s5011_s0 + $0x2dc] ss:$8 sps:$4 sm:$0xff]   ;;  %v3928_v42 = vld [vmem:[%s5011_s0 + $0x210] ss:$8 sps:$4 sm:$0xff]  }
  0x66   :  { %3213 = vmatprep.mubr.msk.bf16.mxu0 %vm279_vm0, %v3844_v43  ;;  %3277 = vmatprep.mubr.msk.bf16.mxu1 %vm279_vm0, %v3846_v44  ;;  %v3931_v43 = vld [vmem:[%s5011_s0 + $0x2d8] ss:$8 sps:$4 sm:$0xff]   ;;  %v3932_v44 = vld [vmem:[%s5011_s0 + $0x224] ss:$8 sps:$4 sm:$0xff]  }
  0x67   :  { %1053 = vmatpush1.bf16.msra.mxu0 %v4170_v16  ;;  %1418 = vmatpush1.bf16.msra.mxu1 %v4170_v16  ;;  %v3890_v16 = vld [vmem:[%s5011_s0 + $0x1b4] ss:$8 sps:$4 sm:$0xff]  }
  0x68   :  { %3596 = vmatprep.subr.bf16.mxu0 %v3997_v11  ;;  %3602 = vmatprep.subr.bf16.mxu1 %v3997_v11 }
  0x6d   :  { %412 = vmatmul.mubr.bf16.gmra.mrb[28].mxu0 %v3848_v45  ;;  %752 = vmatmul.mubr.bf16.gmra.mrb[28].mxu1 %v3849_v46  ;;  %v3935_v45 = vld [vmem:[%s5011_s0 + $0x2ec] ss:$8 sps:$4 sm:$0xff]   ;;  %v3934_v46 = vld [vmem:[%s5011_s0 + $0x220] ss:$8 sps:$4 sm:$0xff]  }
  0x6e   :  { %3214 = vmatprep.mubr.msk.bf16.mxu0 %vm279_vm0, %v3850_v47  ;;  %3278 = vmatprep.mubr.msk.bf16.mxu1 %vm279_vm0, %v3852_v48  ;;  %v3937_v47 = vld [vmem:[%s5011_s0 + $0x2e8] ss:$8 sps:$4 sm:$0xff]   ;;  %v3938_v48 = vld [vmem:[%s5011_s0 + $0x234] ss:$8 sps:$4 sm:$0xff]  }
  0x75   :  { %420 = vmatmul.mubr.bf16.gmra.mrb[32].mxu0 %v3854_v49  ;;  %760 = vmatmul.mubr.bf16.gmra.mrb[32].mxu1 %v3855_v50  ;;  %v3941_v49 = vld [vmem:[%s5011_s0 + $0x2fc] ss:$8 sps:$4 sm:$0xff]   ;;  %v3940_v50 = vld [vmem:[%s5011_s0 + $0x230] ss:$8 sps:$4 sm:$0xff]  }
  0x76   :  { %3215 = vmatprep.mubr.msk.bf16.mxu0 %vm279_vm0, %v3856_v51  ;;  %3279 = vmatprep.mubr.msk.bf16.mxu1 %vm279_vm0, %v3858_v52  ;;  %v3943_v51 = vld [vmem:[%s5011_s0 + $0x2f8] ss:$8 sps:$4 sm:$0xff]   ;;  %v3944_v52 = vld [vmem:[%s5011_s0 + $0x244] ss:$8 sps:$4 sm:$0xff]  }
  0x7d   :  { %428 = vmatmul.mubr.bf16.gmra.mrb[36].mxu0 %v3860_v53  ;;  %768 = vmatmul.mubr.bf16.gmra.mrb[36].mxu1 %v3861_v54  ;;  %v3947_v53 = vld [vmem:[%s5011_s0 + $0x30c] ss:$8 sps:$4 sm:$0xff]  }
  0x7e   :  { %3216 = vmatprep.mubr.msk.bf16.mxu0 %vm279_vm0, %v3862_v55  ;;  %3280 = vmatprep.mubr.msk.bf16.mxu1 %vm279_vm0, %v3864_v56  ;;  %v3307_v54 = vld [vmem:[%s5011_s0 + $0x250] sm:$0xff]  ;;  %v3371_v55 = vld [vmem:[%s5011_s0 + $0x318] sm:$0xff]  ;;  %v3946_v56 = vld [vmem:[%s5011_s0 + $0x240] ss:$8 sps:$4 sm:$0xff]  }
  0x7f   :  { %v3396_v61 = vcombine.low %v3371_v55, %v3371_v55 }
  0x85   :  { %436 = vmatmul.mubr.bf16.gmra.mrb[40].mxu0 %v3866_v57  ;;  %776 = vmatmul.mubr.bf16.gmra.mrb[40].mxu1 %v3867_v58  ;;  %v3949_v57 = vld [vmem:[%s5011_s0 + $0x308] ss:$8 sps:$4 sm:$0xff]   ;;  %v3333_v58 = vcombine.high %v3307_v54, %v3307_v54 }
  0x86   :  { %3217 = vmatprep.mubr.msk.bf16.mxu0 %vm279_vm0, %v3868_v59  ;;  %3281 = vmatprep.mubr.msk.bf16.mxu1 %vm279_vm0, %v3870_v60  ;;  %v3397_v59 = vcombine.high %v3371_v55, %v3371_v55  ;;  %v3332_v60 = vcombine.low %v3307_v54, %v3307_v54 }
  0x8d   :  { %444 = vmatmul.mubr.bf16.gmra.mrb[44].mxu0 %v3872_v63  ;;  %784 = vmatmul.mubr.bf16.gmra.mrb[44].mxu1 %v3873_v0 }
  0x8e   :  { %3218 = vmatprep.mubr.msk.bf16.mxu0 %vm279_vm0, %v3192_v1  ;;  %3282 = vmatprep.mubr.msk.bf16.mxu1 %vm279_vm0, %v3269_v2 }
  0x95   :  { %452 = vmatmul.mubr.bf16.gmra.mrb[48].mxu0 %v3191_v3  ;;  %792 = vmatmul.mubr.bf16.gmra.mrb[48].mxu1 %v3268_v4 }
  0x96   :  { %3334 = vmatprep.mubr.msk.bf16.mxu0 %vm279_vm0, %v3880_v5  ;;  %3398 = vmatprep.mubr.msk.bf16.mxu1 %vm279_vm0, %v3883_v6 }
  0x9d   :  { %1061 = vmatmul.mubr.bf16.vlgmr.msra.gmra.mrb[52].mxu0 %v3878_v7  ;;  %1426 = vmatmul.mubr.bf16.vlgmr.msra.gmra.mrb[52].mxu1 %v3881_v8 }
  0x9e   :  { %3335 = vmatprep.mubr.msk.bf16.mxu0 %vm279_vm0, %v3884_v9  ;;  %3399 = vmatprep.mubr.msk.bf16.mxu1 %vm279_vm0, %v3887_v10 }
  0x9f   :  { %3597 = vmatpush3.bf16.msra.mxu0 %v3954_v12  ;;  %3603 = vmatpush3.bf16.msra.mxu1 %v3955_v15 }
  0xa0   :  { %3608 = vmatprep.subr.bf16.mxu0 %v3997_v11  ;;  %3614 = vmatprep.subr.bf16.mxu1 %v3997_v11 }
  0xa5   :  { %1069 = vmatmul.mubr.bf16.gmra.mrb[56].mxu0 %v3886_v13  ;;  %1434 = vmatmul.mubr.bf16.gmra.mrb[56].mxu1 %v3889_v14 }
  0xa6   :  { %3336 = vmatprep.mubr.msk.bf16.mxu0 %vm279_vm0, %v3890_v16  ;;  %3400 = vmatprep.mubr.msk.bf16.mxu1 %vm279_vm0, %v3893_v17 }
  0xad   :  { %1077 = vmatmul.mubr.bf16.gmra.mrb[60].mxu0 %v3892_v18  ;;  %1442 = vmatmul.mubr.bf16.gmra.mrb[60].mxu1 %v3895_v19 }
  0xae   :  { %3337 = vmatprep.mubr.msk.bf16.mxu0 %vm279_vm0, %v3896_v20  ;;  %3401 = vmatprep.mubr.msk.bf16.mxu1 %vm279_vm0, %v3899_v21 }
  0xb5   :  { %1085 = vmatmul.mubr.bf16.gmra.mrb[64].mxu0 %v3898_v22  ;;  %1450 = vmatmul.mubr.bf16.gmra.mrb[64].mxu1 %v3901_v23 }
  0xb6   :  { %3338 = vmatprep.mubr.msk.bf16.mxu0 %vm279_vm0, %v3902_v24  ;;  %3402 = vmatprep.mubr.msk.bf16.mxu1 %vm279_vm0, %v3905_v25 }
  0xbd   :  { %1093 = vmatmul.mubr.bf16.gmra.mrb[68].mxu0 %v3904_v26  ;;  %1458 = vmatmul.mubr.bf16.gmra.mrb[68].mxu1 %v3907_v27 }
  0xbe   :  { %3339 = vmatprep.mubr.msk.bf16.mxu0 %vm279_vm0, %v3908_v28  ;;  %3403 = vmatprep.mubr.msk.bf16.mxu1 %vm279_vm0, %v3911_v29 }
  0xc5   :  { %1101 = vmatmul.mubr.bf16.gmra.mrb[72].mxu0 %v3910_v30  ;;  %1466 = vmatmul.mubr.bf16.gmra.mrb[72].mxu1 %v3913_v31 }
  0xc6   :  { %3340 = vmatprep.mubr.msk.bf16.mxu0 %vm279_vm0, %v3914_v32  ;;  %3404 = vmatprep.mubr.msk.bf16.mxu1 %vm279_vm0, %v3917_v33 }
  0xcd   :  { %1109 = vmatmul.mubr.bf16.gmra.mrb[76].mxu0 %v3916_v34  ;;  %1474 = vmatmul.mubr.bf16.gmra.mrb[76].mxu1 %v3919_v35 }
  0xce   :  { %3341 = vmatprep.mubr.msk.bf16.mxu0 %vm279_vm0, %v3920_v36  ;;  %3405 = vmatprep.mubr.msk.bf16.mxu1 %vm279_vm0, %v3923_v37 }
  0xd5   :  { %1117 = vmatmul.mubr.bf16.gmra.mrb[80].mxu0 %v3922_v38  ;;  %1482 = vmatmul.mubr.bf16.gmra.mrb[80].mxu1 %v3925_v39 }
  0xd6   :  { %3342 = vmatprep.mubr.msk.bf16.mxu0 %vm279_vm0, %v3926_v40  ;;  %3406 = vmatprep.mubr.msk.bf16.mxu1 %vm279_vm0, %v3929_v41 }
  0xdd   :  { %1125 = vmatmul.mubr.bf16.gmra.mrb[84].mxu0 %v3928_v42  ;;  %1490 = vmatmul.mubr.bf16.gmra.mrb[84].mxu1 %v3931_v43 }
  0xde   :  { %3343 = vmatprep.mubr.msk.bf16.mxu0 %vm279_vm0, %v3932_v44  ;;  %3407 = vmatprep.mubr.msk.bf16.mxu1 %vm279_vm0, %v3935_v45 }
  0xe5   :  { %1133 = vmatmul.mubr.bf16.gmra.mrb[88].mxu0 %v3934_v46  ;;  %1498 = vmatmul.mubr.bf16.gmra.mrb[88].mxu1 %v3937_v47 }
  0xe6   :  { %3344 = vmatprep.mubr.msk.bf16.mxu0 %vm279_vm0, %v3938_v48  ;;  %3408 = vmatprep.mubr.msk.bf16.mxu1 %vm279_vm0, %v3941_v49 }
  0xed   :  { %1141 = vmatmul.mubr.bf16.gmra.mrb[92].mxu0 %v3940_v50  ;;  %1506 = vmatmul.mubr.bf16.gmra.mrb[92].mxu1 %v3943_v51 }
  0xee   :  { %3345 = vmatprep.mubr.msk.bf16.mxu0 %vm279_vm0, %v3944_v52  ;;  %3409 = vmatprep.mubr.msk.bf16.mxu1 %vm279_vm0, %v3947_v53 }
  0xf5   :  { %1149 = vmatmul.mubr.bf16.gmra.mrb[96].mxu0 %v3946_v56  ;;  %1514 = vmatmul.mubr.bf16.gmra.mrb[96].mxu1 %v3949_v57 }
  0xf6   :  { %3346 = vmatprep.mubr.msk.bf16.mxu0 %vm279_vm0, %v3333_v58  ;;  %3410 = vmatprep.mubr.msk.bf16.mxu1 %vm279_vm0, %v3397_v59 }
  0xfd   :  { %1157 = vmatmul.mubr.bf16.gmra.mrb[100].mxu0 %v3332_v60  ;;  %1522 = vmatmul.mubr.bf16.gmra.mrb[100].mxu1 %v3396_v61 }
  0xfe   :  { %3604 = vmatprep.mubr.msk.bf16.mxu1 %vm3998_vm2, %v3997_v11  ;;  %3598 = vmatprep.mubr.msk.bf16.mxu0 %vm3998_vm2, %v3997_v11 }
 0x108   :  { %v357_v63 = vpop.f32.mrb[0].mxu0  ;;  %v697_v0 = vpop.f32.mrb[0].mxu1 }
 0x109   :  { %v358_v1 = vadd.f32 %v4587_v62, %v357_v63  ;;  %v698_v2 = vadd.f32 %v4587_v62, %v697_v0  ;;  %v359_v3 = vpop.f32.mrb[1].mxu0  ;;  %v699_v4 = vpop.f32.mrb[1].mxu1 }
 0x10a   :  { %v360_v5 = vpop.f32.mrb[2].mxu0  ;;  %v700_v6 = vpop.f32.mrb[2].mxu1 }
 0x10b   :  { %v459_v7 = vmax.f32 %v358_v1, 0.0  ;;  %v799_v8 = vmax.f32 %v698_v2, 0.0  ;;  %v361_v9 = vadd.f32 %v4587_v62, %v360_v5  ;;  %v701_v10 = vadd.f32 %v4587_v62, %v700_v6  ;;  %v362_v12 = vpop.f32.mrb[3].mxu0  ;;  %v702_v13 = vpop.f32.mrb[3].mxu1 }
 0x10d   :  { %v4593_v14 = vmax.f32 %v459_v7, %v799_v8  ;;  %v460_v15 = vmax.f32 %v361_v9, 0.0  ;;  %v800_v16 = vmax.f32 %v701_v10, 0.0 }
 0x10f   :  { %v4595_v17 = vmax.f32 %v460_v15, %v800_v16 }
 0x110   :  { %v365_v18 = vpop.f32.mrb[4].mxu0  ;;  %v705_v19 = vpop.f32.mrb[4].mxu1 }
 0x111   :  { %v366_v20 = vadd.f32 %v4587_v62, %v365_v18  ;;  %v706_v21 = vadd.f32 %v4587_v62, %v705_v19  ;;  %v367_v22 = vpop.f32.mrb[5].mxu0  ;;  %v707_v23 = vpop.f32.mrb[5].mxu1 }
 0x112   :  { %v368_v24 = vpop.f32.mrb[6].mxu0  ;;  %v708_v25 = vpop.f32.mrb[6].mxu1 }
 0x113   :  { %v461_v26 = vmax.f32 %v366_v20, 0.0  ;;  %v801_v27 = vmax.f32 %v706_v21, 0.0  ;;  %v369_v28 = vadd.f32 %v4587_v62, %v368_v24  ;;  %v709_v29 = vadd.f32 %v4587_v62, %v708_v25  ;;  %v370_v30 = vpop.f32.mrb[7].mxu0  ;;  %v710_v31 = vpop.f32.mrb[7].mxu1 }
 0x115   :  { %v4601_v32 = vmax.f32 %v461_v26, %v801_v27  ;;  %v462_v33 = vmax.f32 %v369_v28, 0.0  ;;  %v802_v34 = vmax.f32 %v709_v29, 0.0 }
 0x117   :  { %v4603_v35 = vmax.f32 %v462_v33, %v802_v34 }
 0x118   :  { %v373_v36 = vpop.f32.mrb[8].mxu0  ;;  %v713_v37 = vpop.f32.mrb[8].mxu1 }
 0x119   :  { %v374_v38 = vadd.f32 %v4587_v62, %v373_v36  ;;  %v714_v39 = vadd.f32 %v4587_v62, %v713_v37  ;;  %v375_v40 = vpop.f32.mrb[9].mxu0  ;;  %v715_v41 = vpop.f32.mrb[9].mxu1 }
 0x11a   :  { %v376_v42 = vpop.f32.mrb[10].mxu0  ;;  %v716_v43 = vpop.f32.mrb[10].mxu1 }
 0x11b   :  { %v463_v44 = vmax.f32 %v374_v38, 0.0  ;;  %v803_v45 = vmax.f32 %v714_v39, 0.0  ;;  %v377_v46 = vadd.f32 %v4587_v62, %v376_v42  ;;  %v717_v47 = vadd.f32 %v4587_v62, %v716_v43  ;;  %v378_v48 = vpop.f32.mrb[11].mxu0  ;;  %v718_v49 = vpop.f32.mrb[11].mxu1 }
 0x11d   :  { %v4609_v50 = vmax.f32 %v463_v44, %v803_v45  ;;  %v464_v51 = vmax.f32 %v377_v46, 0.0  ;;  %v804_v52 = vmax.f32 %v717_v47, 0.0 }
 0x11f   :  { %v4611_v53 = vmax.f32 %v464_v51, %v804_v52 }
 0x120   :  { %v381_v54 = vpop.f32.mrb[12].mxu0  ;;  %v721_v55 = vpop.f32.mrb[12].mxu1 }
 0x121   :  { %v382_v56 = vadd.f32 %v4587_v62, %v381_v54  ;;  %v722_v57 = vadd.f32 %v4587_v62, %v721_v55  ;;  %v383_v58 = vpop.f32.mrb[13].mxu0  ;;  %v723_v59 = vpop.f32.mrb[13].mxu1 }
 0x122   :  { %v384_v60 = vpop.f32.mrb[14].mxu0  ;;  %v724_v61 = vpop.f32.mrb[14].mxu1 }
 0x123   :  { %v465_v63 = vmax.f32 %v382_v56, 0.0  ;;  %v805_v0 = vmax.f32 %v722_v57, 0.0  ;;  %v385_v1 = vadd.f32 %v4587_v62, %v384_v60  ;;  %v725_v2 = vadd.f32 %v4587_v62, %v724_v61  ;;  %v386_v3 = vpop.f32.mrb[15].mxu0  ;;  %v726_v4 = vpop.f32.mrb[15].mxu1 }
 0x125   :  { %v4617_v5 = vmax.f32 %v465_v63, %v805_v0  ;;  %v466_v6 = vmax.f32 %v385_v1, 0.0  ;;  %v806_v7 = vmax.f32 %v725_v2, 0.0 }
 0x127   :  { %v4619_v8 = vmax.f32 %v466_v6, %v806_v7 }
 0x128   :  { %v389_v9 = vpop.f32.mrb[16].mxu0  ;;  %v729_v10 = vpop.f32.mrb[16].mxu1 }
 0x129   :  { %v390_v12 = vadd.f32 %v4587_v62, %v389_v9  ;;  %v730_v13 = vadd.f32 %v4587_v62, %v729_v10  ;;  %v391_v15 = vpop.f32.mrb[17].mxu0  ;;  %v731_v16 = vpop.f32.mrb[17].mxu1 }
 0x12a   :  { %v392_v18 = vpop.f32.mrb[18].mxu0  ;;  %v732_v19 = vpop.f32.mrb[18].mxu1 }
 0x12b   :  { %v467_v20 = vmax.f32 %v390_v12, 0.0  ;;  %v807_v21 = vmax.f32 %v730_v13, 0.0  ;;  %v393_v22 = vadd.f32 %v4587_v62, %v392_v18  ;;  %v733_v23 = vadd.f32 %v4587_v62, %v732_v19  ;;  %v394_v24 = vpop.f32.mrb[19].mxu0  ;;  %v734_v25 = vpop.f32.mrb[19].mxu1 }
 0x12d   :  { %v4625_v26 = vmax.f32 %v467_v20, %v807_v21  ;;  %v468_v27 = vmax.f32 %v393_v22, 0.0  ;;  %v808_v28 = vmax.f32 %v733_v23, 0.0 }
 0x12f   :  { %v4627_v29 = vmax.f32 %v468_v27, %v808_v28 }
 0x130   :  { %v397_v30 = vpop.f32.mrb[20].mxu0  ;;  %v737_v31 = vpop.f32.mrb[20].mxu1 }
 0x131   :  { %v398_v33 = vadd.f32 %v4587_v62, %v397_v30  ;;  %v738_v34 = vadd.f32 %v4587_v62, %v737_v31  ;;  %v399_v36 = vpop.f32.mrb[21].mxu0  ;;  %v739_v37 = vpop.f32.mrb[21].mxu1 }
 0x132   :  { %v400_v38 = vpop.f32.mrb[22].mxu0  ;;  %v740_v39 = vpop.f32.mrb[22].mxu1 }
 0x133   :  { %v469_v40 = vmax.f32 %v398_v33, 0.0  ;;  %v809_v41 = vmax.f32 %v738_v34, 0.0  ;;  %v401_v42 = vadd.f32 %v4587_v62, %v400_v38  ;;  %v741_v43 = vadd.f32 %v4587_v62, %v740_v39  ;;  %v402_v44 = vpop.f32.mrb[23].mxu0  ;;  %v742_v45 = vpop.f32.mrb[23].mxu1 }
 0x135   :  { %v4633_v46 = vmax.f32 %v469_v40, %v809_v41  ;;  %v470_v47 = vmax.f32 %v401_v42, 0.0  ;;  %v810_v48 = vmax.f32 %v741_v43, 0.0 }
 0x137   :  { %v4635_v49 = vmax.f32 %v470_v47, %v810_v48 }
 0x138   :  { %v405_v51 = vpop.f32.mrb[24].mxu0  ;;  %v745_v52 = vpop.f32.mrb[24].mxu1 }
 0x139   :  { %v406_v54 = vadd.f32 %v4587_v62, %v405_v51  ;;  %v746_v55 = vadd.f32 %v4587_v62, %v745_v52  ;;  %v407_v56 = vpop.f32.mrb[25].mxu0  ;;  %v747_v57 = vpop.f32.mrb[25].mxu1 }
 0x13a   :  { %v408_v58 = vpop.f32.mrb[26].mxu0  ;;  %v748_v59 = vpop.f32.mrb[26].mxu1 }
 0x13b   :  { %v471_v60 = vmax.f32 %v406_v54, 0.0  ;;  %v811_v61 = vmax.f32 %v746_v55, 0.0  ;;  %v409_v63 = vadd.f32 %v4587_v62, %v408_v58  ;;  %v749_v0 = vadd.f32 %v4587_v62, %v748_v59  ;;  %v410_v1 = vpop.f32.mrb[27].mxu0  ;;  %v750_v2 = vpop.f32.mrb[27].mxu1 }
 0x13d   :  { %v4641_v3 = vmax.f32 %v471_v60, %v811_v61  ;;  %v472_v4 = vmax.f32 %v409_v63, 0.0  ;;  %v812_v6 = vmax.f32 %v749_v0, 0.0 }
 0x13f   :  { %v4643_v7 = vmax.f32 %v472_v4, %v812_v6 }
 0x140   :  { %v413_v9 = vpop.f32.mrb[28].mxu0  ;;  %v753_v10 = vpop.f32.mrb[28].mxu1 }
 0x141   :  { %v414_v12 = vadd.f32 %v4587_v62, %v413_v9  ;;  %v754_v13 = vadd.f32 %v4587_v62, %v753_v10  ;;  %v415_v15 = vpop.f32.mrb[29].mxu0  ;;  %v755_v16 = vpop.f32.mrb[29].mxu1 }
 0x142   :  { %v416_v18 = vpop.f32.mrb[30].mxu0  ;;  %v756_v19 = vpop.f32.mrb[30].mxu1 }
 0x143   :  { %v473_v20 = vmax.f32 %v414_v12, 0.0  ;;  %v813_v21 = vmax.f32 %v754_v13, 0.0  ;;  %v417_v22 = vadd.f32 %v4587_v62, %v416_v18  ;;  %v757_v23 = vadd.f32 %v4587_v62, %v756_v19  ;;  %v418_v24 = vpop.f32.mrb[31].mxu0  ;;  %v758_v25 = vpop.f32.mrb[31].mxu1 }
 0x145   :  { %v4649_v27 = vmax.f32 %v473_v20, %v813_v21  ;;  %v474_v28 = vmax.f32 %v417_v22, 0.0  ;;  %v814_v30 = vmax.f32 %v757_v23, 0.0 }
 0x147   :  { %v4651_v31 = vmax.f32 %v474_v28, %v814_v30 }
 0x148   :  { %v421_v33 = vpop.f32.mrb[32].mxu0  ;;  %v761_v34 = vpop.f32.mrb[32].mxu1 }
 0x149   :  { %v422_v36 = vadd.f32 %v4587_v62, %v421_v33  ;;  %v762_v37 = vadd.f32 %v4587_v62, %v761_v34  ;;  %v423_v38 = vpop.f32.mrb[33].mxu0  ;;  %v763_v39 = vpop.f32.mrb[33].mxu1 }
 0x14a   :  { %v424_v40 = vpop.f32.mrb[34].mxu0  ;;  %v764_v41 = vpop.f32.mrb[34].mxu1 }
 0x14b   :  { %v475_v42 = vmax.f32 %v422_v36, 0.0  ;;  %v815_v43 = vmax.f32 %v762_v37, 0.0  ;;  %v425_v44 = vadd.f32 %v4587_v62, %v424_v40  ;;  %v765_v45 = vadd.f32 %v4587_v62, %v764_v41  ;;  %v426_v47 = vpop.f32.mrb[35].mxu0  ;;  %v766_v48 = vpop.f32.mrb[35].mxu1 }
 0x14d   :  { %v4657_v51 = vmax.f32 %v475_v42, %v815_v43  ;;  %v476_v52 = vmax.f32 %v425_v44, 0.0  ;;  %v816_v54 = vmax.f32 %v765_v45, 0.0 }
 0x14f   :  { %v4659_v55 = vmax.f32 %v476_v52, %v816_v54 }
 0x150   :  { %v429_v56 = vpop.f32.mrb[36].mxu0  ;;  %v769_v57 = vpop.f32.mrb[36].mxu1 }
 0x151   :  { %v430_v58 = vadd.f32 %v4587_v62, %v429_v56  ;;  %v770_v59 = vadd.f32 %v4587_v62, %v769_v57  ;;  %v431_v60 = vpop.f32.mrb[37].mxu0  ;;  %v771_v61 = vpop.f32.mrb[37].mxu1 }
 0x152   :  { %v432_v63 = vpop.f32.mrb[38].mxu0  ;;  %v772_v0 = vpop.f32.mrb[38].mxu1 }
 0x153   :  { %v477_v1 = vmax.f32 %v430_v58, 0.0  ;;  %v817_v2 = vmax.f32 %v770_v59, 0.0  ;;  %v433_v4 = vadd.f32 %v4587_v62, %v432_v63  ;;  %v773_v6 = vadd.f32 %v4587_v62, %v772_v0  ;;  %v434_v9 = vpop.f32.mrb[39].mxu0  ;;  %v774_v10 = vpop.f32.mrb[39].mxu1 }
 0x155   :  { %v4665_v12 = vmax.f32 %v477_v1, %v817_v2  ;;  %v478_v13 = vmax.f32 %v433_v4, 0.0  ;;  %v818_v15 = vmax.f32 %v773_v6, 0.0 }
 0x157   :  { %v4667_v16 = vmax.f32 %v478_v13, %v818_v15 }
 0x158   :  { %v437_v18 = vpop.f32.mrb[40].mxu0  ;;  %v777_v19 = vpop.f32.mrb[40].mxu1 }
 0x159   :  { %v438_v20 = vadd.f32 %v4587_v62, %v437_v18  ;;  %v778_v21 = vadd.f32 %v4587_v62, %v777_v19  ;;  %v439_v22 = vpop.f32.mrb[41].mxu0  ;;  %v779_v23 = vpop.f32.mrb[41].mxu1 }
 0x15a   :  { %v440_v24 = vpop.f32.mrb[42].mxu0  ;;  %v780_v25 = vpop.f32.mrb[42].mxu1 }
 0x15b   :  { %v479_v28 = vmax.f32 %v438_v20, 0.0  ;;  %v819_v30 = vmax.f32 %v778_v21, 0.0  ;;  %v441_v33 = vadd.f32 %v4587_v62, %v440_v24  ;;  %v781_v34 = vadd.f32 %v4587_v62, %v780_v25  ;;  %v442_v36 = vpop.f32.mrb[43].mxu0  ;;  %v782_v37 = vpop.f32.mrb[43].mxu1 }
 0x15d   :  { %v4673_v38 = vmax.f32 %v479_v28, %v819_v30  ;;  %v480_v39 = vmax.f32 %v441_v33, 0.0  ;;  %v820_v40 = vmax.f32 %v781_v34, 0.0 }
 0x15f   :  { %v4675_v41 = vmax.f32 %v480_v39, %v820_v40 }
 0x160   :  { %v445_v42 = vpop.f32.mrb[44].mxu0  ;;  %v785_v43 = vpop.f32.mrb[44].mxu1 }
 0x161   :  { %v446_v44 = vadd.f32 %v4587_v62, %v445_v42  ;;  %v786_v45 = vadd.f32 %v4587_v62, %v785_v43  ;;  %v447_v47 = vpop.f32.mrb[45].mxu0  ;;  %v787_v48 = vpop.f32.mrb[45].mxu1 }
 0x162   :  { %v448_v52 = vpop.f32.mrb[46].mxu0  ;;  %v788_v54 = vpop.f32.mrb[46].mxu1 }
 0x163   :  { %v481_v56 = vmax.f32 %v446_v44, 0.0  ;;  %v821_v57 = vmax.f32 %v786_v45, 0.0  ;;  %v449_v58 = vadd.f32 %v4587_v62, %v448_v52  ;;  %v789_v59 = vadd.f32 %v4587_v62, %v788_v54  ;;  %v450_v60 = vpop.f32.mrb[47].mxu0  ;;  %v790_v61 = vpop.f32.mrb[47].mxu1 }
 0x164   :  { %v3957_v60 = vld [vmem:[%s5012_s3 + $0x18] sm:$0xff]  }
 0x165   :  { %v4681_v63 = vmax.f32 %v481_v56, %v821_v57  ;;  %v482_v0 = vmax.f32 %v449_v58, 0.0  ;;  %v822_v1 = vmax.f32 %v789_v59, 0.0 }
 0x167   :  { %v4683_v2 = vmax.f32 %v482_v0, %v822_v1 }
 0x168   :  { %v453_v4 = vpop.f32.mrb[48].mxu0  ;;  %v793_v6 = vpop.f32.mrb[48].mxu1 }
 0x169   :  { %v454_v9 = vadd.f32 %v4587_v62, %v453_v4  ;;  %v794_v10 = vadd.f32 %v4587_v62, %v793_v6  ;;  %v455_v13 = vpop.f32.mrb[49].mxu0  ;;  %v795_v15 = vpop.f32.mrb[49].mxu1 }
 0x16a   :  { %v456_v18 = vpop.f32.mrb[50].mxu0  ;;  %v796_v19 = vpop.f32.mrb[50].mxu1 }
 0x16b   :  { %v483_v20 = vmax.f32 %v454_v9, 0.0  ;;  %v823_v21 = vmax.f32 %v794_v10, 0.0  ;;  %v457_v22 = vpop.f32.mrb[51].mxu0  ;;  %v797_v23 = vpop.f32.mrb[51].mxu1 }
 0x16d   :  { %v4687_v24 = vmax.f32 %v483_v20, %v823_v21 }
 0x170   :  { %v1062_v25 = vpop.f32.mrb[52].mxu0  ;;  %v1427_v28 = vpop.f32.mrb[52].mxu1 }
 0x171   :  { %v1063_v30 = vadd.f32 %v4587_v62, %v1062_v25  ;;  %v1428_v33 = vadd.f32 %v4587_v62, %v1427_v28  ;;  %v1064_v34 = vpop.f32.mrb[53].mxu0  ;;  %v1429_v36 = vpop.f32.mrb[53].mxu1 }
 0x172   :  { %v1065_v37 = vpop.f32.mrb[54].mxu0  ;;  %v1430_v39 = vpop.f32.mrb[54].mxu1 }
 0x173   :  { %v1164_v40 = vmax.f32 %v1063_v30, 0.0  ;;  %v1529_v42 = vmax.f32 %v1428_v33, 0.0  ;;  %v1066_v43 = vadd.f32 %v4587_v62, %v1065_v37  ;;  %v1431_v44 = vadd.f32 %v4587_v62, %v1430_v39  ;;  %v1067_v45 = vpop.f32.mrb[55].mxu0  ;;  %v1432_v47 = vpop.f32.mrb[55].mxu1 }
 0x174   :  { %v3958_v47 = vld [vmem:[%s5012_s3 + $0x20] sm:$0xff]  }
 0x175   :  { %v1189_v48 = vmax.f32 %v4593_v14, %v1164_v40  ;;  %v1165_v52 = vmax.f32 %v1066_v43, 0.0  ;;  %v1530_v57 = vmax.f32 %v1431_v44, 0.0 }
 0x177   :  { %v1554_v54 = vmax.f32 %v1189_v48, %v1529_v42  ;;  %v1190_v56 = vmax.f32 %v4595_v17, %v1165_v52  ;;  %v3956_v17 = vld [vmem:[%s5012_s3 + $0x10] sm:$0xff]  }
 0x178   :  { %v1070_v58 = vpop.f32.mrb[56].mxu0  ;;  %v1435_v59 = vpop.f32.mrb[56].mxu1 }
 0x179   :  { %v1579_v61 = vpack.c.bf16 %v1554_v54, %v1554_v54  ;;  %v1555_v0 = vmax.f32 %v1190_v56, %v1530_v57  ;;  %v1071_v1 = vadd.f32 %v4587_v62, %v1070_v58  ;;  %v1072_v4 = vpop.f32.mrb[57].mxu0  ;;  %v1436_v6 = vadd.f32 %v4587_v62, %v1435_v59  ;;  %v1437_v14 = vpop.f32.mrb[57].mxu1 }
 0x17a   :  { %v1073_v9 = vpop.f32.mrb[58].mxu0  ;;  %v1438_v10 = vpop.f32.mrb[58].mxu1 }
 0x17b   :  { %v1582_v13 = vpack.c.bf16 %v1555_v0, %v1555_v0  ;;  %v1166_v15 = vmax.f32 %v1071_v1, 0.0  ;;  %v1074_v18 = vadd.f32 %v4587_v62, %v1073_v9  ;;  %v1531_v19 = vmax.f32 %v1436_v6, 0.0  ;;  %v1075_v20 = vpop.f32.mrb[59].mxu0  ;;  %3605 = vmatmul.mubr.msk.bf16.vlgmr.msra.gmra.mrb[104].mxu1 %vm1592_vm3, %v1579_v61  ;;  %v1440_v21 = vpop.f32.mrb[59].mxu1 }
 0x17c   :  { %v1439_v22 = vadd.f32 %v4587_v62, %v1438_v10  ;;  %3615 = vmatpush3.bf16.msra.mxu1 %v3957_v60  ;;  %3616 = vmatprep.mubr.msk.bf16.mxu1 %vm3998_vm2, %v3997_v11  ;;  %v3961_v20 = vld [vmem:[%s5012_s3 + $0x38] sm:$0xff]  }
 0x17d   :  { %v1191_v23 = vmax.f32 %v4601_v32, %v1166_v15  ;;  %v1167_v25 = vmax.f32 %v1074_v18, 0.0  ;;  %3599 = vmatmul.mubr.msk.bf16.vlgmr.msra.gmra.mrb[104].mxu0 %vm1592_vm3, %v1582_v13  ;;  %3626 = vmatprep.subr.bf16.mxu1 %v3997_v11 }
 0x17e   :  { %v1532_v28 = vmax.f32 %v1439_v22, 0.0  ;;  %3609 = vmatpush3.bf16.msra.mxu0 %v3956_v17  ;;  %3610 = vmatprep.mubr.msk.bf16.mxu0 %vm3998_vm2, %v3997_v11 }
 0x17f   :  { %v1192_v30 = vmax.f32 %v4603_v35, %v1167_v25  ;;  %v1556_v33 = vmax.f32 %v1191_v23, %v1531_v19  ;;  %3620 = vmatprep.subr.bf16.mxu0 %v3997_v11  ;;  %v3959_v35 = vld [vmem:[%s5012_s3 + $0x28] sm:$0xff]   ;;  %v3960_v19 = vld [vmem:[%s5012_s3 + $0x30] sm:$0xff]  }
 0x180   :  { %v1078_v34 = vpop.f32.mrb[60].mxu0  ;;  %v1443_v36 = vpop.f32.mrb[60].mxu1 }
 0x181   :  { %v1557_v37 = vmax.f32 %v1192_v30, %v1532_v28  ;;  %v1079_v32 = vadd.f32 %v4587_v62, %v1078_v34  ;;  %v1080_v39 = vpop.f32.mrb[61].mxu0  ;;  %v1444_v40 = vadd.f32 %v4587_v62, %v1443_v36  ;;  %v1445_v42 = vpop.f32.mrb[61].mxu1  ;;  %v1685_v43 = vpack.c.bf16 %v1556_v33, %v1556_v33 }
 0x182   :  { %v1081_v44 = vpop.f32.mrb[62].mxu0  ;;  %v1446_v45 = vpop.f32.mrb[62].mxu1 }
 0x183   :  { %v1739_v48 = vpack.c.bf16 %v1557_v37, %v1557_v37  ;;  %v1168_v52 = vmax.f32 %v1079_v32, 0.0  ;;  %v1082_v54 = vadd.f32 %v4587_v62, %v1081_v44  ;;  %v1533_v56 = vmax.f32 %v1444_v40, 0.0  ;;  %v1083_v57 = vpop.f32.mrb[63].mxu0  ;;  %v1448_v58 = vpop.f32.mrb[63].mxu1 }
 0x184   :  { %v1447_v59 = vadd.f32 %v4587_v62, %v1446_v45 }
 0x185   :  { %v1193_v60 = vmax.f32 %v4609_v50, %v1168_v52  ;;  %v1169_v61 = vmax.f32 %v1082_v54, 0.0  ;;  %3611 = vmatmul.mubr.msk.bf16.vlgmr.msra.gmra.mrb[108].mxu0 %vm1592_vm3, %v1685_v43  ;;  %3617 = vmatmul.mubr.msk.bf16.vlgmr.msra.gmra.mrb[108].mxu1 %vm1592_vm3, %v1739_v48  ;;  %v3962_v52 = vld [vmem:[%s5012_s3 + $0x40] sm:$0xff]   ;;  %v3963_v54 = vld [vmem:[%s5012_s3 + $0x48] sm:$0xff]  }
 0x186   :  { %v1534_v0 = vmax.f32 %v1447_v59, 0.0  ;;  %3621 = vmatpush3.bf16.msra.mxu0 %v3958_v47  ;;  %3627 = vmatpush3.bf16.msra.mxu1 %v3959_v35 }
 0x187   :  { %v1194_v1 = vmax.f32 %v4611_v53, %v1169_v61  ;;  %v1558_v4 = vmax.f32 %v1193_v60, %v1533_v56  ;;  %3622 = vmatprep.mubr.msk.bf16.mxu0 %vm3998_vm2, %v3997_v11  ;;  %3628 = vmatprep.mubr.msk.bf16.mxu1 %vm3998_vm2, %v3997_v11 }
 0x188   :  { %v1086_v6 = vpop.f32.mrb[64].mxu0  ;;  %v1451_v14 = vpop.f32.mrb[64].mxu1  ;;  %3632 = vmatprep.subr.bf16.mxu0 %v3997_v11  ;;  %3638 = vmatprep.subr.bf16.mxu1 %v3997_v11 }
 0x189   :  { %v1559_v50 = vmax.f32 %v1194_v1, %v1534_v0  ;;  %v1087_v9 = vadd.f32 %v4587_v62, %v1086_v6  ;;  %v1088_v10 = vpop.f32.mrb[65].mxu0  ;;  %v1452_v17 = vadd.f32 %v4587_v62, %v1451_v14  ;;  %v1453_v53 = vpop.f32.mrb[65].mxu1  ;;  %v1793_v13 = vpack.c.bf16 %v1558_v4, %v1558_v4 }
 0x18a   :  { %v1089_v15 = vpop.f32.mrb[66].mxu0  ;;  %v1454_v18 = vpop.f32.mrb[66].mxu1 }
 0x18b   :  { %v1847_v21 = vpack.c.bf16 %v1559_v50, %v1559_v50  ;;  %v1170_v22 = vmax.f32 %v1087_v9, 0.0  ;;  %v1090_v23 = vadd.f32 %v4587_v62, %v1089_v15  ;;  %v1535_v25 = vmax.f32 %v1452_v17, 0.0  ;;  %v1091_v28 = vpop.f32.mrb[67].mxu0  ;;  %v1456_v30 = vpop.f32.mrb[67].mxu1 }
 0x18c   :  { %v1455_v33 = vadd.f32 %v4587_v62, %v1454_v18 }
 0x18d   :  { %v1195_v34 = vmax.f32 %v4617_v5, %v1170_v22  ;;  %v1171_v36 = vmax.f32 %v1090_v23, 0.0  ;;  %3623 = vmatmul.mubr.msk.bf16.vlgmr.msra.gmra.mrb[112].mxu0 %vm1592_vm3, %v1793_v13  ;;  %3629 = vmatmul.mubr.msk.bf16.vlgmr.msra.gmra.mrb[112].mxu1 %vm1592_vm3, %v1847_v21  ;;  %v3965_v21 = vld [vmem:[%s5012_s3 + $0x58] sm:$0xff]  }
 0x18e   :  { %v1536_v37 = vmax.f32 %v1455_v33, 0.0  ;;  %3633 = vmatpush3.bf16.msra.mxu0 %v3960_v19  ;;  %3639 = vmatpush3.bf16.msra.mxu1 %v3961_v20  ;;  %v3964_v20 = vld [vmem:[%s5012_s3 + $0x50] sm:$0xff]  }
 0x18f   :  { %v1196_v32 = vmax.f32 %v4619_v8, %v1171_v36  ;;  %v1560_v39 = vmax.f32 %v1195_v34, %v1535_v25  ;;  %3634 = vmatprep.mubr.msk.bf16.mxu0 %vm3998_vm2, %v3997_v11  ;;  %3640 = vmatprep.mubr.msk.bf16.mxu1 %vm3998_vm2, %v3997_v11 }
 0x190   :  { %v1094_v40 = vpop.f32.mrb[68].mxu0  ;;  %v1459_v42 = vpop.f32.mrb[68].mxu1  ;;  %3644 = vmatprep.subr.bf16.mxu0 %v3997_v11  ;;  %3650 = vmatprep.subr.bf16.mxu1 %v3997_v11 }
 0x191   :  { %v1561_v5 = vmax.f32 %v1196_v32, %v1536_v37  ;;  %v1095_v43 = vadd.f32 %v4587_v62, %v1094_v40  ;;  %v1096_v44 = vpop.f32.mrb[69].mxu0  ;;  %v1460_v45 = vadd.f32 %v4587_v62, %v1459_v42  ;;  %v1461_v8 = vpop.f32.mrb[69].mxu1  ;;  %v1901_v47 = vpack.c.bf16 %v1560_v39, %v1560_v39 }
 0x192   :  { %v1097_v35 = vpop.f32.mrb[70].mxu0  ;;  %v1462_v48 = vpop.f32.mrb[70].mxu1 }
 0x193   :  { %v1955_v56 = vpack.c.bf16 %v1561_v5, %v1561_v5  ;;  %v1172_v57 = vmax.f32 %v1095_v43, 0.0  ;;  %v1098_v58 = vadd.f32 %v4587_v62, %v1097_v35  ;;  %v1537_v59 = vmax.f32 %v1460_v45, 0.0  ;;  %v1099_v60 = vpop.f32.mrb[71].mxu0  ;;  %v1464_v61 = vpop.f32.mrb[71].mxu1 }
 0x194   :  { %v1463_v0 = vadd.f32 %v4587_v62, %v1462_v48  ;;  %v3966_v48 = vld [vmem:[%s5012_s3 + $0x60] sm:$0xff]  }
 0x195   :  { %v1197_v1 = vmax.f32 %v4625_v26, %v1172_v57  ;;  %v1173_v4 = vmax.f32 %v1098_v58, 0.0  ;;  %3635 = vmatmul.mubr.msk.bf16.vlgmr.msra.gmra.mrb[116].mxu0 %vm1592_vm3, %v1901_v47  ;;  %3641 = vmatmul.mubr.msk.bf16.vlgmr.msra.gmra.mrb[116].mxu1 %vm1592_vm3, %v1955_v56 }
 0x196   :  { %v1538_v6 = vmax.f32 %v1463_v0, 0.0  ;;  %3645 = vmatpush3.bf16.msra.mxu0 %v3962_v52  ;;  %3651 = vmatpush3.bf16.msra.mxu1 %v3963_v54  ;;  %v3967_v52 = vld [vmem:[%s5012_s3 + $0x68] sm:$0xff]  }
 0x197   :  { %v1198_v14 = vmax.f32 %v4627_v29, %v1173_v4  ;;  %v1562_v50 = vmax.f32 %v1197_v1, %v1537_v59  ;;  %3646 = vmatprep.mubr.msk.bf16.mxu0 %vm3998_vm2, %v3997_v11  ;;  %3652 = vmatprep.mubr.msk.bf16.mxu1 %vm3998_vm2, %v3997_v11 }
 0x198   :  { %v1102_v9 = vpop.f32.mrb[72].mxu0  ;;  %v1467_v10 = vpop.f32.mrb[72].mxu1  ;;  %3656 = vmatprep.subr.bf16.mxu0 %v3997_v11  ;;  %3662 = vmatprep.subr.bf16.mxu1 %v3997_v11 }
 0x199   :  { %v1563_v26 = vmax.f32 %v1198_v14, %v1538_v6  ;;  %v1103_v17 = vadd.f32 %v4587_v62, %v1102_v9  ;;  %v1104_v53 = vpop.f32.mrb[73].mxu0  ;;  %v1468_v13 = vadd.f32 %v4587_v62, %v1467_v10  ;;  %v1469_v29 = vpop.f32.mrb[73].mxu1  ;;  %v2009_v15 = vpack.c.bf16 %v1562_v50, %v1562_v50 }
 0x19a   :  { %v1105_v18 = vpop.f32.mrb[74].mxu0  ;;  %v1470_v19 = vpop.f32.mrb[74].mxu1 }
 0x19b   :  { %v2063_v22 = vpack.c.bf16 %v1563_v26, %v1563_v26  ;;  %v1174_v23 = vmax.f32 %v1103_v17, 0.0  ;;  %v1106_v25 = vadd.f32 %v4587_v62, %v1105_v18  ;;  %v1539_v28 = vmax.f32 %v1468_v13, 0.0  ;;  %v1107_v30 = vpop.f32.mrb[75].mxu0  ;;  %v1472_v33 = vpop.f32.mrb[75].mxu1  ;;  %v3969_v18 = vld [vmem:[%s5012_s3 + $0x78] sm:$0xff]  }
 0x19c   :  { %v1471_v34 = vadd.f32 %v4587_v62, %v1470_v19 }
 0x19d   :  { %v1199_v36 = vmax.f32 %v4633_v46, %v1174_v23  ;;  %v1175_v37 = vmax.f32 %v1106_v25, 0.0  ;;  %3647 = vmatmul.mubr.msk.bf16.vlgmr.msra.gmra.mrb[120].mxu0 %vm1592_vm3, %v2009_v15  ;;  %3653 = vmatmul.mubr.msk.bf16.vlgmr.msra.gmra.mrb[120].mxu1 %vm1592_vm3, %v2063_v22  ;;  %v3968_v15 = vld [vmem:[%s5012_s3 + $0x70] sm:$0xff]  }
 0x19e   :  { %v1540_v32 = vmax.f32 %v1471_v34, 0.0  ;;  %3657 = vmatpush3.bf16.msra.mxu0 %v3964_v20  ;;  %3663 = vmatpush3.bf16.msra.mxu1 %v3965_v21 }
 0x19f   :  { %v1200_v39 = vmax.f32 %v4635_v49, %v1175_v37  ;;  %v1564_v40 = vmax.f32 %v1199_v36, %v1539_v28  ;;  %3658 = vmatprep.mubr.msk.bf16.mxu0 %vm3998_vm2, %v3997_v11  ;;  %3664 = vmatprep.mubr.msk.bf16.mxu1 %vm3998_vm2, %v3997_v11 }
 0x1a0   :  { %v1110_v42 = vpop.f32.mrb[76].mxu0  ;;  %v1475_v5 = vpop.f32.mrb[76].mxu1  ;;  %3668 = vmatprep.subr.bf16.mxu0 %v3997_v11  ;;  %3674 = vmatprep.subr.bf16.mxu1 %v3997_v11 }
 0x1a1   :  { %v1565_v46 = vmax.f32 %v1200_v39, %v1540_v32  ;;  %v1111_v43 = vadd.f32 %v4587_v62, %v1110_v42  ;;  %v1112_v44 = vpop.f32.mrb[77].mxu0  ;;  %v1476_v45 = vadd.f32 %v4587_v62, %v1475_v5  ;;  %v1477_v49 = vpop.f32.mrb[77].mxu1  ;;  %v2117_v8 = vpack.c.bf16 %v1564_v40, %v1564_v40 }
 0x1a2   :  { %v1113_v47 = vpop.f32.mrb[78].mxu0  ;;  %v1478_v35 = vpop.f32.mrb[78].mxu1  ;;  %v3971_v49 = vld [vmem:[%s5012_s3 + $0x88] sm:$0xff]  }
 0x1a3   :  { %v2171_v54 = vpack.c.bf16 %v1565_v46, %v1565_v46  ;;  %v1176_v56 = vmax.f32 %v1111_v43, 0.0  ;;  %v1114_v57 = vadd.f32 %v4587_v62, %v1113_v47  ;;  %v1541_v58 = vmax.f32 %v1476_v45, 0.0  ;;  %v1115_v59 = vpop.f32.mrb[79].mxu0  ;;  %v1480_v60 = vpop.f32.mrb[79].mxu1  ;;  %v3970_v45 = vld [vmem:[%s5012_s3 + $0x80] sm:$0xff]  }
 0x1a4   :  { %v1479_v61 = vadd.f32 %v4587_v62, %v1478_v35 }
 0x1a5   :  { %v1201_v0 = vmax.f32 %v4641_v3, %v1176_v56  ;;  %v1177_v1 = vmax.f32 %v1114_v57, 0.0  ;;  %3659 = vmatmul.mubr.msk.bf16.vlgmr.msra.gmra.mrb[124].mxu0 %vm1592_vm3, %v2117_v8  ;;  %3665 = vmatmul.mubr.msk.bf16.vlgmr.msra.gmra.mrb[124].mxu1 %vm1592_vm3, %v2171_v54 }
 0x1a6   :  { %v1542_v4 = vmax.f32 %v1479_v61, 0.0  ;;  %3669 = vmatpush3.bf16.msra.mxu0 %v3966_v48  ;;  %3675 = vmatpush3.bf16.msra.mxu1 %v3967_v52 }
 0x1a7   :  { %v1202_v6 = vmax.f32 %v4643_v7, %v1177_v1  ;;  %v1566_v14 = vmax.f32 %v1201_v0, %v1541_v58  ;;  %3670 = vmatprep.mubr.msk.bf16.mxu0 %vm3998_vm2, %v3997_v11  ;;  %3676 = vmatprep.mubr.msk.bf16.mxu1 %vm3998_vm2, %v3997_v11 }
 0x1a8   :  { %v1118_v50 = vpop.f32.mrb[80].mxu0  ;;  %v1483_v9 = vpop.f32.mrb[80].mxu1  ;;  %3680 = vmatprep.subr.bf16.mxu0 %v3997_v11  ;;  %3686 = vmatprep.subr.bf16.mxu1 %v3997_v11 }
 0x1a9   :  { %v1567_v3 = vmax.f32 %v1202_v6, %v1542_v4  ;;  %v1119_v10 = vadd.f32 %v4587_v62, %v1118_v50  ;;  %v1120_v26 = vpop.f32.mrb[81].mxu0  ;;  %v1484_v17 = vadd.f32 %v4587_v62, %v1483_v9  ;;  %v1485_v7 = vpop.f32.mrb[81].mxu1  ;;  %v2225_v53 = vpack.c.bf16 %v1566_v14, %v1566_v14 }
 0x1aa   :  { %v1121_v13 = vpop.f32.mrb[82].mxu0  ;;  %v1486_v29 = vpop.f32.mrb[82].mxu1  ;;  %v3973_v26 = vld [vmem:[%s5012_s3 + $0x98] sm:$0xff]  }
 0x1ab   :  { %v2279_v19 = vpack.c.bf16 %v1567_v3, %v1567_v3  ;;  %v1178_v20 = vmax.f32 %v1119_v10, 0.0  ;;  %v1122_v21 = vadd.f32 %v4587_v62, %v1121_v13  ;;  %v1543_v22 = vmax.f32 %v1484_v17, 0.0  ;;  %v1123_v23 = vpop.f32.mrb[83].mxu0  ;;  %v1488_v25 = vpop.f32.mrb[83].mxu1  ;;  %v3972_v10 = vld [vmem:[%s5012_s3 + $0x90] sm:$0xff]  }
 0x1ac   :  { %v1487_v28 = vadd.f32 %v4587_v62, %v1486_v29 }
 0x1ad   :  { %v1203_v30 = vmax.f32 %v4649_v27, %v1178_v20  ;;  %v1179_v33 = vmax.f32 %v1122_v21, 0.0  ;;  %3671 = vmatmul.mubr.msk.bf16.vlgmr.msra.gmra.mrb[128].mxu0 %vm1592_vm3, %v2225_v53  ;;  %3677 = vmatmul.mubr.msk.bf16.vlgmr.msra.gmra.mrb[128].mxu1 %vm1592_vm3, %v2279_v19  ;;  %v4866_v53 = vld [vmem:[%s5013_s2] ss:$0 sm:$0xff] }
 0x1ae   :  { %v1544_v34 = vmax.f32 %v1487_v28, 0.0  ;;  %3681 = vmatpush3.bf16.msra.mxu0 %v3968_v15  ;;  %3687 = vmatpush3.bf16.msra.mxu1 %v3969_v18 }
 0x1af   :  { %v1204_v36 = vmax.f32 %v4651_v31, %v1179_v33  ;;  %v1568_v37 = vmax.f32 %v1203_v30, %v1543_v22  ;;  %3682 = vmatprep.mubr.msk.bf16.mxu0 %vm3998_vm2, %v3997_v11  ;;  %3688 = vmatprep.mubr.msk.bf16.mxu1 %vm3998_vm2, %v3997_v11 }
 0x1b0   :  { %v1126_v32 = vpop.f32.mrb[84].mxu0  ;;  %v1491_v39 = vpop.f32.mrb[84].mxu1  ;;  %3692 = vmatprep.subr.bf16.mxu0 %v3997_v11  ;;  %3698 = vmatprep.subr.bf16.mxu1 %v3997_v11 }
 0x1b1   :  { %v1569_v27 = vmax.f32 %v1204_v36, %v1544_v34  ;;  %v1127_v40 = vadd.f32 %v4587_v62, %v1126_v32  ;;  %v1128_v42 = vpop.f32.mrb[85].mxu0  ;;  %v1492_v5 = vadd.f32 %v4587_v62, %v1491_v39  ;;  %v1493_v31 = vpop.f32.mrb[85].mxu1  ;;  %v2333_v46 = vpack.c.bf16 %v1568_v37, %v1568_v37  ;;  %v3974_v39 = vld [vmem:[%s5012_s3 + $0xa0] sm:$0xff]  }
 0x1b2   :  { %v1129_v43 = vpop.f32.mrb[86].mxu0  ;;  %v1494_v44 = vpop.f32.mrb[86].mxu1 }
 0x1b3   :  { %v2387_v8 = vpack.c.bf16 %v1569_v27, %v1569_v27  ;;  %v1180_v47 = vmax.f32 %v1127_v40, 0.0  ;;  %v1130_v35 = vadd.f32 %v4587_v62, %v1129_v43  ;;  %v1545_v48 = vmax.f32 %v1492_v5, 0.0  ;;  %v1131_v52 = vpop.f32.mrb[87].mxu0  ;;  %v1496_v54 = vpop.f32.mrb[87].mxu1  ;;  %v3975_v27 = vld [vmem:[%s5012_s3 + $0xa8] sm:$0xff]  }
 0x1b4   :  { %v1495_v56 = vadd.f32 %v4587_v62, %v1494_v44 }
 0x1b5   :  { %v1205_v57 = vmax.f32 %v4657_v51, %v1180_v47  ;;  %v1181_v58 = vmax.f32 %v1130_v35, 0.0  ;;  %3683 = vmatmul.mubr.msk.bf16.vlgmr.msra.gmra.mrb[132].mxu0 %vm1592_vm3, %v2333_v46  ;;  %3689 = vmatmul.mubr.msk.bf16.vlgmr.msra.gmra.mrb[132].mxu1 %vm1592_vm3, %v2387_v8 }
 0x1b6   :  { %v1546_v59 = vmax.f32 %v1495_v56, 0.0  ;;  %3693 = vmatpush3.bf16.msra.mxu0 %v3970_v45  ;;  %3699 = vmatpush3.bf16.msra.mxu1 %v3971_v49 }
 0x1b7   :  { %v1206_v60 = vmax.f32 %v4659_v55, %v1181_v58  ;;  %v1570_v61 = vmax.f32 %v1205_v57, %v1545_v48  ;;  %3694 = vmatprep.mubr.msk.bf16.mxu0 %vm3998_vm2, %v3997_v11  ;;  %3700 = vmatprep.mubr.msk.bf16.mxu1 %vm3998_vm2, %v3997_v11 }
 0x1b8   :  { %v1134_v0 = vpop.f32.mrb[88].mxu0  ;;  %v1499_v1 = vpop.f32.mrb[88].mxu1  ;;  %3704 = vmatprep.subr.bf16.mxu0 %v3997_v11  ;;  %3710 = vmatprep.subr.bf16.mxu1 %v3997_v11 }
 0x1b9   :  { %v1571_v51 = vmax.f32 %v1206_v60, %v1546_v59  ;;  %v1135_v4 = vadd.f32 %v4587_v62, %v1134_v0  ;;  %v1136_v6 = vpop.f32.mrb[89].mxu0  ;;  %v1500_v14 = vadd.f32 %v4587_v62, %v1499_v1  ;;  %v1501_v55 = vpop.f32.mrb[89].mxu1  ;;  %v2441_v50 = vpack.c.bf16 %v1570_v61, %v1570_v61  ;;  %v3976_v61 = vld [vmem:[%s5012_s3 + $0xb0] sm:$0xff]   ;;  %v3977_v0 = vld [vmem:[%s5012_s3 + $0xb8] sm:$0xff]  }
 0x1ba   :  { %v1137_v9 = vpop.f32.mrb[90].mxu0  ;;  %v1502_v3 = vpop.f32.mrb[90].mxu1 }
 0x1bb   :  { %v2495_v17 = vpack.c.bf16 %v1571_v51, %v1571_v51  ;;  %v1182_v7 = vmax.f32 %v1135_v4, 0.0  ;;  %v1138_v62 = vadd.f32 %v4866_v53, %v1137_v9  ;;  %v1547_v13 = vmax.f32 %v1500_v14, 0.0  ;;  %v1139_v29 = vpop.f32.mrb[91].mxu0  ;;  %v1504_v15 = vpop.f32.mrb[91].mxu1 }
 0x1bc   :  { %v1503_v18 = vadd.f32 %v4866_v53, %v1502_v3 }
 0x1bd   :  { %v1207_v19 = vmax.f32 %v4665_v12, %v1182_v7  ;;  %v1183_v20 = vmax.f32 %v1138_v62, 0.0  ;;  %3695 = vmatmul.mubr.msk.bf16.vlgmr.msra.gmra.mrb[136].mxu0 %vm1592_vm3, %v2441_v50  ;;  %3701 = vmatmul.mubr.msk.bf16.vlgmr.msra.gmra.mrb[136].mxu1 %vm1592_vm3, %v2495_v17 }
 0x1be   :  { %v1548_v21 = vmax.f32 %v1503_v18, 0.0  ;;  %3705 = vmatpush3.bf16.msra.mxu0 %v3972_v10  ;;  %3711 = vmatpush3.bf16.msra.mxu1 %v3973_v26 }
 0x1bf   :  { %v1208_v22 = vmax.f32 %v4667_v16, %v1183_v20  ;;  %v1572_v23 = vmax.f32 %v1207_v19, %v1547_v13  ;;  %3706 = vmatprep.mubr.msk.bf16.mxu0 %vm3998_vm2, %v3997_v11  ;;  %3712 = vmatprep.mubr.msk.bf16.mxu1 %vm3998_vm2, %v3997_v11  ;;  %v3978_v20 = vld [vmem:[%s5012_s3 + $0xc0] sm:$0xff]  }
 0x1c0   :  { %v1142_v25 = vpop.f32.mrb[92].mxu0  ;;  %v1507_v28 = vpop.f32.mrb[92].mxu1  ;;  %3716 = vmatprep.subr.bf16.mxu0 %v3997_v11  ;;  %3722 = vmatprep.subr.bf16.mxu1 %v3997_v11 }
 0x1c1   :  { %v1573_v12 = vmax.f32 %v1208_v22, %v1548_v21  ;;  %v1143_v30 = vadd.f32 %v4866_v53, %v1142_v25  ;;  %v1144_v33 = vpop.f32.mrb[93].mxu0  ;;  %v1508_v34 = vadd.f32 %v4866_v53, %v1507_v28  ;;  %v1509_v16 = vpop.f32.mrb[93].mxu1  ;;  %v2549_v36 = vpack.c.bf16 %v1572_v23, %v1572_v23 }
 0x1c2   :  { %v1145_v37 = vpop.f32.mrb[94].mxu0  ;;  %v1510_v32 = vpop.f32.mrb[94].mxu1  ;;  %v3981_v16 = vld [vmem:[%s5014_s5 + $0x10] sm:$0xff]  }
 0x1c3   :  { %v2603_v40 = vpack.c.bf16 %v1573_v12, %v1573_v12  ;;  %v1184_v42 = vmax.f32 %v1143_v30, 0.0  ;;  %v1146_v5 = vadd.f32 %v4866_v53, %v1145_v37  ;;  %v1549_v31 = vmax.f32 %v1508_v34, 0.0  ;;  %v1147_v46 = vpop.f32.mrb[95].mxu0  ;;  %v1512_v43 = vpop.f32.mrb[95].mxu1  ;;  %v3980_v34 = vld [vmem:[%s5014_s5 + $0x8] sm:$0xff]   ;;  %v3983_v37 = vld [vmem:[%s5014_s5 + $0x20] sm:$0xff]  }
 0x1c4   :  { %v1511_v44 = vadd.f32 %v4866_v53, %v1510_v32  ;;  %v3984_v32 = vld [vmem:[%s5014_s5 + $0x28] sm:$0xff]   ;;  %v3991_v46 = vld [vmem:[%s5015_s7 + $0x20] sm:$0xff]  }
 0x1c5   :  { %v1209_v45 = vmax.f32 %v4673_v38, %v1184_v42  ;;  %v1185_v49 = vmax.f32 %v1146_v5, 0.0  ;;  %3707 = vmatmul.mubr.msk.bf16.vlgmr.msra.gmra.mrb[140].mxu0 %vm1592_vm3, %v2549_v36  ;;  %3713 = vmatmul.mubr.msk.bf16.vlgmr.msra.gmra.mrb[140].mxu1 %vm1592_vm3, %v2603_v40  ;;  %v3982_v36 = vld [vmem:[%s5014_s5 + $0x18] sm:$0xff]   ;;  %v3987_v40 = vld [vmem:[%s5015_s7] sm:$0xff]   ;;  %v3988_v42 = vld [vmem:[%s5015_s7 + $0x8] sm:$0xff]  }
 0x1c6   :  { %v1550_v8 = vmax.f32 %v1511_v44, 0.0  ;;  %3717 = vmatpush3.bf16.msra.mxu0 %v3974_v39  ;;  %3723 = vmatpush3.bf16.msra.mxu1 %v3975_v27  ;;  %v3985_v39 = vld [vmem:[%s5014_s5 + $0x30] sm:$0xff]   ;;  %v3986_v27 = vld [vmem:[%s5014_s5 + $0x38] sm:$0xff]   ;;  %v3992_v43 = vld [vmem:[%s5015_s7 + $0x28] sm:$0xff]  }
 0x1c7   :  { %v1210_v47 = vmax.f32 %v4675_v41, %v1185_v49  ;;  %v1574_v35 = vmax.f32 %v1209_v45, %v1549_v31  ;;  %3718 = vmatprep.mubr.msk.bf16.mxu0 %vm3998_vm2, %v3997_v11  ;;  %3724 = vmatprep.mubr.msk.bf16.mxu1 %vm3998_vm2, %v3997_v11  ;;  %v3989_v5 = vld [vmem:[%s5015_s7 + $0x10] sm:$0xff]   ;;  %v3990_v31 = vld [vmem:[%s5015_s7 + $0x18] sm:$0xff]  }
 0x1c8   :  { %v1150_v48 = vpop.f32.mrb[96].mxu0  ;;  %v1515_v52 = vpop.f32.mrb[96].mxu1  ;;  %3728 = vmatprep.subr.bf16.mxu0 %v3997_v11  ;;  %3734 = vmatprep.subr.bf16.mxu1 %v3997_v11 }
 0x1c9   :  { %v1575_v38 = vmax.f32 %v1210_v47, %v1550_v8  ;;  %v1151_v54 = vadd.f32 %v4866_v53, %v1150_v48  ;;  %v1152_v56 = vpop.f32.mrb[97].mxu0  ;;  %v1516_v57 = vadd.f32 %v4866_v53, %v1515_v52  ;;  %v1517_v41 = vpop.f32.mrb[97].mxu1  ;;  %v2657_v58 = vpack.c.bf16 %v1574_v35, %v1574_v35 }
 0x1ca   :  { %v1153_v59 = vpop.f32.mrb[98].mxu0  ;;  %v1518_v60 = vpop.f32.mrb[98].mxu1 }
 0x1cb   :  { %v2711_v1 = vpack.c.bf16 %v1575_v38, %v1575_v38  ;;  %v1186_v51 = vmax.f32 %v1151_v54, 0.0  ;;  %v1154_v4 = vadd.f32 %v4866_v53, %v1153_v59  ;;  %v1551_v6 = vmax.f32 %v1516_v57, 0.0  ;;  %v1155_v14 = vpop.f32.mrb[99].mxu0  ;;  %v1520_v55 = vpop.f32.mrb[99].mxu1 }
 0x1cc   :  { %v1519_v50 = vadd.f32 %v4866_v53, %v1518_v60 }
 0x1cd   :  { %v1211_v9 = vmax.f32 %v4681_v63, %v1186_v51  ;;  %v1187_v3 = vmax.f32 %v1154_v4, 0.0  ;;  %3719 = vmatmul.mubr.msk.bf16.vlgmr.msra.gmra.mrb[144].mxu0 %vm1592_vm3, %v2657_v58  ;;  %3725 = vmatmul.mubr.msk.bf16.vlgmr.msra.gmra.mrb[144].mxu1 %vm1592_vm3, %v2711_v1 }
 0x1ce   :  { %v1552_v10 = vmax.f32 %v1519_v50, 0.0  ;;  %3729 = vmatpush3.bf16.msra.mxu0 %v3976_v61  ;;  %3735 = vmatpush3.bf16.msra.mxu1 %v3977_v0 }
 0x1cf   :  { %v1212_v26 = vmax.f32 %v4683_v2, %v1187_v3  ;;  %v1576_v17 = vmax.f32 %v1211_v9, %v1551_v6  ;;  %3730 = vmatprep.mubr.msk.bf16.mxu0 %vm3998_vm2, %v3997_v11  ;;  %3736 = vmatprep.mubr.msk.bf16.mxu1 %vm3998_vm2, %v3997_v11 }
 0x1d0   :  { %v1158_v7 = vpop.f32.mrb[100].mxu0  ;;  %v1523_v62 = vpop.f32.mrb[100].mxu1  ;;  %3740 = vmatprep.subr.bf16.mxu0 %v3997_v11  ;;  %3746 = vmatprep.subr.bf16.mxu1 %v3997_v11 }
 0x1d1   :  { %v1577_v63 = vmax.f32 %v1212_v26, %v1552_v10  ;;  %v1159_v13 = vadd.f32 %v4866_v53, %v1158_v7  ;;  %v1160_v29 = vpop.f32.mrb[101].mxu0  ;;  %v1524_v15 = vadd.f32 %v4866_v53, %v1523_v62  ;;  %v1525_v2 = vpop.f32.mrb[101].mxu1  ;;  %v2765_v21 = vpack.c.bf16 %v1576_v17, %v1576_v17 }
 0x1d2   :  { %v1161_v18 = vpop.f32.mrb[102].mxu0  ;;  %v1526_v19 = vpop.f32.mrb[102].mxu1 }
 0x1d3   :  { %v2819_v22 = vpack.c.bf16 %v1577_v63, %v1577_v63  ;;  %v1188_v23 = vmax.f32 %v1159_v13, 0.0  ;;  %v1553_v25 = vmax.f32 %v1524_v15, 0.0  ;;  %v1162_v28 = vpop.f32.mrb[103].mxu0  ;;  %v1527_v12 = vpop.f32.mrb[103].mxu1 }
 0x1d5   :  { %v1213_v30 = vmax.f32 %v4687_v24, %v1188_v23  ;;  %3731 = vmatmul.mubr.msk.bf16.vlgmr.msra.gmra.mrb[148].mxu0 %vm1592_vm3, %v2765_v21  ;;  %3737 = vmatmul.mubr.msk.bf16.vlgmr.msra.gmra.mrb[148].mxu1 %vm1592_vm3, %v2819_v22  ;;  %v3979_v24 = vld [vmem:[%s5014_s5] sm:$0xff]  }
 0x1d6   :  { %3741 = vmatpush3.bf16.msra.mxu0 %v3978_v20  ;;  %3742 = vmatprep.mubr.msk.bf16.mxu0 %vm3998_vm2, %v3997_v11 }
 0x1d7   :  { %v1578_v53 = vmax.f32 %v1213_v30, %v1553_v25  ;;  %3762 = vmatprep.mubr.msk.bf16.mxu1 %vm3998_vm2, %v3997_v11  ;;  %3766 = vmatprep.subr.bf16.mxu0 %v3997_v11 }
 0x1d8   :  { %3747 = vmatpush3.bf16.msra.mxu1 %v3979_v24 }
 0x1d9   :  { %v2873_v33 = vpack.c.bf16 %v1578_v53, %v1578_v53  ;;  %3748 = vmatprep.subr.bf16.mxu1 %v3997_v11 }
 0x1dc   :  { %3749 = vmatpush3.bf16.msra.mxu1 %v3980_v34 }
 0x1dd   :  { %3743 = vmatmul.mubr.msk.bf16.vlgmr.msra.gmra.mrb[152].mxu0 %vm1592_vm3, %v2873_v33  ;;  %3750 = vmatprep.subr.bf16.mxu1 %v3997_v11 }
 0x1de   :  { %3782 = vmatprep.mubr.msk.bf16.mxu0 %vm3998_vm2, %v3997_v11  ;;  %3767 = vmatpush3.bf16.msra.mxu0 %v3987_v40 }
 0x1df   :  { %3768 = vmatprep.subr.bf16.mxu0 %v3997_v11 }
 0x1e0   :  { %3751 = vmatpush3.bf16.msra.mxu1 %v3981_v16 }
 0x1e1   :  { %3752 = vmatprep.subr.bf16.mxu1 %v3997_v11 }
 0x1e2   :  { %3769 = vmatpush3.bf16.msra.mxu0 %v3988_v42 }
 0x1e3   :  { %3770 = vmatprep.subr.bf16.mxu0 %v3997_v11 }
 0x1e4   :  { %3753 = vmatpush3.bf16.msra.mxu1 %v3982_v36 }
 0x1e5   :  { %3754 = vmatprep.subr.bf16.mxu1 %v3997_v11 }
 0x1e6   :  { %3771 = vmatpush3.bf16.msra.mxu0 %v3989_v5 }
 0x1e7   :  { %3772 = vmatprep.subr.bf16.mxu0 %v3997_v11 }
 0x1e8   :  { %3755 = vmatpush3.bf16.msra.mxu1 %v3983_v37 }
 0x1e9   :  { %3756 = vmatprep.subr.bf16.mxu1 %v3997_v11 }
 0x1ea   :  { %3773 = vmatpush3.bf16.msra.mxu0 %v3990_v31 }
 0x1eb   :  { %3774 = vmatprep.subr.bf16.mxu0 %v3997_v11 }
 0x1ec   :  { %3757 = vmatpush3.bf16.msra.mxu1 %v3984_v32 }
 0x1ed   :  { %3758 = vmatprep.subr.bf16.mxu1 %v3997_v11 }
 0x1ee   :  { %3775 = vmatpush3.bf16.msra.mxu0 %v3991_v46 }
 0x1ef   :  { %3776 = vmatprep.subr.bf16.mxu0 %v3997_v11 }
 0x1f0   :  { %3759 = vmatpush3.bf16.msra.mxu1 %v3985_v39 }
 0x1f1   :  { %3760 = vmatprep.subr.bf16.mxu1 %v3997_v11 }
 0x1f2   :  { %3777 = vmatpush3.bf16.msra.mxu0 %v3992_v43 }
 0x1f3   :  { %3778 = vmatprep.subr.bf16.mxu0 %v3997_v11 }
 0x1f4   :  { %3761 = vmatpush3.bf16.msra.mxu1 %v3986_v27 }
 0x24e   :  { %v1679_v44 = vpop.f32.mrb[104].mxu1 }
 0x24f   :  { %v3606_v45 = vpop.f32.mrb[105].mxu1 }
 0x250   :  { %v1630_v49 = vpop.f32.mrb[104].mxu0  ;;  %v1682_v8 = vpop.f32.mrb[106].mxu1 }
 0x251   :  { %v1680_v47 = vadd.f32 %v1679_v44, %v1630_v49  ;;  %v3600_v35 = vpop.f32.mrb[105].mxu0  ;;  %v3607_v48 = vpop.f32.mrb[107].mxu1 }
 0x252   :  { %v1633_v52 = vpop.f32.mrb[106].mxu0 }
 0x253   :  { %v3601_v38 = vpop.f32.mrb[107].mxu0 }
 0x258   :  { %v1732_v54 = vpop.f32.mrb[108].mxu0  ;;  %v1786_v56 = vpop.f32.mrb[108].mxu1 }
 0x259   :  { %v1738_v57 = vadd.f32 %v1732_v54, %v1680_v47  ;;  %v3612_v41 = vpop.f32.mrb[109].mxu0  ;;  %v3618_v58 = vpop.f32.mrb[109].mxu1 }
 0x25a   :  { %v1735_v59 = vpop.f32.mrb[110].mxu0  ;;  %v1789_v60 = vpop.f32.mrb[110].mxu1 }
 0x25b   :  { %v1792_v61 = vadd.f32 %v1786_v56, %v1738_v57  ;;  %v3613_v0 = vpop.f32.mrb[111].mxu0  ;;  %v3619_v1 = vpop.f32.mrb[111].mxu1 }
 0x260   :  { %v1840_v51 = vpop.f32.mrb[112].mxu0  ;;  %v1894_v4 = vpop.f32.mrb[112].mxu1 }
 0x261   :  { %v1846_v6 = vadd.f32 %v1840_v51, %v1792_v61  ;;  %v3624_v14 = vpop.f32.mrb[113].mxu0  ;;  %v3630_v55 = vpop.f32.mrb[113].mxu1 }
 0x262   :  { %v1843_v50 = vpop.f32.mrb[114].mxu0  ;;  %v1897_v9 = vpop.f32.mrb[114].mxu1 }
 0x263   :  { %v1900_v3 = vadd.f32 %v1894_v4, %v1846_v6  ;;  %v3625_v10 = vpop.f32.mrb[115].mxu0  ;;  %v3631_v26 = vpop.f32.mrb[115].mxu1 }
 0x268   :  { %v1948_v17 = vpop.f32.mrb[116].mxu0  ;;  %v2002_v7 = vpop.f32.mrb[116].mxu1 }
 0x269   :  { %v1954_v62 = vadd.f32 %v1948_v17, %v1900_v3  ;;  %v3636_v63 = vpop.f32.mrb[117].mxu0  ;;  %v3642_v13 = vpop.f32.mrb[117].mxu1 }
 0x26a   :  { %v1951_v29 = vpop.f32.mrb[118].mxu0  ;;  %v2005_v15 = vpop.f32.mrb[118].mxu1 }
 0x26b   :  { %v2008_v2 = vadd.f32 %v2002_v7, %v1954_v62  ;;  %v3637_v18 = vpop.f32.mrb[119].mxu0  ;;  %v3643_v19 = vpop.f32.mrb[119].mxu1 }
 0x270   :  { %v2056_v20 = vpop.f32.mrb[120].mxu0  ;;  %v2110_v21 = vpop.f32.mrb[120].mxu1 }
 0x271   :  { %v2062_v22 = vadd.f32 %v2056_v20, %v2008_v2  ;;  %v3648_v23 = vpop.f32.mrb[121].mxu0  ;;  %v3654_v25 = vpop.f32.mrb[121].mxu1 }
 0x272   :  { %v2059_v28 = vpop.f32.mrb[122].mxu0  ;;  %v2113_v12 = vpop.f32.mrb[122].mxu1 }
 0x273   :  { %v2116_v30 = vadd.f32 %v2110_v21, %v2062_v22  ;;  %v3649_v53 = vpop.f32.mrb[123].mxu0  ;;  %v3655_v33 = vpop.f32.mrb[123].mxu1 }
 0x278   :  { %v2164_v24 = vpop.f32.mrb[124].mxu0  ;;  %v2218_v34 = vpop.f32.mrb[124].mxu1 }
 0x279   :  { %v2170_v16 = vadd.f32 %v2164_v24, %v2116_v30  ;;  %v3660_v36 = vpop.f32.mrb[125].mxu0  ;;  %v3666_v37 = vpop.f32.mrb[125].mxu1 }
 0x27a   :  { %v2167_v32 = vpop.f32.mrb[126].mxu0  ;;  %v2221_v39 = vpop.f32.mrb[126].mxu1 }
 0x27b   :  { %v2224_v27 = vadd.f32 %v2218_v34, %v2170_v16  ;;  %v3661_v40 = vpop.f32.mrb[127].mxu0  ;;  %v3667_v42 = vpop.f32.mrb[127].mxu1 }
 0x27c   :  { %v3509_v40 = vld [vmem:[%s5016_s4] ss:$0 sm:$0xff] }
 0x280   :  { %v2272_v5 = vpop.f32.mrb[128].mxu0  ;;  %v2326_v31 = vpop.f32.mrb[128].mxu1 }
 0x281   :  { %v2278_v46 = vadd.f32 %v2272_v5, %v2224_v27  ;;  %v3672_v43 = vpop.f32.mrb[129].mxu0  ;;  %v3678_v44 = vpop.f32.mrb[129].mxu1 }
 0x282   :  { %v2275_v45 = vpop.f32.mrb[130].mxu0  ;;  %v2329_v49 = vpop.f32.mrb[130].mxu1 }
 0x283   :  { %v2332_v8 = vadd.f32 %v2326_v31, %v2278_v46  ;;  %v3673_v47 = vpop.f32.mrb[131].mxu0  ;;  %v3679_v35 = vpop.f32.mrb[131].mxu1  ;;  %v3993_v49 = vld [vmem:[%s5015_s7 + $0x30] sm:$0xff]  }
 0x284   :  { %3779 = vmatpush3.bf16.msra.mxu0 %v3993_v49  ;;  %v3510_v47 = vld [vmem:[%s5017_s6] ss:$0 sm:$0xff] }
 0x285   :  { %3780 = vmatprep.subr.bf16.mxu0 %v3997_v11  ;;  %v3519_v11 = vld [vmem:[%s5018_s8] ss:$0 sm:$0xff] }
 0x288   :  { %v2380_v48 = vpop.f32.mrb[132].mxu0  ;;  %v2434_v52 = vpop.f32.mrb[132].mxu1 }
 0x289   :  { %v2386_v38 = vadd.f32 %v2380_v48, %v2332_v8  ;;  %v3684_v54 = vpop.f32.mrb[133].mxu0  ;;  %v3690_v56 = vpop.f32.mrb[133].mxu1  ;;  %v3994_v8 = vld [vmem:[%s5015_s7 + $0x38] sm:$0xff]  }
 0x28a   :  { %v2383_v57 = vpop.f32.mrb[134].mxu0  ;;  %v2437_v41 = vpop.f32.mrb[134].mxu1  ;;  %3781 = vmatpush3.bf16.msra.mxu0 %v3994_v8 }
 0x28b   :  { %v2440_v58 = vadd.f32 %v2434_v52, %v2386_v38  ;;  %v3685_v59 = vpop.f32.mrb[135].mxu0  ;;  %v3691_v60 = vpop.f32.mrb[135].mxu1 }
 0x290   :  { %v2488_v61 = vpop.f32.mrb[136].mxu0  ;;  %v2542_v0 = vpop.f32.mrb[136].mxu1 }
 0x291   :  { %v2494_v1 = vadd.f32 %v2488_v61, %v2440_v58  ;;  %v3696_v51 = vpop.f32.mrb[137].mxu0  ;;  %v3702_v4 = vpop.f32.mrb[137].mxu1 }
 0x292   :  { %v2491_v6 = vpop.f32.mrb[138].mxu0  ;;  %v2545_v14 = vpop.f32.mrb[138].mxu1 }
 0x293   :  { %v2548_v55 = vadd.f32 %v2542_v0, %v2494_v1  ;;  %v3697_v50 = vpop.f32.mrb[139].mxu0  ;;  %v3703_v9 = vpop.f32.mrb[139].mxu1 }
 0x298   :  { %v2596_v3 = vpop.f32.mrb[140].mxu0  ;;  %v2650_v10 = vpop.f32.mrb[140].mxu1 }
 0x299   :  { %v2602_v26 = vadd.f32 %v2596_v3, %v2548_v55  ;;  %v3708_v17 = vpop.f32.mrb[141].mxu0  ;;  %v3714_v7 = vpop.f32.mrb[141].mxu1 }
 0x29a   :  { %v2599_v62 = vpop.f32.mrb[142].mxu0  ;;  %v2653_v63 = vpop.f32.mrb[142].mxu1 }
 0x29b   :  { %v2656_v13 = vadd.f32 %v2650_v10, %v2602_v26  ;;  %v3709_v29 = vpop.f32.mrb[143].mxu0  ;;  %v3715_v15 = vpop.f32.mrb[143].mxu1 }
 0x2a0   :  { %v2704_v2 = vpop.f32.mrb[144].mxu0  ;;  %v2758_v18 = vpop.f32.mrb[144].mxu1 }
 0x2a1   :  { %v2710_v19 = vadd.f32 %v2704_v2, %v2656_v13  ;;  %v3720_v20 = vpop.f32.mrb[145].mxu0  ;;  %v3726_v21 = vpop.f32.mrb[145].mxu1 }
 0x2a2   :  { %v2707_v22 = vpop.f32.mrb[146].mxu0  ;;  %v2761_v23 = vpop.f32.mrb[146].mxu1 }
 0x2a3   :  { %v2764_v25 = vadd.f32 %v2758_v18, %v2710_v19  ;;  %v3721_v28 = vpop.f32.mrb[147].mxu0  ;;  %v3727_v12 = vpop.f32.mrb[147].mxu1 }
 0x2a8   :  { %v2812_v30 = vpop.f32.mrb[148].mxu0  ;;  %v2866_v53 = vpop.f32.mrb[148].mxu1 }
 0x2a9   :  { %v2818_v33 = vadd.f32 %v2812_v30, %v2764_v25  ;;  %v3732_v24 = vpop.f32.mrb[149].mxu0  ;;  %v3738_v34 = vpop.f32.mrb[149].mxu1 }
 0x2aa   :  { %v2815_v16 = vpop.f32.mrb[150].mxu0  ;;  %v2869_v36 = vpop.f32.mrb[150].mxu1 }
 0x2ab   :  { %v2872_v37 = vadd.f32 %v2866_v53, %v2818_v33  ;;  %v3733_v32 = vpop.f32.mrb[151].mxu0  ;;  %v3739_v39 = vpop.f32.mrb[151].mxu1 }
 0x2b0   :  { %v2920_v27 = vpop.f32.mrb[152].mxu0 }
 0x2b1   :  { %v2926_v42 = vadd.f32 %v2920_v27, %v2872_v37  ;;  %v3744_v5 = vpop.f32.mrb[153].mxu0 }
 0x2b2   :  { %v2923_v31 = vpop.f32.mrb[154].mxu0 }
 0x2b3   :  { %v2934_v46 = vadd.f32 %v3509_v40, %v2926_v42  ;;  %v3745_v43 = vpop.f32.mrb[155].mxu0 }
 0x2b5   :  { %v2935_v44 = vmax.f32 %v2934_v46, 0.0 }
 0x2b7   :  { %v2936_v45 = vpack.c.bf16 %v2935_v44, %v2935_v44 }
 0x2b9   :  { %3763 = vmatmul.mubr.bf16.vlgmr.msra.gmra.mrb[152].mxu1 %v2936_v45 }
 0x38c   :  { %v3042_v35 = vpop.f32.mrb[152].mxu1 }
 0x38d   :  { %v3043_v48 = vadd.f32 %v3510_v47, %v3042_v35  ;;  %v3764_v52 = vpop.f32.mrb[153].mxu1 }
 0x38e   :  { %v3045_v38 = vpop.f32.mrb[154].mxu1 }
 0x38f   :  { %v3048_v54 = vmax.f32 %v3043_v48, 0.0  ;;  %v3765_v56 = vpop.f32.mrb[155].mxu1 }
 0x391   :  { %v3049_v57 = vpack.c.bf16 %v3048_v54, %v3048_v54 }
 0x393   :  { %3783 = vmatmul.mubr.bf16.vlgmr.msra.gmra.mrb[156].mxu0 %v3049_v57 }
 0x466   :  { %v3155_v41 = vpop.f32.mrb[156].mxu0 }
 0x467   :  { %v3156_v58 = vadd.f32 %v3519_v11, %v3155_v41  ;;  %v3784_v59 = vpop.f32.mrb[157].mxu0 }
 0x468   :  { %v3158_v60 = vpop.f32.mrb[158].mxu0 }
 0x469   :  { %3161 = vst [vmem:[%s5019_s9] sm:$0xff] %v3156_v58  ;;  %v3785_v61 = vpop.f32.mrb[159].mxu0 }

</bundles_post_ra>
